<compile_context>
chip_gen: v7x
topology: tpu7x:2x2x1
jax: 0.10.0
libtpu: 0.0.40
codegen_flags: <defaults>
</compile_context>

<pallas_src>
import functools

import jax
import jax.numpy as jnp
from jax.experimental import pallas as pl
from jax.experimental.pallas import tpu as pltpu

NC = 1
NDF = 64
K = 4            # conv kernel size (stride 2, padding 1)
BN_EPS = 1e-5
LRELU_SLOPE = 0.2


def _vmem_spec():
    return pl.BlockSpec(memory_space=pltpu.MemorySpace.VMEM)


def _bn_lrelu(acc, gamma, beta):
    """BatchNorm2d (training-mode batch stats, two-pass variance) + LeakyReLU(0.2)."""
    mean = jnp.mean(acc, axis=0, keepdims=True)
    cen = acc - mean
    var = jnp.mean(cen * cen, axis=0, keepdims=True)
    z = gamma * cen * jax.lax.rsqrt(var + BN_EPS) + beta
    return jnp.where(z >= 0, z, LRELU_SLOPE * z)


def _tap(out_phase, k, m):
    """Conv tap k (0..3, stride 2, pad 1) for output phase `out_phase`, input split
    into `m` sub-phases per axis -> (input sub-phase, block shift in {-1,0,+1})."""
    o = 2 * out_phase + k - 1
    return o % m, o // m


# -----------------------------------------------------------------------------
# Fused kernel: conv1+BN+LReLU -> conv2+BN+LReLU -> conv3+BN+LReLU -> pool -> FC
# -----------------------------------------------------------------------------
def _disc_kernel(xcol1_ref, w1_ref, g1_ref, be1_ref,
                 w2_ref, g2_ref, be2_ref,
                 w3_hbm_ref, g3_ref, be3_ref,
                 wfc_ref, bfc_ref,
                 out_ref,
                 s1_ref, s2_ref, lhs2_ref, lhs3_ref, w3_ref, w3_sem,
                 *, bsz):
    # Kick off the ~1 MiB layer-3 weight DMA immediately; it overlaps layers 1-2.
    w3_copy = pltpu.make_async_copy(w3_hbm_ref, w3_ref, w3_sem)
    w3_copy.start()

    n_blk = bsz * 16  # rows per (batch, 4x4 block grid) group; equals 32 at B=2

    # Zero the padded phase-plane scratches: the zero borders ARE the conv padding.
    s1_ref[...] = jnp.zeros(s1_ref.shape, s1_ref.dtype)
    s2_ref[...] = jnp.zeros(s2_ref.shape, s2_ref.dtype)

    # ---- layer 1: Conv(1->64, k4 s2 p1) + BN + LeakyReLU ---------------------
    # xcol1 rows are ordered (mh, mw, b, th, tw) with (mh, mw) = output coord mod 4
    # and (th, tw) = output coord // 4, columns are the 16 conv taps (Cin = 1).
    acc1 = jnp.dot(xcol1_ref[...], w1_ref[...], preferred_element_type=jnp.float32)
    a1 = _bn_lrelu(acc1, g1_ref[...], be1_ref[...])            # (bsz*256, 64) f32
    for q in range(16):                                         # (mh, mw) phase planes
        blk = a1[q * n_blk:(q + 1) * n_blk].reshape(bsz, 4, 4, NDF)
        s1_ref[q, :, 1:5, 1:5, :] = blk                         # interior of padded plane

    # ---- layer 2: Conv(64->128, k4 s2 p1) + BN + LeakyReLU -------------------
    # Assemble one (bsz*64, 1024) im2col LHS; rows grouped by output phase
    # (i%2, j%2) so the result is already in layer-3's phase-plane order.
    for g, (phi, pwj) in enumerate([(0, 0), (0, 1), (1, 0), (1, 1)]):
        for kh in range(4):
            mh, dh = _tap(phi, kh, 4)
            for kw in range(4):
                mw, dw = _tap(pwj, kw, 4)
                win = s1_ref[mh * 4 + mw, :, 1 + dh:5 + dh, 1 + dw:5 + dw, :]
                lhs2_ref[g * n_blk:(g + 1) * n_blk,
                         (kh * 4 + kw) * NDF:(kh * 4 + kw + 1) * NDF] = (
                    win.reshape(n_blk, NDF))
    acc2 = jnp.dot(lhs2_ref[...].astype(jnp.bfloat16), w2_ref[...],
                   preferred_element_type=jnp.float32)          # (bsz*64, 128)
    a2 = _bn_lrelu(acc2, g2_ref[...], be2_ref[...])
    for g in range(4):                                          # (i%2, j%2) phase planes
        s2_ref[g, :, 1:5, 1:5, :] = (
            a2[g * n_blk:(g + 1) * n_blk].reshape(bsz, 4, 4, 2 * NDF))

    # ---- layer 3: Conv(128->256) + BN + LeakyReLU + AvgPool2d(4) + Linear ----
    for kh in range(4):
        ph, dh = _tap(0, kh, 2)
        for kw in range(4):
            pw, dw = _tap(0, kw, 2)
            win = s2_ref[ph * 2 + pw, :, 1 + dh:5 + dh, 1 + dw:5 + dw, :]
            lhs3_ref[:, (kh * 4 + kw) * 2 * NDF:(kh * 4 + kw + 1) * 2 * NDF] = (
                win.reshape(n_blk, 2 * NDF))
    w3_copy.wait()                                              # weight prefetch done
    acc3 = jnp.dot(lhs3_ref[...].astype(jnp.bfloat16), w3_ref[...],
                   preferred_element_type=jnp.float32)          # (bsz*16, 256)
    z3 = _bn_lrelu(acc3, g3_ref[...], be3_ref[...])
    pooled = jnp.mean(z3.reshape(bsz, 16, 4 * NDF), axis=1)     # AvgPool2d(4) -> (B, 256)
    # FC(256 -> 1) on the VPU: elementwise mul + lane reduction, all f32.
    out_ref[...] = (jnp.sum(pooled * wfc_ref[...], axis=1, keepdims=True)
                    + bfc_ref[0, 0])


# -----------------------------------------------------------------------------
# Wrapper: tiny layer-1 im2col (Cin = 1) in XLA, then one pallas_call
# -----------------------------------------------------------------------------
@jax.jit
def discriminator_forward(params, x_nchw):
    b = x_nchw.shape[0]
    x = x_nchw[:, 0]                                   # nc == 1 -> (B, 32, 32)
    xp = jnp.pad(x, ((0, 0), (1, 1), (1, 1)))          # conv padding = 1
    # Layer-1 im2col (512 x 16 bf16 = 16 KiB): rows ordered (mh, mw, b, th, tw),
    # i.e. grouped by (output coord mod 4) so the kernel can write the result
    # straight into layer-2's phase-plane scratch without any strided access.
    taps = [xp[:, kh:kh + 32:2, kw:kw + 32:2] for kh in range(4) for kw in range(4)]
    col = jnp.stack(taps, axis=-1)                     # (B, 16, 16, 16)  (b, h, w, tap)
    col = col.reshape(b, 4, 4, 4, 4, 16).transpose(2, 4, 0, 1, 3, 5)
    xcol1 = col.reshape(b * 256, 16).astype(jnp.bfloat16)

    out = pl.pallas_call(
        functools.partial(_disc_kernel, bsz=b),
        out_shape=jax.ShapeDtypeStruct((b, 1), jnp.float32),
        in_specs=[
            _vmem_spec(),                                        # xcol1
            _vmem_spec(), _vmem_spec(), _vmem_spec(),            # w1, g1, be1
            _vmem_spec(), _vmem_spec(), _vmem_spec(),            # w2, g2, be2
            pl.BlockSpec(memory_space=pl.ANY),                   # w3 stays in HBM
            _vmem_spec(), _vmem_spec(),                          # g3, be3
            _vmem_spec(),                                        # wfc (f32)
            pl.BlockSpec(memory_space=pltpu.MemorySpace.SMEM),   # fc bias scalar
        ],
        out_specs=_vmem_spec(),
        scratch_shapes=[
            pltpu.VMEM((16, b, 6, 6, NDF), jnp.float32),         # layer-1 act, padded planes
            pltpu.VMEM((4, b, 6, 6, 2 * NDF), jnp.float32),      # layer-2 act, padded planes
            pltpu.VMEM((b * 64, 16 * NDF), jnp.float32),         # layer-2 im2col LHS
            pltpu.VMEM((b * 16, 16 * 2 * NDF), jnp.float32),     # layer-3 im2col LHS
            pltpu.VMEM((16 * 2 * NDF, 4 * NDF), jnp.bfloat16),   # layer-3 weight (DMA dst)
            pltpu.SemaphoreType.DMA,                             # weight-prefetch semaphore
        ],
    )(xcol1, params["w1"], params["g1"], params["be1"],
      params["w2"], params["g2"], params["be2"],
      params["w3"], params["g3"], params["be3"],
      params["wfc"], params["bfc"])
    return out


# -----------------------------------------------------------------------------
# Parameter init mirroring weights_init (weights pre-packed / pre-cast once)
# -----------------------------------------------------------------------------
def _pack_conv_weight(w_oihw):
    """PyTorch (Cout, Cin, 4, 4) -> (16*Cin, Cout) bf16, rows ordered (kh, kw, cin)."""
    cout, cin = w_oihw.shape[:2]
    return w_oihw.transpose(2, 3, 1, 0).reshape(16 * cin, cout).astype(jnp.bfloat16)


def init_params(key):
    """Returns (kernel_params, raw_params); raw keeps original-layout f32 tensors
    for the pure-JAX reference.  Conv biases are omitted: training-mode BatchNorm
    cancels a per-channel constant bias exactly."""
    ks = jax.random.split(key, 8)
    chans = [(NC, NDF), (NDF, 2 * NDF), (2 * NDF, 4 * NDF)]
    params, raw = {}, {}
    for i, (cin, cout) in enumerate(chans, start=1):
        w = 0.02 * jax.random.normal(ks[2 * (i - 1)], (cout, cin, K, K), jnp.float32)
        g = 1.0 + 0.02 * jax.random.normal(ks[2 * (i - 1) + 1], (cout,), jnp.float32)
        raw[f"w{i}"], raw[f"g{i}"] = w, g
        raw[f"be{i}"] = jnp.zeros((cout,), jnp.float32)
        params[f"w{i}"] = _pack_conv_weight(w)                   # bf16, pre-packed
        params[f"g{i}"] = g.reshape(1, cout)
        params[f"be{i}"] = jnp.zeros((1, cout), jnp.float32)
    limit = (6.0 / (4 * NDF + 1)) ** 0.5                         # xavier_uniform (1, 256)
    wfc = jax.random.uniform(ks[6], (1, 4 * NDF), jnp.float32, -limit, limit)
    raw["wfc"], raw["bfc"] = wfc, jnp.full((1,), 0.01, jnp.float32)
    params["wfc"] = wfc                                          # (1, 256) f32 (VPU FC)
    params["bfc"] = jnp.full((1, 1), 0.01, jnp.float32)          # SMEM scalar
    return params, raw


# -----------------------------------------------------------------------------
# Pure-JAX reference (lax.conv with matching bf16 matmul operands)
# -----------------------------------------------------------------------------
@jax.jit
def _ref_forward(raw, x_nchw):
    h = jnp.transpose(x_nchw, (0, 2, 3, 1))                      # NHWC, f32
    for i in range(1, 4):
        w_hwio = raw[f"w{i}"].transpose(2, 3, 1, 0).astype(jnp.bfloat16)
        y = jax.lax.conv_general_dilated(
            h.astype(jnp.bfloat16), w_hwio, window_strides=(2, 2),
            padding=((1, 1), (1, 1)),
            dimension_numbers=("NHWC", "HWIO", "NHWC"),
            preferred_element_type=jnp.float32)
        mean = jnp.mean(y, axis=(0, 1, 2), keepdims=True)
        var = jnp.mean(jnp.square(y - mean), axis=(0, 1, 2), keepdims=True)
        z = raw[f"g{i}"] * (y - mean) * jax.lax.rsqrt(var + BN_EPS) + raw[f"be{i}"]
        h = jnp.where(z >= 0, z, LRELU_SLOPE * z)
    pooled = jnp.mean(h, axis=(1, 2))                            # AvgPool2d(4) -> (B, 256)
    return pooled @ raw["wfc"].T + raw["bfc"][None, :]


if __name__ == "__main__":
    key = jax.random.PRNGKey(0)
    pkey, xkey = jax.random.split(key)
    params, raw = init_params(pkey)

    # Architecture requires 32x32 inputs (32 -> 16 -> 8 -> 4 -> AvgPool2d(4) -> 1x1).
    x = jax.random.normal(xkey, (2, NC, 32, 32), jnp.float32)

    out = jax.block_until_ready(discriminator_forward(params, x))
    assert out.shape == (2, 1), out.shape

    ref = jax.block_until_ready(_ref_forward(raw, x))
    # bf16 MXU operands on both sides + BN renormalization -> loose-ish tolerance;
    # any layout/packing bug would be orders of magnitude outside this.
    assert jnp.allclose(out, ref, rtol=5e-2, atol=5e-2), (out, ref)

    print("KERNEL_OK")
</pallas_src>

<mosaic_0001>
module attributes {stable_mosaic.version = 11 : i64} {
  func.func @_disc_kernel(%arg0: memref<512x16xbf16, #tpu.memory_space<vmem>>, %arg1: memref<16x64xbf16, #tpu.memory_space<vmem>>, %arg2: memref<1x64xf32, #tpu.memory_space<vmem>>, %arg3: memref<1x64xf32, #tpu.memory_space<vmem>>, %arg4: memref<1024x128xbf16, #tpu.memory_space<vmem>>, %arg5: memref<1x128xf32, #tpu.memory_space<vmem>>, %arg6: memref<1x128xf32, #tpu.memory_space<vmem>>, %arg7: memref<2048x256xbf16, #tpu.memory_space<any>>, %arg8: memref<1x256xf32, #tpu.memory_space<vmem>>, %arg9: memref<1x256xf32, #tpu.memory_space<vmem>>, %arg10: memref<1x256xf32, #tpu.memory_space<vmem>>, %arg11: memref<1x1xf32, #tpu.memory_space<smem>>, %arg12: memref<2x1xf32, #tpu.memory_space<vmem>>, %arg13: memref<16x2x6x6x64xf32, #tpu.memory_space<vmem>>, %arg14: memref<4x2x6x6x128xf32, #tpu.memory_space<vmem>>, %arg15: memref<128x1024xf32, #tpu.memory_space<vmem>>, %arg16: memref<32x2048xf32, #tpu.memory_space<vmem>>, %arg17: memref<2048x256xbf16, #tpu.memory_space<vmem>>, %arg18: memref<!tpu.dma_semaphore, #tpu.memory_space<semaphore_mem>>) attributes {dimension_semantics = [], scalar_prefetch = 0 : i64, scratch_operands = 6 : i64, tpu.core_type = #tpu.core_type<tc>} {
    tpu.enqueue_dma source(%arg7 : memref<2048x256xbf16, #tpu.memory_space<any>>) target(%arg17 : memref<2048x256xbf16, #tpu.memory_space<vmem>>) target_semaphore(%arg18 : memref<!tpu.dma_semaphore, #tpu.memory_space<semaphore_mem>>)
    %cst = arith.constant 0.000000e+00 : f32
    %0 = vector.broadcast %cst : f32 to vector<16x2x6x6x64xf32>
    %c0 = arith.constant 0 : index
    %c0_0 = arith.constant 0 : index
    %c0_1 = arith.constant 0 : index
    %c0_2 = arith.constant 0 : index
    %c0_3 = arith.constant 0 : index
    %1 = vector.load %arg13[%c0, %c0_0, %c0_1, %c0_2, %c0_3] : memref<16x2x6x6x64xf32, #tpu.memory_space<vmem>>, vector<16x2x6x6x64xf32>
    tpu.vector_store %arg13[%c0, %c0_0, %c0_1, %c0_2, %c0_3], %0 {strides = array<i32>} : memref<16x2x6x6x64xf32, #tpu.memory_space<vmem>>, vector<16x2x6x6x64xf32>,
    %cst_4 = arith.constant 0.000000e+00 : f32
    %2 = vector.broadcast %cst_4 : f32 to vector<4x2x6x6x128xf32>
    %c0_5 = arith.constant 0 : index
    %c0_6 = arith.constant 0 : index
    %c0_7 = arith.constant 0 : index
    %c0_8 = arith.constant 0 : index
    %c0_9 = arith.constant 0 : index
    %3 = vector.load %arg14[%c0_5, %c0_6, %c0_7, %c0_8, %c0_9] : memref<4x2x6x6x128xf32, #tpu.memory_space<vmem>>, vector<4x2x6x6x128xf32>
    tpu.vector_store %arg14[%c0_5, %c0_6, %c0_7, %c0_8, %c0_9], %2 {strides = array<i32>} : memref<4x2x6x6x128xf32, #tpu.memory_space<vmem>>, vector<4x2x6x6x128xf32>,
    %c0_10 = arith.constant 0 : index
    %c0_11 = arith.constant 0 : index
    %4 = vector.load %arg0[%c0_10, %c0_11] : memref<512x16xbf16, #tpu.memory_space<vmem>>, vector<512x16xbf16>
    %c0_12 = arith.constant 0 : index
    %c0_13 = arith.constant 0 : index
    %5 = vector.load %arg1[%c0_12, %c0_13] : memref<16x64xbf16, #tpu.memory_space<vmem>>, vector<16x64xbf16>
    %cst_14 = arith.constant dense<0.000000e+00> : vector<512x64xf32>
    %6 = tpu.matmul %4, %5, %cst_14 {dimension_numbers = #tpu.dot_dimension_numbers<[1], [0], [0], [1], [0, 0, 1, 1], [], []>} : vector<512x16xbf16>, vector<16x64xbf16>, vector<512x64xf32> -> vector<512x64xf32>
    %c0_15 = arith.constant 0 : index
    %c0_16 = arith.constant 0 : index
    %7 = vector.load %arg2[%c0_15, %c0_16] : memref<1x64xf32, #tpu.memory_space<vmem>>, vector<1x64xf32>
    %c0_17 = arith.constant 0 : index
    %c0_18 = arith.constant 0 : index
    %8 = vector.load %arg3[%c0_17, %c0_18] : memref<1x64xf32, #tpu.memory_space<vmem>>, vector<1x64xf32>
    %cst_19 = arith.constant dense<0.000000e+00> : vector<64xf32>
    %9 = vector.multi_reduction <add>, %6, %cst_19 [0] : vector<512x64xf32> to vector<64xf32>
    %10 = vector.shape_cast %9 : vector<64xf32> to vector<1x64xf32>
    %cst_20 = arith.constant 5.120000e+02 : f32
    %11 = vector.broadcast %cst_20 : f32 to vector<1x64xf32>
    %12 = arith.divf %10, %11 : vector<1x64xf32>
    %13 = vector.broadcast %12 : vector<1x64xf32> to vector<512x64xf32>
    %14 = arith.subf %6, %13 : vector<512x64xf32>
    %15 = arith.mulf %14, %14 : vector<512x64xf32>
    %cst_21 = arith.constant dense<0.000000e+00> : vector<64xf32>
    %16 = vector.multi_reduction <add>, %15, %cst_21 [0] : vector<512x64xf32> to vector<64xf32>
    %17 = vector.shape_cast %16 : vector<64xf32> to vector<1x64xf32>
    %cst_22 = arith.constant 5.120000e+02 : f32
    %18 = vector.broadcast %cst_22 : f32 to vector<1x64xf32>
    %19 = arith.divf %17, %18 : vector<1x64xf32>
    %20 = vector.broadcast %7 : vector<1x64xf32> to vector<512x64xf32>
    %21 = arith.mulf %20, %14 : vector<512x64xf32>
    %cst_23 = arith.constant 9.99999974E-6 : f32
    %22 = vector.broadcast %cst_23 : f32 to vector<1x64xf32>
    %23 = arith.addf %19, %22 : vector<1x64xf32>
    %24 = math.rsqrt %23 : vector<1x64xf32>
    %25 = vector.broadcast %24 : vector<1x64xf32> to vector<512x64xf32>
    %26 = arith.mulf %21, %25 : vector<512x64xf32>
    %27 = vector.broadcast %8 : vector<1x64xf32> to vector<512x64xf32>
    %28 = arith.addf %26, %27 : vector<512x64xf32>
    %cst_24 = arith.constant 0.000000e+00 : f32
    %29 = vector.broadcast %cst_24 : f32 to vector<512x64xf32>
    %30 = arith.cmpf oge, %28, %29 : vector<512x64xf32>
    %cst_25 = arith.constant 2.000000e-01 : f32
    %31 = vector.broadcast %cst_25 : f32 to vector<512x64xf32>
    %32 = arith.mulf %31, %28 : vector<512x64xf32>
    %33 = arith.select %30, %28, %32 : vector<512x64xi1>, vector<512x64xf32>
    %34 = vector.extract_strided_slice %33 {offsets = [0, 0], sizes = [32, 64], strides = [1, 1]} : vector<512x64xf32> to vector<32x64xf32>
    %35 = vector.shape_cast %34 : vector<32x64xf32> to vector<2x4x4x64xf32>
    %c0_26 = arith.constant 0 : index
    %c0_27 = arith.constant 0 : index
    %c1 = arith.constant 1 : index
    %c1_28 = arith.constant 1 : index
    %c0_29 = arith.constant 0 : index
    %36 = vector.load %arg13[%c0_26, %c0_27, %c1, %c1_28, %c0_29] : memref<16x2x6x6x64xf32, #tpu.memory_space<vmem>>, vector<1x2x4x4x64xf32>
    %37 = vector.shape_cast %36 : vector<1x2x4x4x64xf32> to vector<2x4x4x64xf32>
    %38 = vector.shape_cast %35 : vector<2x4x4x64xf32> to vector<1x2x4x4x64xf32>
    tpu.vector_store %arg13[%c0_26, %c0_27, %c1, %c1_28, %c0_29], %38 {strides = array<i32>} : memref<16x2x6x6x64xf32, #tpu.memory_space<vmem>>, vector<1x2x4x4x64xf32>,
    %39 = vector.extract_strided_slice %33 {offsets = [32, 0], sizes = [32, 64], strides = [1, 1]} : vector<512x64xf32> to vector<32x64xf32>
    %40 = vector.shape_cast %39 : vector<32x64xf32> to vector<2x4x4x64xf32>
    %c1_30 = arith.constant 1 : index
    %c0_31 = arith.constant 0 : index
    %c1_32 = arith.constant 1 : index
    %c1_33 = arith.constant 1 : index
    %c0_34 = arith.constant 0 : index
    %41 = vector.load %arg13[%c1_30, %c0_31, %c1_32, %c1_33, %c0_34] : memref<16x2x6x6x64xf32, #tpu.memory_space<vmem>>, vector<1x2x4x4x64xf32>
    %42 = vector.shape_cast %41 : vector<1x2x4x4x64xf32> to vector<2x4x4x64xf32>
    %43 = vector.shape_cast %40 : vector<2x4x4x64xf32> to vector<1x2x4x4x64xf32>
    tpu.vector_store %arg13[%c1_30, %c0_31, %c1_32, %c1_33, %c0_34], %43 {strides = array<i32>} : memref<16x2x6x6x64xf32, #tpu.memory_space<vmem>>, vector<1x2x4x4x64xf32>,
    %44 = vector.extract_strided_slice %33 {offsets = [64, 0], sizes = [32, 64], strides = [1, 1]} : vector<512x64xf32> to vector<32x64xf32>
    %45 = vector.shape_cast %44 : vector<32x64xf32> to vector<2x4x4x64xf32>
    %c2 = arith.constant 2 : index
    %c0_35 = arith.constant 0 : index
    %c1_36 = arith.constant 1 : index
    %c1_37 = arith.constant 1 : index
    %c0_38 = arith.constant 0 : index
    %46 = vector.load %arg13[%c2, %c0_35, %c1_36, %c1_37, %c0_38] : memref<16x2x6x6x64xf32, #tpu.memory_space<vmem>>, vector<1x2x4x4x64xf32>
    %47 = vector.shape_cast %46 : vector<1x2x4x4x64xf32> to vector<2x4x4x64xf32>
    %48 = vector.shape_cast %45 : vector<2x4x4x64xf32> to vector<1x2x4x4x64xf32>
    tpu.vector_store %arg13[%c2, %c0_35, %c1_36, %c1_37, %c0_38], %48 {strides = array<i32>} : memref<16x2x6x6x64xf32, #tpu.memory_space<vmem>>, vector<1x2x4x4x64xf32>,
    %49 = vector.extract_strided_slice %33 {offsets = [96, 0], sizes = [32, 64], strides = [1, 1]} : vector<512x64xf32> to vector<32x64xf32>
    %50 = vector.shape_cast %49 : vector<32x64xf32> to vector<2x4x4x64xf32>
    %c3 = arith.constant 3 : index
    %c0_39 = arith.constant 0 : index
    %c1_40 = arith.constant 1 : index
    %c1_41 = arith.constant 1 : index
    %c0_42 = arith.constant 0 : index
    %51 = vector.load %arg13[%c3, %c0_39, %c1_40, %c1_41, %c0_42] : memref<16x2x6x6x64xf32, #tpu.memory_space<vmem>>, vector<1x2x4x4x64xf32>
    %52 = vector.shape_cast %51 : vector<1x2x4x4x64xf32> to vector<2x4x4x64xf32>
    %53 = vector.shape_cast %50 : vector<2x4x4x64xf32> to vector<1x2x4x4x64xf32>
    tpu.vector_store %arg13[%c3, %c0_39, %c1_40, %c1_41, %c0_42], %53 {strides = array<i32>} : memref<16x2x6x6x64xf32, #tpu.memory_space<vmem>>, vector<1x2x4x4x64xf32>,
    %54 = vector.extract_strided_slice %33 {offsets = [128, 0], sizes = [32, 64], strides = [1, 1]} : vector<512x64xf32> to vector<32x64xf32>
    %55 = vector.shape_cast %54 : vector<32x64xf32> to vector<2x4x4x64xf32>
    %c4 = arith.constant 4 : index
    %c0_43 = arith.constant 0 : index
    %c1_44 = arith.constant 1 : index
    %c1_45 = arith.constant 1 : index
    %c0_46 = arith.constant 0 : index
    %56 = vector.load %arg13[%c4, %c0_43, %c1_44, %c1_45, %c0_46] : memref<16x2x6x6x64xf32, #tpu.memory_space<vmem>>, vector<1x2x4x4x64xf32>
    %57 = vector.shape_cast %56 : vector<1x2x4x4x64xf32> to vector<2x4x4x64xf32>
    %58 = vector.shape_cast %55 : vector<2x4x4x64xf32> to vector<1x2x4x4x64xf32>
    tpu.vector_store %arg13[%c4, %c0_43, %c1_44, %c1_45, %c0_46], %58 {strides = array<i32>} : memref<16x2x6x6x64xf32, #tpu.memory_space<vmem>>, vector<1x2x4x4x64xf32>,
    %59 = vector.extract_strided_slice %33 {offsets = [160, 0], sizes = [32, 64], strides = [1, 1]} : vector<512x64xf32> to vector<32x64xf32>
    %60 = vector.shape_cast %59 : vector<32x64xf32> to vector<2x4x4x64xf32>
    %c5 = arith.constant 5 : index
    %c0_47 = arith.constant 0 : index
    %c1_48 = arith.constant 1 : index
    %c1_49 = arith.constant 1 : index
    %c0_50 = arith.constant 0 : index
    %61 = vector.load %arg13[%c5, %c0_47, %c1_48, %c1_49, %c0_50] : memref<16x2x6x6x64xf32, #tpu.memory_space<vmem>>, vector<1x2x4x4x64xf32>
    %62 = vector.shape_cast %61 : vector<1x2x4x4x64xf32> to vector<2x4x4x64xf32>
    %63 = vector.shape_cast %60 : vector<2x4x4x64xf32> to vector<1x2x4x4x64xf32>
    tpu.vector_store %arg13[%c5, %c0_47, %c1_48, %c1_49, %c0_50], %63 {strides = array<i32>} : memref<16x2x6x6x64xf32, #tpu.memory_space<vmem>>, vector<1x2x4x4x64xf32>,
    %64 = vector.extract_strided_slice %33 {offsets = [192, 0], sizes = [32, 64], strides = [1, 1]} : vector<512x64xf32> to vector<32x64xf32>
    %65 = vector.shape_cast %64 : vector<32x64xf32> to vector<2x4x4x64xf32>
    %c6 = arith.constant 6 : index
    %c0_51 = arith.constant 0 : index
    %c1_52 = arith.constant 1 : index
    %c1_53 = arith.constant 1 : index
    %c0_54 = arith.constant 0 : index
    %66 = vector.load %arg13[%c6, %c0_51, %c1_52, %c1_53, %c0_54] : memref<16x2x6x6x64xf32, #tpu.memory_space<vmem>>, vector<1x2x4x4x64xf32>
    %67 = vector.shape_cast %66 : vector<1x2x4x4x64xf32> to vector<2x4x4x64xf32>
    %68 = vector.shape_cast %65 : vector<2x4x4x64xf32> to vector<1x2x4x4x64xf32>
    tpu.vector_store %arg13[%c6, %c0_51, %c1_52, %c1_53, %c0_54], %68 {strides = array<i32>} : memref<16x2x6x6x64xf32, #tpu.memory_space<vmem>>, vector<1x2x4x4x64xf32>,
    %69 = vector.extract_strided_slice %33 {offsets = [224, 0], sizes = [32, 64], strides = [1, 1]} : vector<512x64xf32> to vector<32x64xf32>
    %70 = vector.shape_cast %69 : vector<32x64xf32> to vector<2x4x4x64xf32>
    %c7 = arith.constant 7 : index
    %c0_55 = arith.constant 0 : index
    %c1_56 = arith.constant 1 : index
    %c1_57 = arith.constant 1 : index
    %c0_58 = arith.constant 0 : index
    %71 = vector.load %arg13[%c7, %c0_55, %c1_56, %c1_57, %c0_58] : memref<16x2x6x6x64xf32, #tpu.memory_space<vmem>>, vector<1x2x4x4x64xf32>
    %72 = vector.shape_cast %71 : vector<1x2x4x4x64xf32> to vector<2x4x4x64xf32>
    %73 = vector.shape_cast %70 : vector<2x4x4x64xf32> to vector<1x2x4x4x64xf32>
    tpu.vector_store %arg13[%c7, %c0_55, %c1_56, %c1_57, %c0_58], %73 {strides = array<i32>} : memref<16x2x6x6x64xf32, #tpu.memory_space<vmem>>, vector<1x2x4x4x64xf32>,
    %74 = vector.extract_strided_slice %33 {offsets = [256, 0], sizes = [32, 64], strides = [1, 1]} : vector<512x64xf32> to vector<32x64xf32>
    %75 = vector.shape_cast %74 : vector<32x64xf32> to vector<2x4x4x64xf32>
    %c8 = arith.constant 8 : index
    %c0_59 = arith.constant 0 : index
    %c1_60 = arith.constant 1 : index
    %c1_61 = arith.constant 1 : index
    %c0_62 = arith.constant 0 : index
    %76 = vector.load %arg13[%c8, %c0_59, %c1_60, %c1_61, %c0_62] : memref<16x2x6x6x64xf32, #tpu.memory_space<vmem>>, vector<1x2x4x4x64xf32>
    %77 = vector.shape_cast %76 : vector<1x2x4x4x64xf32> to vector<2x4x4x64xf32>
    %78 = vector.shape_cast %75 : vector<2x4x4x64xf32> to vector<1x2x4x4x64xf32>
    tpu.vector_store %arg13[%c8, %c0_59, %c1_60, %c1_61, %c0_62], %78 {strides = array<i32>} : memref<16x2x6x6x64xf32, #tpu.memory_space<vmem>>, vector<1x2x4x4x64xf32>,
    %79 = vector.extract_strided_slice %33 {offsets = [288, 0], sizes = [32, 64], strides = [1, 1]} : vector<512x64xf32> to vector<32x64xf32>
    %80 = vector.shape_cast %79 : vector<32x64xf32> to vector<2x4x4x64xf32>
    %c9 = arith.constant 9 : index
    %c0_63 = arith.constant 0 : index
    %c1_64 = arith.constant 1 : index
    %c1_65 = arith.constant 1 : index
    %c0_66 = arith.constant 0 : index
    %81 = vector.load %arg13[%c9, %c0_63, %c1_64, %c1_65, %c0_66] : memref<16x2x6x6x64xf32, #tpu.memory_space<vmem>>, vector<1x2x4x4x64xf32>
    %82 = vector.shape_cast %81 : vector<1x2x4x4x64xf32> to vector<2x4x4x64xf32>
    %83 = vector.shape_cast %80 : vector<2x4x4x64xf32> to vector<1x2x4x4x64xf32>
    tpu.vector_store %arg13[%c9, %c0_63, %c1_64, %c1_65, %c0_66], %83 {strides = array<i32>} : memref<16x2x6x6x64xf32, #tpu.memory_space<vmem>>, vector<1x2x4x4x64xf32>,
    %84 = vector.extract_strided_slice %33 {offsets = [320, 0], sizes = [32, 64], strides = [1, 1]} : vector<512x64xf32> to vector<32x64xf32>
    %85 = vector.shape_cast %84 : vector<32x64xf32> to vector<2x4x4x64xf32>
    %c10 = arith.constant 10 : index
    %c0_67 = arith.constant 0 : index
    %c1_68 = arith.constant 1 : index
    %c1_69 = arith.constant 1 : index
    %c0_70 = arith.constant 0 : index
    %86 = vector.load %arg13[%c10, %c0_67, %c1_68, %c1_69, %c0_70] : memref<16x2x6x6x64xf32, #tpu.memory_space<vmem>>, vector<1x2x4x4x64xf32>
    %87 = vector.shape_cast %86 : vector<1x2x4x4x64xf32> to vector<2x4x4x64xf32>
    %88 = vector.shape_cast %85 : vector<2x4x4x64xf32> to vector<1x2x4x4x64xf32>
    tpu.vector_store %arg13[%c10, %c0_67, %c1_68, %c1_69, %c0_70], %88 {strides = array<i32>} : memref<16x2x6x6x64xf32, #tpu.memory_space<vmem>>, vector<1x2x4x4x64xf32>,
    %89 = vector.extract_strided_slice %33 {offsets = [352, 0], sizes = [32, 64], strides = [1, 1]} : vector<512x64xf32> to vector<32x64xf32>
    %90 = vector.shape_cast %89 : vector<32x64xf32> to vector<2x4x4x64xf32>
    %c11 = arith.constant 11 : index
    %c0_71 = arith.constant 0 : index
    %c1_72 = arith.constant 1 : index
    %c1_73 = arith.constant 1 : index
    %c0_74 = arith.constant 0 : index
    %91 = vector.load %arg13[%c11, %c0_71, %c1_72, %c1_73, %c0_74] : memref<16x2x6x6x64xf32, #tpu.memory_space<vmem>>, vector<1x2x4x4x64xf32>
    %92 = vector.shape_cast %91 : vector<1x2x4x4x64xf32> to vector<2x4x4x64xf32>
    %93 = vector.shape_cast %90 : vector<2x4x4x64xf32> to vector<1x2x4x4x64xf32>
    tpu.vector_store %arg13[%c11, %c0_71, %c1_72, %c1_73, %c0_74], %93 {strides = array<i32>} : memref<16x2x6x6x64xf32, #tpu.memory_space<vmem>>, vector<1x2x4x4x64xf32>,
    %94 = vector.extract_strided_slice %33 {offsets = [384, 0], sizes = [32, 64], strides = [1, 1]} : vector<512x64xf32> to vector<32x64xf32>
    %95 = vector.shape_cast %94 : vector<32x64xf32> to vector<2x4x4x64xf32>
    %c12 = arith.constant 12 : index
    %c0_75 = arith.constant 0 : index
    %c1_76 = arith.constant 1 : index
    %c1_77 = arith.constant 1 : index
    %c0_78 = arith.constant 0 : index
    %96 = vector.load %arg13[%c12, %c0_75, %c1_76, %c1_77, %c0_78] : memref<16x2x6x6x64xf32, #tpu.memory_space<vmem>>, vector<1x2x4x4x64xf32>
    %97 = vector.shape_cast %96 : vector<1x2x4x4x64xf32> to vector<2x4x4x64xf32>
    %98 = vector.shape_cast %95 : vector<2x4x4x64xf32> to vector<1x2x4x4x64xf32>
    tpu.vector_store %arg13[%c12, %c0_75, %c1_76, %c1_77, %c0_78], %98 {strides = array<i32>} : memref<16x2x6x6x64xf32, #tpu.memory_space<vmem>>, vector<1x2x4x4x64xf32>,
    %99 = vector.extract_strided_slice %33 {offsets = [416, 0], sizes = [32, 64], strides = [1, 1]} : vector<512x64xf32> to vector<32x64xf32>
    %100 = vector.shape_cast %99 : vector<32x64xf32> to vector<2x4x4x64xf32>
    %c13 = arith.constant 13 : index
    %c0_79 = arith.constant 0 : index
    %c1_80 = arith.constant 1 : index
    %c1_81 = arith.constant 1 : index
    %c0_82 = arith.constant 0 : index
    %101 = vector.load %arg13[%c13, %c0_79, %c1_80, %c1_81, %c0_82] : memref<16x2x6x6x64xf32, #tpu.memory_space<vmem>>, vector<1x2x4x4x64xf32>
    %102 = vector.shape_cast %101 : vector<1x2x4x4x64xf32> to vector<2x4x4x64xf32>
    %103 = vector.shape_cast %100 : vector<2x4x4x64xf32> to vector<1x2x4x4x64xf32>
    tpu.vector_store %arg13[%c13, %c0_79, %c1_80, %c1_81, %c0_82], %103 {strides = array<i32>} : memref<16x2x6x6x64xf32, #tpu.memory_space<vmem>>, vector<1x2x4x4x64xf32>,
    %104 = vector.extract_strided_slice %33 {offsets = [448, 0], sizes = [32, 64], strides = [1, 1]} : vector<512x64xf32> to vector<32x64xf32>
    %105 = vector.shape_cast %104 : vector<32x64xf32> to vector<2x4x4x64xf32>
    %c14 = arith.constant 14 : index
    %c0_83 = arith.constant 0 : index
    %c1_84 = arith.constant 1 : index
    %c1_85 = arith.constant 1 : index
    %c0_86 = arith.constant 0 : index
    %106 = vector.load %arg13[%c14, %c0_83, %c1_84, %c1_85, %c0_86] : memref<16x2x6x6x64xf32, #tpu.memory_space<vmem>>, vector<1x2x4x4x64xf32>
    %107 = vector.shape_cast %106 : vector<1x2x4x4x64xf32> to vector<2x4x4x64xf32>
    %108 = vector.shape_cast %105 : vector<2x4x4x64xf32> to vector<1x2x4x4x64xf32>
    tpu.vector_store %arg13[%c14, %c0_83, %c1_84, %c1_85, %c0_86], %108 {strides = array<i32>} : memref<16x2x6x6x64xf32, #tpu.memory_space<vmem>>, vector<1x2x4x4x64xf32>,
    %109 = vector.extract_strided_slice %33 {offsets = [480, 0], sizes = [32, 64], strides = [1, 1]} : vector<512x64xf32> to vector<32x64xf32>
    %110 = vector.shape_cast %109 : vector<32x64xf32> to vector<2x4x4x64xf32>
    %c15 = arith.constant 15 : index
    %c0_87 = arith.constant 0 : index
    %c1_88 = arith.constant 1 : index
    %c1_89 = arith.constant 1 : index
    %c0_90 = arith.constant 0 : index
    %111 = vector.load %arg13[%c15, %c0_87, %c1_88, %c1_89, %c0_90] : memref<16x2x6x6x64xf32, #tpu.memory_space<vmem>>, vector<1x2x4x4x64xf32>
    %112 = vector.shape_cast %111 : vector<1x2x4x4x64xf32> to vector<2x4x4x64xf32>
    %113 = vector.shape_cast %110 : vector<2x4x4x64xf32> to vector<1x2x4x4x64xf32>
    tpu.vector_store %arg13[%c15, %c0_87, %c1_88, %c1_89, %c0_90], %113 {strides = array<i32>} : memref<16x2x6x6x64xf32, #tpu.memory_space<vmem>>, vector<1x2x4x4x64xf32>,
    %c15_91 = arith.constant 15 : index
    %c0_92 = arith.constant 0 : index
    %c0_93 = arith.constant 0 : index
    %c0_94 = arith.constant 0 : index
    %c0_95 = arith.constant 0 : index
    %114 = vector.load %arg13[%c15_91, %c0_92, %c0_93, %c0_94, %c0_95] : memref<16x2x6x6x64xf32, #tpu.memory_space<vmem>>, vector<1x2x4x4x64xf32>
    %115 = vector.shape_cast %114 : vector<1x2x4x4x64xf32> to vector<2x4x4x64xf32>
    %116 = vector.shape_cast %115 : vector<2x4x4x64xf32> to vector<32x64xf32>
    %c0_96 = arith.constant 0 : index
    %c0_97 = arith.constant 0 : index
    %117 = vector.load %arg15[%c0_96, %c0_97] : memref<128x1024xf32, #tpu.memory_space<vmem>>, vector<32x64xf32>
    tpu.vector_store %arg15[%c0_96, %c0_97], %116 {strides = array<i32>} : memref<128x1024xf32, #tpu.memory_space<vmem>>, vector<32x64xf32>,
    %c12_98 = arith.constant 12 : index
    %c0_99 = arith.constant 0 : index
    %c0_100 = arith.constant 0 : index
    %c1_101 = arith.constant 1 : index
    %c0_102 = arith.constant 0 : index
    %118 = vector.load %arg13[%c12_98, %c0_99, %c0_100, %c1_101, %c0_102] : memref<16x2x6x6x64xf32, #tpu.memory_space<vmem>>, vector<1x2x4x4x64xf32>
    %119 = vector.shape_cast %118 : vector<1x2x4x4x64xf32> to vector<2x4x4x64xf32>
    %120 = vector.shape_cast %119 : vector<2x4x4x64xf32> to vector<32x64xf32>
    %c0_103 = arith.constant 0 : index
    %c64 = arith.constant 64 : index
    %121 = vector.load %arg15[%c0_103, %c64] : memref<128x1024xf32, #tpu.memory_space<vmem>>, vector<32x64xf32>
    tpu.vector_store %arg15[%c0_103, %c64], %120 {strides = array<i32>} : memref<128x1024xf32, #tpu.memory_space<vmem>>, vector<32x64xf32>,
    %c13_104 = arith.constant 13 : index
    %c0_105 = arith.constant 0 : index
    %c0_106 = arith.constant 0 : index
    %c1_107 = arith.constant 1 : index
    %c0_108 = arith.constant 0 : index
    %122 = vector.load %arg13[%c13_104, %c0_105, %c0_106, %c1_107, %c0_108] : memref<16x2x6x6x64xf32, #tpu.memory_space<vmem>>, vector<1x2x4x4x64xf32>
    %123 = vector.shape_cast %122 : vector<1x2x4x4x64xf32> to vector<2x4x4x64xf32>
    %124 = vector.shape_cast %123 : vector<2x4x4x64xf32> to vector<32x64xf32>
    %c0_109 = arith.constant 0 : index
    %c128 = arith.constant 128 : index
    %125 = vector.load %arg15[%c0_109, %c128] : memref<128x1024xf32, #tpu.memory_space<vmem>>, vector<32x64xf32>
    tpu.vector_store %arg15[%c0_109, %c128], %124 {strides = array<i32>} : memref<128x1024xf32, #tpu.memory_space<vmem>>, vector<32x64xf32>,
    %c14_110 = arith.constant 14 : index
    %c0_111 = arith.constant 0 : index
    %c0_112 = arith.constant 0 : index
    %c1_113 = arith.constant 1 : index
    %c0_114 = arith.constant 0 : index
    %126 = vector.load %arg13[%c14_110, %c0_111, %c0_112, %c1_113, %c0_114] : memref<16x2x6x6x64xf32, #tpu.memory_space<vmem>>, vector<1x2x4x4x64xf32>
    %127 = vector.shape_cast %126 : vector<1x2x4x4x64xf32> to vector<2x4x4x64xf32>
    %128 = vector.shape_cast %127 : vector<2x4x4x64xf32> to vector<32x64xf32>
    %c0_115 = arith.constant 0 : index
    %c192 = arith.constant 192 : index
    %129 = vector.load %arg15[%c0_115, %c192] : memref<128x1024xf32, #tpu.memory_space<vmem>>, vector<32x64xf32>
    tpu.vector_store %arg15[%c0_115, %c192], %128 {strides = array<i32>} : memref<128x1024xf32, #tpu.memory_space<vmem>>, vector<32x64xf32>,
    %c3_116 = arith.constant 3 : index
    %c0_117 = arith.constant 0 : index
    %c1_118 = arith.constant 1 : index
    %c0_119 = arith.constant 0 : index
    %c0_120 = arith.constant 0 : index
    %130 = vector.load %arg13[%c3_116, %c0_117, %c1_118, %c0_119, %c0_120] : memref<16x2x6x6x64xf32, #tpu.memory_space<vmem>>, vector<1x2x4x4x64xf32>
    %131 = vector.shape_cast %130 : vector<1x2x4x4x64xf32> to vector<2x4x4x64xf32>
    %132 = vector.shape_cast %131 : vector<2x4x4x64xf32> to vector<32x64xf32>
    %c0_121 = arith.constant 0 : index
    %c256 = arith.constant 256 : index
    %133 = vector.load %arg15[%c0_121, %c256] : memref<128x1024xf32, #tpu.memory_space<vmem>>, vector<32x64xf32>
    tpu.vector_store %arg15[%c0_121, %c256], %132 {strides = array<i32>} : memref<128x1024xf32, #tpu.memory_space<vmem>>, vector<32x64xf32>,
    %c0_122 = arith.constant 0 : index
    %c0_123 = arith.constant 0 : index
    %c1_124 = arith.constant 1 : index
    %c1_125 = arith.constant 1 : index
    %c0_126 = arith.constant 0 : index
    %134 = vector.load %arg13[%c0_122, %c0_123, %c1_124, %c1_125, %c0_126] : memref<16x2x6x6x64xf32, #tpu.memory_space<vmem>>, vector<1x2x4x4x64xf32>
    %135 = vector.shape_cast %134 : vector<1x2x4x4x64xf32> to vector<2x4x4x64xf32>
    %136 = vector.shape_cast %135 : vector<2x4x4x64xf32> to vector<32x64xf32>
    %c0_127 = arith.constant 0 : index
    %c320 = arith.constant 320 : index
    %137 = vector.load %arg15[%c0_127, %c320] : memref<128x1024xf32, #tpu.memory_space<vmem>>, vector<32x64xf32>
    tpu.vector_store %arg15[%c0_127, %c320], %136 {strides = array<i32>} : memref<128x1024xf32, #tpu.memory_space<vmem>>, vector<32x64xf32>,
    %c1_128 = arith.constant 1 : index
    %c0_129 = arith.constant 0 : index
    %c1_130 = arith.constant 1 : index
    %c1_131 = arith.constant 1 : index
    %c0_132 = arith.constant 0 : index
    %138 = vector.load %arg13[%c1_128, %c0_129, %c1_130, %c1_131, %c0_132] : memref<16x2x6x6x64xf32, #tpu.memory_space<vmem>>, vector<1x2x4x4x64xf32>
    %139 = vector.shape_cast %138 : vector<1x2x4x4x64xf32> to vector<2x4x4x64xf32>
    %140 = vector.shape_cast %139 : vector<2x4x4x64xf32> to vector<32x64xf32>
    %c0_133 = arith.constant 0 : index
    %c384 = arith.constant 384 : index
    %141 = vector.load %arg15[%c0_133, %c384] : memref<128x1024xf32, #tpu.memory_space<vmem>>, vector<32x64xf32>
    tpu.vector_store %arg15[%c0_133, %c384], %140 {strides = array<i32>} : memref<128x1024xf32, #tpu.memory_space<vmem>>, vector<32x64xf32>,
    %c2_134 = arith.constant 2 : index
    %c0_135 = arith.constant 0 : index
    %c1_136 = arith.constant 1 : index
    %c1_137 = arith.constant 1 : index
    %c0_138 = arith.constant 0 : index
    %142 = vector.load %arg13[%c2_134, %c0_135, %c1_136, %c1_137, %c0_138] : memref<16x2x6x6x64xf32, #tpu.memory_space<vmem>>, vector<1x2x4x4x64xf32>
    %143 = vector.shape_cast %142 : vector<1x2x4x4x64xf32> to vector<2x4x4x64xf32>
    %144 = vector.shape_cast %143 : vector<2x4x4x64xf32> to vector<32x64xf32>
    %c0_139 = arith.constant 0 : index
    %c448 = arith.constant 448 : index
    %145 = vector.load %arg15[%c0_139, %c448] : memref<128x1024xf32, #tpu.memory_space<vmem>>, vector<32x64xf32>
    tpu.vector_store %arg15[%c0_139, %c448], %144 {strides = array<i32>} : memref<128x1024xf32, #tpu.memory_space<vmem>>, vector<32x64xf32>,
    %c7_140 = arith.constant 7 : index
    %c0_141 = arith.constant 0 : index
    %c1_142 = arith.constant 1 : index
    %c0_143 = arith.constant 0 : index
    %c0_144 = arith.constant 0 : index
    %146 = vector.load %arg13[%c7_140, %c0_141, %c1_142, %c0_143, %c0_144] : memref<16x2x6x6x64xf32, #tpu.memory_space<vmem>>, vector<1x2x4x4x64xf32>
    %147 = vector.shape_cast %146 : vector<1x2x4x4x64xf32> to vector<2x4x4x64xf32>
    %148 = vector.shape_cast %147 : vector<2x4x4x64xf32> to vector<32x64xf32>
    %c0_145 = arith.constant 0 : index
    %c512 = arith.constant 512 : index
    %149 = vector.load %arg15[%c0_145, %c512] : memref<128x1024xf32, #tpu.memory_space<vmem>>, vector<32x64xf32>
    tpu.vector_store %arg15[%c0_145, %c512], %148 {strides = array<i32>} : memref<128x1024xf32, #tpu.memory_space<vmem>>, vector<32x64xf32>,
    %c4_146 = arith.constant 4 : index
    %c0_147 = arith.constant 0 : index
    %c1_148 = arith.constant 1 : index
    %c1_149 = arith.constant 1 : index
    %c0_150 = arith.constant 0 : index
    %150 = vector.load %arg13[%c4_146, %c0_147, %c1_148, %c1_149, %c0_150] : memref<16x2x6x6x64xf32, #tpu.memory_space<vmem>>, vector<1x2x4x4x64xf32>
    %151 = vector.shape_cast %150 : vector<1x2x4x4x64xf32> to vector<2x4x4x64xf32>
    %152 = vector.shape_cast %151 : vector<2x4x4x64xf32> to vector<32x64xf32>
    %c0_151 = arith.constant 0 : index
    %c576 = arith.constant 576 : index
    %153 = vector.load %arg15[%c0_151, %c576] : memref<128x1024xf32, #tpu.memory_space<vmem>>, vector<32x64xf32>
    tpu.vector_store %arg15[%c0_151, %c576], %152 {strides = array<i32>} : memref<128x1024xf32, #tpu.memory_space<vmem>>, vector<32x64xf32>,
    %c5_152 = arith.constant 5 : index
    %c0_153 = arith.constant 0 : index
    %c1_154 = arith.constant 1 : index
    %c1_155 = arith.constant 1 : index
    %c0_156 = arith.constant 0 : index
    %154 = vector.load %arg13[%c5_152, %c0_153, %c1_154, %c1_155, %c0_156] : memref<16x2x6x6x64xf32, #tpu.memory_space<vmem>>, vector<1x2x4x4x64xf32>
    %155 = vector.shape_cast %154 : vector<1x2x4x4x64xf32> to vector<2x4x4x64xf32>
    %156 = vector.shape_cast %155 : vector<2x4x4x64xf32> to vector<32x64xf32>
    %c0_157 = arith.constant 0 : index
    %c640 = arith.constant 640 : index
    %157 = vector.load %arg15[%c0_157, %c640] : memref<128x1024xf32, #tpu.memory_space<vmem>>, vector<32x64xf32>
    tpu.vector_store %arg15[%c0_157, %c640], %156 {strides = array<i32>} : memref<128x1024xf32, #tpu.memory_space<vmem>>, vector<32x64xf32>,
    %c6_158 = arith.constant 6 : index
    %c0_159 = arith.constant 0 : index
    %c1_160 = arith.constant 1 : index
    %c1_161 = arith.constant 1 : index
    %c0_162 = arith.constant 0 : index
    %158 = vector.load %arg13[%c6_158, %c0_159, %c1_160, %c1_161, %c0_162] : memref<16x2x6x6x64xf32, #tpu.memory_space<vmem>>, vector<1x2x4x4x64xf32>
    %159 = vector.shape_cast %158 : vector<1x2x4x4x64xf32> to vector<2x4x4x64xf32>
    %160 = vector.shape_cast %159 : vector<2x4x4x64xf32> to vector<32x64xf32>
    %c0_163 = arith.constant 0 : index
    %c704 = arith.constant 704 : index
    %161 = vector.load %arg15[%c0_163, %c704] : memref<128x1024xf32, #tpu.memory_space<vmem>>, vector<32x64xf32>
    tpu.vector_store %arg15[%c0_163, %c704], %160 {strides = array<i32>} : memref<128x1024xf32, #tpu.memory_space<vmem>>, vector<32x64xf32>,
    %c11_164 = arith.constant 11 : index
    %c0_165 = arith.constant 0 : index
    %c1_166 = arith.constant 1 : index
    %c0_167 = arith.constant 0 : index
    %c0_168 = arith.constant 0 : index
    %162 = vector.load %arg13[%c11_164, %c0_165, %c1_166, %c0_167, %c0_168] : memref<16x2x6x6x64xf32, #tpu.memory_space<vmem>>, vector<1x2x4x4x64xf32>
    %163 = vector.shape_cast %162 : vector<1x2x4x4x64xf32> to vector<2x4x4x64xf32>
    %164 = vector.shape_cast %163 : vector<2x4x4x64xf32> to vector<32x64xf32>
    %c0_169 = arith.constant 0 : index
    %c768 = arith.constant 768 : index
    %165 = vector.load %arg15[%c0_169, %c768] : memref<128x1024xf32, #tpu.memory_space<vmem>>, vector<32x64xf32>
    tpu.vector_store %arg15[%c0_169, %c768], %164 {strides = array<i32>} : memref<128x1024xf32, #tpu.memory_space<vmem>>, vector<32x64xf32>,
    %c8_170 = arith.constant 8 : index
    %c0_171 = arith.constant 0 : index
    %c1_172 = arith.constant 1 : index
    %c1_173 = arith.constant 1 : index
    %c0_174 = arith.constant 0 : index
    %166 = vector.load %arg13[%c8_170, %c0_171, %c1_172, %c1_173, %c0_174] : memref<16x2x6x6x64xf32, #tpu.memory_space<vmem>>, vector<1x2x4x4x64xf32>
    %167 = vector.shape_cast %166 : vector<1x2x4x4x64xf32> to vector<2x4x4x64xf32>
    %168 = vector.shape_cast %167 : vector<2x4x4x64xf32> to vector<32x64xf32>
    %c0_175 = arith.constant 0 : index
    %c832 = arith.constant 832 : index
    %169 = vector.load %arg15[%c0_175, %c832] : memref<128x1024xf32, #tpu.memory_space<vmem>>, vector<32x64xf32>
    tpu.vector_store %arg15[%c0_175, %c832], %168 {strides = array<i32>} : memref<128x1024xf32, #tpu.memory_space<vmem>>, vector<32x64xf32>,
    %c9_176 = arith.constant 9 : index
    %c0_177 = arith.constant 0 : index
    %c1_178 = arith.constant 1 : index
    %c1_179 = arith.constant 1 : index
    %c0_180 = arith.constant 0 : index
    %170 = vector.load %arg13[%c9_176, %c0_177, %c1_178, %c1_179, %c0_180] : memref<16x2x6x6x64xf32, #tpu.memory_space<vmem>>, vector<1x2x4x4x64xf32>
    %171 = vector.shape_cast %170 : vector<1x2x4x4x64xf32> to vector<2x4x4x64xf32>
    %172 = vector.shape_cast %171 : vector<2x4x4x64xf32> to vector<32x64xf32>
    %c0_181 = arith.constant 0 : index
    %c896 = arith.constant 896 : index
    %173 = vector.load %arg15[%c0_181, %c896] : memref<128x1024xf32, #tpu.memory_space<vmem>>, vector<32x64xf32>
    tpu.vector_store %arg15[%c0_181, %c896], %172 {strides = array<i32>} : memref<128x1024xf32, #tpu.memory_space<vmem>>, vector<32x64xf32>,
    %c10_182 = arith.constant 10 : index
    %c0_183 = arith.constant 0 : index
    %c1_184 = arith.constant 1 : index
    %c1_185 = arith.constant 1 : index
    %c0_186 = arith.constant 0 : index
    %174 = vector.load %arg13[%c10_182, %c0_183, %c1_184, %c1_185, %c0_186] : memref<16x2x6x6x64xf32, #tpu.memory_space<vmem>>, vector<1x2x4x4x64xf32>
    %175 = vector.shape_cast %174 : vector<1x2x4x4x64xf32> to vector<2x4x4x64xf32>
    %176 = vector.shape_cast %175 : vector<2x4x4x64xf32> to vector<32x64xf32>
    %c0_187 = arith.constant 0 : index
    %c960 = arith.constant 960 : index
    %177 = vector.load %arg15[%c0_187, %c960] : memref<128x1024xf32, #tpu.memory_space<vmem>>, vector<32x64xf32>
    tpu.vector_store %arg15[%c0_187, %c960], %176 {strides = array<i32>} : memref<128x1024xf32, #tpu.memory_space<vmem>>, vector<32x64xf32>,
    %c13_188 = arith.constant 13 : index
    %c0_189 = arith.constant 0 : index
    %c0_190 = arith.constant 0 : index
    %c1_191 = arith.constant 1 : index
    %c0_192 = arith.constant 0 : index
    %178 = vector.load %arg13[%c13_188, %c0_189, %c0_190, %c1_191, %c0_192] : memref<16x2x6x6x64xf32, #tpu.memory_space<vmem>>, vector<1x2x4x4x64xf32>
    %179 = vector.shape_cast %178 : vector<1x2x4x4x64xf32> to vector<2x4x4x64xf32>
    %180 = vector.shape_cast %179 : vector<2x4x4x64xf32> to vector<32x64xf32>
    %c32 = arith.constant 32 : index
    %c0_193 = arith.constant 0 : index
    %181 = vector.load %arg15[%c32, %c0_193] : memref<128x1024xf32, #tpu.memory_space<vmem>>, vector<32x64xf32>
    tpu.vector_store %arg15[%c32, %c0_193], %180 {strides = array<i32>} : memref<128x1024xf32, #tpu.memory_space<vmem>>, vector<32x64xf32>,
    %c14_194 = arith.constant 14 : index
    %c0_195 = arith.constant 0 : index
    %c0_196 = arith.constant 0 : index
    %c1_197 = arith.constant 1 : index
    %c0_198 = arith.constant 0 : index
    %182 = vector.load %arg13[%c14_194, %c0_195, %c0_196, %c1_197, %c0_198] : memref<16x2x6x6x64xf32, #tpu.memory_space<vmem>>, vector<1x2x4x4x64xf32>
    %183 = vector.shape_cast %182 : vector<1x2x4x4x64xf32> to vector<2x4x4x64xf32>
    %184 = vector.shape_cast %183 : vector<2x4x4x64xf32> to vector<32x64xf32>
    %c32_199 = arith.constant 32 : index
    %c64_200 = arith.constant 64 : index
    %185 = vector.load %arg15[%c32_199, %c64_200] : memref<128x1024xf32, #tpu.memory_space<vmem>>, vector<32x64xf32>
    tpu.vector_store %arg15[%c32_199, %c64_200], %184 {strides = array<i32>} : memref<128x1024xf32, #tpu.memory_space<vmem>>, vector<32x64xf32>,
    %c15_201 = arith.constant 15 : index
    %c0_202 = arith.constant 0 : index
    %c0_203 = arith.constant 0 : index
    %c1_204 = arith.constant 1 : index
    %c0_205 = arith.constant 0 : index
    %186 = vector.load %arg13[%c15_201, %c0_202, %c0_203, %c1_204, %c0_205] : memref<16x2x6x6x64xf32, #tpu.memory_space<vmem>>, vector<1x2x4x4x64xf32>
    %187 = vector.shape_cast %186 : vector<1x2x4x4x64xf32> to vector<2x4x4x64xf32>
    %188 = vector.shape_cast %187 : vector<2x4x4x64xf32> to vector<32x64xf32>
    %c32_206 = arith.constant 32 : index
    %c128_207 = arith.constant 128 : index
    %189 = vector.load %arg15[%c32_206, %c128_207] : memref<128x1024xf32, #tpu.memory_space<vmem>>, vector<32x64xf32>
    tpu.vector_store %arg15[%c32_206, %c128_207], %188 {strides = array<i32>} : memref<128x1024xf32, #tpu.memory_space<vmem>>, vector<32x64xf32>,
    %c12_208 = arith.constant 12 : index
    %c0_209 = arith.constant 0 : index
    %c0_210 = arith.constant 0 : index
    %c2_211 = arith.constant 2 : index
    %c0_212 = arith.constant 0 : index
    %190 = vector.load %arg13[%c12_208, %c0_209, %c0_210, %c2_211, %c0_212] : memref<16x2x6x6x64xf32, #tpu.memory_space<vmem>>, vector<1x2x4x4x64xf32>
    %191 = vector.shape_cast %190 : vector<1x2x4x4x64xf32> to vector<2x4x4x64xf32>
    %192 = vector.shape_cast %191 : vector<2x4x4x64xf32> to vector<32x64xf32>
    %c32_213 = arith.constant 32 : index
    %c192_214 = arith.constant 192 : index
    %193 = vector.load %arg15[%c32_213, %c192_214] : memref<128x1024xf32, #tpu.memory_space<vmem>>, vector<32x64xf32>
    tpu.vector_store %arg15[%c32_213, %c192_214], %192 {strides = array<i32>} : memref<128x1024xf32, #tpu.memory_space<vmem>>, vector<32x64xf32>,
    %c1_215 = arith.constant 1 : index
    %c0_216 = arith.constant 0 : index
    %c1_217 = arith.constant 1 : index
    %c1_218 = arith.constant 1 : index
    %c0_219 = arith.constant 0 : index
    %194 = vector.load %arg13[%c1_215, %c0_216, %c1_217, %c1_218, %c0_219] : memref<16x2x6x6x64xf32, #tpu.memory_space<vmem>>, vector<1x2x4x4x64xf32>
    %195 = vector.shape_cast %194 : vector<1x2x4x4x64xf32> to vector<2x4x4x64xf32>
    %196 = vector.shape_cast %195 : vector<2x4x4x64xf32> to vector<32x64xf32>
    %c32_220 = arith.constant 32 : index
    %c256_221 = arith.constant 256 : index
    %197 = vector.load %arg15[%c32_220, %c256_221] : memref<128x1024xf32, #tpu.memory_space<vmem>>, vector<32x64xf32>
    tpu.vector_store %arg15[%c32_220, %c256_221], %196 {strides = array<i32>} : memref<128x1024xf32, #tpu.memory_space<vmem>>, vector<32x64xf32>,
    %c2_222 = arith.constant 2 : index
    %c0_223 = arith.constant 0 : index
    %c1_224 = arith.constant 1 : index
    %c1_225 = arith.constant 1 : index
    %c0_226 = arith.constant 0 : index
    %198 = vector.load %arg13[%c2_222, %c0_223, %c1_224, %c1_225, %c0_226] : memref<16x2x6x6x64xf32, #tpu.memory_space<vmem>>, vector<1x2x4x4x64xf32>
    %199 = vector.shape_cast %198 : vector<1x2x4x4x64xf32> to vector<2x4x4x64xf32>
    %200 = vector.shape_cast %199 : vector<2x4x4x64xf32> to vector<32x64xf32>
    %c32_227 = arith.constant 32 : index
    %c320_228 = arith.constant 320 : index
    %201 = vector.load %arg15[%c32_227, %c320_228] : memref<128x1024xf32, #tpu.memory_space<vmem>>, vector<32x64xf32>
    tpu.vector_store %arg15[%c32_227, %c320_228], %200 {strides = array<i32>} : memref<128x1024xf32, #tpu.memory_space<vmem>>, vector<32x64xf32>,
    %c3_229 = arith.constant 3 : index
    %c0_230 = arith.constant 0 : index
    %c1_231 = arith.constant 1 : index
    %c1_232 = arith.constant 1 : index
    %c0_233 = arith.constant 0 : index
    %202 = vector.load %arg13[%c3_229, %c0_230, %c1_231, %c1_232, %c0_233] : memref<16x2x6x6x64xf32, #tpu.memory_space<vmem>>, vector<1x2x4x4x64xf32>
    %203 = vector.shape_cast %202 : vector<1x2x4x4x64xf32> to vector<2x4x4x64xf32>
    %204 = vector.shape_cast %203 : vector<2x4x4x64xf32> to vector<32x64xf32>
    %c32_234 = arith.constant 32 : index
    %c384_235 = arith.constant 384 : index
    %205 = vector.load %arg15[%c32_234, %c384_235] : memref<128x1024xf32, #tpu.memory_space<vmem>>, vector<32x64xf32>
    tpu.vector_store %arg15[%c32_234, %c384_235], %204 {strides = array<i32>} : memref<128x1024xf32, #tpu.memory_space<vmem>>, vector<32x64xf32>,
    %c0_236 = arith.constant 0 : index
    %c0_237 = arith.constant 0 : index
    %c1_238 = arith.constant 1 : index
    %c2_239 = arith.constant 2 : index
    %c0_240 = arith.constant 0 : index
    %206 = vector.load %arg13[%c0_236, %c0_237, %c1_238, %c2_239, %c0_240] : memref<16x2x6x6x64xf32, #tpu.memory_space<vmem>>, vector<1x2x4x4x64xf32>
    %207 = vector.shape_cast %206 : vector<1x2x4x4x64xf32> to vector<2x4x4x64xf32>
    %208 = vector.shape_cast %207 : vector<2x4x4x64xf32> to vector<32x64xf32>
    %c32_241 = arith.constant 32 : index
    %c448_242 = arith.constant 448 : index
    %209 = vector.load %arg15[%c32_241, %c448_242] : memref<128x1024xf32, #tpu.memory_space<vmem>>, vector<32x64xf32>
    tpu.vector_store %arg15[%c32_241, %c448_242], %208 {strides = array<i32>} : memref<128x1024xf32, #tpu.memory_space<vmem>>, vector<32x64xf32>,
    %c5_243 = arith.constant 5 : index
    %c0_244 = arith.constant 0 : index
    %c1_245 = arith.constant 1 : index
    %c1_246 = arith.constant 1 : index
    %c0_247 = arith.constant 0 : index
    %210 = vector.load %arg13[%c5_243, %c0_244, %c1_245, %c1_246, %c0_247] : memref<16x2x6x6x64xf32, #tpu.memory_space<vmem>>, vector<1x2x4x4x64xf32>
    %211 = vector.shape_cast %210 : vector<1x2x4x4x64xf32> to vector<2x4x4x64xf32>
    %212 = vector.shape_cast %211 : vector<2x4x4x64xf32> to vector<32x64xf32>
    %c32_248 = arith.constant 32 : index
    %c512_249 = arith.constant 512 : index
    %213 = vector.load %arg15[%c32_248, %c512_249] : memref<128x1024xf32, #tpu.memory_space<vmem>>, vector<32x64xf32>
    tpu.vector_store %arg15[%c32_248, %c512_249], %212 {strides = array<i32>} : memref<128x1024xf32, #tpu.memory_space<vmem>>, vector<32x64xf32>,
    %c6_250 = arith.constant 6 : index
    %c0_251 = arith.constant 0 : index
    %c1_252 = arith.constant 1 : index
    %c1_253 = arith.constant 1 : index
    %c0_254 = arith.constant 0 : index
    %214 = vector.load %arg13[%c6_250, %c0_251, %c1_252, %c1_253, %c0_254] : memref<16x2x6x6x64xf32, #tpu.memory_space<vmem>>, vector<1x2x4x4x64xf32>
    %215 = vector.shape_cast %214 : vector<1x2x4x4x64xf32> to vector<2x4x4x64xf32>
    %216 = vector.shape_cast %215 : vector<2x4x4x64xf32> to vector<32x64xf32>
    %c32_255 = arith.constant 32 : index
    %c576_256 = arith.constant 576 : index
    %217 = vector.load %arg15[%c32_255, %c576_256] : memref<128x1024xf32, #tpu.memory_space<vmem>>, vector<32x64xf32>
    tpu.vector_store %arg15[%c32_255, %c576_256], %216 {strides = array<i32>} : memref<128x1024xf32, #tpu.memory_space<vmem>>, vector<32x64xf32>,
    %c7_257 = arith.constant 7 : index
    %c0_258 = arith.constant 0 : index
    %c1_259 = arith.constant 1 : index
    %c1_260 = arith.constant 1 : index
    %c0_261 = arith.constant 0 : index
    %218 = vector.load %arg13[%c7_257, %c0_258, %c1_259, %c1_260, %c0_261] : memref<16x2x6x6x64xf32, #tpu.memory_space<vmem>>, vector<1x2x4x4x64xf32>
    %219 = vector.shape_cast %218 : vector<1x2x4x4x64xf32> to vector<2x4x4x64xf32>
    %220 = vector.shape_cast %219 : vector<2x4x4x64xf32> to vector<32x64xf32>
    %c32_262 = arith.constant 32 : index
    %c640_263 = arith.constant 640 : index
    %221 = vector.load %arg15[%c32_262, %c640_263] : memref<128x1024xf32, #tpu.memory_space<vmem>>, vector<32x64xf32>
    tpu.vector_store %arg15[%c32_262, %c640_263], %220 {strides = array<i32>} : memref<128x1024xf32, #tpu.memory_space<vmem>>, vector<32x64xf32>,
    %c4_264 = arith.constant 4 : index
    %c0_265 = arith.constant 0 : index
    %c1_266 = arith.constant 1 : index
    %c2_267 = arith.constant 2 : index
    %c0_268 = arith.constant 0 : index
    %222 = vector.load %arg13[%c4_264, %c0_265, %c1_266, %c2_267, %c0_268] : memref<16x2x6x6x64xf32, #tpu.memory_space<vmem>>, vector<1x2x4x4x64xf32>
    %223 = vector.shape_cast %222 : vector<1x2x4x4x64xf32> to vector<2x4x4x64xf32>
    %224 = vector.shape_cast %223 : vector<2x4x4x64xf32> to vector<32x64xf32>
    %c32_269 = arith.constant 32 : index
    %c704_270 = arith.constant 704 : index
    %225 = vector.load %arg15[%c32_269, %c704_270] : memref<128x1024xf32, #tpu.memory_space<vmem>>, vector<32x64xf32>
    tpu.vector_store %arg15[%c32_269, %c704_270], %224 {strides = array<i32>} : memref<128x1024xf32, #tpu.memory_space<vmem>>, vector<32x64xf32>,
    %c9_271 = arith.constant 9 : index
    %c0_272 = arith.constant 0 : index
    %c1_273 = arith.constant 1 : index
    %c1_274 = arith.constant 1 : index
    %c0_275 = arith.constant 0 : index
    %226 = vector.load %arg13[%c9_271, %c0_272, %c1_273, %c1_274, %c0_275] : memref<16x2x6x6x64xf32, #tpu.memory_space<vmem>>, vector<1x2x4x4x64xf32>
    %227 = vector.shape_cast %226 : vector<1x2x4x4x64xf32> to vector<2x4x4x64xf32>
    %228 = vector.shape_cast %227 : vector<2x4x4x64xf32> to vector<32x64xf32>
    %c32_276 = arith.constant 32 : index
    %c768_277 = arith.constant 768 : index
    %229 = vector.load %arg15[%c32_276, %c768_277] : memref<128x1024xf32, #tpu.memory_space<vmem>>, vector<32x64xf32>
    tpu.vector_store %arg15[%c32_276, %c768_277], %228 {strides = array<i32>} : memref<128x1024xf32, #tpu.memory_space<vmem>>, vector<32x64xf32>,
    %c10_278 = arith.constant 10 : index
    %c0_279 = arith.constant 0 : index
    %c1_280 = arith.constant 1 : index
    %c1_281 = arith.constant 1 : index
    %c0_282 = arith.constant 0 : index
    %230 = vector.load %arg13[%c10_278, %c0_279, %c1_280, %c1_281, %c0_282] : memref<16x2x6x6x64xf32, #tpu.memory_space<vmem>>, vector<1x2x4x4x64xf32>
    %231 = vector.shape_cast %230 : vector<1x2x4x4x64xf32> to vector<2x4x4x64xf32>
    %232 = vector.shape_cast %231 : vector<2x4x4x64xf32> to vector<32x64xf32>
    %c32_283 = arith.constant 32 : index
    %c832_284 = arith.constant 832 : index
    %233 = vector.load %arg15[%c32_283, %c832_284] : memref<128x1024xf32, #tpu.memory_space<vmem>>, vector<32x64xf32>
    tpu.vector_store %arg15[%c32_283, %c832_284], %232 {strides = array<i32>} : memref<128x1024xf32, #tpu.memory_space<vmem>>, vector<32x64xf32>,
    %c11_285 = arith.constant 11 : index
    %c0_286 = arith.constant 0 : index
    %c1_287 = arith.constant 1 : index
    %c1_288 = arith.constant 1 : index
    %c0_289 = arith.constant 0 : index
    %234 = vector.load %arg13[%c11_285, %c0_286, %c1_287, %c1_288, %c0_289] : memref<16x2x6x6x64xf32, #tpu.memory_space<vmem>>, vector<1x2x4x4x64xf32>
    %235 = vector.shape_cast %234 : vector<1x2x4x4x64xf32> to vector<2x4x4x64xf32>
    %236 = vector.shape_cast %235 : vector<2x4x4x64xf32> to vector<32x64xf32>
    %c32_290 = arith.constant 32 : index
    %c896_291 = arith.constant 896 : index
    %237 = vector.load %arg15[%c32_290, %c896_291] : memref<128x1024xf32, #tpu.memory_space<vmem>>, vector<32x64xf32>
    tpu.vector_store %arg15[%c32_290, %c896_291], %236 {strides = array<i32>} : memref<128x1024xf32, #tpu.memory_space<vmem>>, vector<32x64xf32>,
    %c8_292 = arith.constant 8 : index
    %c0_293 = arith.constant 0 : index
    %c1_294 = arith.constant 1 : index
    %c2_295 = arith.constant 2 : index
    %c0_296 = arith.constant 0 : index
    %238 = vector.load %arg13[%c8_292, %c0_293, %c1_294, %c2_295, %c0_296] : memref<16x2x6x6x64xf32, #tpu.memory_space<vmem>>, vector<1x2x4x4x64xf32>
    %239 = vector.shape_cast %238 : vector<1x2x4x4x64xf32> to vector<2x4x4x64xf32>
    %240 = vector.shape_cast %239 : vector<2x4x4x64xf32> to vector<32x64xf32>
    %c32_297 = arith.constant 32 : index
    %c960_298 = arith.constant 960 : index
    %241 = vector.load %arg15[%c32_297, %c960_298] : memref<128x1024xf32, #tpu.memory_space<vmem>>, vector<32x64xf32>
    tpu.vector_store %arg15[%c32_297, %c960_298], %240 {strides = array<i32>} : memref<128x1024xf32, #tpu.memory_space<vmem>>, vector<32x64xf32>,
    %c7_299 = arith.constant 7 : index
    %c0_300 = arith.constant 0 : index
    %c1_301 = arith.constant 1 : index
    %c0_302 = arith.constant 0 : index
    %c0_303 = arith.constant 0 : index
    %242 = vector.load %arg13[%c7_299, %c0_300, %c1_301, %c0_302, %c0_303] : memref<16x2x6x6x64xf32, #tpu.memory_space<vmem>>, vector<1x2x4x4x64xf32>
    %243 = vector.shape_cast %242 : vector<1x2x4x4x64xf32> to vector<2x4x4x64xf32>
    %244 = vector.shape_cast %243 : vector<2x4x4x64xf32> to vector<32x64xf32>
    %c64_304 = arith.constant 64 : index
    %c0_305 = arith.constant 0 : index
    %245 = vector.load %arg15[%c64_304, %c0_305] : memref<128x1024xf32, #tpu.memory_space<vmem>>, vector<32x64xf32>
    tpu.vector_store %arg15[%c64_304, %c0_305], %244 {strides = array<i32>} : memref<128x1024xf32, #tpu.memory_space<vmem>>, vector<32x64xf32>,
    %c4_306 = arith.constant 4 : index
    %c0_307 = arith.constant 0 : index
    %c1_308 = arith.constant 1 : index
    %c1_309 = arith.constant 1 : index
    %c0_310 = arith.constant 0 : index
    %246 = vector.load %arg13[%c4_306, %c0_307, %c1_308, %c1_309, %c0_310] : memref<16x2x6x6x64xf32, #tpu.memory_space<vmem>>, vector<1x2x4x4x64xf32>
    %247 = vector.shape_cast %246 : vector<1x2x4x4x64xf32> to vector<2x4x4x64xf32>
    %248 = vector.shape_cast %247 : vector<2x4x4x64xf32> to vector<32x64xf32>
    %c64_311 = arith.constant 64 : index
    %c64_312 = arith.constant 64 : index
    %249 = vector.load %arg15[%c64_311, %c64_312] : memref<128x1024xf32, #tpu.memory_space<vmem>>, vector<32x64xf32>
    tpu.vector_store %arg15[%c64_311, %c64_312], %248 {strides = array<i32>} : memref<128x1024xf32, #tpu.memory_space<vmem>>, vector<32x64xf32>,
    %c5_313 = arith.constant 5 : index
    %c0_314 = arith.constant 0 : index
    %c1_315 = arith.constant 1 : index
    %c1_316 = arith.constant 1 : index
    %c0_317 = arith.constant 0 : index
    %250 = vector.load %arg13[%c5_313, %c0_314, %c1_315, %c1_316, %c0_317] : memref<16x2x6x6x64xf32, #tpu.memory_space<vmem>>, vector<1x2x4x4x64xf32>
    %251 = vector.shape_cast %250 : vector<1x2x4x4x64xf32> to vector<2x4x4x64xf32>
    %252 = vector.shape_cast %251 : vector<2x4x4x64xf32> to vector<32x64xf32>
    %c64_318 = arith.constant 64 : index
    %c128_319 = arith.constant 128 : index
    %253 = vector.load %arg15[%c64_318, %c128_319] : memref<128x1024xf32, #tpu.memory_space<vmem>>, vector<32x64xf32>
    tpu.vector_store %arg15[%c64_318, %c128_319], %252 {strides = array<i32>} : memref<128x1024xf32, #tpu.memory_space<vmem>>, vector<32x64xf32>,
    %c6_320 = arith.constant 6 : index
    %c0_321 = arith.constant 0 : index
    %c1_322 = arith.constant 1 : index
    %c1_323 = arith.constant 1 : index
    %c0_324 = arith.constant 0 : index
    %254 = vector.load %arg13[%c6_320, %c0_321, %c1_322, %c1_323, %c0_324] : memref<16x2x6x6x64xf32, #tpu.memory_space<vmem>>, vector<1x2x4x4x64xf32>
    %255 = vector.shape_cast %254 : vector<1x2x4x4x64xf32> to vector<2x4x4x64xf32>
    %256 = vector.shape_cast %255 : vector<2x4x4x64xf32> to vector<32x64xf32>
    %c64_325 = arith.constant 64 : index
    %c192_326 = arith.constant 192 : index
    %257 = vector.load %arg15[%c64_325, %c192_326] : memref<128x1024xf32, #tpu.memory_space<vmem>>, vector<32x64xf32>
    tpu.vector_store %arg15[%c64_325, %c192_326], %256 {strides = array<i32>} : memref<128x1024xf32, #tpu.memory_space<vmem>>, vector<32x64xf32>,
    %c11_327 = arith.constant 11 : index
    %c0_328 = arith.constant 0 : index
    %c1_329 = arith.constant 1 : index
    %c0_330 = arith.constant 0 : index
    %c0_331 = arith.constant 0 : index
    %258 = vector.load %arg13[%c11_327, %c0_328, %c1_329, %c0_330, %c0_331] : memref<16x2x6x6x64xf32, #tpu.memory_space<vmem>>, vector<1x2x4x4x64xf32>
    %259 = vector.shape_cast %258 : vector<1x2x4x4x64xf32> to vector<2x4x4x64xf32>
    %260 = vector.shape_cast %259 : vector<2x4x4x64xf32> to vector<32x64xf32>
    %c64_332 = arith.constant 64 : index
    %c256_333 = arith.constant 256 : index
    %261 = vector.load %arg15[%c64_332, %c256_333] : memref<128x1024xf32, #tpu.memory_space<vmem>>, vector<32x64xf32>
    tpu.vector_store %arg15[%c64_332, %c256_333], %260 {strides = array<i32>} : memref<128x1024xf32, #tpu.memory_space<vmem>>, vector<32x64xf32>,
    %c8_334 = arith.constant 8 : index
    %c0_335 = arith.constant 0 : index
    %c1_336 = arith.constant 1 : index
    %c1_337 = arith.constant 1 : index
    %c0_338 = arith.constant 0 : index
    %262 = vector.load %arg13[%c8_334, %c0_335, %c1_336, %c1_337, %c0_338] : memref<16x2x6x6x64xf32, #tpu.memory_space<vmem>>, vector<1x2x4x4x64xf32>
    %263 = vector.shape_cast %262 : vector<1x2x4x4x64xf32> to vector<2x4x4x64xf32>
    %264 = vector.shape_cast %263 : vector<2x4x4x64xf32> to vector<32x64xf32>
    %c64_339 = arith.constant 64 : index
    %c320_340 = arith.constant 320 : index
    %265 = vector.load %arg15[%c64_339, %c320_340] : memref<128x1024xf32, #tpu.memory_space<vmem>>, vector<32x64xf32>
    tpu.vector_store %arg15[%c64_339, %c320_340], %264 {strides = array<i32>} : memref<128x1024xf32, #tpu.memory_space<vmem>>, vector<32x64xf32>,
    %c9_341 = arith.constant 9 : index
    %c0_342 = arith.constant 0 : index
    %c1_343 = arith.constant 1 : index
    %c1_344 = arith.constant 1 : index
    %c0_345 = arith.constant 0 : index
    %266 = vector.load %arg13[%c9_341, %c0_342, %c1_343, %c1_344, %c0_345] : memref<16x2x6x6x64xf32, #tpu.memory_space<vmem>>, vector<1x2x4x4x64xf32>
    %267 = vector.shape_cast %266 : vector<1x2x4x4x64xf32> to vector<2x4x4x64xf32>
    %268 = vector.shape_cast %267 : vector<2x4x4x64xf32> to vector<32x64xf32>
    %c64_346 = arith.constant 64 : index
    %c384_347 = arith.constant 384 : index
    %269 = vector.load %arg15[%c64_346, %c384_347] : memref<128x1024xf32, #tpu.memory_space<vmem>>, vector<32x64xf32>
    tpu.vector_store %arg15[%c64_346, %c384_347], %268 {strides = array<i32>} : memref<128x1024xf32, #tpu.memory_space<vmem>>, vector<32x64xf32>,
    %c10_348 = arith.constant 10 : index
    %c0_349 = arith.constant 0 : index
    %c1_350 = arith.constant 1 : index
    %c1_351 = arith.constant 1 : index
    %c0_352 = arith.constant 0 : index
    %270 = vector.load %arg13[%c10_348, %c0_349, %c1_350, %c1_351, %c0_352] : memref<16x2x6x6x64xf32, #tpu.memory_space<vmem>>, vector<1x2x4x4x64xf32>
    %271 = vector.shape_cast %270 : vector<1x2x4x4x64xf32> to vector<2x4x4x64xf32>
    %272 = vector.shape_cast %271 : vector<2x4x4x64xf32> to vector<32x64xf32>
    %c64_353 = arith.constant 64 : index
    %c448_354 = arith.constant 448 : index
    %273 = vector.load %arg15[%c64_353, %c448_354] : memref<128x1024xf32, #tpu.memory_space<vmem>>, vector<32x64xf32>
    tpu.vector_store %arg15[%c64_353, %c448_354], %272 {strides = array<i32>} : memref<128x1024xf32, #tpu.memory_space<vmem>>, vector<32x64xf32>,
    %c15_355 = arith.constant 15 : index
    %c0_356 = arith.constant 0 : index
    %c1_357 = arith.constant 1 : index
    %c0_358 = arith.constant 0 : index
    %c0_359 = arith.constant 0 : index
    %274 = vector.load %arg13[%c15_355, %c0_356, %c1_357, %c0_358, %c0_359] : memref<16x2x6x6x64xf32, #tpu.memory_space<vmem>>, vector<1x2x4x4x64xf32>
    %275 = vector.shape_cast %274 : vector<1x2x4x4x64xf32> to vector<2x4x4x64xf32>
    %276 = vector.shape_cast %275 : vector<2x4x4x64xf32> to vector<32x64xf32>
    %c64_360 = arith.constant 64 : index
    %c512_361 = arith.constant 512 : index
    %277 = vector.load %arg15[%c64_360, %c512_361] : memref<128x1024xf32, #tpu.memory_space<vmem>>, vector<32x64xf32>
    tpu.vector_store %arg15[%c64_360, %c512_361], %276 {strides = array<i32>} : memref<128x1024xf32, #tpu.memory_space<vmem>>, vector<32x64xf32>,
    %c12_362 = arith.constant 12 : index
    %c0_363 = arith.constant 0 : index
    %c1_364 = arith.constant 1 : index
    %c1_365 = arith.constant 1 : index
    %c0_366 = arith.constant 0 : index
    %278 = vector.load %arg13[%c12_362, %c0_363, %c1_364, %c1_365, %c0_366] : memref<16x2x6x6x64xf32, #tpu.memory_space<vmem>>, vector<1x2x4x4x64xf32>
    %279 = vector.shape_cast %278 : vector<1x2x4x4x64xf32> to vector<2x4x4x64xf32>
    %280 = vector.shape_cast %279 : vector<2x4x4x64xf32> to vector<32x64xf32>
    %c64_367 = arith.constant 64 : index
    %c576_368 = arith.constant 576 : index
    %281 = vector.load %arg15[%c64_367, %c576_368] : memref<128x1024xf32, #tpu.memory_space<vmem>>, vector<32x64xf32>
    tpu.vector_store %arg15[%c64_367, %c576_368], %280 {strides = array<i32>} : memref<128x1024xf32, #tpu.memory_space<vmem>>, vector<32x64xf32>,
    %c13_369 = arith.constant 13 : index
    %c0_370 = arith.constant 0 : index
    %c1_371 = arith.constant 1 : index
    %c1_372 = arith.constant 1 : index
    %c0_373 = arith.constant 0 : index
    %282 = vector.load %arg13[%c13_369, %c0_370, %c1_371, %c1_372, %c0_373] : memref<16x2x6x6x64xf32, #tpu.memory_space<vmem>>, vector<1x2x4x4x64xf32>
    %283 = vector.shape_cast %282 : vector<1x2x4x4x64xf32> to vector<2x4x4x64xf32>
    %284 = vector.shape_cast %283 : vector<2x4x4x64xf32> to vector<32x64xf32>
    %c64_374 = arith.constant 64 : index
    %c640_375 = arith.constant 640 : index
    %285 = vector.load %arg15[%c64_374, %c640_375] : memref<128x1024xf32, #tpu.memory_space<vmem>>, vector<32x64xf32>
    tpu.vector_store %arg15[%c64_374, %c640_375], %284 {strides = array<i32>} : memref<128x1024xf32, #tpu.memory_space<vmem>>, vector<32x64xf32>,
    %c14_376 = arith.constant 14 : index
    %c0_377 = arith.constant 0 : index
    %c1_378 = arith.constant 1 : index
    %c1_379 = arith.constant 1 : index
    %c0_380 = arith.constant 0 : index
    %286 = vector.load %arg13[%c14_376, %c0_377, %c1_378, %c1_379, %c0_380] : memref<16x2x6x6x64xf32, #tpu.memory_space<vmem>>, vector<1x2x4x4x64xf32>
    %287 = vector.shape_cast %286 : vector<1x2x4x4x64xf32> to vector<2x4x4x64xf32>
    %288 = vector.shape_cast %287 : vector<2x4x4x64xf32> to vector<32x64xf32>
    %c64_381 = arith.constant 64 : index
    %c704_382 = arith.constant 704 : index
    %289 = vector.load %arg15[%c64_381, %c704_382] : memref<128x1024xf32, #tpu.memory_space<vmem>>, vector<32x64xf32>
    tpu.vector_store %arg15[%c64_381, %c704_382], %288 {strides = array<i32>} : memref<128x1024xf32, #tpu.memory_space<vmem>>, vector<32x64xf32>,
    %c3_383 = arith.constant 3 : index
    %c0_384 = arith.constant 0 : index
    %c2_385 = arith.constant 2 : index
    %c0_386 = arith.constant 0 : index
    %c0_387 = arith.constant 0 : index
    %290 = vector.load %arg13[%c3_383, %c0_384, %c2_385, %c0_386, %c0_387] : memref<16x2x6x6x64xf32, #tpu.memory_space<vmem>>, vector<1x2x4x4x64xf32>
    %291 = vector.shape_cast %290 : vector<1x2x4x4x64xf32> to vector<2x4x4x64xf32>
    %292 = vector.shape_cast %291 : vector<2x4x4x64xf32> to vector<32x64xf32>
    %c64_388 = arith.constant 64 : index
    %c768_389 = arith.constant 768 : index
    %293 = vector.load %arg15[%c64_388, %c768_389] : memref<128x1024xf32, #tpu.memory_space<vmem>>, vector<32x64xf32>
    tpu.vector_store %arg15[%c64_388, %c768_389], %292 {strides = array<i32>} : memref<128x1024xf32, #tpu.memory_space<vmem>>, vector<32x64xf32>,
    %c0_390 = arith.constant 0 : index
    %c0_391 = arith.constant 0 : index
    %c2_392 = arith.constant 2 : index
    %c1_393 = arith.constant 1 : index
    %c0_394 = arith.constant 0 : index
    %294 = vector.load %arg13[%c0_390, %c0_391, %c2_392, %c1_393, %c0_394] : memref<16x2x6x6x64xf32, #tpu.memory_space<vmem>>, vector<1x2x4x4x64xf32>
    %295 = vector.shape_cast %294 : vector<1x2x4x4x64xf32> to vector<2x4x4x64xf32>
    %296 = vector.shape_cast %295 : vector<2x4x4x64xf32> to vector<32x64xf32>
    %c64_395 = arith.constant 64 : index
    %c832_396 = arith.constant 832 : index
    %297 = vector.load %arg15[%c64_395, %c832_396] : memref<128x1024xf32, #tpu.memory_space<vmem>>, vector<32x64xf32>
    tpu.vector_store %arg15[%c64_395, %c832_396], %296 {strides = array<i32>} : memref<128x1024xf32, #tpu.memory_space<vmem>>, vector<32x64xf32>,
    %c1_397 = arith.constant 1 : index
    %c0_398 = arith.constant 0 : index
    %c2_399 = arith.constant 2 : index
    %c1_400 = arith.constant 1 : index
    %c0_401 = arith.constant 0 : index
    %298 = vector.load %arg13[%c1_397, %c0_398, %c2_399, %c1_400, %c0_401] : memref<16x2x6x6x64xf32, #tpu.memory_space<vmem>>, vector<1x2x4x4x64xf32>
    %299 = vector.shape_cast %298 : vector<1x2x4x4x64xf32> to vector<2x4x4x64xf32>
    %300 = vector.shape_cast %299 : vector<2x4x4x64xf32> to vector<32x64xf32>
    %c64_402 = arith.constant 64 : index
    %c896_403 = arith.constant 896 : index
    %301 = vector.load %arg15[%c64_402, %c896_403] : memref<128x1024xf32, #tpu.memory_space<vmem>>, vector<32x64xf32>
    tpu.vector_store %arg15[%c64_402, %c896_403], %300 {strides = array<i32>} : memref<128x1024xf32, #tpu.memory_space<vmem>>, vector<32x64xf32>,
    %c2_404 = arith.constant 2 : index
    %c0_405 = arith.constant 0 : index
    %c2_406 = arith.constant 2 : index
    %c1_407 = arith.constant 1 : index
    %c0_408 = arith.constant 0 : index
    %302 = vector.load %arg13[%c2_404, %c0_405, %c2_406, %c1_407, %c0_408] : memref<16x2x6x6x64xf32, #tpu.memory_space<vmem>>, vector<1x2x4x4x64xf32>
    %303 = vector.shape_cast %302 : vector<1x2x4x4x64xf32> to vector<2x4x4x64xf32>
    %304 = vector.shape_cast %303 : vector<2x4x4x64xf32> to vector<32x64xf32>
    %c64_409 = arith.constant 64 : index
    %c960_410 = arith.constant 960 : index
    %305 = vector.load %arg15[%c64_409, %c960_410] : memref<128x1024xf32, #tpu.memory_space<vmem>>, vector<32x64xf32>
    tpu.vector_store %arg15[%c64_409, %c960_410], %304 {strides = array<i32>} : memref<128x1024xf32, #tpu.memory_space<vmem>>, vector<32x64xf32>,
    %c5_411 = arith.constant 5 : index
    %c0_412 = arith.constant 0 : index
    %c1_413 = arith.constant 1 : index
    %c1_414 = arith.constant 1 : index
    %c0_415 = arith.constant 0 : index
    %306 = vector.load %arg13[%c5_411, %c0_412, %c1_413, %c1_414, %c0_415] : memref<16x2x6x6x64xf32, #tpu.memory_space<vmem>>, vector<1x2x4x4x64xf32>
    %307 = vector.shape_cast %306 : vector<1x2x4x4x64xf32> to vector<2x4x4x64xf32>
    %308 = vector.shape_cast %307 : vector<2x4x4x64xf32> to vector<32x64xf32>
    %c96 = arith.constant 96 : index
    %c0_416 = arith.constant 0 : index
    %309 = vector.load %arg15[%c96, %c0_416] : memref<128x1024xf32, #tpu.memory_space<vmem>>, vector<32x64xf32>
    tpu.vector_store %arg15[%c96, %c0_416], %308 {strides = array<i32>} : memref<128x1024xf32, #tpu.memory_space<vmem>>, vector<32x64xf32>,
    %c6_417 = arith.constant 6 : index
    %c0_418 = arith.constant 0 : index
    %c1_419 = arith.constant 1 : index
    %c1_420 = arith.constant 1 : index
    %c0_421 = arith.constant 0 : index
    %310 = vector.load %arg13[%c6_417, %c0_418, %c1_419, %c1_420, %c0_421] : memref<16x2x6x6x64xf32, #tpu.memory_space<vmem>>, vector<1x2x4x4x64xf32>
    %311 = vector.shape_cast %310 : vector<1x2x4x4x64xf32> to vector<2x4x4x64xf32>
    %312 = vector.shape_cast %311 : vector<2x4x4x64xf32> to vector<32x64xf32>
    %c96_422 = arith.constant 96 : index
    %c64_423 = arith.constant 64 : index
    %313 = vector.load %arg15[%c96_422, %c64_423] : memref<128x1024xf32, #tpu.memory_space<vmem>>, vector<32x64xf32>
    tpu.vector_store %arg15[%c96_422, %c64_423], %312 {strides = array<i32>} : memref<128x1024xf32, #tpu.memory_space<vmem>>, vector<32x64xf32>,
    %c7_424 = arith.constant 7 : index
    %c0_425 = arith.constant 0 : index
    %c1_426 = arith.constant 1 : index
    %c1_427 = arith.constant 1 : index
    %c0_428 = arith.constant 0 : index
    %314 = vector.load %arg13[%c7_424, %c0_425, %c1_426, %c1_427, %c0_428] : memref<16x2x6x6x64xf32, #tpu.memory_space<vmem>>, vector<1x2x4x4x64xf32>
    %315 = vector.shape_cast %314 : vector<1x2x4x4x64xf32> to vector<2x4x4x64xf32>
    %316 = vector.shape_cast %315 : vector<2x4x4x64xf32> to vector<32x64xf32>
    %c96_429 = arith.constant 96 : index
    %c128_430 = arith.constant 128 : index
    %317 = vector.load %arg15[%c96_429, %c128_430] : memref<128x1024xf32, #tpu.memory_space<vmem>>, vector<32x64xf32>
    tpu.vector_store %arg15[%c96_429, %c128_430], %316 {strides = array<i32>} : memref<128x1024xf32, #tpu.memory_space<vmem>>, vector<32x64xf32>,
    %c4_431 = arith.constant 4 : index
    %c0_432 = arith.constant 0 : index
    %c1_433 = arith.constant 1 : index
    %c2_434 = arith.constant 2 : index
    %c0_435 = arith.constant 0 : index
    %318 = vector.load %arg13[%c4_431, %c0_432, %c1_433, %c2_434, %c0_435] : memref<16x2x6x6x64xf32, #tpu.memory_space<vmem>>, vector<1x2x4x4x64xf32>
    %319 = vector.shape_cast %318 : vector<1x2x4x4x64xf32> to vector<2x4x4x64xf32>
    %320 = vector.shape_cast %319 : vector<2x4x4x64xf32> to vector<32x64xf32>
    %c96_436 = arith.constant 96 : index
    %c192_437 = arith.constant 192 : index
    %321 = vector.load %arg15[%c96_436, %c192_437] : memref<128x1024xf32, #tpu.memory_space<vmem>>, vector<32x64xf32>
    tpu.vector_store %arg15[%c96_436, %c192_437], %320 {strides = array<i32>} : memref<128x1024xf32, #tpu.memory_space<vmem>>, vector<32x64xf32>,
    %c9_438 = arith.constant 9 : index
    %c0_439 = arith.constant 0 : index
    %c1_440 = arith.constant 1 : index
    %c1_441 = arith.constant 1 : index
    %c0_442 = arith.constant 0 : index
    %322 = vector.load %arg13[%c9_438, %c0_439, %c1_440, %c1_441, %c0_442] : memref<16x2x6x6x64xf32, #tpu.memory_space<vmem>>, vector<1x2x4x4x64xf32>
    %323 = vector.shape_cast %322 : vector<1x2x4x4x64xf32> to vector<2x4x4x64xf32>
    %324 = vector.shape_cast %323 : vector<2x4x4x64xf32> to vector<32x64xf32>
    %c96_443 = arith.constant 96 : index
    %c256_444 = arith.constant 256 : index
    %325 = vector.load %arg15[%c96_443, %c256_444] : memref<128x1024xf32, #tpu.memory_space<vmem>>, vector<32x64xf32>
    tpu.vector_store %arg15[%c96_443, %c256_444], %324 {strides = array<i32>} : memref<128x1024xf32, #tpu.memory_space<vmem>>, vector<32x64xf32>,
    %c10_445 = arith.constant 10 : index
    %c0_446 = arith.constant 0 : index
    %c1_447 = arith.constant 1 : index
    %c1_448 = arith.constant 1 : index
    %c0_449 = arith.constant 0 : index
    %326 = vector.load %arg13[%c10_445, %c0_446, %c1_447, %c1_448, %c0_449] : memref<16x2x6x6x64xf32, #tpu.memory_space<vmem>>, vector<1x2x4x4x64xf32>
    %327 = vector.shape_cast %326 : vector<1x2x4x4x64xf32> to vector<2x4x4x64xf32>
    %328 = vector.shape_cast %327 : vector<2x4x4x64xf32> to vector<32x64xf32>
    %c96_450 = arith.constant 96 : index
    %c320_451 = arith.constant 320 : index
    %329 = vector.load %arg15[%c96_450, %c320_451] : memref<128x1024xf32, #tpu.memory_space<vmem>>, vector<32x64xf32>
    tpu.vector_store %arg15[%c96_450, %c320_451], %328 {strides = array<i32>} : memref<128x1024xf32, #tpu.memory_space<vmem>>, vector<32x64xf32>,
    %c11_452 = arith.constant 11 : index
    %c0_453 = arith.constant 0 : index
    %c1_454 = arith.constant 1 : index
    %c1_455 = arith.constant 1 : index
    %c0_456 = arith.constant 0 : index
    %330 = vector.load %arg13[%c11_452, %c0_453, %c1_454, %c1_455, %c0_456] : memref<16x2x6x6x64xf32, #tpu.memory_space<vmem>>, vector<1x2x4x4x64xf32>
    %331 = vector.shape_cast %330 : vector<1x2x4x4x64xf32> to vector<2x4x4x64xf32>
    %332 = vector.shape_cast %331 : vector<2x4x4x64xf32> to vector<32x64xf32>
    %c96_457 = arith.constant 96 : index
    %c384_458 = arith.constant 384 : index
    %333 = vector.load %arg15[%c96_457, %c384_458] : memref<128x1024xf32, #tpu.memory_space<vmem>>, vector<32x64xf32>
    tpu.vector_store %arg15[%c96_457, %c384_458], %332 {strides = array<i32>} : memref<128x1024xf32, #tpu.memory_space<vmem>>, vector<32x64xf32>,
    %c8_459 = arith.constant 8 : index
    %c0_460 = arith.constant 0 : index
    %c1_461 = arith.constant 1 : index
    %c2_462 = arith.constant 2 : index
    %c0_463 = arith.constant 0 : index
    %334 = vector.load %arg13[%c8_459, %c0_460, %c1_461, %c2_462, %c0_463] : memref<16x2x6x6x64xf32, #tpu.memory_space<vmem>>, vector<1x2x4x4x64xf32>
    %335 = vector.shape_cast %334 : vector<1x2x4x4x64xf32> to vector<2x4x4x64xf32>
    %336 = vector.shape_cast %335 : vector<2x4x4x64xf32> to vector<32x64xf32>
    %c96_464 = arith.constant 96 : index
    %c448_465 = arith.constant 448 : index
    %337 = vector.load %arg15[%c96_464, %c448_465] : memref<128x1024xf32, #tpu.memory_space<vmem>>, vector<32x64xf32>
    tpu.vector_store %arg15[%c96_464, %c448_465], %336 {strides = array<i32>} : memref<128x1024xf32, #tpu.memory_space<vmem>>, vector<32x64xf32>,
    %c13_466 = arith.constant 13 : index
    %c0_467 = arith.constant 0 : index
    %c1_468 = arith.constant 1 : index
    %c1_469 = arith.constant 1 : index
    %c0_470 = arith.constant 0 : index
    %338 = vector.load %arg13[%c13_466, %c0_467, %c1_468, %c1_469, %c0_470] : memref<16x2x6x6x64xf32, #tpu.memory_space<vmem>>, vector<1x2x4x4x64xf32>
    %339 = vector.shape_cast %338 : vector<1x2x4x4x64xf32> to vector<2x4x4x64xf32>
    %340 = vector.shape_cast %339 : vector<2x4x4x64xf32> to vector<32x64xf32>
    %c96_471 = arith.constant 96 : index
    %c512_472 = arith.constant 512 : index
    %341 = vector.load %arg15[%c96_471, %c512_472] : memref<128x1024xf32, #tpu.memory_space<vmem>>, vector<32x64xf32>
    tpu.vector_store %arg15[%c96_471, %c512_472], %340 {strides = array<i32>} : memref<128x1024xf32, #tpu.memory_space<vmem>>, vector<32x64xf32>,
    %c14_473 = arith.constant 14 : index
    %c0_474 = arith.constant 0 : index
    %c1_475 = arith.constant 1 : index
    %c1_476 = arith.constant 1 : index
    %c0_477 = arith.constant 0 : index
    %342 = vector.load %arg13[%c14_473, %c0_474, %c1_475, %c1_476, %c0_477] : memref<16x2x6x6x64xf32, #tpu.memory_space<vmem>>, vector<1x2x4x4x64xf32>
    %343 = vector.shape_cast %342 : vector<1x2x4x4x64xf32> to vector<2x4x4x64xf32>
    %344 = vector.shape_cast %343 : vector<2x4x4x64xf32> to vector<32x64xf32>
    %c96_478 = arith.constant 96 : index
    %c576_479 = arith.constant 576 : index
    %345 = vector.load %arg15[%c96_478, %c576_479] : memref<128x1024xf32, #tpu.memory_space<vmem>>, vector<32x64xf32>
    tpu.vector_store %arg15[%c96_478, %c576_479], %344 {strides = array<i32>} : memref<128x1024xf32, #tpu.memory_space<vmem>>, vector<32x64xf32>,
    %c15_480 = arith.constant 15 : index
    %c0_481 = arith.constant 0 : index
    %c1_482 = arith.constant 1 : index
    %c1_483 = arith.constant 1 : index
    %c0_484 = arith.constant 0 : index
    %346 = vector.load %arg13[%c15_480, %c0_481, %c1_482, %c1_483, %c0_484] : memref<16x2x6x6x64xf32, #tpu.memory_space<vmem>>, vector<1x2x4x4x64xf32>
    %347 = vector.shape_cast %346 : vector<1x2x4x4x64xf32> to vector<2x4x4x64xf32>
    %348 = vector.shape_cast %347 : vector<2x4x4x64xf32> to vector<32x64xf32>
    %c96_485 = arith.constant 96 : index
    %c640_486 = arith.constant 640 : index
    %349 = vector.load %arg15[%c96_485, %c640_486] : memref<128x1024xf32, #tpu.memory_space<vmem>>, vector<32x64xf32>
    tpu.vector_store %arg15[%c96_485, %c640_486], %348 {strides = array<i32>} : memref<128x1024xf32, #tpu.memory_space<vmem>>, vector<32x64xf32>,
    %c12_487 = arith.constant 12 : index
    %c0_488 = arith.constant 0 : index
    %c1_489 = arith.constant 1 : index
    %c2_490 = arith.constant 2 : index
    %c0_491 = arith.constant 0 : index
    %350 = vector.load %arg13[%c12_487, %c0_488, %c1_489, %c2_490, %c0_491] : memref<16x2x6x6x64xf32, #tpu.memory_space<vmem>>, vector<1x2x4x4x64xf32>
    %351 = vector.shape_cast %350 : vector<1x2x4x4x64xf32> to vector<2x4x4x64xf32>
    %352 = vector.shape_cast %351 : vector<2x4x4x64xf32> to vector<32x64xf32>
    %c96_492 = arith.constant 96 : index
    %c704_493 = arith.constant 704 : index
    %353 = vector.load %arg15[%c96_492, %c704_493] : memref<128x1024xf32, #tpu.memory_space<vmem>>, vector<32x64xf32>
    tpu.vector_store %arg15[%c96_492, %c704_493], %352 {strides = array<i32>} : memref<128x1024xf32, #tpu.memory_space<vmem>>, vector<32x64xf32>,
    %c1_494 = arith.constant 1 : index
    %c0_495 = arith.constant 0 : index
    %c2_496 = arith.constant 2 : index
    %c1_497 = arith.constant 1 : index
    %c0_498 = arith.constant 0 : index
    %354 = vector.load %arg13[%c1_494, %c0_495, %c2_496, %c1_497, %c0_498] : memref<16x2x6x6x64xf32, #tpu.memory_space<vmem>>, vector<1x2x4x4x64xf32>
    %355 = vector.shape_cast %354 : vector<1x2x4x4x64xf32> to vector<2x4x4x64xf32>
    %356 = vector.shape_cast %355 : vector<2x4x4x64xf32> to vector<32x64xf32>
    %c96_499 = arith.constant 96 : index
    %c768_500 = arith.constant 768 : index
    %357 = vector.load %arg15[%c96_499, %c768_500] : memref<128x1024xf32, #tpu.memory_space<vmem>>, vector<32x64xf32>
    tpu.vector_store %arg15[%c96_499, %c768_500], %356 {strides = array<i32>} : memref<128x1024xf32, #tpu.memory_space<vmem>>, vector<32x64xf32>,
    %c2_501 = arith.constant 2 : index
    %c0_502 = arith.constant 0 : index
    %c2_503 = arith.constant 2 : index
    %c1_504 = arith.constant 1 : index
    %c0_505 = arith.constant 0 : index
    %358 = vector.load %arg13[%c2_501, %c0_502, %c2_503, %c1_504, %c0_505] : memref<16x2x6x6x64xf32, #tpu.memory_space<vmem>>, vector<1x2x4x4x64xf32>
    %359 = vector.shape_cast %358 : vector<1x2x4x4x64xf32> to vector<2x4x4x64xf32>
    %360 = vector.shape_cast %359 : vector<2x4x4x64xf32> to vector<32x64xf32>
    %c96_506 = arith.constant 96 : index
    %c832_507 = arith.constant 832 : index
    %361 = vector.load %arg15[%c96_506, %c832_507] : memref<128x1024xf32, #tpu.memory_space<vmem>>, vector<32x64xf32>
    tpu.vector_store %arg15[%c96_506, %c832_507], %360 {strides = array<i32>} : memref<128x1024xf32, #tpu.memory_space<vmem>>, vector<32x64xf32>,
    %c3_508 = arith.constant 3 : index
    %c0_509 = arith.constant 0 : index
    %c2_510 = arith.constant 2 : index
    %c1_511 = arith.constant 1 : index
    %c0_512 = arith.constant 0 : index
    %362 = vector.load %arg13[%c3_508, %c0_509, %c2_510, %c1_511, %c0_512] : memref<16x2x6x6x64xf32, #tpu.memory_space<vmem>>, vector<1x2x4x4x64xf32>
    %363 = vector.shape_cast %362 : vector<1x2x4x4x64xf32> to vector<2x4x4x64xf32>
    %364 = vector.shape_cast %363 : vector<2x4x4x64xf32> to vector<32x64xf32>
    %c96_513 = arith.constant 96 : index
    %c896_514 = arith.constant 896 : index
    %365 = vector.load %arg15[%c96_513, %c896_514] : memref<128x1024xf32, #tpu.memory_space<vmem>>, vector<32x64xf32>
    tpu.vector_store %arg15[%c96_513, %c896_514], %364 {strides = array<i32>} : memref<128x1024xf32, #tpu.memory_space<vmem>>, vector<32x64xf32>,
    %c0_515 = arith.constant 0 : index
    %c0_516 = arith.constant 0 : index
    %c2_517 = arith.constant 2 : index
    %c2_518 = arith.constant 2 : index
    %c0_519 = arith.constant 0 : index
    %366 = vector.load %arg13[%c0_515, %c0_516, %c2_517, %c2_518, %c0_519] : memref<16x2x6x6x64xf32, #tpu.memory_space<vmem>>, vector<1x2x4x4x64xf32>
    %367 = vector.shape_cast %366 : vector<1x2x4x4x64xf32> to vector<2x4x4x64xf32>
    %368 = vector.shape_cast %367 : vector<2x4x4x64xf32> to vector<32x64xf32>
    %c96_520 = arith.constant 96 : index
    %c960_521 = arith.constant 960 : index
    %369 = vector.load %arg15[%c96_520, %c960_521] : memref<128x1024xf32, #tpu.memory_space<vmem>>, vector<32x64xf32>
    tpu.vector_store %arg15[%c96_520, %c960_521], %368 {strides = array<i32>} : memref<128x1024xf32, #tpu.memory_space<vmem>>, vector<32x64xf32>,
    %c0_522 = arith.constant 0 : index
    %c0_523 = arith.constant 0 : index
    %370 = vector.load %arg15[%c0_522, %c0_523] : memref<128x1024xf32, #tpu.memory_space<vmem>>, vector<128x1024xf32>
    %371 = arith.truncf %370 : vector<128x1024xf32> to vector<128x1024xbf16>
    %c0_524 = arith.constant 0 : index
    %c0_525 = arith.constant 0 : index
    %372 = vector.load %arg4[%c0_524, %c0_525] : memref<1024x128xbf16, #tpu.memory_space<vmem>>, vector<1024x128xbf16>
    %cst_526 = arith.constant dense<0.000000e+00> : vector<128x128xf32>
    %373 = tpu.matmul %371, %372, %cst_526 {dimension_numbers = #tpu.dot_dimension_numbers<[1], [0], [0], [1], [0, 0, 1, 1], [], []>} : vector<128x1024xbf16>, vector<1024x128xbf16>, vector<128x128xf32> -> vector<128x128xf32>
    %c0_527 = arith.constant 0 : index
    %c0_528 = arith.constant 0 : index
    %374 = vector.load %arg5[%c0_527, %c0_528] : memref<1x128xf32, #tpu.memory_space<vmem>>, vector<1x128xf32>
    %c0_529 = arith.constant 0 : index
    %c0_530 = arith.constant 0 : index
    %375 = vector.load %arg6[%c0_529, %c0_530] : memref<1x128xf32, #tpu.memory_space<vmem>>, vector<1x128xf32>
    %cst_531 = arith.constant dense<0.000000e+00> : vector<128xf32>
    %376 = vector.multi_reduction <add>, %373, %cst_531 [0] : vector<128x128xf32> to vector<128xf32>
    %377 = vector.shape_cast %376 : vector<128xf32> to vector<1x128xf32>
    %cst_532 = arith.constant 1.280000e+02 : f32
    %378 = vector.broadcast %cst_532 : f32 to vector<1x128xf32>
    %379 = arith.divf %377, %378 : vector<1x128xf32>
    %380 = vector.broadcast %379 : vector<1x128xf32> to vector<128x128xf32>
    %381 = arith.subf %373, %380 : vector<128x128xf32>
    %382 = arith.mulf %381, %381 : vector<128x128xf32>
    %cst_533 = arith.constant dense<0.000000e+00> : vector<128xf32>
    %383 = vector.multi_reduction <add>, %382, %cst_533 [0] : vector<128x128xf32> to vector<128xf32>
    %384 = vector.shape_cast %383 : vector<128xf32> to vector<1x128xf32>
    %cst_534 = arith.constant 1.280000e+02 : f32
    %385 = vector.broadcast %cst_534 : f32 to vector<1x128xf32>
    %386 = arith.divf %384, %385 : vector<1x128xf32>
    %387 = vector.broadcast %374 : vector<1x128xf32> to vector<128x128xf32>
    %388 = arith.mulf %387, %381 : vector<128x128xf32>
    %cst_535 = arith.constant 9.99999974E-6 : f32
    %389 = vector.broadcast %cst_535 : f32 to vector<1x128xf32>
    %390 = arith.addf %386, %389 : vector<1x128xf32>
    %391 = math.rsqrt %390 : vector<1x128xf32>
    %392 = vector.broadcast %391 : vector<1x128xf32> to vector<128x128xf32>
    %393 = arith.mulf %388, %392 : vector<128x128xf32>
    %394 = vector.broadcast %375 : vector<1x128xf32> to vector<128x128xf32>
    %395 = arith.addf %393, %394 : vector<128x128xf32>
    %cst_536 = arith.constant 0.000000e+00 : f32
    %396 = vector.broadcast %cst_536 : f32 to vector<128x128xf32>
    %397 = arith.cmpf oge, %395, %396 : vector<128x128xf32>
    %cst_537 = arith.constant 2.000000e-01 : f32
    %398 = vector.broadcast %cst_537 : f32 to vector<128x128xf32>
    %399 = arith.mulf %398, %395 : vector<128x128xf32>
    %400 = arith.select %397, %395, %399 : vector<128x128xi1>, vector<128x128xf32>
    %401 = vector.extract_strided_slice %400 {offsets = [0, 0], sizes = [32, 128], strides = [1, 1]} : vector<128x128xf32> to vector<32x128xf32>
    %402 = vector.shape_cast %401 : vector<32x128xf32> to vector<2x4x4x128xf32>
    %c0_538 = arith.constant 0 : index
    %c0_539 = arith.constant 0 : index
    %c1_540 = arith.constant 1 : index
    %c1_541 = arith.constant 1 : index
    %c0_542 = arith.constant 0 : index
    %403 = vector.load %arg14[%c0_538, %c0_539, %c1_540, %c1_541, %c0_542] : memref<4x2x6x6x128xf32, #tpu.memory_space<vmem>>, vector<1x2x4x4x128xf32>
    %404 = vector.shape_cast %403 : vector<1x2x4x4x128xf32> to vector<2x4x4x128xf32>
    %405 = vector.shape_cast %402 : vector<2x4x4x128xf32> to vector<1x2x4x4x128xf32>
    tpu.vector_store %arg14[%c0_538, %c0_539, %c1_540, %c1_541, %c0_542], %405 {strides = array<i32>} : memref<4x2x6x6x128xf32, #tpu.memory_space<vmem>>, vector<1x2x4x4x128xf32>,
    %406 = vector.extract_strided_slice %400 {offsets = [32, 0], sizes = [32, 128], strides = [1, 1]} : vector<128x128xf32> to vector<32x128xf32>
    %407 = vector.shape_cast %406 : vector<32x128xf32> to vector<2x4x4x128xf32>
    %c1_543 = arith.constant 1 : index
    %c0_544 = arith.constant 0 : index
    %c1_545 = arith.constant 1 : index
    %c1_546 = arith.constant 1 : index
    %c0_547 = arith.constant 0 : index
    %408 = vector.load %arg14[%c1_543, %c0_544, %c1_545, %c1_546, %c0_547] : memref<4x2x6x6x128xf32, #tpu.memory_space<vmem>>, vector<1x2x4x4x128xf32>
    %409 = vector.shape_cast %408 : vector<1x2x4x4x128xf32> to vector<2x4x4x128xf32>
    %410 = vector.shape_cast %407 : vector<2x4x4x128xf32> to vector<1x2x4x4x128xf32>
    tpu.vector_store %arg14[%c1_543, %c0_544, %c1_545, %c1_546, %c0_547], %410 {strides = array<i32>} : memref<4x2x6x6x128xf32, #tpu.memory_space<vmem>>, vector<1x2x4x4x128xf32>,
    %411 = vector.extract_strided_slice %400 {offsets = [64, 0], sizes = [32, 128], strides = [1, 1]} : vector<128x128xf32> to vector<32x128xf32>
    %412 = vector.shape_cast %411 : vector<32x128xf32> to vector<2x4x4x128xf32>
    %c2_548 = arith.constant 2 : index
    %c0_549 = arith.constant 0 : index
    %c1_550 = arith.constant 1 : index
    %c1_551 = arith.constant 1 : index
    %c0_552 = arith.constant 0 : index
    %413 = vector.load %arg14[%c2_548, %c0_549, %c1_550, %c1_551, %c0_552] : memref<4x2x6x6x128xf32, #tpu.memory_space<vmem>>, vector<1x2x4x4x128xf32>
    %414 = vector.shape_cast %413 : vector<1x2x4x4x128xf32> to vector<2x4x4x128xf32>
    %415 = vector.shape_cast %412 : vector<2x4x4x128xf32> to vector<1x2x4x4x128xf32>
    tpu.vector_store %arg14[%c2_548, %c0_549, %c1_550, %c1_551, %c0_552], %415 {strides = array<i32>} : memref<4x2x6x6x128xf32, #tpu.memory_space<vmem>>, vector<1x2x4x4x128xf32>,
    %416 = vector.extract_strided_slice %400 {offsets = [96, 0], sizes = [32, 128], strides = [1, 1]} : vector<128x128xf32> to vector<32x128xf32>
    %417 = vector.shape_cast %416 : vector<32x128xf32> to vector<2x4x4x128xf32>
    %c3_553 = arith.constant 3 : index
    %c0_554 = arith.constant 0 : index
    %c1_555 = arith.constant 1 : index
    %c1_556 = arith.constant 1 : index
    %c0_557 = arith.constant 0 : index
    %418 = vector.load %arg14[%c3_553, %c0_554, %c1_555, %c1_556, %c0_557] : memref<4x2x6x6x128xf32, #tpu.memory_space<vmem>>, vector<1x2x4x4x128xf32>
    %419 = vector.shape_cast %418 : vector<1x2x4x4x128xf32> to vector<2x4x4x128xf32>
    %420 = vector.shape_cast %417 : vector<2x4x4x128xf32> to vector<1x2x4x4x128xf32>
    tpu.vector_store %arg14[%c3_553, %c0_554, %c1_555, %c1_556, %c0_557], %420 {strides = array<i32>} : memref<4x2x6x6x128xf32, #tpu.memory_space<vmem>>, vector<1x2x4x4x128xf32>,
    %c3_558 = arith.constant 3 : index
    %c0_559 = arith.constant 0 : index
    %c0_560 = arith.constant 0 : index
    %c0_561 = arith.constant 0 : index
    %c0_562 = arith.constant 0 : index
    %421 = vector.load %arg14[%c3_558, %c0_559, %c0_560, %c0_561, %c0_562] : memref<4x2x6x6x128xf32, #tpu.memory_space<vmem>>, vector<1x2x4x4x128xf32>
    %422 = vector.shape_cast %421 : vector<1x2x4x4x128xf32> to vector<2x4x4x128xf32>
    %423 = vector.shape_cast %422 : vector<2x4x4x128xf32> to vector<32x128xf32>
    %c0_563 = arith.constant 0 : index
    %c0_564 = arith.constant 0 : index
    %424 = vector.load %arg16[%c0_563, %c0_564] : memref<32x2048xf32, #tpu.memory_space<vmem>>, vector<32x128xf32>
    tpu.vector_store %arg16[%c0_563, %c0_564], %423 {strides = array<i32>} : memref<32x2048xf32, #tpu.memory_space<vmem>>, vector<32x128xf32>,
    %c2_565 = arith.constant 2 : index
    %c0_566 = arith.constant 0 : index
    %c0_567 = arith.constant 0 : index
    %c1_568 = arith.constant 1 : index
    %c0_569 = arith.constant 0 : index
    %425 = vector.load %arg14[%c2_565, %c0_566, %c0_567, %c1_568, %c0_569] : memref<4x2x6x6x128xf32, #tpu.memory_space<vmem>>, vector<1x2x4x4x128xf32>
    %426 = vector.shape_cast %425 : vector<1x2x4x4x128xf32> to vector<2x4x4x128xf32>
    %427 = vector.shape_cast %426 : vector<2x4x4x128xf32> to vector<32x128xf32>
    %c0_570 = arith.constant 0 : index
    %c128_571 = arith.constant 128 : index
    %428 = vector.load %arg16[%c0_570, %c128_571] : memref<32x2048xf32, #tpu.memory_space<vmem>>, vector<32x128xf32>
    tpu.vector_store %arg16[%c0_570, %c128_571], %427 {strides = array<i32>} : memref<32x2048xf32, #tpu.memory_space<vmem>>, vector<32x128xf32>,
    %c3_572 = arith.constant 3 : index
    %c0_573 = arith.constant 0 : index
    %c0_574 = arith.constant 0 : index
    %c1_575 = arith.constant 1 : index
    %c0_576 = arith.constant 0 : index
    %429 = vector.load %arg14[%c3_572, %c0_573, %c0_574, %c1_575, %c0_576] : memref<4x2x6x6x128xf32, #tpu.memory_space<vmem>>, vector<1x2x4x4x128xf32>
    %430 = vector.shape_cast %429 : vector<1x2x4x4x128xf32> to vector<2x4x4x128xf32>
    %431 = vector.shape_cast %430 : vector<2x4x4x128xf32> to vector<32x128xf32>
    %c0_577 = arith.constant 0 : index
    %c256_578 = arith.constant 256 : index
    %432 = vector.load %arg16[%c0_577, %c256_578] : memref<32x2048xf32, #tpu.memory_space<vmem>>, vector<32x128xf32>
    tpu.vector_store %arg16[%c0_577, %c256_578], %431 {strides = array<i32>} : memref<32x2048xf32, #tpu.memory_space<vmem>>, vector<32x128xf32>,
    %c2_579 = arith.constant 2 : index
    %c0_580 = arith.constant 0 : index
    %c0_581 = arith.constant 0 : index
    %c2_582 = arith.constant 2 : index
    %c0_583 = arith.constant 0 : index
    %433 = vector.load %arg14[%c2_579, %c0_580, %c0_581, %c2_582, %c0_583] : memref<4x2x6x6x128xf32, #tpu.memory_space<vmem>>, vector<1x2x4x4x128xf32>
    %434 = vector.shape_cast %433 : vector<1x2x4x4x128xf32> to vector<2x4x4x128xf32>
    %435 = vector.shape_cast %434 : vector<2x4x4x128xf32> to vector<32x128xf32>
    %c0_584 = arith.constant 0 : index
    %c384_585 = arith.constant 384 : index
    %436 = vector.load %arg16[%c0_584, %c384_585] : memref<32x2048xf32, #tpu.memory_space<vmem>>, vector<32x128xf32>
    tpu.vector_store %arg16[%c0_584, %c384_585], %435 {strides = array<i32>} : memref<32x2048xf32, #tpu.memory_space<vmem>>, vector<32x128xf32>,
    %c1_586 = arith.constant 1 : index
    %c0_587 = arith.constant 0 : index
    %c1_588 = arith.constant 1 : index
    %c0_589 = arith.constant 0 : index
    %c0_590 = arith.constant 0 : index
    %437 = vector.load %arg14[%c1_586, %c0_587, %c1_588, %c0_589, %c0_590] : memref<4x2x6x6x128xf32, #tpu.memory_space<vmem>>, vector<1x2x4x4x128xf32>
    %438 = vector.shape_cast %437 : vector<1x2x4x4x128xf32> to vector<2x4x4x128xf32>
    %439 = vector.shape_cast %438 : vector<2x4x4x128xf32> to vector<32x128xf32>
    %c0_591 = arith.constant 0 : index
    %c512_592 = arith.constant 512 : index
    %440 = vector.load %arg16[%c0_591, %c512_592] : memref<32x2048xf32, #tpu.memory_space<vmem>>, vector<32x128xf32>
    tpu.vector_store %arg16[%c0_591, %c512_592], %439 {strides = array<i32>} : memref<32x2048xf32, #tpu.memory_space<vmem>>, vector<32x128xf32>,
    %c0_593 = arith.constant 0 : index
    %c0_594 = arith.constant 0 : index
    %c1_595 = arith.constant 1 : index
    %c1_596 = arith.constant 1 : index
    %c0_597 = arith.constant 0 : index
    %441 = vector.load %arg14[%c0_593, %c0_594, %c1_595, %c1_596, %c0_597] : memref<4x2x6x6x128xf32, #tpu.memory_space<vmem>>, vector<1x2x4x4x128xf32>
    %442 = vector.shape_cast %441 : vector<1x2x4x4x128xf32> to vector<2x4x4x128xf32>
    %443 = vector.shape_cast %442 : vector<2x4x4x128xf32> to vector<32x128xf32>
    %c0_598 = arith.constant 0 : index
    %c640_599 = arith.constant 640 : index
    %444 = vector.load %arg16[%c0_598, %c640_599] : memref<32x2048xf32, #tpu.memory_space<vmem>>, vector<32x128xf32>
    tpu.vector_store %arg16[%c0_598, %c640_599], %443 {strides = array<i32>} : memref<32x2048xf32, #tpu.memory_space<vmem>>, vector<32x128xf32>,
    %c1_600 = arith.constant 1 : index
    %c0_601 = arith.constant 0 : index
    %c1_602 = arith.constant 1 : index
    %c1_603 = arith.constant 1 : index
    %c0_604 = arith.constant 0 : index
    %445 = vector.load %arg14[%c1_600, %c0_601, %c1_602, %c1_603, %c0_604] : memref<4x2x6x6x128xf32, #tpu.memory_space<vmem>>, vector<1x2x4x4x128xf32>
    %446 = vector.shape_cast %445 : vector<1x2x4x4x128xf32> to vector<2x4x4x128xf32>
    %447 = vector.shape_cast %446 : vector<2x4x4x128xf32> to vector<32x128xf32>
    %c0_605 = arith.constant 0 : index
    %c768_606 = arith.constant 768 : index
    %448 = vector.load %arg16[%c0_605, %c768_606] : memref<32x2048xf32, #tpu.memory_space<vmem>>, vector<32x128xf32>
    tpu.vector_store %arg16[%c0_605, %c768_606], %447 {strides = array<i32>} : memref<32x2048xf32, #tpu.memory_space<vmem>>, vector<32x128xf32>,
    %c0_607 = arith.constant 0 : index
    %c0_608 = arith.constant 0 : index
    %c1_609 = arith.constant 1 : index
    %c2_610 = arith.constant 2 : index
    %c0_611 = arith.constant 0 : index
    %449 = vector.load %arg14[%c0_607, %c0_608, %c1_609, %c2_610, %c0_611] : memref<4x2x6x6x128xf32, #tpu.memory_space<vmem>>, vector<1x2x4x4x128xf32>
    %450 = vector.shape_cast %449 : vector<1x2x4x4x128xf32> to vector<2x4x4x128xf32>
    %451 = vector.shape_cast %450 : vector<2x4x4x128xf32> to vector<32x128xf32>
    %c0_612 = arith.constant 0 : index
    %c896_613 = arith.constant 896 : index
    %452 = vector.load %arg16[%c0_612, %c896_613] : memref<32x2048xf32, #tpu.memory_space<vmem>>, vector<32x128xf32>
    tpu.vector_store %arg16[%c0_612, %c896_613], %451 {strides = array<i32>} : memref<32x2048xf32, #tpu.memory_space<vmem>>, vector<32x128xf32>,
    %c3_614 = arith.constant 3 : index
    %c0_615 = arith.constant 0 : index
    %c1_616 = arith.constant 1 : index
    %c0_617 = arith.constant 0 : index
    %c0_618 = arith.constant 0 : index
    %453 = vector.load %arg14[%c3_614, %c0_615, %c1_616, %c0_617, %c0_618] : memref<4x2x6x6x128xf32, #tpu.memory_space<vmem>>, vector<1x2x4x4x128xf32>
    %454 = vector.shape_cast %453 : vector<1x2x4x4x128xf32> to vector<2x4x4x128xf32>
    %455 = vector.shape_cast %454 : vector<2x4x4x128xf32> to vector<32x128xf32>
    %c0_619 = arith.constant 0 : index
    %c1024 = arith.constant 1024 : index
    %456 = vector.load %arg16[%c0_619, %c1024] : memref<32x2048xf32, #tpu.memory_space<vmem>>, vector<32x128xf32>
    tpu.vector_store %arg16[%c0_619, %c1024], %455 {strides = array<i32>} : memref<32x2048xf32, #tpu.memory_space<vmem>>, vector<32x128xf32>,
    %c2_620 = arith.constant 2 : index
    %c0_621 = arith.constant 0 : index
    %c1_622 = arith.constant 1 : index
    %c1_623 = arith.constant 1 : index
    %c0_624 = arith.constant 0 : index
    %457 = vector.load %arg14[%c2_620, %c0_621, %c1_622, %c1_623, %c0_624] : memref<4x2x6x6x128xf32, #tpu.memory_space<vmem>>, vector<1x2x4x4x128xf32>
    %458 = vector.shape_cast %457 : vector<1x2x4x4x128xf32> to vector<2x4x4x128xf32>
    %459 = vector.shape_cast %458 : vector<2x4x4x128xf32> to vector<32x128xf32>
    %c0_625 = arith.constant 0 : index
    %c1152 = arith.constant 1152 : index
    %460 = vector.load %arg16[%c0_625, %c1152] : memref<32x2048xf32, #tpu.memory_space<vmem>>, vector<32x128xf32>
    tpu.vector_store %arg16[%c0_625, %c1152], %459 {strides = array<i32>} : memref<32x2048xf32, #tpu.memory_space<vmem>>, vector<32x128xf32>,
    %c3_626 = arith.constant 3 : index
    %c0_627 = arith.constant 0 : index
    %c1_628 = arith.constant 1 : index
    %c1_629 = arith.constant 1 : index
    %c0_630 = arith.constant 0 : index
    %461 = vector.load %arg14[%c3_626, %c0_627, %c1_628, %c1_629, %c0_630] : memref<4x2x6x6x128xf32, #tpu.memory_space<vmem>>, vector<1x2x4x4x128xf32>
    %462 = vector.shape_cast %461 : vector<1x2x4x4x128xf32> to vector<2x4x4x128xf32>
    %463 = vector.shape_cast %462 : vector<2x4x4x128xf32> to vector<32x128xf32>
    %c0_631 = arith.constant 0 : index
    %c1280 = arith.constant 1280 : index
    %464 = vector.load %arg16[%c0_631, %c1280] : memref<32x2048xf32, #tpu.memory_space<vmem>>, vector<32x128xf32>
    tpu.vector_store %arg16[%c0_631, %c1280], %463 {strides = array<i32>} : memref<32x2048xf32, #tpu.memory_space<vmem>>, vector<32x128xf32>,
    %c2_632 = arith.constant 2 : index
    %c0_633 = arith.constant 0 : index
    %c1_634 = arith.constant 1 : index
    %c2_635 = arith.constant 2 : index
    %c0_636 = arith.constant 0 : index
    %465 = vector.load %arg14[%c2_632, %c0_633, %c1_634, %c2_635, %c0_636] : memref<4x2x6x6x128xf32, #tpu.memory_space<vmem>>, vector<1x2x4x4x128xf32>
    %466 = vector.shape_cast %465 : vector<1x2x4x4x128xf32> to vector<2x4x4x128xf32>
    %467 = vector.shape_cast %466 : vector<2x4x4x128xf32> to vector<32x128xf32>
    %c0_637 = arith.constant 0 : index
    %c1408 = arith.constant 1408 : index
    %468 = vector.load %arg16[%c0_637, %c1408] : memref<32x2048xf32, #tpu.memory_space<vmem>>, vector<32x128xf32>
    tpu.vector_store %arg16[%c0_637, %c1408], %467 {strides = array<i32>} : memref<32x2048xf32, #tpu.memory_space<vmem>>, vector<32x128xf32>,
    %c1_638 = arith.constant 1 : index
    %c0_639 = arith.constant 0 : index
    %c2_640 = arith.constant 2 : index
    %c0_641 = arith.constant 0 : index
    %c0_642 = arith.constant 0 : index
    %469 = vector.load %arg14[%c1_638, %c0_639, %c2_640, %c0_641, %c0_642] : memref<4x2x6x6x128xf32, #tpu.memory_space<vmem>>, vector<1x2x4x4x128xf32>
    %470 = vector.shape_cast %469 : vector<1x2x4x4x128xf32> to vector<2x4x4x128xf32>
    %471 = vector.shape_cast %470 : vector<2x4x4x128xf32> to vector<32x128xf32>
    %c0_643 = arith.constant 0 : index
    %c1536 = arith.constant 1536 : index
    %472 = vector.load %arg16[%c0_643, %c1536] : memref<32x2048xf32, #tpu.memory_space<vmem>>, vector<32x128xf32>
    tpu.vector_store %arg16[%c0_643, %c1536], %471 {strides = array<i32>} : memref<32x2048xf32, #tpu.memory_space<vmem>>, vector<32x128xf32>,
    %c0_644 = arith.constant 0 : index
    %c0_645 = arith.constant 0 : index
    %c2_646 = arith.constant 2 : index
    %c1_647 = arith.constant 1 : index
    %c0_648 = arith.constant 0 : index
    %473 = vector.load %arg14[%c0_644, %c0_645, %c2_646, %c1_647, %c0_648] : memref<4x2x6x6x128xf32, #tpu.memory_space<vmem>>, vector<1x2x4x4x128xf32>
    %474 = vector.shape_cast %473 : vector<1x2x4x4x128xf32> to vector<2x4x4x128xf32>
    %475 = vector.shape_cast %474 : vector<2x4x4x128xf32> to vector<32x128xf32>
    %c0_649 = arith.constant 0 : index
    %c1664 = arith.constant 1664 : index
    %476 = vector.load %arg16[%c0_649, %c1664] : memref<32x2048xf32, #tpu.memory_space<vmem>>, vector<32x128xf32>
    tpu.vector_store %arg16[%c0_649, %c1664], %475 {strides = array<i32>} : memref<32x2048xf32, #tpu.memory_space<vmem>>, vector<32x128xf32>,
    %c1_650 = arith.constant 1 : index
    %c0_651 = arith.constant 0 : index
    %c2_652 = arith.constant 2 : index
    %c1_653 = arith.constant 1 : index
    %c0_654 = arith.constant 0 : index
    %477 = vector.load %arg14[%c1_650, %c0_651, %c2_652, %c1_653, %c0_654] : memref<4x2x6x6x128xf32, #tpu.memory_space<vmem>>, vector<1x2x4x4x128xf32>
    %478 = vector.shape_cast %477 : vector<1x2x4x4x128xf32> to vector<2x4x4x128xf32>
    %479 = vector.shape_cast %478 : vector<2x4x4x128xf32> to vector<32x128xf32>
    %c0_655 = arith.constant 0 : index
    %c1792 = arith.constant 1792 : index
    %480 = vector.load %arg16[%c0_655, %c1792] : memref<32x2048xf32, #tpu.memory_space<vmem>>, vector<32x128xf32>
    tpu.vector_store %arg16[%c0_655, %c1792], %479 {strides = array<i32>} : memref<32x2048xf32, #tpu.memory_space<vmem>>, vector<32x128xf32>,
    %c0_656 = arith.constant 0 : index
    %c0_657 = arith.constant 0 : index
    %c2_658 = arith.constant 2 : index
    %c2_659 = arith.constant 2 : index
    %c0_660 = arith.constant 0 : index
    %481 = vector.load %arg14[%c0_656, %c0_657, %c2_658, %c2_659, %c0_660] : memref<4x2x6x6x128xf32, #tpu.memory_space<vmem>>, vector<1x2x4x4x128xf32>
    %482 = vector.shape_cast %481 : vector<1x2x4x4x128xf32> to vector<2x4x4x128xf32>
    %483 = vector.shape_cast %482 : vector<2x4x4x128xf32> to vector<32x128xf32>
    %c0_661 = arith.constant 0 : index
    %c1920 = arith.constant 1920 : index
    %484 = vector.load %arg16[%c0_661, %c1920] : memref<32x2048xf32, #tpu.memory_space<vmem>>, vector<32x128xf32>
    tpu.vector_store %arg16[%c0_661, %c1920], %483 {strides = array<i32>} : memref<32x2048xf32, #tpu.memory_space<vmem>>, vector<32x128xf32>,
    tpu.wait_dma2 semaphore(%arg18 : memref<!tpu.dma_semaphore, #tpu.memory_space<semaphore_mem>>) src(%arg7 : memref<2048x256xbf16, #tpu.memory_space<any>>) dst(%arg17 : memref<2048x256xbf16, #tpu.memory_space<vmem>>)
    %c0_662 = arith.constant 0 : index
    %c0_663 = arith.constant 0 : index
    %485 = vector.load %arg16[%c0_662, %c0_663] : memref<32x2048xf32, #tpu.memory_space<vmem>>, vector<32x2048xf32>
    %486 = arith.truncf %485 : vector<32x2048xf32> to vector<32x2048xbf16>
    %c0_664 = arith.constant 0 : index
    %c0_665 = arith.constant 0 : index
    %487 = vector.load %arg17[%c0_664, %c0_665] : memref<2048x256xbf16, #tpu.memory_space<vmem>>, vector<2048x256xbf16>
    %cst_666 = arith.constant dense<0.000000e+00> : vector<32x256xf32>
    %488 = tpu.matmul %486, %487, %cst_666 {dimension_numbers = #tpu.dot_dimension_numbers<[1], [0], [0], [1], [0, 0, 1, 1], [], []>} : vector<32x2048xbf16>, vector<2048x256xbf16>, vector<32x256xf32> -> vector<32x256xf32>
    %c0_667 = arith.constant 0 : index
    %c0_668 = arith.constant 0 : index
    %489 = vector.load %arg8[%c0_667, %c0_668] : memref<1x256xf32, #tpu.memory_space<vmem>>, vector<1x256xf32>
    %c0_669 = arith.constant 0 : index
    %c0_670 = arith.constant 0 : index
    %490 = vector.load %arg9[%c0_669, %c0_670] : memref<1x256xf32, #tpu.memory_space<vmem>>, vector<1x256xf32>
    %cst_671 = arith.constant dense<0.000000e+00> : vector<256xf32>
    %491 = vector.multi_reduction <add>, %488, %cst_671 [0] : vector<32x256xf32> to vector<256xf32>
    %492 = vector.shape_cast %491 : vector<256xf32> to vector<1x256xf32>
    %cst_672 = arith.constant 3.200000e+01 : f32
    %493 = vector.broadcast %cst_672 : f32 to vector<1x256xf32>
    %494 = arith.divf %492, %493 : vector<1x256xf32>
    %495 = vector.broadcast %494 : vector<1x256xf32> to vector<32x256xf32>
    %496 = arith.subf %488, %495 : vector<32x256xf32>
    %497 = arith.mulf %496, %496 : vector<32x256xf32>
    %cst_673 = arith.constant dense<0.000000e+00> : vector<256xf32>
    %498 = vector.multi_reduction <add>, %497, %cst_673 [0] : vector<32x256xf32> to vector<256xf32>
    %499 = vector.shape_cast %498 : vector<256xf32> to vector<1x256xf32>
    %cst_674 = arith.constant 3.200000e+01 : f32
    %500 = vector.broadcast %cst_674 : f32 to vector<1x256xf32>
    %501 = arith.divf %499, %500 : vector<1x256xf32>
    %502 = vector.broadcast %489 : vector<1x256xf32> to vector<32x256xf32>
    %503 = arith.mulf %502, %496 : vector<32x256xf32>
    %cst_675 = arith.constant 9.99999974E-6 : f32
    %504 = vector.broadcast %cst_675 : f32 to vector<1x256xf32>
    %505 = arith.addf %501, %504 : vector<1x256xf32>
    %506 = math.rsqrt %505 : vector<1x256xf32>
    %507 = vector.broadcast %506 : vector<1x256xf32> to vector<32x256xf32>
    %508 = arith.mulf %503, %507 : vector<32x256xf32>
    %509 = vector.broadcast %490 : vector<1x256xf32> to vector<32x256xf32>
    %510 = arith.addf %508, %509 : vector<32x256xf32>
    %cst_676 = arith.constant 0.000000e+00 : f32
    %511 = vector.broadcast %cst_676 : f32 to vector<32x256xf32>
    %512 = arith.cmpf oge, %510, %511 : vector<32x256xf32>
    %cst_677 = arith.constant 2.000000e-01 : f32
    %513 = vector.broadcast %cst_677 : f32 to vector<32x256xf32>
    %514 = arith.mulf %513, %510 : vector<32x256xf32>
    %515 = arith.select %512, %510, %514 : vector<32x256xi1>, vector<32x256xf32>
    %516 = vector.shape_cast %515 : vector<32x256xf32> to vector<2x16x256xf32>
    %cst_678 = arith.constant dense<0.000000e+00> : vector<2x256xf32>
    %517 = vector.multi_reduction <add>, %516, %cst_678 [1] : vector<2x16x256xf32> to vector<2x256xf32>
    %cst_679 = arith.constant 1.600000e+01 : f32
    %518 = vector.broadcast %cst_679 : f32 to vector<2x256xf32>
    %519 = arith.divf %517, %518 : vector<2x256xf32>
    %c0_680 = arith.constant 0 : index
    %c0_681 = arith.constant 0 : index
    %520 = vector.load %arg10[%c0_680, %c0_681] : memref<1x256xf32, #tpu.memory_space<vmem>>, vector<1x256xf32>
    %521 = vector.broadcast %520 : vector<1x256xf32> to vector<2x256xf32>
    %522 = arith.mulf %519, %521 : vector<2x256xf32>
    %cst_682 = arith.constant dense<0.000000e+00> : vector<2xf32>
    %523 = vector.multi_reduction <add>, %522, %cst_682 [1] : vector<2x256xf32> to vector<2xf32>
    %524 = vector.shape_cast %523 : vector<2xf32> to vector<2x1xf32>
    %c0_683 = arith.constant 0 : index
    %c0_684 = arith.constant 0 : index
    %525 = memref.load %arg11[%c0_683, %c0_684] : memref<1x1xf32, #tpu.memory_space<smem>>
    %526 = vector.broadcast %525 : f32 to vector<2x1xf32>
    %527 = arith.addf %524, %526 : vector<2x1xf32>
    %c0_685 = arith.constant 0 : index
    %c0_686 = arith.constant 0 : index
    %528 = vector.load %arg12[%c0_685, %c0_686] : memref<2x1xf32, #tpu.memory_space<vmem>>, vector<2x1xf32>
    tpu.vector_store %arg12[%c0_685, %c0_686], %527 {strides = array<i32>} : memref<2x1xf32, #tpu.memory_space<vmem>>, vector<2x1xf32>,
    return
  }
}

</mosaic_0001>

<bundles_post_ra>
// kernel: discriminator_forward.1
= control target key start
LH: loop header
LB: loop body
LE: loop exit
PB: predicated region body
PF: predicated region fallthrough
CT: control target
= control target key end

     0   :  { %s16835_s0 = inlined_call_operand.vmem [shape: bf16[512,16], index: 0, kind: input, shape index: {}]   ;;  %s16836_s1 = inlined_call_operand.vmem [shape: bf16[16,64], index: 1, kind: input, shape index: {}]   ;;  %s16837_s2 = inlined_call_operand.vmem [shape: f32[1,64], index: 2, kind: input, shape index: {}]   ;;  %s16838_s3 = inlined_call_operand.vmem [shape: f32[1,64], index: 3, kind: input, shape index: {}]   ;;  %s16839_s4 = inlined_call_operand.vmem [shape: bf16[1024,128], index: 4, kind: input, shape index: {}]   ;;  %s16840_s5 = inlined_call_operand.vmem [shape: f32[1,128], index: 5, kind: input, shape index: {}]   ;;  %s16841_s6 = inlined_call_operand.vmem [shape: f32[1,128], index: 6, kind: input, shape index: {}]   ;;  %s16842_s7 = inlined_call_operand.vmem [shape: bf16[2048,256], index: 7, kind: input, shape index: {}]   ;;  %s16843_s8 = inlined_call_operand.vmem [shape: f32[1,256], index: 8, kind: input, shape index: {}]   ;;  %s16844_s9 = inlined_call_operand.vmem [shape: f32[1,256], index: 9, kind: input, shape index: {}]   ;;  %s16845_s10 = inlined_call_operand.vmem [shape: f32[1,256], index: 10, kind: input, shape index: {}]   ;;  %s16846_s11 = inlined_call_operand.<no memory space> [shape: f32[1,1], index: 11, kind: input, shape index: {}]   ;;  %s16847_s12 = inlined_call_operand.vmem [shape: f32[2,1], index: 12, kind: output, shape index: {}]  }
   0x1   :  { %v58_v0 = vld [vmem:[%s16842_s7] sm:$0xf]  ;;  %v60_v1 = vld [vmem:[%s16842_s7 + $0x8] sm:$0xf]  ;;  %v62_v2 = vld [vmem:[%s16842_s7 + $0x4] sm:$0xf] }
   0x2   :  { %59 = vst [vmem:[#allocation6] sm:$0xf] %v58_v0  ;;  %61 = vst [vmem:[#allocation6 + $0x4] sm:$0xf] %v60_v1  ;;  %v64_v3 = vld [vmem:[%s16842_s7 + $0xc] sm:$0xff]   ;;  %v72_v6 = vld [vmem:[%s16842_s7 + $0x1c] sm:$0xff]  }
   0x3   :  { %63 = vst [vmem:[#allocation6 + $0x8] sm:$0xf] %v62_v2  ;;  %v68_v4 = vld [vmem:[%s16842_s7 + $0x18] sm:$0xf]  ;;  %v70_v5 = vld [vmem:[%s16842_s7 + $0x14] sm:$0xf] }
   0x4   :  { %65 = vst [vmem:[#allocation6 + $0xc] sm:$0xff] %v64_v3   ;;  %69 = vst [vmem:[#allocation6 + $0x14] sm:$0xf] %v68_v4  ;;  %v76_v7 = vld [vmem:[%s16842_s7 + $0x28] sm:$0xf]  ;;  %v80_v9 = vld [vmem:[%s16842_s7 + $0x2c] sm:$0xff]  }
   0x5   :  { %71 = vst [vmem:[#allocation6 + $0x18] sm:$0xf] %v70_v5  ;;  %v78_v8 = vld [vmem:[%s16842_s7 + $0x24] sm:$0xf]  ;;  %73 = vst [vmem:[#allocation6 + $0x1c] sm:$0xff] %v72_v6   ;;  %v88_v12 = vld [vmem:[%s16842_s7 + $0x3c] sm:$0xff]  }
   0x6   :  { %77 = vst [vmem:[#allocation6 + $0x24] sm:$0xf] %v76_v7  ;;  %79 = vst [vmem:[#allocation6 + $0x28] sm:$0xf] %v78_v8  ;;  %v84_v10 = vld [vmem:[%s16842_s7 + $0x38] sm:$0xf] }
   0x7   :  { %v86_v11 = vld [vmem:[%s16842_s7 + $0x34] sm:$0xf]  ;;  %81 = vst [vmem:[#allocation6 + $0x2c] sm:$0xff] %v80_v9   ;;  %85 = vst [vmem:[#allocation6 + $0x34] sm:$0xf] %v84_v10  ;;  %v96_v15 = vld [vmem:[%s16842_s7 + $0x4c] sm:$0xff]  }
   0x8   :  { %87 = vst [vmem:[#allocation6 + $0x38] sm:$0xf] %v86_v11  ;;  %v92_v13 = vld [vmem:[%s16842_s7 + $0x48] sm:$0xf]  ;;  %v94_v14 = vld [vmem:[%s16842_s7 + $0x44] sm:$0xf] }
   0x9   :  { %89 = vst [vmem:[#allocation6 + $0x3c] sm:$0xff] %v88_v12   ;;  %93 = vst [vmem:[#allocation6 + $0x44] sm:$0xf] %v92_v13  ;;  %v100_v16 = vld [vmem:[%s16842_s7 + $0x58] sm:$0xf]  ;;  %v104_v18 = vld [vmem:[%s16842_s7 + $0x5c] sm:$0xff]  }
   0xa   :  { %95 = vst [vmem:[#allocation6 + $0x48] sm:$0xf] %v94_v14  ;;  %v102_v17 = vld [vmem:[%s16842_s7 + $0x54] sm:$0xf]  ;;  %97 = vst [vmem:[#allocation6 + $0x4c] sm:$0xff] %v96_v15   ;;  %v112_v21 = vld [vmem:[%s16842_s7 + $0x6c] sm:$0xff]  }
   0xb   :  { %101 = vst [vmem:[#allocation6 + $0x54] sm:$0xf] %v100_v16  ;;  %103 = vst [vmem:[#allocation6 + $0x58] sm:$0xf] %v102_v17  ;;  %v108_v19 = vld [vmem:[%s16842_s7 + $0x68] sm:$0xf] }
   0xc   :  { %v110_v20 = vld [vmem:[%s16842_s7 + $0x64] sm:$0xf]  ;;  %105 = vst [vmem:[#allocation6 + $0x5c] sm:$0xff] %v104_v18   ;;  %109 = vst [vmem:[#allocation6 + $0x64] sm:$0xf] %v108_v19  ;;  %v120_v24 = vld [vmem:[%s16842_s7 + $0x7c] sm:$0xff]  }
   0xd   :  { %111 = vst [vmem:[#allocation6 + $0x68] sm:$0xf] %v110_v20  ;;  %v116_v22 = vld [vmem:[%s16842_s7 + $0x78] sm:$0xf]  ;;  %v118_v23 = vld [vmem:[%s16842_s7 + $0x74] sm:$0xf] }
   0xe   :  { %113 = vst [vmem:[#allocation6 + $0x6c] sm:$0xff] %v112_v21   ;;  %117 = vst [vmem:[#allocation6 + $0x74] sm:$0xf] %v116_v22  ;;  %v124_v25 = vld [vmem:[%s16842_s7 + $0x88] sm:$0xf]  ;;  %v128_v27 = vld [vmem:[%s16842_s7 + $0x8c] sm:$0xff]  }
   0xf   :  { %119 = vst [vmem:[#allocation6 + $0x78] sm:$0xf] %v118_v23  ;;  %v126_v26 = vld [vmem:[%s16842_s7 + $0x84] sm:$0xf]  ;;  %121 = vst [vmem:[#allocation6 + $0x7c] sm:$0xff] %v120_v24   ;;  %v136_v30 = vld [vmem:[%s16842_s7 + $0x9c] sm:$0xff]  }
  0x10   :  { %125 = vst [vmem:[#allocation6 + $0x84] sm:$0xf] %v124_v25  ;;  %127 = vst [vmem:[#allocation6 + $0x88] sm:$0xf] %v126_v26  ;;  %v132_v28 = vld [vmem:[%s16842_s7 + $0x98] sm:$0xf] }
  0x11   :  { %v134_v29 = vld [vmem:[%s16842_s7 + $0x94] sm:$0xf]  ;;  %129 = vst [vmem:[#allocation6 + $0x8c] sm:$0xff] %v128_v27   ;;  %133 = vst [vmem:[#allocation6 + $0x94] sm:$0xf] %v132_v28  ;;  %v144_v33 = vld [vmem:[%s16842_s7 + $0xac] sm:$0xff]  }
  0x12   :  { %135 = vst [vmem:[#allocation6 + $0x98] sm:$0xf] %v134_v29  ;;  %v140_v31 = vld [vmem:[%s16842_s7 + $0xa8] sm:$0xf]  ;;  %v142_v32 = vld [vmem:[%s16842_s7 + $0xa4] sm:$0xf] }
  0x13   :  { %137 = vst [vmem:[#allocation6 + $0x9c] sm:$0xff] %v136_v30   ;;  %141 = vst [vmem:[#allocation6 + $0xa4] sm:$0xf] %v140_v31  ;;  %v148_v34 = vld [vmem:[%s16842_s7 + $0xb8] sm:$0xf]  ;;  %v152_v36 = vld [vmem:[%s16842_s7 + $0xbc] sm:$0xff]  }
  0x14   :  { %143 = vst [vmem:[#allocation6 + $0xa8] sm:$0xf] %v142_v32  ;;  %v150_v35 = vld [vmem:[%s16842_s7 + $0xb4] sm:$0xf]  ;;  %145 = vst [vmem:[#allocation6 + $0xac] sm:$0xff] %v144_v33   ;;  %v160_v39 = vld [vmem:[%s16842_s7 + $0xcc] sm:$0xff]  }
  0x15   :  { %149 = vst [vmem:[#allocation6 + $0xb4] sm:$0xf] %v148_v34  ;;  %151 = vst [vmem:[#allocation6 + $0xb8] sm:$0xf] %v150_v35  ;;  %v156_v37 = vld [vmem:[%s16842_s7 + $0xc8] sm:$0xf] }
  0x16   :  { %v158_v38 = vld [vmem:[%s16842_s7 + $0xc4] sm:$0xf]  ;;  %153 = vst [vmem:[#allocation6 + $0xbc] sm:$0xff] %v152_v36   ;;  %157 = vst [vmem:[#allocation6 + $0xc4] sm:$0xf] %v156_v37  ;;  %v168_v42 = vld [vmem:[%s16842_s7 + $0xdc] sm:$0xff]  }
  0x17   :  { %159 = vst [vmem:[#allocation6 + $0xc8] sm:$0xf] %v158_v38  ;;  %v164_v40 = vld [vmem:[%s16842_s7 + $0xd8] sm:$0xf]  ;;  %v166_v41 = vld [vmem:[%s16842_s7 + $0xd4] sm:$0xf] }
  0x18   :  { %161 = vst [vmem:[#allocation6 + $0xcc] sm:$0xff] %v160_v39   ;;  %165 = vst [vmem:[#allocation6 + $0xd4] sm:$0xf] %v164_v40  ;;  %v172_v43 = vld [vmem:[%s16842_s7 + $0xe8] sm:$0xf]  ;;  %v176_v45 = vld [vmem:[%s16842_s7 + $0xec] sm:$0xff]  }
  0x19   :  { %167 = vst [vmem:[#allocation6 + $0xd8] sm:$0xf] %v166_v41  ;;  %v174_v44 = vld [vmem:[%s16842_s7 + $0xe4] sm:$0xf]  ;;  %169 = vst [vmem:[#allocation6 + $0xdc] sm:$0xff] %v168_v42   ;;  %v184_v48 = vld [vmem:[%s16842_s7 + $0xfc] sm:$0xff]  }
  0x1a   :  { %173 = vst [vmem:[#allocation6 + $0xe4] sm:$0xf] %v172_v43  ;;  %175 = vst [vmem:[#allocation6 + $0xe8] sm:$0xf] %v174_v44  ;;  %v180_v46 = vld [vmem:[%s16842_s7 + $0xf8] sm:$0xf] }
  0x1b   :  { %v182_v47 = vld [vmem:[%s16842_s7 + $0xf4] sm:$0xf]  ;;  %177 = vst [vmem:[#allocation6 + $0xec] sm:$0xff] %v176_v45   ;;  %181 = vst [vmem:[#allocation6 + $0xf4] sm:$0xf] %v180_v46  ;;  %v192_v51 = vld [vmem:[%s16842_s7 + $0x10c] sm:$0xff]  }
  0x1c   :  { %183 = vst [vmem:[#allocation6 + $0xf8] sm:$0xf] %v182_v47  ;;  %v188_v49 = vld [vmem:[%s16842_s7 + $0x108] sm:$0xf]  ;;  %v190_v50 = vld [vmem:[%s16842_s7 + $0x104] sm:$0xf] }
  0x1d   :  { %185 = vst [vmem:[#allocation6 + $0xfc] sm:$0xff] %v184_v48   ;;  %189 = vst [vmem:[#allocation6 + $0x104] sm:$0xf] %v188_v49  ;;  %v196_v52 = vld [vmem:[%s16842_s7 + $0x118] sm:$0xf]  ;;  %v200_v54 = vld [vmem:[%s16842_s7 + $0x11c] sm:$0xff]  }
  0x1e   :  { %191 = vst [vmem:[#allocation6 + $0x108] sm:$0xf] %v190_v50  ;;  %v198_v53 = vld [vmem:[%s16842_s7 + $0x114] sm:$0xf]  ;;  %193 = vst [vmem:[#allocation6 + $0x10c] sm:$0xff] %v192_v51   ;;  %v208_v57 = vld [vmem:[%s16842_s7 + $0x12c] sm:$0xff]  }
  0x1f   :  { %197 = vst [vmem:[#allocation6 + $0x114] sm:$0xf] %v196_v52  ;;  %199 = vst [vmem:[#allocation6 + $0x118] sm:$0xf] %v198_v53  ;;  %v204_v55 = vld [vmem:[%s16842_s7 + $0x128] sm:$0xf] }
  0x20   :  { %v206_v56 = vld [vmem:[%s16842_s7 + $0x124] sm:$0xf]  ;;  %201 = vst [vmem:[#allocation6 + $0x11c] sm:$0xff] %v200_v54   ;;  %205 = vst [vmem:[#allocation6 + $0x124] sm:$0xf] %v204_v55  ;;  %v216_v60 = vld [vmem:[%s16842_s7 + $0x13c] sm:$0xff]  }
  0x21   :  { %207 = vst [vmem:[#allocation6 + $0x128] sm:$0xf] %v206_v56  ;;  %v212_v58 = vld [vmem:[%s16842_s7 + $0x138] sm:$0xf]  ;;  %v214_v59 = vld [vmem:[%s16842_s7 + $0x134] sm:$0xf] }
  0x22   :  { %209 = vst [vmem:[#allocation6 + $0x12c] sm:$0xff] %v208_v57   ;;  %213 = vst [vmem:[#allocation6 + $0x134] sm:$0xf] %v212_v58  ;;  %v220_v61 = vld [vmem:[%s16842_s7 + $0x148] sm:$0xf]  ;;  %v224_v63 = vld [vmem:[%s16842_s7 + $0x14c] sm:$0xff]  }
  0x23   :  { %215 = vst [vmem:[#allocation6 + $0x138] sm:$0xf] %v214_v59  ;;  %v222_v62 = vld [vmem:[%s16842_s7 + $0x144] sm:$0xf]  ;;  %217 = vst [vmem:[#allocation6 + $0x13c] sm:$0xff] %v216_v60   ;;  %v232_v2 = vld [vmem:[%s16842_s7 + $0x15c] sm:$0xff]  }
  0x24   :  { %221 = vst [vmem:[#allocation6 + $0x144] sm:$0xf] %v220_v61  ;;  %223 = vst [vmem:[#allocation6 + $0x148] sm:$0xf] %v222_v62  ;;  %v228_v0 = vld [vmem:[%s16842_s7 + $0x158] sm:$0xf] }
  0x25   :  { %v230_v1 = vld [vmem:[%s16842_s7 + $0x154] sm:$0xf]  ;;  %225 = vst [vmem:[#allocation6 + $0x14c] sm:$0xff] %v224_v63   ;;  %229 = vst [vmem:[#allocation6 + $0x154] sm:$0xf] %v228_v0  ;;  %v240_v5 = vld [vmem:[%s16842_s7 + $0x16c] sm:$0xff]  }
  0x26   :  { %231 = vst [vmem:[#allocation6 + $0x158] sm:$0xf] %v230_v1  ;;  %v236_v3 = vld [vmem:[%s16842_s7 + $0x168] sm:$0xf]  ;;  %v238_v4 = vld [vmem:[%s16842_s7 + $0x164] sm:$0xf] }
  0x27   :  { %233 = vst [vmem:[#allocation6 + $0x15c] sm:$0xff] %v232_v2   ;;  %237 = vst [vmem:[#allocation6 + $0x164] sm:$0xf] %v236_v3  ;;  %v244_v6 = vld [vmem:[%s16842_s7 + $0x178] sm:$0xf]  ;;  %v248_v8 = vld [vmem:[%s16842_s7 + $0x17c] sm:$0xff]  }
  0x28   :  { %239 = vst [vmem:[#allocation6 + $0x168] sm:$0xf] %v238_v4  ;;  %v246_v7 = vld [vmem:[%s16842_s7 + $0x174] sm:$0xf]  ;;  %241 = vst [vmem:[#allocation6 + $0x16c] sm:$0xff] %v240_v5   ;;  %v256_v11 = vld [vmem:[%s16842_s7 + $0x18c] sm:$0xff]  }
  0x29   :  { %245 = vst [vmem:[#allocation6 + $0x174] sm:$0xf] %v244_v6  ;;  %247 = vst [vmem:[#allocation6 + $0x178] sm:$0xf] %v246_v7  ;;  %v252_v9 = vld [vmem:[%s16842_s7 + $0x188] sm:$0xf] }
  0x2a   :  { %v254_v10 = vld [vmem:[%s16842_s7 + $0x184] sm:$0xf]  ;;  %249 = vst [vmem:[#allocation6 + $0x17c] sm:$0xff] %v248_v8   ;;  %253 = vst [vmem:[#allocation6 + $0x184] sm:$0xf] %v252_v9  ;;  %v264_v14 = vld [vmem:[%s16842_s7 + $0x19c] sm:$0xff]  }
  0x2b   :  { %255 = vst [vmem:[#allocation6 + $0x188] sm:$0xf] %v254_v10  ;;  %v260_v12 = vld [vmem:[%s16842_s7 + $0x198] sm:$0xf]  ;;  %v262_v13 = vld [vmem:[%s16842_s7 + $0x194] sm:$0xf] }
  0x2c   :  { %257 = vst [vmem:[#allocation6 + $0x18c] sm:$0xff] %v256_v11   ;;  %261 = vst [vmem:[#allocation6 + $0x194] sm:$0xf] %v260_v12  ;;  %v268_v15 = vld [vmem:[%s16842_s7 + $0x1a8] sm:$0xf]  ;;  %v272_v17 = vld [vmem:[%s16842_s7 + $0x1ac] sm:$0xff]  }
  0x2d   :  { %263 = vst [vmem:[#allocation6 + $0x198] sm:$0xf] %v262_v13  ;;  %v270_v16 = vld [vmem:[%s16842_s7 + $0x1a4] sm:$0xf]  ;;  %265 = vst [vmem:[#allocation6 + $0x19c] sm:$0xff] %v264_v14   ;;  %v280_v20 = vld [vmem:[%s16842_s7 + $0x1bc] sm:$0xff]  }
  0x2e   :  { %269 = vst [vmem:[#allocation6 + $0x1a4] sm:$0xf] %v268_v15  ;;  %271 = vst [vmem:[#allocation6 + $0x1a8] sm:$0xf] %v270_v16  ;;  %v276_v18 = vld [vmem:[%s16842_s7 + $0x1b8] sm:$0xf] }
  0x2f   :  { %v278_v19 = vld [vmem:[%s16842_s7 + $0x1b4] sm:$0xf]  ;;  %273 = vst [vmem:[#allocation6 + $0x1ac] sm:$0xff] %v272_v17   ;;  %277 = vst [vmem:[#allocation6 + $0x1b4] sm:$0xf] %v276_v18  ;;  %v288_v23 = vld [vmem:[%s16842_s7 + $0x1cc] sm:$0xff]  }
  0x30   :  { %279 = vst [vmem:[#allocation6 + $0x1b8] sm:$0xf] %v278_v19  ;;  %v284_v21 = vld [vmem:[%s16842_s7 + $0x1c8] sm:$0xf]  ;;  %v286_v22 = vld [vmem:[%s16842_s7 + $0x1c4] sm:$0xf] }
  0x31   :  { %281 = vst [vmem:[#allocation6 + $0x1bc] sm:$0xff] %v280_v20   ;;  %285 = vst [vmem:[#allocation6 + $0x1c4] sm:$0xf] %v284_v21  ;;  %v292_v24 = vld [vmem:[%s16842_s7 + $0x1d8] sm:$0xf]  ;;  %v296_v26 = vld [vmem:[%s16842_s7 + $0x1dc] sm:$0xff]  }
  0x32   :  { %287 = vst [vmem:[#allocation6 + $0x1c8] sm:$0xf] %v286_v22  ;;  %v294_v25 = vld [vmem:[%s16842_s7 + $0x1d4] sm:$0xf]  ;;  %289 = vst [vmem:[#allocation6 + $0x1cc] sm:$0xff] %v288_v23   ;;  %v304_v29 = vld [vmem:[%s16842_s7 + $0x1ec] sm:$0xff]  }
  0x33   :  { %293 = vst [vmem:[#allocation6 + $0x1d4] sm:$0xf] %v292_v24  ;;  %295 = vst [vmem:[#allocation6 + $0x1d8] sm:$0xf] %v294_v25  ;;  %v300_v27 = vld [vmem:[%s16842_s7 + $0x1e8] sm:$0xf] }
  0x34   :  { %v302_v28 = vld [vmem:[%s16842_s7 + $0x1e4] sm:$0xf]  ;;  %297 = vst [vmem:[#allocation6 + $0x1dc] sm:$0xff] %v296_v26   ;;  %301 = vst [vmem:[#allocation6 + $0x1e4] sm:$0xf] %v300_v27  ;;  %v312_v32 = vld [vmem:[%s16842_s7 + $0x1fc] sm:$0xff]  }
  0x35   :  { %303 = vst [vmem:[#allocation6 + $0x1e8] sm:$0xf] %v302_v28  ;;  %v308_v30 = vld [vmem:[%s16842_s7 + $0x1f8] sm:$0xf]  ;;  %v310_v31 = vld [vmem:[%s16842_s7 + $0x1f4] sm:$0xf] }
  0x36   :  { %305 = vst [vmem:[#allocation6 + $0x1ec] sm:$0xff] %v304_v29   ;;  %309 = vst [vmem:[#allocation6 + $0x1f4] sm:$0xf] %v308_v30  ;;  %v316_v33 = vld [vmem:[%s16842_s7 + $0x208] sm:$0xf]  ;;  %v320_v35 = vld [vmem:[%s16842_s7 + $0x20c] sm:$0xff]  }
  0x37   :  { %311 = vst [vmem:[#allocation6 + $0x1f8] sm:$0xf] %v310_v31  ;;  %v318_v34 = vld [vmem:[%s16842_s7 + $0x204] sm:$0xf]  ;;  %313 = vst [vmem:[#allocation6 + $0x1fc] sm:$0xff] %v312_v32   ;;  %v328_v38 = vld [vmem:[%s16842_s7 + $0x21c] sm:$0xff]  }
  0x38   :  { %317 = vst [vmem:[#allocation6 + $0x204] sm:$0xf] %v316_v33  ;;  %319 = vst [vmem:[#allocation6 + $0x208] sm:$0xf] %v318_v34  ;;  %v324_v36 = vld [vmem:[%s16842_s7 + $0x218] sm:$0xf] }
  0x39   :  { %v326_v37 = vld [vmem:[%s16842_s7 + $0x214] sm:$0xf]  ;;  %321 = vst [vmem:[#allocation6 + $0x20c] sm:$0xff] %v320_v35   ;;  %325 = vst [vmem:[#allocation6 + $0x214] sm:$0xf] %v324_v36  ;;  %v336_v41 = vld [vmem:[%s16842_s7 + $0x22c] sm:$0xff]  }
  0x3a   :  { %327 = vst [vmem:[#allocation6 + $0x218] sm:$0xf] %v326_v37  ;;  %v332_v39 = vld [vmem:[%s16842_s7 + $0x228] sm:$0xf]  ;;  %v334_v40 = vld [vmem:[%s16842_s7 + $0x224] sm:$0xf] }
  0x3b   :  { %329 = vst [vmem:[#allocation6 + $0x21c] sm:$0xff] %v328_v38   ;;  %333 = vst [vmem:[#allocation6 + $0x224] sm:$0xf] %v332_v39  ;;  %v340_v42 = vld [vmem:[%s16842_s7 + $0x238] sm:$0xf]  ;;  %v344_v44 = vld [vmem:[%s16842_s7 + $0x23c] sm:$0xff]  }
  0x3c   :  { %335 = vst [vmem:[#allocation6 + $0x228] sm:$0xf] %v334_v40  ;;  %v342_v43 = vld [vmem:[%s16842_s7 + $0x234] sm:$0xf]  ;;  %337 = vst [vmem:[#allocation6 + $0x22c] sm:$0xff] %v336_v41   ;;  %v352_v47 = vld [vmem:[%s16842_s7 + $0x24c] sm:$0xff]  }
  0x3d   :  { %341 = vst [vmem:[#allocation6 + $0x234] sm:$0xf] %v340_v42  ;;  %343 = vst [vmem:[#allocation6 + $0x238] sm:$0xf] %v342_v43  ;;  %v348_v45 = vld [vmem:[%s16842_s7 + $0x248] sm:$0xf] }
  0x3e   :  { %v350_v46 = vld [vmem:[%s16842_s7 + $0x244] sm:$0xf]  ;;  %345 = vst [vmem:[#allocation6 + $0x23c] sm:$0xff] %v344_v44   ;;  %349 = vst [vmem:[#allocation6 + $0x244] sm:$0xf] %v348_v45  ;;  %v360_v50 = vld [vmem:[%s16842_s7 + $0x25c] sm:$0xff]  }
  0x3f   :  { %351 = vst [vmem:[#allocation6 + $0x248] sm:$0xf] %v350_v46  ;;  %v356_v48 = vld [vmem:[%s16842_s7 + $0x258] sm:$0xf]  ;;  %v358_v49 = vld [vmem:[%s16842_s7 + $0x254] sm:$0xf] }
  0x40   :  { %353 = vst [vmem:[#allocation6 + $0x24c] sm:$0xff] %v352_v47   ;;  %357 = vst [vmem:[#allocation6 + $0x254] sm:$0xf] %v356_v48  ;;  %v364_v51 = vld [vmem:[%s16842_s7 + $0x268] sm:$0xf]  ;;  %v368_v53 = vld [vmem:[%s16842_s7 + $0x26c] sm:$0xff]  }
  0x41   :  { %359 = vst [vmem:[#allocation6 + $0x258] sm:$0xf] %v358_v49  ;;  %v366_v52 = vld [vmem:[%s16842_s7 + $0x264] sm:$0xf]  ;;  %361 = vst [vmem:[#allocation6 + $0x25c] sm:$0xff] %v360_v50   ;;  %v376_v56 = vld [vmem:[%s16842_s7 + $0x27c] sm:$0xff]  }
  0x42   :  { %365 = vst [vmem:[#allocation6 + $0x264] sm:$0xf] %v364_v51  ;;  %367 = vst [vmem:[#allocation6 + $0x268] sm:$0xf] %v366_v52  ;;  %v372_v54 = vld [vmem:[%s16842_s7 + $0x278] sm:$0xf] }
  0x43   :  { %v374_v55 = vld [vmem:[%s16842_s7 + $0x274] sm:$0xf]  ;;  %369 = vst [vmem:[#allocation6 + $0x26c] sm:$0xff] %v368_v53   ;;  %373 = vst [vmem:[#allocation6 + $0x274] sm:$0xf] %v372_v54  ;;  %v384_v59 = vld [vmem:[%s16842_s7 + $0x28c] sm:$0xff]  }
  0x44   :  { %375 = vst [vmem:[#allocation6 + $0x278] sm:$0xf] %v374_v55  ;;  %v380_v57 = vld [vmem:[%s16842_s7 + $0x288] sm:$0xf]  ;;  %v382_v58 = vld [vmem:[%s16842_s7 + $0x284] sm:$0xf] }
  0x45   :  { %377 = vst [vmem:[#allocation6 + $0x27c] sm:$0xff] %v376_v56   ;;  %381 = vst [vmem:[#allocation6 + $0x284] sm:$0xf] %v380_v57  ;;  %v388_v60 = vld [vmem:[%s16842_s7 + $0x298] sm:$0xf]  ;;  %v392_v62 = vld [vmem:[%s16842_s7 + $0x29c] sm:$0xff]  }
  0x46   :  { %383 = vst [vmem:[#allocation6 + $0x288] sm:$0xf] %v382_v58  ;;  %v390_v61 = vld [vmem:[%s16842_s7 + $0x294] sm:$0xf]  ;;  %385 = vst [vmem:[#allocation6 + $0x28c] sm:$0xff] %v384_v59   ;;  %v400_v1 = vld [vmem:[%s16842_s7 + $0x2ac] sm:$0xff]  }
  0x47   :  { %389 = vst [vmem:[#allocation6 + $0x294] sm:$0xf] %v388_v60  ;;  %391 = vst [vmem:[#allocation6 + $0x298] sm:$0xf] %v390_v61  ;;  %v396_v63 = vld [vmem:[%s16842_s7 + $0x2a8] sm:$0xf] }
  0x48   :  { %v398_v0 = vld [vmem:[%s16842_s7 + $0x2a4] sm:$0xf]  ;;  %393 = vst [vmem:[#allocation6 + $0x29c] sm:$0xff] %v392_v62   ;;  %397 = vst [vmem:[#allocation6 + $0x2a4] sm:$0xf] %v396_v63  ;;  %v408_v4 = vld [vmem:[%s16842_s7 + $0x2bc] sm:$0xff]  }
  0x49   :  { %399 = vst [vmem:[#allocation6 + $0x2a8] sm:$0xf] %v398_v0  ;;  %v404_v2 = vld [vmem:[%s16842_s7 + $0x2b8] sm:$0xf]  ;;  %v406_v3 = vld [vmem:[%s16842_s7 + $0x2b4] sm:$0xf] }
  0x4a   :  { %401 = vst [vmem:[#allocation6 + $0x2ac] sm:$0xff] %v400_v1   ;;  %405 = vst [vmem:[#allocation6 + $0x2b4] sm:$0xf] %v404_v2  ;;  %v412_v5 = vld [vmem:[%s16842_s7 + $0x2c8] sm:$0xf]  ;;  %v416_v7 = vld [vmem:[%s16842_s7 + $0x2cc] sm:$0xff]  }
  0x4b   :  { %407 = vst [vmem:[#allocation6 + $0x2b8] sm:$0xf] %v406_v3  ;;  %v414_v6 = vld [vmem:[%s16842_s7 + $0x2c4] sm:$0xf]  ;;  %409 = vst [vmem:[#allocation6 + $0x2bc] sm:$0xff] %v408_v4   ;;  %v424_v10 = vld [vmem:[%s16842_s7 + $0x2dc] sm:$0xff]  }
  0x4c   :  { %413 = vst [vmem:[#allocation6 + $0x2c4] sm:$0xf] %v412_v5  ;;  %415 = vst [vmem:[#allocation6 + $0x2c8] sm:$0xf] %v414_v6  ;;  %v420_v8 = vld [vmem:[%s16842_s7 + $0x2d8] sm:$0xf] }
  0x4d   :  { %v422_v9 = vld [vmem:[%s16842_s7 + $0x2d4] sm:$0xf]  ;;  %417 = vst [vmem:[#allocation6 + $0x2cc] sm:$0xff] %v416_v7   ;;  %421 = vst [vmem:[#allocation6 + $0x2d4] sm:$0xf] %v420_v8  ;;  %v432_v13 = vld [vmem:[%s16842_s7 + $0x2ec] sm:$0xff]  }
  0x4e   :  { %423 = vst [vmem:[#allocation6 + $0x2d8] sm:$0xf] %v422_v9  ;;  %v428_v11 = vld [vmem:[%s16842_s7 + $0x2e8] sm:$0xf]  ;;  %v430_v12 = vld [vmem:[%s16842_s7 + $0x2e4] sm:$0xf] }
  0x4f   :  { %425 = vst [vmem:[#allocation6 + $0x2dc] sm:$0xff] %v424_v10   ;;  %429 = vst [vmem:[#allocation6 + $0x2e4] sm:$0xf] %v428_v11  ;;  %v436_v14 = vld [vmem:[%s16842_s7 + $0x2f8] sm:$0xf]  ;;  %v440_v16 = vld [vmem:[%s16842_s7 + $0x2fc] sm:$0xff]  }
  0x50   :  { %431 = vst [vmem:[#allocation6 + $0x2e8] sm:$0xf] %v430_v12  ;;  %v438_v15 = vld [vmem:[%s16842_s7 + $0x2f4] sm:$0xf]  ;;  %433 = vst [vmem:[#allocation6 + $0x2ec] sm:$0xff] %v432_v13   ;;  %v448_v19 = vld [vmem:[%s16842_s7 + $0x30c] sm:$0xff]  }
  0x51   :  { %437 = vst [vmem:[#allocation6 + $0x2f4] sm:$0xf] %v436_v14  ;;  %439 = vst [vmem:[#allocation6 + $0x2f8] sm:$0xf] %v438_v15  ;;  %v444_v17 = vld [vmem:[%s16842_s7 + $0x308] sm:$0xf] }
  0x52   :  { %v446_v18 = vld [vmem:[%s16842_s7 + $0x304] sm:$0xf]  ;;  %441 = vst [vmem:[#allocation6 + $0x2fc] sm:$0xff] %v440_v16   ;;  %445 = vst [vmem:[#allocation6 + $0x304] sm:$0xf] %v444_v17  ;;  %v456_v22 = vld [vmem:[%s16842_s7 + $0x31c] sm:$0xff]  }
  0x53   :  { %447 = vst [vmem:[#allocation6 + $0x308] sm:$0xf] %v446_v18  ;;  %v452_v20 = vld [vmem:[%s16842_s7 + $0x318] sm:$0xf]  ;;  %v454_v21 = vld [vmem:[%s16842_s7 + $0x314] sm:$0xf] }
  0x54   :  { %449 = vst [vmem:[#allocation6 + $0x30c] sm:$0xff] %v448_v19   ;;  %453 = vst [vmem:[#allocation6 + $0x314] sm:$0xf] %v452_v20  ;;  %v460_v23 = vld [vmem:[%s16842_s7 + $0x328] sm:$0xf]  ;;  %v464_v25 = vld [vmem:[%s16842_s7 + $0x32c] sm:$0xff]  }
  0x55   :  { %455 = vst [vmem:[#allocation6 + $0x318] sm:$0xf] %v454_v21  ;;  %v462_v24 = vld [vmem:[%s16842_s7 + $0x324] sm:$0xf]  ;;  %457 = vst [vmem:[#allocation6 + $0x31c] sm:$0xff] %v456_v22   ;;  %v472_v28 = vld [vmem:[%s16842_s7 + $0x33c] sm:$0xff]  }
  0x56   :  { %461 = vst [vmem:[#allocation6 + $0x324] sm:$0xf] %v460_v23  ;;  %463 = vst [vmem:[#allocation6 + $0x328] sm:$0xf] %v462_v24  ;;  %v468_v26 = vld [vmem:[%s16842_s7 + $0x338] sm:$0xf] }
  0x57   :  { %v470_v27 = vld [vmem:[%s16842_s7 + $0x334] sm:$0xf]  ;;  %465 = vst [vmem:[#allocation6 + $0x32c] sm:$0xff] %v464_v25   ;;  %469 = vst [vmem:[#allocation6 + $0x334] sm:$0xf] %v468_v26  ;;  %v480_v31 = vld [vmem:[%s16842_s7 + $0x34c] sm:$0xff]  }
  0x58   :  { %471 = vst [vmem:[#allocation6 + $0x338] sm:$0xf] %v470_v27  ;;  %v476_v29 = vld [vmem:[%s16842_s7 + $0x348] sm:$0xf]  ;;  %v478_v30 = vld [vmem:[%s16842_s7 + $0x344] sm:$0xf] }
  0x59   :  { %473 = vst [vmem:[#allocation6 + $0x33c] sm:$0xff] %v472_v28   ;;  %477 = vst [vmem:[#allocation6 + $0x344] sm:$0xf] %v476_v29  ;;  %v484_v32 = vld [vmem:[%s16842_s7 + $0x358] sm:$0xf]  ;;  %v488_v34 = vld [vmem:[%s16842_s7 + $0x35c] sm:$0xff]  }
  0x5a   :  { %479 = vst [vmem:[#allocation6 + $0x348] sm:$0xf] %v478_v30  ;;  %v486_v33 = vld [vmem:[%s16842_s7 + $0x354] sm:$0xf]  ;;  %481 = vst [vmem:[#allocation6 + $0x34c] sm:$0xff] %v480_v31   ;;  %v496_v37 = vld [vmem:[%s16842_s7 + $0x36c] sm:$0xff]  }
  0x5b   :  { %485 = vst [vmem:[#allocation6 + $0x354] sm:$0xf] %v484_v32  ;;  %487 = vst [vmem:[#allocation6 + $0x358] sm:$0xf] %v486_v33  ;;  %v492_v35 = vld [vmem:[%s16842_s7 + $0x368] sm:$0xf] }
  0x5c   :  { %v494_v36 = vld [vmem:[%s16842_s7 + $0x364] sm:$0xf]  ;;  %489 = vst [vmem:[#allocation6 + $0x35c] sm:$0xff] %v488_v34   ;;  %493 = vst [vmem:[#allocation6 + $0x364] sm:$0xf] %v492_v35  ;;  %v504_v40 = vld [vmem:[%s16842_s7 + $0x37c] sm:$0xff]  }
  0x5d   :  { %495 = vst [vmem:[#allocation6 + $0x368] sm:$0xf] %v494_v36  ;;  %v500_v38 = vld [vmem:[%s16842_s7 + $0x378] sm:$0xf]  ;;  %v502_v39 = vld [vmem:[%s16842_s7 + $0x374] sm:$0xf] }
  0x5e   :  { %497 = vst [vmem:[#allocation6 + $0x36c] sm:$0xff] %v496_v37   ;;  %501 = vst [vmem:[#allocation6 + $0x374] sm:$0xf] %v500_v38  ;;  %v508_v41 = vld [vmem:[%s16842_s7 + $0x388] sm:$0xf]  ;;  %v512_v43 = vld [vmem:[%s16842_s7 + $0x38c] sm:$0xff]  }
  0x5f   :  { %503 = vst [vmem:[#allocation6 + $0x378] sm:$0xf] %v502_v39  ;;  %v510_v42 = vld [vmem:[%s16842_s7 + $0x384] sm:$0xf]  ;;  %505 = vst [vmem:[#allocation6 + $0x37c] sm:$0xff] %v504_v40   ;;  %v520_v46 = vld [vmem:[%s16842_s7 + $0x39c] sm:$0xff]  }
  0x60   :  { %509 = vst [vmem:[#allocation6 + $0x384] sm:$0xf] %v508_v41  ;;  %511 = vst [vmem:[#allocation6 + $0x388] sm:$0xf] %v510_v42  ;;  %v516_v44 = vld [vmem:[%s16842_s7 + $0x398] sm:$0xf] }
  0x61   :  { %v518_v45 = vld [vmem:[%s16842_s7 + $0x394] sm:$0xf]  ;;  %513 = vst [vmem:[#allocation6 + $0x38c] sm:$0xff] %v512_v43   ;;  %517 = vst [vmem:[#allocation6 + $0x394] sm:$0xf] %v516_v44  ;;  %v528_v49 = vld [vmem:[%s16842_s7 + $0x3ac] sm:$0xff]  }
  0x62   :  { %519 = vst [vmem:[#allocation6 + $0x398] sm:$0xf] %v518_v45  ;;  %v524_v47 = vld [vmem:[%s16842_s7 + $0x3a8] sm:$0xf]  ;;  %v526_v48 = vld [vmem:[%s16842_s7 + $0x3a4] sm:$0xf] }
  0x63   :  { %521 = vst [vmem:[#allocation6 + $0x39c] sm:$0xff] %v520_v46   ;;  %525 = vst [vmem:[#allocation6 + $0x3a4] sm:$0xf] %v524_v47  ;;  %v532_v50 = vld [vmem:[%s16842_s7 + $0x3b8] sm:$0xf]  ;;  %v536_v52 = vld [vmem:[%s16842_s7 + $0x3bc] sm:$0xff]  }
  0x64   :  { %527 = vst [vmem:[#allocation6 + $0x3a8] sm:$0xf] %v526_v48  ;;  %v534_v51 = vld [vmem:[%s16842_s7 + $0x3b4] sm:$0xf]  ;;  %529 = vst [vmem:[#allocation6 + $0x3ac] sm:$0xff] %v528_v49   ;;  %v544_v55 = vld [vmem:[%s16842_s7 + $0x3cc] sm:$0xff]  }
  0x65   :  { %533 = vst [vmem:[#allocation6 + $0x3b4] sm:$0xf] %v532_v50  ;;  %535 = vst [vmem:[#allocation6 + $0x3b8] sm:$0xf] %v534_v51  ;;  %v540_v53 = vld [vmem:[%s16842_s7 + $0x3c8] sm:$0xf] }
  0x66   :  { %v542_v54 = vld [vmem:[%s16842_s7 + $0x3c4] sm:$0xf]  ;;  %537 = vst [vmem:[#allocation6 + $0x3bc] sm:$0xff] %v536_v52   ;;  %541 = vst [vmem:[#allocation6 + $0x3c4] sm:$0xf] %v540_v53  ;;  %v552_v58 = vld [vmem:[%s16842_s7 + $0x3dc] sm:$0xff]  }
  0x67   :  { %543 = vst [vmem:[#allocation6 + $0x3c8] sm:$0xf] %v542_v54  ;;  %v548_v56 = vld [vmem:[%s16842_s7 + $0x3d8] sm:$0xf]  ;;  %v550_v57 = vld [vmem:[%s16842_s7 + $0x3d4] sm:$0xf] }
  0x68   :  { %545 = vst [vmem:[#allocation6 + $0x3cc] sm:$0xff] %v544_v55   ;;  %549 = vst [vmem:[#allocation6 + $0x3d4] sm:$0xf] %v548_v56  ;;  %v556_v59 = vld [vmem:[%s16842_s7 + $0x3e8] sm:$0xf]  ;;  %v560_v61 = vld [vmem:[%s16842_s7 + $0x3ec] sm:$0xff]  }
  0x69   :  { %551 = vst [vmem:[#allocation6 + $0x3d8] sm:$0xf] %v550_v57  ;;  %v558_v60 = vld [vmem:[%s16842_s7 + $0x3e4] sm:$0xf]  ;;  %553 = vst [vmem:[#allocation6 + $0x3dc] sm:$0xff] %v552_v58   ;;  %v568_v0 = vld [vmem:[%s16842_s7 + $0x3fc] sm:$0xff]  }
  0x6a   :  { %557 = vst [vmem:[#allocation6 + $0x3e4] sm:$0xf] %v556_v59  ;;  %559 = vst [vmem:[#allocation6 + $0x3e8] sm:$0xf] %v558_v60  ;;  %v564_v62 = vld [vmem:[%s16842_s7 + $0x3f8] sm:$0xf] }
  0x6b   :  { %v566_v63 = vld [vmem:[%s16842_s7 + $0x3f4] sm:$0xf]  ;;  %561 = vst [vmem:[#allocation6 + $0x3ec] sm:$0xff] %v560_v61   ;;  %565 = vst [vmem:[#allocation6 + $0x3f4] sm:$0xf] %v564_v62  ;;  %v576_v3 = vld [vmem:[%s16842_s7 + $0x40c] sm:$0xff]  }
  0x6c   :  { %567 = vst [vmem:[#allocation6 + $0x3f8] sm:$0xf] %v566_v63  ;;  %v572_v1 = vld [vmem:[%s16842_s7 + $0x408] sm:$0xf]  ;;  %v574_v2 = vld [vmem:[%s16842_s7 + $0x404] sm:$0xf] }
  0x6d   :  { %569 = vst [vmem:[#allocation6 + $0x3fc] sm:$0xff] %v568_v0   ;;  %573 = vst [vmem:[#allocation6 + $0x404] sm:$0xf] %v572_v1  ;;  %v580_v4 = vld [vmem:[%s16842_s7 + $0x418] sm:$0xf]  ;;  %v584_v6 = vld [vmem:[%s16842_s7 + $0x41c] sm:$0xff]  }
  0x6e   :  { %575 = vst [vmem:[#allocation6 + $0x408] sm:$0xf] %v574_v2  ;;  %v582_v5 = vld [vmem:[%s16842_s7 + $0x414] sm:$0xf]  ;;  %577 = vst [vmem:[#allocation6 + $0x40c] sm:$0xff] %v576_v3   ;;  %v592_v9 = vld [vmem:[%s16842_s7 + $0x42c] sm:$0xff]  }
  0x6f   :  { %581 = vst [vmem:[#allocation6 + $0x414] sm:$0xf] %v580_v4  ;;  %583 = vst [vmem:[#allocation6 + $0x418] sm:$0xf] %v582_v5  ;;  %v588_v7 = vld [vmem:[%s16842_s7 + $0x428] sm:$0xf] }
  0x70   :  { %v590_v8 = vld [vmem:[%s16842_s7 + $0x424] sm:$0xf]  ;;  %585 = vst [vmem:[#allocation6 + $0x41c] sm:$0xff] %v584_v6   ;;  %589 = vst [vmem:[#allocation6 + $0x424] sm:$0xf] %v588_v7  ;;  %v600_v12 = vld [vmem:[%s16842_s7 + $0x43c] sm:$0xff]  }
  0x71   :  { %591 = vst [vmem:[#allocation6 + $0x428] sm:$0xf] %v590_v8  ;;  %v596_v10 = vld [vmem:[%s16842_s7 + $0x438] sm:$0xf]  ;;  %v598_v11 = vld [vmem:[%s16842_s7 + $0x434] sm:$0xf] }
  0x72   :  { %593 = vst [vmem:[#allocation6 + $0x42c] sm:$0xff] %v592_v9   ;;  %597 = vst [vmem:[#allocation6 + $0x434] sm:$0xf] %v596_v10  ;;  %v604_v13 = vld [vmem:[%s16842_s7 + $0x448] sm:$0xf]  ;;  %v608_v15 = vld [vmem:[%s16842_s7 + $0x44c] sm:$0xff]  }
  0x73   :  { %599 = vst [vmem:[#allocation6 + $0x438] sm:$0xf] %v598_v11  ;;  %v606_v14 = vld [vmem:[%s16842_s7 + $0x444] sm:$0xf]  ;;  %601 = vst [vmem:[#allocation6 + $0x43c] sm:$0xff] %v600_v12   ;;  %v616_v18 = vld [vmem:[%s16842_s7 + $0x45c] sm:$0xff]  }
  0x74   :  { %605 = vst [vmem:[#allocation6 + $0x444] sm:$0xf] %v604_v13  ;;  %607 = vst [vmem:[#allocation6 + $0x448] sm:$0xf] %v606_v14  ;;  %v612_v16 = vld [vmem:[%s16842_s7 + $0x458] sm:$0xf] }
  0x75   :  { %v614_v17 = vld [vmem:[%s16842_s7 + $0x454] sm:$0xf]  ;;  %609 = vst [vmem:[#allocation6 + $0x44c] sm:$0xff] %v608_v15   ;;  %613 = vst [vmem:[#allocation6 + $0x454] sm:$0xf] %v612_v16  ;;  %v624_v21 = vld [vmem:[%s16842_s7 + $0x46c] sm:$0xff]  }
  0x76   :  { %615 = vst [vmem:[#allocation6 + $0x458] sm:$0xf] %v614_v17  ;;  %v620_v19 = vld [vmem:[%s16842_s7 + $0x468] sm:$0xf]  ;;  %v622_v20 = vld [vmem:[%s16842_s7 + $0x464] sm:$0xf] }
  0x77   :  { %617 = vst [vmem:[#allocation6 + $0x45c] sm:$0xff] %v616_v18   ;;  %621 = vst [vmem:[#allocation6 + $0x464] sm:$0xf] %v620_v19  ;;  %v628_v22 = vld [vmem:[%s16842_s7 + $0x478] sm:$0xf]  ;;  %v632_v24 = vld [vmem:[%s16842_s7 + $0x47c] sm:$0xff]  }
  0x78   :  { %623 = vst [vmem:[#allocation6 + $0x468] sm:$0xf] %v622_v20  ;;  %v630_v23 = vld [vmem:[%s16842_s7 + $0x474] sm:$0xf]  ;;  %625 = vst [vmem:[#allocation6 + $0x46c] sm:$0xff] %v624_v21   ;;  %v640_v27 = vld [vmem:[%s16842_s7 + $0x48c] sm:$0xff]  }
  0x79   :  { %629 = vst [vmem:[#allocation6 + $0x474] sm:$0xf] %v628_v22  ;;  %631 = vst [vmem:[#allocation6 + $0x478] sm:$0xf] %v630_v23  ;;  %v636_v25 = vld [vmem:[%s16842_s7 + $0x488] sm:$0xf] }
  0x7a   :  { %v638_v26 = vld [vmem:[%s16842_s7 + $0x484] sm:$0xf]  ;;  %633 = vst [vmem:[#allocation6 + $0x47c] sm:$0xff] %v632_v24   ;;  %637 = vst [vmem:[#allocation6 + $0x484] sm:$0xf] %v636_v25  ;;  %v648_v30 = vld [vmem:[%s16842_s7 + $0x49c] sm:$0xff]  }
  0x7b   :  { %639 = vst [vmem:[#allocation6 + $0x488] sm:$0xf] %v638_v26  ;;  %v644_v28 = vld [vmem:[%s16842_s7 + $0x498] sm:$0xf]  ;;  %v646_v29 = vld [vmem:[%s16842_s7 + $0x494] sm:$0xf] }
  0x7c   :  { %641 = vst [vmem:[#allocation6 + $0x48c] sm:$0xff] %v640_v27   ;;  %645 = vst [vmem:[#allocation6 + $0x494] sm:$0xf] %v644_v28  ;;  %v652_v31 = vld [vmem:[%s16842_s7 + $0x4a8] sm:$0xf]  ;;  %v656_v33 = vld [vmem:[%s16842_s7 + $0x4ac] sm:$0xff]  }
  0x7d   :  { %647 = vst [vmem:[#allocation6 + $0x498] sm:$0xf] %v646_v29  ;;  %v654_v32 = vld [vmem:[%s16842_s7 + $0x4a4] sm:$0xf]  ;;  %649 = vst [vmem:[#allocation6 + $0x49c] sm:$0xff] %v648_v30   ;;  %v664_v36 = vld [vmem:[%s16842_s7 + $0x4bc] sm:$0xff]  }
  0x7e   :  { %653 = vst [vmem:[#allocation6 + $0x4a4] sm:$0xf] %v652_v31  ;;  %655 = vst [vmem:[#allocation6 + $0x4a8] sm:$0xf] %v654_v32  ;;  %v660_v34 = vld [vmem:[%s16842_s7 + $0x4b8] sm:$0xf] }
  0x7f   :  { %v662_v35 = vld [vmem:[%s16842_s7 + $0x4b4] sm:$0xf]  ;;  %657 = vst [vmem:[#allocation6 + $0x4ac] sm:$0xff] %v656_v33   ;;  %661 = vst [vmem:[#allocation6 + $0x4b4] sm:$0xf] %v660_v34  ;;  %v672_v39 = vld [vmem:[%s16842_s7 + $0x4cc] sm:$0xff]  }
  0x80   :  { %663 = vst [vmem:[#allocation6 + $0x4b8] sm:$0xf] %v662_v35  ;;  %v668_v37 = vld [vmem:[%s16842_s7 + $0x4c8] sm:$0xf]  ;;  %v670_v38 = vld [vmem:[%s16842_s7 + $0x4c4] sm:$0xf] }
  0x81   :  { %665 = vst [vmem:[#allocation6 + $0x4bc] sm:$0xff] %v664_v36   ;;  %669 = vst [vmem:[#allocation6 + $0x4c4] sm:$0xf] %v668_v37  ;;  %v676_v40 = vld [vmem:[%s16842_s7 + $0x4d8] sm:$0xf]  ;;  %v680_v42 = vld [vmem:[%s16842_s7 + $0x4dc] sm:$0xff]  }
  0x82   :  { %671 = vst [vmem:[#allocation6 + $0x4c8] sm:$0xf] %v670_v38  ;;  %v678_v41 = vld [vmem:[%s16842_s7 + $0x4d4] sm:$0xf]  ;;  %673 = vst [vmem:[#allocation6 + $0x4cc] sm:$0xff] %v672_v39   ;;  %v688_v45 = vld [vmem:[%s16842_s7 + $0x4ec] sm:$0xff]  }
  0x83   :  { %677 = vst [vmem:[#allocation6 + $0x4d4] sm:$0xf] %v676_v40  ;;  %679 = vst [vmem:[#allocation6 + $0x4d8] sm:$0xf] %v678_v41  ;;  %v684_v43 = vld [vmem:[%s16842_s7 + $0x4e8] sm:$0xf] }
  0x84   :  { %v686_v44 = vld [vmem:[%s16842_s7 + $0x4e4] sm:$0xf]  ;;  %681 = vst [vmem:[#allocation6 + $0x4dc] sm:$0xff] %v680_v42   ;;  %685 = vst [vmem:[#allocation6 + $0x4e4] sm:$0xf] %v684_v43  ;;  %v696_v48 = vld [vmem:[%s16842_s7 + $0x4fc] sm:$0xff]  }
  0x85   :  { %687 = vst [vmem:[#allocation6 + $0x4e8] sm:$0xf] %v686_v44  ;;  %v692_v46 = vld [vmem:[%s16842_s7 + $0x4f8] sm:$0xf]  ;;  %v694_v47 = vld [vmem:[%s16842_s7 + $0x4f4] sm:$0xf] }
  0x86   :  { %689 = vst [vmem:[#allocation6 + $0x4ec] sm:$0xff] %v688_v45   ;;  %693 = vst [vmem:[#allocation6 + $0x4f4] sm:$0xf] %v692_v46  ;;  %v700_v49 = vld [vmem:[%s16842_s7 + $0x508] sm:$0xf]  ;;  %v704_v51 = vld [vmem:[%s16842_s7 + $0x50c] sm:$0xff]  }
  0x87   :  { %695 = vst [vmem:[#allocation6 + $0x4f8] sm:$0xf] %v694_v47  ;;  %v702_v50 = vld [vmem:[%s16842_s7 + $0x504] sm:$0xf]  ;;  %697 = vst [vmem:[#allocation6 + $0x4fc] sm:$0xff] %v696_v48   ;;  %v712_v54 = vld [vmem:[%s16842_s7 + $0x51c] sm:$0xff]  }
  0x88   :  { %701 = vst [vmem:[#allocation6 + $0x504] sm:$0xf] %v700_v49  ;;  %703 = vst [vmem:[#allocation6 + $0x508] sm:$0xf] %v702_v50  ;;  %v708_v52 = vld [vmem:[%s16842_s7 + $0x518] sm:$0xf] }
  0x89   :  { %v710_v53 = vld [vmem:[%s16842_s7 + $0x514] sm:$0xf]  ;;  %705 = vst [vmem:[#allocation6 + $0x50c] sm:$0xff] %v704_v51   ;;  %709 = vst [vmem:[#allocation6 + $0x514] sm:$0xf] %v708_v52  ;;  %v720_v57 = vld [vmem:[%s16842_s7 + $0x52c] sm:$0xff]  }
  0x8a   :  { %711 = vst [vmem:[#allocation6 + $0x518] sm:$0xf] %v710_v53  ;;  %v716_v55 = vld [vmem:[%s16842_s7 + $0x528] sm:$0xf]  ;;  %v718_v56 = vld [vmem:[%s16842_s7 + $0x524] sm:$0xf] }
  0x8b   :  { %713 = vst [vmem:[#allocation6 + $0x51c] sm:$0xff] %v712_v54   ;;  %717 = vst [vmem:[#allocation6 + $0x524] sm:$0xf] %v716_v55  ;;  %v724_v58 = vld [vmem:[%s16842_s7 + $0x538] sm:$0xf]  ;;  %v728_v60 = vld [vmem:[%s16842_s7 + $0x53c] sm:$0xff]  }
  0x8c   :  { %719 = vst [vmem:[#allocation6 + $0x528] sm:$0xf] %v718_v56  ;;  %v726_v59 = vld [vmem:[%s16842_s7 + $0x534] sm:$0xf]  ;;  %721 = vst [vmem:[#allocation6 + $0x52c] sm:$0xff] %v720_v57   ;;  %v736_v63 = vld [vmem:[%s16842_s7 + $0x54c] sm:$0xff]  }
  0x8d   :  { %725 = vst [vmem:[#allocation6 + $0x534] sm:$0xf] %v724_v58  ;;  %727 = vst [vmem:[#allocation6 + $0x538] sm:$0xf] %v726_v59  ;;  %v732_v61 = vld [vmem:[%s16842_s7 + $0x548] sm:$0xf] }
  0x8e   :  { %v734_v62 = vld [vmem:[%s16842_s7 + $0x544] sm:$0xf]  ;;  %729 = vst [vmem:[#allocation6 + $0x53c] sm:$0xff] %v728_v60   ;;  %733 = vst [vmem:[#allocation6 + $0x544] sm:$0xf] %v732_v61  ;;  %v744_v2 = vld [vmem:[%s16842_s7 + $0x55c] sm:$0xff]  }
  0x8f   :  { %735 = vst [vmem:[#allocation6 + $0x548] sm:$0xf] %v734_v62  ;;  %v740_v0 = vld [vmem:[%s16842_s7 + $0x558] sm:$0xf]  ;;  %v742_v1 = vld [vmem:[%s16842_s7 + $0x554] sm:$0xf] }
  0x90   :  { %737 = vst [vmem:[#allocation6 + $0x54c] sm:$0xff] %v736_v63   ;;  %741 = vst [vmem:[#allocation6 + $0x554] sm:$0xf] %v740_v0  ;;  %v748_v3 = vld [vmem:[%s16842_s7 + $0x568] sm:$0xf]  ;;  %v752_v5 = vld [vmem:[%s16842_s7 + $0x56c] sm:$0xff]  }
  0x91   :  { %743 = vst [vmem:[#allocation6 + $0x558] sm:$0xf] %v742_v1  ;;  %v750_v4 = vld [vmem:[%s16842_s7 + $0x564] sm:$0xf]  ;;  %745 = vst [vmem:[#allocation6 + $0x55c] sm:$0xff] %v744_v2   ;;  %v760_v8 = vld [vmem:[%s16842_s7 + $0x57c] sm:$0xff]  }
  0x92   :  { %749 = vst [vmem:[#allocation6 + $0x564] sm:$0xf] %v748_v3  ;;  %751 = vst [vmem:[#allocation6 + $0x568] sm:$0xf] %v750_v4  ;;  %v756_v6 = vld [vmem:[%s16842_s7 + $0x578] sm:$0xf] }
  0x93   :  { %v758_v7 = vld [vmem:[%s16842_s7 + $0x574] sm:$0xf]  ;;  %753 = vst [vmem:[#allocation6 + $0x56c] sm:$0xff] %v752_v5   ;;  %757 = vst [vmem:[#allocation6 + $0x574] sm:$0xf] %v756_v6  ;;  %v768_v11 = vld [vmem:[%s16842_s7 + $0x58c] sm:$0xff]  }
  0x94   :  { %759 = vst [vmem:[#allocation6 + $0x578] sm:$0xf] %v758_v7  ;;  %v764_v9 = vld [vmem:[%s16842_s7 + $0x588] sm:$0xf]  ;;  %v766_v10 = vld [vmem:[%s16842_s7 + $0x584] sm:$0xf] }
  0x95   :  { %761 = vst [vmem:[#allocation6 + $0x57c] sm:$0xff] %v760_v8   ;;  %765 = vst [vmem:[#allocation6 + $0x584] sm:$0xf] %v764_v9  ;;  %v772_v12 = vld [vmem:[%s16842_s7 + $0x598] sm:$0xf]  ;;  %v776_v14 = vld [vmem:[%s16842_s7 + $0x59c] sm:$0xff]  }
  0x96   :  { %767 = vst [vmem:[#allocation6 + $0x588] sm:$0xf] %v766_v10  ;;  %v774_v13 = vld [vmem:[%s16842_s7 + $0x594] sm:$0xf]  ;;  %769 = vst [vmem:[#allocation6 + $0x58c] sm:$0xff] %v768_v11   ;;  %v784_v17 = vld [vmem:[%s16842_s7 + $0x5ac] sm:$0xff]  }
  0x97   :  { %773 = vst [vmem:[#allocation6 + $0x594] sm:$0xf] %v772_v12  ;;  %775 = vst [vmem:[#allocation6 + $0x598] sm:$0xf] %v774_v13  ;;  %v780_v15 = vld [vmem:[%s16842_s7 + $0x5a8] sm:$0xf] }
  0x98   :  { %v782_v16 = vld [vmem:[%s16842_s7 + $0x5a4] sm:$0xf]  ;;  %777 = vst [vmem:[#allocation6 + $0x59c] sm:$0xff] %v776_v14   ;;  %781 = vst [vmem:[#allocation6 + $0x5a4] sm:$0xf] %v780_v15  ;;  %v792_v20 = vld [vmem:[%s16842_s7 + $0x5bc] sm:$0xff]  }
  0x99   :  { %783 = vst [vmem:[#allocation6 + $0x5a8] sm:$0xf] %v782_v16  ;;  %v788_v18 = vld [vmem:[%s16842_s7 + $0x5b8] sm:$0xf]  ;;  %v790_v19 = vld [vmem:[%s16842_s7 + $0x5b4] sm:$0xf] }
  0x9a   :  { %785 = vst [vmem:[#allocation6 + $0x5ac] sm:$0xff] %v784_v17   ;;  %789 = vst [vmem:[#allocation6 + $0x5b4] sm:$0xf] %v788_v18  ;;  %v796_v21 = vld [vmem:[%s16842_s7 + $0x5c8] sm:$0xf]  ;;  %v800_v23 = vld [vmem:[%s16842_s7 + $0x5cc] sm:$0xff]  }
  0x9b   :  { %791 = vst [vmem:[#allocation6 + $0x5b8] sm:$0xf] %v790_v19  ;;  %v798_v22 = vld [vmem:[%s16842_s7 + $0x5c4] sm:$0xf]  ;;  %793 = vst [vmem:[#allocation6 + $0x5bc] sm:$0xff] %v792_v20   ;;  %v808_v26 = vld [vmem:[%s16842_s7 + $0x5dc] sm:$0xff]  }
  0x9c   :  { %797 = vst [vmem:[#allocation6 + $0x5c4] sm:$0xf] %v796_v21  ;;  %799 = vst [vmem:[#allocation6 + $0x5c8] sm:$0xf] %v798_v22  ;;  %v804_v24 = vld [vmem:[%s16842_s7 + $0x5d8] sm:$0xf] }
  0x9d   :  { %v806_v25 = vld [vmem:[%s16842_s7 + $0x5d4] sm:$0xf]  ;;  %801 = vst [vmem:[#allocation6 + $0x5cc] sm:$0xff] %v800_v23   ;;  %805 = vst [vmem:[#allocation6 + $0x5d4] sm:$0xf] %v804_v24  ;;  %v816_v29 = vld [vmem:[%s16842_s7 + $0x5ec] sm:$0xff]  }
  0x9e   :  { %807 = vst [vmem:[#allocation6 + $0x5d8] sm:$0xf] %v806_v25  ;;  %v812_v27 = vld [vmem:[%s16842_s7 + $0x5e8] sm:$0xf]  ;;  %v814_v28 = vld [vmem:[%s16842_s7 + $0x5e4] sm:$0xf] }
  0x9f   :  { %809 = vst [vmem:[#allocation6 + $0x5dc] sm:$0xff] %v808_v26   ;;  %813 = vst [vmem:[#allocation6 + $0x5e4] sm:$0xf] %v812_v27  ;;  %v820_v30 = vld [vmem:[%s16842_s7 + $0x5f8] sm:$0xf]  ;;  %v824_v32 = vld [vmem:[%s16842_s7 + $0x5fc] sm:$0xff]  }
  0xa0   :  { %815 = vst [vmem:[#allocation6 + $0x5e8] sm:$0xf] %v814_v28  ;;  %v822_v31 = vld [vmem:[%s16842_s7 + $0x5f4] sm:$0xf]  ;;  %817 = vst [vmem:[#allocation6 + $0x5ec] sm:$0xff] %v816_v29   ;;  %v832_v35 = vld [vmem:[%s16842_s7 + $0x60c] sm:$0xff]  }
  0xa1   :  { %821 = vst [vmem:[#allocation6 + $0x5f4] sm:$0xf] %v820_v30  ;;  %823 = vst [vmem:[#allocation6 + $0x5f8] sm:$0xf] %v822_v31  ;;  %v828_v33 = vld [vmem:[%s16842_s7 + $0x608] sm:$0xf] }
  0xa2   :  { %v830_v34 = vld [vmem:[%s16842_s7 + $0x604] sm:$0xf]  ;;  %825 = vst [vmem:[#allocation6 + $0x5fc] sm:$0xff] %v824_v32   ;;  %829 = vst [vmem:[#allocation6 + $0x604] sm:$0xf] %v828_v33  ;;  %v840_v38 = vld [vmem:[%s16842_s7 + $0x61c] sm:$0xff]  }
  0xa3   :  { %831 = vst [vmem:[#allocation6 + $0x608] sm:$0xf] %v830_v34  ;;  %v836_v36 = vld [vmem:[%s16842_s7 + $0x618] sm:$0xf]  ;;  %v838_v37 = vld [vmem:[%s16842_s7 + $0x614] sm:$0xf] }
  0xa4   :  { %833 = vst [vmem:[#allocation6 + $0x60c] sm:$0xff] %v832_v35   ;;  %837 = vst [vmem:[#allocation6 + $0x614] sm:$0xf] %v836_v36  ;;  %v844_v39 = vld [vmem:[%s16842_s7 + $0x628] sm:$0xf]  ;;  %v848_v41 = vld [vmem:[%s16842_s7 + $0x62c] sm:$0xff]  }
  0xa5   :  { %839 = vst [vmem:[#allocation6 + $0x618] sm:$0xf] %v838_v37  ;;  %v846_v40 = vld [vmem:[%s16842_s7 + $0x624] sm:$0xf]  ;;  %841 = vst [vmem:[#allocation6 + $0x61c] sm:$0xff] %v840_v38   ;;  %v856_v44 = vld [vmem:[%s16842_s7 + $0x63c] sm:$0xff]  }
  0xa6   :  { %845 = vst [vmem:[#allocation6 + $0x624] sm:$0xf] %v844_v39  ;;  %847 = vst [vmem:[#allocation6 + $0x628] sm:$0xf] %v846_v40  ;;  %v852_v42 = vld [vmem:[%s16842_s7 + $0x638] sm:$0xf] }
  0xa7   :  { %v854_v43 = vld [vmem:[%s16842_s7 + $0x634] sm:$0xf]  ;;  %849 = vst [vmem:[#allocation6 + $0x62c] sm:$0xff] %v848_v41   ;;  %853 = vst [vmem:[#allocation6 + $0x634] sm:$0xf] %v852_v42  ;;  %v864_v47 = vld [vmem:[%s16842_s7 + $0x64c] sm:$0xff]  }
  0xa8   :  { %855 = vst [vmem:[#allocation6 + $0x638] sm:$0xf] %v854_v43  ;;  %v860_v45 = vld [vmem:[%s16842_s7 + $0x648] sm:$0xf]  ;;  %v862_v46 = vld [vmem:[%s16842_s7 + $0x644] sm:$0xf] }
  0xa9   :  { %857 = vst [vmem:[#allocation6 + $0x63c] sm:$0xff] %v856_v44   ;;  %861 = vst [vmem:[#allocation6 + $0x644] sm:$0xf] %v860_v45  ;;  %v868_v48 = vld [vmem:[%s16842_s7 + $0x658] sm:$0xf]  ;;  %v872_v50 = vld [vmem:[%s16842_s7 + $0x65c] sm:$0xff]  }
  0xaa   :  { %863 = vst [vmem:[#allocation6 + $0x648] sm:$0xf] %v862_v46  ;;  %v870_v49 = vld [vmem:[%s16842_s7 + $0x654] sm:$0xf]  ;;  %865 = vst [vmem:[#allocation6 + $0x64c] sm:$0xff] %v864_v47   ;;  %v880_v53 = vld [vmem:[%s16842_s7 + $0x66c] sm:$0xff]  }
  0xab   :  { %869 = vst [vmem:[#allocation6 + $0x654] sm:$0xf] %v868_v48  ;;  %871 = vst [vmem:[#allocation6 + $0x658] sm:$0xf] %v870_v49  ;;  %v876_v51 = vld [vmem:[%s16842_s7 + $0x668] sm:$0xf] }
  0xac   :  { %v878_v52 = vld [vmem:[%s16842_s7 + $0x664] sm:$0xf]  ;;  %873 = vst [vmem:[#allocation6 + $0x65c] sm:$0xff] %v872_v50   ;;  %877 = vst [vmem:[#allocation6 + $0x664] sm:$0xf] %v876_v51  ;;  %v888_v56 = vld [vmem:[%s16842_s7 + $0x67c] sm:$0xff]  }
  0xad   :  { %879 = vst [vmem:[#allocation6 + $0x668] sm:$0xf] %v878_v52  ;;  %v884_v54 = vld [vmem:[%s16842_s7 + $0x678] sm:$0xf]  ;;  %v886_v55 = vld [vmem:[%s16842_s7 + $0x674] sm:$0xf] }
  0xae   :  { %881 = vst [vmem:[#allocation6 + $0x66c] sm:$0xff] %v880_v53   ;;  %885 = vst [vmem:[#allocation6 + $0x674] sm:$0xf] %v884_v54  ;;  %v892_v57 = vld [vmem:[%s16842_s7 + $0x688] sm:$0xf]  ;;  %v896_v59 = vld [vmem:[%s16842_s7 + $0x68c] sm:$0xff]  }
  0xaf   :  { %887 = vst [vmem:[#allocation6 + $0x678] sm:$0xf] %v886_v55  ;;  %v894_v58 = vld [vmem:[%s16842_s7 + $0x684] sm:$0xf]  ;;  %889 = vst [vmem:[#allocation6 + $0x67c] sm:$0xff] %v888_v56   ;;  %v904_v62 = vld [vmem:[%s16842_s7 + $0x69c] sm:$0xff]  }
  0xb0   :  { %893 = vst [vmem:[#allocation6 + $0x684] sm:$0xf] %v892_v57  ;;  %895 = vst [vmem:[#allocation6 + $0x688] sm:$0xf] %v894_v58  ;;  %v900_v60 = vld [vmem:[%s16842_s7 + $0x698] sm:$0xf] }
  0xb1   :  { %v902_v61 = vld [vmem:[%s16842_s7 + $0x694] sm:$0xf]  ;;  %897 = vst [vmem:[#allocation6 + $0x68c] sm:$0xff] %v896_v59   ;;  %901 = vst [vmem:[#allocation6 + $0x694] sm:$0xf] %v900_v60  ;;  %v912_v1 = vld [vmem:[%s16842_s7 + $0x6ac] sm:$0xff]  }
  0xb2   :  { %903 = vst [vmem:[#allocation6 + $0x698] sm:$0xf] %v902_v61  ;;  %v908_v63 = vld [vmem:[%s16842_s7 + $0x6a8] sm:$0xf]  ;;  %v910_v0 = vld [vmem:[%s16842_s7 + $0x6a4] sm:$0xf] }
  0xb3   :  { %905 = vst [vmem:[#allocation6 + $0x69c] sm:$0xff] %v904_v62   ;;  %909 = vst [vmem:[#allocation6 + $0x6a4] sm:$0xf] %v908_v63  ;;  %v916_v2 = vld [vmem:[%s16842_s7 + $0x6b8] sm:$0xf]  ;;  %v920_v4 = vld [vmem:[%s16842_s7 + $0x6bc] sm:$0xff]  }
  0xb4   :  { %911 = vst [vmem:[#allocation6 + $0x6a8] sm:$0xf] %v910_v0  ;;  %v918_v3 = vld [vmem:[%s16842_s7 + $0x6b4] sm:$0xf]  ;;  %913 = vst [vmem:[#allocation6 + $0x6ac] sm:$0xff] %v912_v1   ;;  %v928_v7 = vld [vmem:[%s16842_s7 + $0x6cc] sm:$0xff]  }
  0xb5   :  { %917 = vst [vmem:[#allocation6 + $0x6b4] sm:$0xf] %v916_v2  ;;  %919 = vst [vmem:[#allocation6 + $0x6b8] sm:$0xf] %v918_v3  ;;  %v924_v5 = vld [vmem:[%s16842_s7 + $0x6c8] sm:$0xf] }
  0xb6   :  { %v926_v6 = vld [vmem:[%s16842_s7 + $0x6c4] sm:$0xf]  ;;  %921 = vst [vmem:[#allocation6 + $0x6bc] sm:$0xff] %v920_v4   ;;  %925 = vst [vmem:[#allocation6 + $0x6c4] sm:$0xf] %v924_v5  ;;  %v936_v10 = vld [vmem:[%s16842_s7 + $0x6dc] sm:$0xff]  }
  0xb7   :  { %927 = vst [vmem:[#allocation6 + $0x6c8] sm:$0xf] %v926_v6  ;;  %v932_v8 = vld [vmem:[%s16842_s7 + $0x6d8] sm:$0xf]  ;;  %v934_v9 = vld [vmem:[%s16842_s7 + $0x6d4] sm:$0xf] }
  0xb8   :  { %929 = vst [vmem:[#allocation6 + $0x6cc] sm:$0xff] %v928_v7   ;;  %933 = vst [vmem:[#allocation6 + $0x6d4] sm:$0xf] %v932_v8  ;;  %v940_v11 = vld [vmem:[%s16842_s7 + $0x6e8] sm:$0xf]  ;;  %v944_v13 = vld [vmem:[%s16842_s7 + $0x6ec] sm:$0xff]  }
  0xb9   :  { %935 = vst [vmem:[#allocation6 + $0x6d8] sm:$0xf] %v934_v9  ;;  %v942_v12 = vld [vmem:[%s16842_s7 + $0x6e4] sm:$0xf]  ;;  %937 = vst [vmem:[#allocation6 + $0x6dc] sm:$0xff] %v936_v10   ;;  %v952_v16 = vld [vmem:[%s16842_s7 + $0x6fc] sm:$0xff]  }
  0xba   :  { %941 = vst [vmem:[#allocation6 + $0x6e4] sm:$0xf] %v940_v11  ;;  %943 = vst [vmem:[#allocation6 + $0x6e8] sm:$0xf] %v942_v12  ;;  %v948_v14 = vld [vmem:[%s16842_s7 + $0x6f8] sm:$0xf] }
  0xbb   :  { %v950_v15 = vld [vmem:[%s16842_s7 + $0x6f4] sm:$0xf]  ;;  %945 = vst [vmem:[#allocation6 + $0x6ec] sm:$0xff] %v944_v13   ;;  %949 = vst [vmem:[#allocation6 + $0x6f4] sm:$0xf] %v948_v14  ;;  %v960_v19 = vld [vmem:[%s16842_s7 + $0x70c] sm:$0xff]  }
  0xbc   :  { %951 = vst [vmem:[#allocation6 + $0x6f8] sm:$0xf] %v950_v15  ;;  %v956_v17 = vld [vmem:[%s16842_s7 + $0x708] sm:$0xf]  ;;  %v958_v18 = vld [vmem:[%s16842_s7 + $0x704] sm:$0xf] }
  0xbd   :  { %953 = vst [vmem:[#allocation6 + $0x6fc] sm:$0xff] %v952_v16   ;;  %957 = vst [vmem:[#allocation6 + $0x704] sm:$0xf] %v956_v17  ;;  %v964_v20 = vld [vmem:[%s16842_s7 + $0x718] sm:$0xf]  ;;  %v968_v22 = vld [vmem:[%s16842_s7 + $0x71c] sm:$0xff]  }
  0xbe   :  { %959 = vst [vmem:[#allocation6 + $0x708] sm:$0xf] %v958_v18  ;;  %v966_v21 = vld [vmem:[%s16842_s7 + $0x714] sm:$0xf]  ;;  %961 = vst [vmem:[#allocation6 + $0x70c] sm:$0xff] %v960_v19   ;;  %v976_v25 = vld [vmem:[%s16842_s7 + $0x72c] sm:$0xff]  }
  0xbf   :  { %965 = vst [vmem:[#allocation6 + $0x714] sm:$0xf] %v964_v20  ;;  %967 = vst [vmem:[#allocation6 + $0x718] sm:$0xf] %v966_v21  ;;  %v972_v23 = vld [vmem:[%s16842_s7 + $0x728] sm:$0xf] }
  0xc0   :  { %v974_v24 = vld [vmem:[%s16842_s7 + $0x724] sm:$0xf]  ;;  %969 = vst [vmem:[#allocation6 + $0x71c] sm:$0xff] %v968_v22   ;;  %973 = vst [vmem:[#allocation6 + $0x724] sm:$0xf] %v972_v23  ;;  %v984_v28 = vld [vmem:[%s16842_s7 + $0x73c] sm:$0xff]  }
  0xc1   :  { %975 = vst [vmem:[#allocation6 + $0x728] sm:$0xf] %v974_v24  ;;  %v980_v26 = vld [vmem:[%s16842_s7 + $0x738] sm:$0xf]  ;;  %v982_v27 = vld [vmem:[%s16842_s7 + $0x734] sm:$0xf] }
  0xc2   :  { %977 = vst [vmem:[#allocation6 + $0x72c] sm:$0xff] %v976_v25   ;;  %981 = vst [vmem:[#allocation6 + $0x734] sm:$0xf] %v980_v26  ;;  %v988_v29 = vld [vmem:[%s16842_s7 + $0x748] sm:$0xf]  ;;  %v992_v31 = vld [vmem:[%s16842_s7 + $0x74c] sm:$0xff]  }
  0xc3   :  { %983 = vst [vmem:[#allocation6 + $0x738] sm:$0xf] %v982_v27  ;;  %v990_v30 = vld [vmem:[%s16842_s7 + $0x744] sm:$0xf]  ;;  %985 = vst [vmem:[#allocation6 + $0x73c] sm:$0xff] %v984_v28   ;;  %v1000_v34 = vld [vmem:[%s16842_s7 + $0x75c] sm:$0xff]  }
  0xc4   :  { %989 = vst [vmem:[#allocation6 + $0x744] sm:$0xf] %v988_v29  ;;  %991 = vst [vmem:[#allocation6 + $0x748] sm:$0xf] %v990_v30  ;;  %v996_v32 = vld [vmem:[%s16842_s7 + $0x758] sm:$0xf] }
  0xc5   :  { %v998_v33 = vld [vmem:[%s16842_s7 + $0x754] sm:$0xf]  ;;  %993 = vst [vmem:[#allocation6 + $0x74c] sm:$0xff] %v992_v31   ;;  %997 = vst [vmem:[#allocation6 + $0x754] sm:$0xf] %v996_v32  ;;  %v1008_v37 = vld [vmem:[%s16842_s7 + $0x76c] sm:$0xff]  }
  0xc6   :  { %999 = vst [vmem:[#allocation6 + $0x758] sm:$0xf] %v998_v33  ;;  %v1004_v35 = vld [vmem:[%s16842_s7 + $0x768] sm:$0xf]  ;;  %v1006_v36 = vld [vmem:[%s16842_s7 + $0x764] sm:$0xf] }
  0xc7   :  { %1001 = vst [vmem:[#allocation6 + $0x75c] sm:$0xff] %v1000_v34   ;;  %1005 = vst [vmem:[#allocation6 + $0x764] sm:$0xf] %v1004_v35  ;;  %v1012_v38 = vld [vmem:[%s16842_s7 + $0x778] sm:$0xf]  ;;  %v1016_v40 = vld [vmem:[%s16842_s7 + $0x77c] sm:$0xff]  }
  0xc8   :  { %1007 = vst [vmem:[#allocation6 + $0x768] sm:$0xf] %v1006_v36  ;;  %v1014_v39 = vld [vmem:[%s16842_s7 + $0x774] sm:$0xf]  ;;  %1009 = vst [vmem:[#allocation6 + $0x76c] sm:$0xff] %v1008_v37   ;;  %v1024_v43 = vld [vmem:[%s16842_s7 + $0x78c] sm:$0xff]  }
  0xc9   :  { %1013 = vst [vmem:[#allocation6 + $0x774] sm:$0xf] %v1012_v38  ;;  %1015 = vst [vmem:[#allocation6 + $0x778] sm:$0xf] %v1014_v39  ;;  %v1020_v41 = vld [vmem:[%s16842_s7 + $0x788] sm:$0xf] }
  0xca   :  { %v1022_v42 = vld [vmem:[%s16842_s7 + $0x784] sm:$0xf]  ;;  %1017 = vst [vmem:[#allocation6 + $0x77c] sm:$0xff] %v1016_v40   ;;  %1021 = vst [vmem:[#allocation6 + $0x784] sm:$0xf] %v1020_v41  ;;  %v1032_v46 = vld [vmem:[%s16842_s7 + $0x79c] sm:$0xff]  }
  0xcb   :  { %1023 = vst [vmem:[#allocation6 + $0x788] sm:$0xf] %v1022_v42  ;;  %v1028_v44 = vld [vmem:[%s16842_s7 + $0x798] sm:$0xf]  ;;  %v1030_v45 = vld [vmem:[%s16842_s7 + $0x794] sm:$0xf] }
  0xcc   :  { %1025 = vst [vmem:[#allocation6 + $0x78c] sm:$0xff] %v1024_v43   ;;  %1029 = vst [vmem:[#allocation6 + $0x794] sm:$0xf] %v1028_v44  ;;  %v1036_v47 = vld [vmem:[%s16842_s7 + $0x7a8] sm:$0xf]  ;;  %v1040_v49 = vld [vmem:[%s16842_s7 + $0x7ac] sm:$0xff]  }
  0xcd   :  { %1031 = vst [vmem:[#allocation6 + $0x798] sm:$0xf] %v1030_v45  ;;  %v1038_v48 = vld [vmem:[%s16842_s7 + $0x7a4] sm:$0xf]  ;;  %1033 = vst [vmem:[#allocation6 + $0x79c] sm:$0xff] %v1032_v46   ;;  %v1048_v52 = vld [vmem:[%s16842_s7 + $0x7bc] sm:$0xff]  }
  0xce   :  { %1037 = vst [vmem:[#allocation6 + $0x7a4] sm:$0xf] %v1036_v47  ;;  %1039 = vst [vmem:[#allocation6 + $0x7a8] sm:$0xf] %v1038_v48  ;;  %v1044_v50 = vld [vmem:[%s16842_s7 + $0x7b8] sm:$0xf] }
  0xcf   :  { %v1046_v51 = vld [vmem:[%s16842_s7 + $0x7b4] sm:$0xf]  ;;  %1041 = vst [vmem:[#allocation6 + $0x7ac] sm:$0xff] %v1040_v49   ;;  %1045 = vst [vmem:[#allocation6 + $0x7b4] sm:$0xf] %v1044_v50  ;;  %v1056_v55 = vld [vmem:[%s16842_s7 + $0x7cc] sm:$0xff]  }
  0xd0   :  { %1047 = vst [vmem:[#allocation6 + $0x7b8] sm:$0xf] %v1046_v51  ;;  %v1052_v53 = vld [vmem:[%s16842_s7 + $0x7c8] sm:$0xf]  ;;  %v1054_v54 = vld [vmem:[%s16842_s7 + $0x7c4] sm:$0xf] }
  0xd1   :  { %1049 = vst [vmem:[#allocation6 + $0x7bc] sm:$0xff] %v1048_v52   ;;  %1053 = vst [vmem:[#allocation6 + $0x7c4] sm:$0xf] %v1052_v53  ;;  %v1060_v56 = vld [vmem:[%s16842_s7 + $0x7d8] sm:$0xf]  ;;  %v1064_v58 = vld [vmem:[%s16842_s7 + $0x7dc] sm:$0xff]  }
  0xd2   :  { %1055 = vst [vmem:[#allocation6 + $0x7c8] sm:$0xf] %v1054_v54  ;;  %v1062_v57 = vld [vmem:[%s16842_s7 + $0x7d4] sm:$0xf]  ;;  %1057 = vst [vmem:[#allocation6 + $0x7cc] sm:$0xff] %v1056_v55   ;;  %v1072_v61 = vld [vmem:[%s16842_s7 + $0x7ec] sm:$0xff]  }
  0xd3   :  { %1061 = vst [vmem:[#allocation6 + $0x7d4] sm:$0xf] %v1060_v56  ;;  %1063 = vst [vmem:[#allocation6 + $0x7d8] sm:$0xf] %v1062_v57  ;;  %v1068_v59 = vld [vmem:[%s16842_s7 + $0x7e8] sm:$0xf] }
  0xd4   :  { %v1070_v60 = vld [vmem:[%s16842_s7 + $0x7e4] sm:$0xf]  ;;  %1065 = vst [vmem:[#allocation6 + $0x7dc] sm:$0xff] %v1064_v58   ;;  %1069 = vst [vmem:[#allocation6 + $0x7e4] sm:$0xf] %v1068_v59 }
  0xd5   :  { %1071 = vst [vmem:[#allocation6 + $0x7e8] sm:$0xf] %v1070_v60  ;;  %v1076_v62 = vld [vmem:[%s16842_s7 + $0x7f8] sm:$0xf]  ;;  %v1078_v63 = vld [vmem:[%s16842_s7 + $0x7f4] sm:$0xf] }
  0xd6   :  { %1073 = vst [vmem:[#allocation6 + $0x7ec] sm:$0xff] %v1072_v61   ;;  %1077 = vst [vmem:[#allocation6 + $0x7f4] sm:$0xf] %v1076_v62  ;;  %v1080_v0 = vld [vmem:[%s16842_s7 + $0x7fc] sm:$0xf] }
  0xd7   :  { %1079 = vst [vmem:[#allocation6 + $0x7f8] sm:$0xf] %v1078_v63  ;;  %1081 = vst [vmem:[#allocation6 + $0x7fc] sm:$0xf] %v1080_v0 }
  0xd8   :  { %4217 = vsyncadd [#allocation7], 32768  ;;  %v11677_v1 = vld [vmem:[%s16836_s1] sm:$0xff]   ;;  %vm4691_vm0 = vcmask 130048   ;;  %vm4218_vm1 = vcmask 521216   ;;  %v13335_v3 = vld [vmem:[%s16835_s0 + $0x8] sm:$0xff]  }
  0xd9   :  { %v11678_v2 = vld [vmem:[%s16835_s0] sm:$0xff]   ;;  %11553 = vmatprep.subr.bf16.mxu1 %v11677_v1  ;;  %v13341_v4 = vld [vmem:[%s16835_s0 + $0x10] sm:$0xff]   ;;  %v12104_v5 = vmov 0.0   ;;  %v11681_v6 = vld [vmem:[%s16835_s0 + $0x18] sm:$0xff]   ;;  %vm16899_vm2 = vcmask 523264   ;;  %vm5888_vm3 = vcmask 519168  }
  0xda   :  { %11554 = vmatpush3.bf16.msra.mxu1 %v11677_v1  ;;  %11555 = vmatprep.mubr.msk.bf16.mxu1 %vm4691_vm0, %v11678_v2  ;;  %4226 = vst.msk [vmem:[#allocation2 + $0x38] sm:$0x3f] %vm4218_vm1, %v12104_v5  ;;  %4227 = vst.msk [vmem:[#allocation2 + $0x40] sm:$0x3f] %vm4218_vm1, %v12104_v5  ;;  %v11682_v7 = vld [vmem:[%s16835_s0 + $0x20] sm:$0xff]   ;;  %v11683_v8 = vld [vmem:[%s16835_s0 + $0x28] sm:$0xff]  }
  0xdb   :  { %4220 = vst.msk [vmem:[#allocation2 + $0x8] sm:$0x3f] %vm4218_vm1, %v12104_v5  ;;  %4221 = vst.msk [vmem:[#allocation2 + $0x10] sm:$0x3f] %vm4218_vm1, %v12104_v5  ;;  %v11684_v9 = vld [vmem:[%s16835_s0 + $0x30] sm:$0xff]   ;;  %v11685_v10 = vld [vmem:[%s16835_s0 + $0x38] sm:$0xff]  }
  0xdc   :  { %4222 = vst.msk [vmem:[#allocation2 + $0x18] sm:$0x3f] %vm4218_vm1, %v12104_v5  ;;  %4223 = vst.msk [vmem:[#allocation2 + $0x20] sm:$0x3f] %vm4218_vm1, %v12104_v5  ;;  %v11686_v11 = vld [vmem:[%s16835_s0 + $0x40] sm:$0xff]   ;;  %v11687_v12 = vld [vmem:[%s16835_s0 + $0x48] sm:$0xff]  }
  0xdd   :  { %4224 = vst.msk [vmem:[#allocation2 + $0x28] sm:$0x3f] %vm4218_vm1, %v12104_v5  ;;  %4228 = vst.msk [vmem:[#allocation2 + $0x48] sm:$0x3f] %vm4218_vm1, %v12104_v5  ;;  %11556 = vmatmul.mubr.msk.bf16.vlgmr.msra.gmra.mrb[0].mxu1 %vm4691_vm0, %v13335_v3  ;;  %v11688_v13 = vld [vmem:[%s16835_s0 + $0x50] sm:$0xff]   ;;  %v11689_v14 = vld [vmem:[%s16835_s0 + $0x58] sm:$0xff]  }
  0xde   :  { %4229 = vst.msk [vmem:[#allocation2 + $0x50] sm:$0x3f] %vm4218_vm1, %v12104_v5  ;;  %4230 = vst.msk [vmem:[#allocation2 + $0x58] sm:$0x3f] %vm4218_vm1, %v12104_v5  ;;  %11559 = vmatprep.mubr.msk.bf16.mxu1 %vm4691_vm0, %v13341_v4  ;;  %v11690_v15 = vld [vmem:[%s16835_s0 + $0x60] sm:$0xff]   ;;  %v11691_v16 = vld [vmem:[%s16835_s0 + $0x68] sm:$0xff]  }
  0xdf   :  { %4232 = vst.msk [vmem:[#allocation2 + $0x68] sm:$0x3f] %vm4218_vm1, %v12104_v5  ;;  %4233 = vst.msk [vmem:[#allocation2 + $0x70] sm:$0x3f] %vm4218_vm1, %v12104_v5  ;;  %v11692_v17 = vld [vmem:[%s16835_s0 + $0x70] sm:$0xff]   ;;  %v11693_v18 = vld [vmem:[%s16835_s0 + $0x78] sm:$0xff]  }
  0xe0   :  { %4234 = vst.msk [vmem:[#allocation2 + $0x78] sm:$0x3f] %vm4218_vm1, %v12104_v5  ;;  %4235 = vst.msk [vmem:[#allocation2 + $0x80] sm:$0x3f] %vm4218_vm1, %v12104_v5  ;;  %v11694_v19 = vld [vmem:[%s16835_s0 + $0x80] sm:$0xff]   ;;  %v11695_v20 = vld [vmem:[%s16835_s0 + $0x88] sm:$0xff]  }
  0xe1   :  { %4236 = vst.msk [vmem:[#allocation2 + $0x88] sm:$0x3f] %vm4218_vm1, %v12104_v5  ;;  %4238 = vst.msk [vmem:[#allocation2 + $0x98] sm:$0x3f] %vm4218_vm1, %v12104_v5  ;;  %v11696_v21 = vld [vmem:[%s16835_s0 + $0x90] sm:$0xff]   ;;  %v11697_v22 = vld [vmem:[%s16835_s0 + $0x98] sm:$0xff]  }
  0xe2   :  { %4239 = vst.msk [vmem:[#allocation2 + $0xa0] sm:$0x3f] %vm4218_vm1, %v12104_v5  ;;  %4240 = vst.msk [vmem:[#allocation2 + $0xa8] sm:$0x3f] %vm4218_vm1, %v12104_v5  ;;  %v11698_v23 = vld [vmem:[%s16835_s0 + $0xa0] sm:$0xff]   ;;  %v11699_v24 = vld [vmem:[%s16835_s0 + $0xa8] sm:$0xff]  }
  0xe3   :  { %4241 = vst.msk [vmem:[#allocation2 + $0xb0] sm:$0x3f] %vm4218_vm1, %v12104_v5  ;;  %4242 = vst.msk [vmem:[#allocation2 + $0xb8] sm:$0x3f] %vm4218_vm1, %v12104_v5  ;;  %v11700_v25 = vld [vmem:[%s16835_s0 + $0xb0] sm:$0xff]   ;;  %v11701_v26 = vld [vmem:[%s16835_s0 + $0xb8] sm:$0xff]  }
  0xe4   :  { %4244 = vst.msk [vmem:[#allocation2 + $0xc8] sm:$0x3f] %vm4218_vm1, %v12104_v5  ;;  %4245 = vst.msk [vmem:[#allocation2 + $0xd0] sm:$0x3f] %vm4218_vm1, %v12104_v5  ;;  %v11702_v27 = vld [vmem:[%s16835_s0 + $0xc0] sm:$0xff]   ;;  %v11703_v28 = vld [vmem:[%s16835_s0 + $0xc8] sm:$0xff]  }
  0xe5   :  { %4246 = vst.msk [vmem:[#allocation2 + $0xd8] sm:$0x3f] %vm4218_vm1, %v12104_v5  ;;  %4247 = vst.msk [vmem:[#allocation2 + $0xe0] sm:$0x3f] %vm4218_vm1, %v12104_v5  ;;  %11560 = vmatmul.mubr.msk.bf16.gmra.mrb[4].mxu1 %vm4691_vm0, %v11681_v6  ;;  %v11704_v29 = vld [vmem:[%s16835_s0 + $0xd0] sm:$0xff]   ;;  %v11705_v30 = vld [vmem:[%s16835_s0 + $0xd8] sm:$0xff]  }
  0xe6   :  { %4248 = vst.msk [vmem:[#allocation2 + $0xe8] sm:$0x3f] %vm4218_vm1, %v12104_v5  ;;  %4250 = vst.msk [vmem:[#allocation2 + $0xf8] sm:$0x3f] %vm4218_vm1, %v12104_v5  ;;  %11563 = vmatprep.mubr.msk.bf16.mxu1 %vm4691_vm0, %v11682_v7  ;;  %v11706_v31 = vld [vmem:[%s16835_s0 + $0xe0] sm:$0xff]   ;;  %v11707_v32 = vld [vmem:[%s16835_s0 + $0xe8] sm:$0xff]  }
  0xe7   :  { %4251 = vst.msk [vmem:[#allocation2 + $0x100] sm:$0x3f] %vm4218_vm1, %v12104_v5  ;;  %4252 = vst.msk [vmem:[#allocation2 + $0x108] sm:$0x3f] %vm4218_vm1, %v12104_v5  ;;  %v11708_v33 = vld [vmem:[%s16835_s0 + $0xf0] sm:$0xff]   ;;  %v11709_v34 = vld [vmem:[%s16835_s0 + $0xf8] sm:$0xff]  }
  0xe8   :  { %4253 = vst.msk [vmem:[#allocation2 + $0x110] sm:$0x3f] %vm4218_vm1, %v12104_v5  ;;  %4254 = vst.msk [vmem:[#allocation2 + $0x118] sm:$0x3f] %vm4218_vm1, %v12104_v5 }
  0xe9   :  { %4256 = vst.msk [vmem:[#allocation2 + $0x128] sm:$0x3f] %vm4218_vm1, %v12104_v5  ;;  %4257 = vst.msk [vmem:[#allocation2 + $0x130] sm:$0x3f] %vm4218_vm1, %v12104_v5 }
  0xea   :  { %4258 = vst.msk [vmem:[#allocation2 + $0x138] sm:$0x3f] %vm4218_vm1, %v12104_v5  ;;  %4259 = vst.msk [vmem:[#allocation2 + $0x140] sm:$0x3f] %vm4218_vm1, %v12104_v5 }
  0xeb   :  { %4260 = vst.msk [vmem:[#allocation2 + $0x148] sm:$0x3f] %vm4218_vm1, %v12104_v5  ;;  %4262 = vst.msk [vmem:[#allocation2 + $0x158] sm:$0x3f] %vm4218_vm1, %v12104_v5 }
  0xec   :  { %4263 = vst.msk [vmem:[#allocation2 + $0x160] sm:$0x3f] %vm4218_vm1, %v12104_v5  ;;  %4264 = vst.msk [vmem:[#allocation2 + $0x168] sm:$0x3f] %vm4218_vm1, %v12104_v5 }
  0xed   :  { %4265 = vst.msk [vmem:[#allocation2 + $0x170] sm:$0x3f] %vm4218_vm1, %v12104_v5  ;;  %4266 = vst.msk [vmem:[#allocation2 + $0x178] sm:$0x3f] %vm4218_vm1, %v12104_v5  ;;  %11564 = vmatmul.mubr.msk.bf16.gmra.mrb[8].mxu1 %vm4691_vm0, %v11683_v8 }
  0xee   :  { %4268 = vst.msk [vmem:[#allocation2 + $0x188] sm:$0x3f] %vm4218_vm1, %v12104_v5  ;;  %4269 = vst.msk [vmem:[#allocation2 + $0x190] sm:$0x3f] %vm4218_vm1, %v12104_v5  ;;  %11567 = vmatprep.mubr.msk.bf16.mxu1 %vm4691_vm0, %v11684_v9 }
  0xef   :  { %4270 = vst.msk [vmem:[#allocation2 + $0x198] sm:$0x3f] %vm4218_vm1, %v12104_v5  ;;  %4271 = vst.msk [vmem:[#allocation2 + $0x1a0] sm:$0x3f] %vm4218_vm1, %v12104_v5 }
  0xf0   :  { %4274 = vst.msk [vmem:[#allocation2 + $0x1b8] sm:$0x3f] %vm4218_vm1, %v12104_v5  ;;  %4275 = vst.msk [vmem:[#allocation2 + $0x1c0] sm:$0x3f] %vm4218_vm1, %v12104_v5 }
  0xf1   :  { %4276 = vst.msk [vmem:[#allocation2 + $0x1c8] sm:$0x3f] %vm4218_vm1, %v12104_v5  ;;  %4277 = vst.msk [vmem:[#allocation2 + $0x1d0] sm:$0x3f] %vm4218_vm1, %v12104_v5 }
  0xf2   :  { %4280 = vst.msk [vmem:[#allocation2 + $0x1e8] sm:$0x3f] %vm4218_vm1, %v12104_v5  ;;  %4281 = vst.msk [vmem:[#allocation2 + $0x1f0] sm:$0x3f] %vm4218_vm1, %v12104_v5 }
  0xf3   :  { %4282 = vst.msk [vmem:[#allocation2 + $0x1f8] sm:$0x3f] %vm4218_vm1, %v12104_v5  ;;  %4283 = vst.msk [vmem:[#allocation2 + $0x200] sm:$0x3f] %vm4218_vm1, %v12104_v5 }
  0xf4   :  { %4286 = vst.msk [vmem:[#allocation2 + $0x218] sm:$0x3f] %vm4218_vm1, %v12104_v5  ;;  %4287 = vst.msk [vmem:[#allocation2 + $0x220] sm:$0x3f] %vm4218_vm1, %v12104_v5 }
  0xf5   :  { %4288 = vst.msk [vmem:[#allocation2 + $0x228] sm:$0x3f] %vm4218_vm1, %v12104_v5  ;;  %4289 = vst.msk [vmem:[#allocation2 + $0x230] sm:$0x3f] %vm4218_vm1, %v12104_v5  ;;  %11568 = vmatmul.mubr.msk.bf16.gmra.mrb[12].mxu1 %vm4691_vm0, %v11685_v10 }
  0xf6   :  { %4292 = vst.msk [vmem:[#allocation2 + $0x248] sm:$0x3f] %vm4218_vm1, %v12104_v5  ;;  %4293 = vst.msk [vmem:[#allocation2 + $0x250] sm:$0x3f] %vm4218_vm1, %v12104_v5  ;;  %11571 = vmatprep.mubr.msk.bf16.mxu1 %vm4691_vm0, %v11686_v11 }
  0xf7   :  { %4294 = vst.msk [vmem:[#allocation2 + $0x258] sm:$0x3f] %vm4218_vm1, %v12104_v5  ;;  %4295 = vst.msk [vmem:[#allocation2 + $0x260] sm:$0x3f] %vm4218_vm1, %v12104_v5 }
  0xf8   :  { %4298 = vst.msk [vmem:[#allocation2 + $0x278] sm:$0x3f] %vm4218_vm1, %v12104_v5  ;;  %4299 = vst.msk [vmem:[#allocation2 + $0x280] sm:$0x3f] %vm4218_vm1, %v12104_v5 }
  0xf9   :  { %4300 = vst.msk [vmem:[#allocation2 + $0x288] sm:$0x3f] %vm4218_vm1, %v12104_v5  ;;  %4301 = vst.msk [vmem:[#allocation2 + $0x290] sm:$0x3f] %vm4218_vm1, %v12104_v5 }
  0xfa   :  { %4304 = vst.msk [vmem:[#allocation2 + $0x2a8] sm:$0x3f] %vm4218_vm1, %v12104_v5  ;;  %4305 = vst.msk [vmem:[#allocation2 + $0x2b0] sm:$0x3f] %vm4218_vm1, %v12104_v5 }
  0xfb   :  { %4306 = vst.msk [vmem:[#allocation2 + $0x2b8] sm:$0x3f] %vm4218_vm1, %v12104_v5  ;;  %4307 = vst.msk [vmem:[#allocation2 + $0x2c0] sm:$0x3f] %vm4218_vm1, %v12104_v5 }
  0xfc   :  { %4310 = vst.msk [vmem:[#allocation2 + $0x2d8] sm:$0x3f] %vm4218_vm1, %v12104_v5  ;;  %4311 = vst.msk [vmem:[#allocation2 + $0x2e0] sm:$0x3f] %vm4218_vm1, %v12104_v5 }
  0xfd   :  { %4312 = vst.msk [vmem:[#allocation2 + $0x2e8] sm:$0x3f] %vm4218_vm1, %v12104_v5  ;;  %4313 = vst.msk [vmem:[#allocation2 + $0x2f0] sm:$0x3f] %vm4218_vm1, %v12104_v5  ;;  %11572 = vmatmul.mubr.msk.bf16.gmra.mrb[16].mxu1 %vm4691_vm0, %v11687_v12 }
  0xfe   :  { %4316 = vst.msk [vmem:[#allocation2 + $0x308] sm:$0x3f] %vm4218_vm1, %v12104_v5  ;;  %4317 = vst.msk [vmem:[#allocation2 + $0x310] sm:$0x3f] %vm4218_vm1, %v12104_v5  ;;  %11575 = vmatprep.mubr.msk.bf16.mxu1 %vm4691_vm0, %v11688_v13 }
  0xff   :  { %4318 = vst.msk [vmem:[#allocation2 + $0x318] sm:$0x3f] %vm4218_vm1, %v12104_v5  ;;  %4319 = vst.msk [vmem:[#allocation2 + $0x320] sm:$0x3f] %vm4218_vm1, %v12104_v5 }
 0x100   :  { %4322 = vst.msk [vmem:[#allocation2 + $0x338] sm:$0x3f] %vm4218_vm1, %v12104_v5  ;;  %4323 = vst.msk [vmem:[#allocation2 + $0x340] sm:$0x3f] %vm4218_vm1, %v12104_v5 }
 0x101   :  { %4324 = vst.msk [vmem:[#allocation2 + $0x348] sm:$0x3f] %vm4218_vm1, %v12104_v5  ;;  %4325 = vst.msk [vmem:[#allocation2 + $0x350] sm:$0x3f] %vm4218_vm1, %v12104_v5 }
 0x102   :  { %4328 = vst.msk [vmem:[#allocation2 + $0x368] sm:$0x3f] %vm4218_vm1, %v12104_v5  ;;  %4329 = vst.msk [vmem:[#allocation2 + $0x370] sm:$0x3f] %vm4218_vm1, %v12104_v5 }
 0x103   :  { %4330 = vst.msk [vmem:[#allocation2 + $0x378] sm:$0x3f] %vm4218_vm1, %v12104_v5  ;;  %4331 = vst.msk [vmem:[#allocation2 + $0x380] sm:$0x3f] %vm4218_vm1, %v12104_v5 }
 0x104   :  { %4334 = vst.msk [vmem:[#allocation2 + $0x398] sm:$0x3f] %vm4218_vm1, %v12104_v5  ;;  %4335 = vst.msk [vmem:[#allocation2 + $0x3a0] sm:$0x3f] %vm4218_vm1, %v12104_v5 }
 0x105   :  { %4336 = vst.msk [vmem:[#allocation2 + $0x3a8] sm:$0x3f] %vm4218_vm1, %v12104_v5  ;;  %4337 = vst.msk [vmem:[#allocation2 + $0x3b0] sm:$0x3f] %vm4218_vm1, %v12104_v5  ;;  %11576 = vmatmul.mubr.msk.bf16.gmra.mrb[20].mxu1 %vm4691_vm0, %v11689_v14 }
 0x106   :  { %4340 = vst.msk [vmem:[#allocation2 + $0x3c8] sm:$0x3f] %vm4218_vm1, %v12104_v5  ;;  %4341 = vst.msk [vmem:[#allocation2 + $0x3d0] sm:$0x3f] %vm4218_vm1, %v12104_v5  ;;  %11579 = vmatprep.mubr.msk.bf16.mxu1 %vm4691_vm0, %v11690_v15 }
 0x107   :  { %4342 = vst.msk [vmem:[#allocation2 + $0x3d8] sm:$0x3f] %vm4218_vm1, %v12104_v5  ;;  %4343 = vst.msk [vmem:[#allocation2 + $0x3e0] sm:$0x3f] %vm4218_vm1, %v12104_v5 }
 0x108   :  { %4346 = vst.msk [vmem:[#allocation2 + $0x3f8] sm:$0x3f] %vm4218_vm1, %v12104_v5  ;;  %4347 = vst.msk [vmem:[#allocation2 + $0x400] sm:$0x3f] %vm4218_vm1, %v12104_v5 }
 0x109   :  { %4348 = vst.msk [vmem:[#allocation2 + $0x408] sm:$0x3f] %vm4218_vm1, %v12104_v5  ;;  %4349 = vst.msk [vmem:[#allocation2 + $0x410] sm:$0x3f] %vm4218_vm1, %v12104_v5 }
 0x10a   :  { %4352 = vst.msk [vmem:[#allocation2 + $0x428] sm:$0x3f] %vm4218_vm1, %v12104_v5  ;;  %4353 = vst.msk [vmem:[#allocation2 + $0x430] sm:$0x3f] %vm4218_vm1, %v12104_v5 }
 0x10b   :  { %4354 = vst.msk [vmem:[#allocation2 + $0x438] sm:$0x3f] %vm4218_vm1, %v12104_v5  ;;  %4355 = vst.msk [vmem:[#allocation2 + $0x440] sm:$0x3f] %vm4218_vm1, %v12104_v5 }
 0x10c   :  { %4358 = vst.msk [vmem:[#allocation2 + $0x458] sm:$0x3f] %vm4218_vm1, %v12104_v5  ;;  %4359 = vst.msk [vmem:[#allocation2 + $0x460] sm:$0x3f] %vm4218_vm1, %v12104_v5 }
 0x10d   :  { %4360 = vst.msk [vmem:[#allocation2 + $0x468] sm:$0x3f] %vm4218_vm1, %v12104_v5  ;;  %4361 = vst.msk [vmem:[#allocation2 + $0x470] sm:$0x3f] %vm4218_vm1, %v12104_v5  ;;  %11580 = vmatmul.mubr.msk.bf16.gmra.mrb[24].mxu1 %vm4691_vm0, %v11691_v16 }
 0x10e   :  { %4363 = vst.msk [vmem:[#allocation2 + $0x480] sm:$0x3f] %vm4218_vm1, %v12104_v5  ;;  %4364 = vst.msk [vmem:[#allocation2 + $0x488] sm:$0x3f] %vm4218_vm1, %v12104_v5  ;;  %11583 = vmatprep.mubr.msk.bf16.mxu1 %vm4691_vm0, %v11692_v17 }
 0x10f   :  { %4365 = vst.msk [vmem:[#allocation2 + $0x490] sm:$0x3f] %vm4218_vm1, %v12104_v5  ;;  %4366 = vst.msk [vmem:[#allocation2 + $0x498] sm:$0x3f] %vm4218_vm1, %v12104_v5 }
 0x110   :  { %4367 = vst.msk [vmem:[#allocation2 + $0x4a0] sm:$0x3f] %vm4218_vm1, %v12104_v5  ;;  %4369 = vst.msk [vmem:[#allocation2 + $0x4b0] sm:$0x3f] %vm4218_vm1, %v12104_v5 }
 0x111   :  { %4370 = vst.msk [vmem:[#allocation2 + $0x4b8] sm:$0x3f] %vm4218_vm1, %v12104_v5  ;;  %4371 = vst.msk [vmem:[#allocation2 + $0x4c0] sm:$0x3f] %vm4218_vm1, %v12104_v5 }
 0x112   :  { %4372 = vst.msk [vmem:[#allocation2 + $0x4c8] sm:$0x3f] %vm4218_vm1, %v12104_v5  ;;  %4373 = vst.msk [vmem:[#allocation2 + $0x4d0] sm:$0x3f] %vm4218_vm1, %v12104_v5 }
 0x113   :  { %4375 = vst.msk [vmem:[#allocation2 + $0x4e0] sm:$0x3f] %vm4218_vm1, %v12104_v5  ;;  %4376 = vst.msk [vmem:[#allocation2 + $0x4e8] sm:$0x3f] %vm4218_vm1, %v12104_v5 }
 0x114   :  { %4377 = vst.msk [vmem:[#allocation2 + $0x4f0] sm:$0x3f] %vm4218_vm1, %v12104_v5  ;;  %4378 = vst.msk [vmem:[#allocation2 + $0x4f8] sm:$0x3f] %vm4218_vm1, %v12104_v5 }
 0x115   :  { %4379 = vst.msk [vmem:[#allocation2 + $0x500] sm:$0x3f] %vm4218_vm1, %v12104_v5  ;;  %4381 = vst.msk [vmem:[#allocation2 + $0x510] sm:$0x3f] %vm4218_vm1, %v12104_v5  ;;  %11584 = vmatmul.mubr.msk.bf16.gmra.mrb[28].mxu1 %vm4691_vm0, %v11693_v18 }
 0x116   :  { %4382 = vst.msk [vmem:[#allocation2 + $0x518] sm:$0x3f] %vm4218_vm1, %v12104_v5  ;;  %4383 = vst.msk [vmem:[#allocation2 + $0x520] sm:$0x3f] %vm4218_vm1, %v12104_v5  ;;  %11587 = vmatprep.mubr.msk.bf16.mxu1 %vm4691_vm0, %v11694_v19 }
 0x117   :  { %4384 = vst.msk [vmem:[#allocation2 + $0x528] sm:$0x3f] %vm4218_vm1, %v12104_v5  ;;  %4385 = vst.msk [vmem:[#allocation2 + $0x530] sm:$0x3f] %vm4218_vm1, %v12104_v5 }
 0x118   :  { %4387 = vst.msk [vmem:[#allocation2 + $0x540] sm:$0x3f] %vm4218_vm1, %v12104_v5  ;;  %4388 = vst.msk [vmem:[#allocation2 + $0x548] sm:$0x3f] %vm4218_vm1, %v12104_v5 }
 0x119   :  { %4389 = vst.msk [vmem:[#allocation2 + $0x550] sm:$0x3f] %vm4218_vm1, %v12104_v5  ;;  %4390 = vst.msk [vmem:[#allocation2 + $0x558] sm:$0x3f] %vm4218_vm1, %v12104_v5 }
 0x11a   :  { %4391 = vst.msk [vmem:[#allocation2 + $0x560] sm:$0x3f] %vm4218_vm1, %v12104_v5  ;;  %4393 = vst.msk [vmem:[#allocation2 + $0x570] sm:$0x3f] %vm4218_vm1, %v12104_v5 }
 0x11b   :  { %4394 = vst.msk [vmem:[#allocation2 + $0x578] sm:$0x3f] %vm4218_vm1, %v12104_v5  ;;  %4395 = vst.msk [vmem:[#allocation2 + $0x580] sm:$0x3f] %vm4218_vm1, %v12104_v5 }
 0x11c   :  { %4396 = vst.msk [vmem:[#allocation2 + $0x588] sm:$0x3f] %vm4218_vm1, %v12104_v5  ;;  %4397 = vst.msk [vmem:[#allocation2 + $0x590] sm:$0x3f] %vm4218_vm1, %v12104_v5 }
 0x11d   :  { %4399 = vst.msk [vmem:[#allocation2 + $0x5a0] sm:$0x3f] %vm4218_vm1, %v12104_v5  ;;  %4400 = vst.msk [vmem:[#allocation2 + $0x5a8] sm:$0x3f] %vm4218_vm1, %v12104_v5  ;;  %11588 = vmatmul.mubr.msk.bf16.gmra.mrb[32].mxu1 %vm4691_vm0, %v11695_v20 }
 0x11e   :  { %4401 = vst.msk [vmem:[#allocation2 + $0x5b0] sm:$0x3f] %vm4218_vm1, %v12104_v5  ;;  %4402 = vst.msk [vmem:[#allocation2 + $0x5b8] sm:$0x3f] %vm4218_vm1, %v12104_v5  ;;  %11591 = vmatprep.mubr.msk.bf16.mxu1 %vm4691_vm0, %v11696_v21 }
 0x11f   :  { %4403 = vst.msk [vmem:[#allocation2 + $0x5c0] sm:$0x3f] %vm4218_vm1, %v12104_v5  ;;  %4405 = vst.msk [vmem:[#allocation2 + $0x5d0] sm:$0x3f] %vm4218_vm1, %v12104_v5 }
 0x120   :  { %4406 = vst.msk [vmem:[#allocation2 + $0x5d8] sm:$0x3f] %vm4218_vm1, %v12104_v5  ;;  %4407 = vst.msk [vmem:[#allocation2 + $0x5e0] sm:$0x3f] %vm4218_vm1, %v12104_v5 }
 0x121   :  { %4408 = vst.msk [vmem:[#allocation2 + $0x5e8] sm:$0x3f] %vm4218_vm1, %v12104_v5  ;;  %4409 = vst.msk [vmem:[#allocation2 + $0x5f0] sm:$0x3f] %vm4218_vm1, %v12104_v5 }
 0x122   :  { %4412 = vst [vmem:[#allocation3 + $0x8] sm:$0x3f] %v12104_v5  ;;  %4413 = vst [vmem:[#allocation3 + $0x10] sm:$0x3f] %v12104_v5 }
 0x123   :  { %4414 = vst [vmem:[#allocation3 + $0x18] sm:$0x3f] %v12104_v5  ;;  %4415 = vst [vmem:[#allocation3 + $0x20] sm:$0x3f] %v12104_v5 }
 0x124   :  { %4416 = vst [vmem:[#allocation3 + $0x28] sm:$0x3f] %v12104_v5  ;;  %4418 = vst [vmem:[#allocation3 + $0x38] sm:$0x3f] %v12104_v5 }
 0x125   :  { %4419 = vst [vmem:[#allocation3 + $0x40] sm:$0x3f] %v12104_v5  ;;  %4420 = vst [vmem:[#allocation3 + $0x48] sm:$0x3f] %v12104_v5  ;;  %11592 = vmatmul.mubr.msk.bf16.gmra.mrb[36].mxu1 %vm4691_vm0, %v11697_v22 }
 0x126   :  { %4421 = vst [vmem:[#allocation3 + $0x50] sm:$0x3f] %v12104_v5  ;;  %4422 = vst [vmem:[#allocation3 + $0x58] sm:$0x3f] %v12104_v5  ;;  %11595 = vmatprep.mubr.msk.bf16.mxu1 %vm4691_vm0, %v11698_v23 }
 0x127   :  { %4424 = vst [vmem:[#allocation3 + $0x68] sm:$0x3f] %v12104_v5  ;;  %4425 = vst [vmem:[#allocation3 + $0x70] sm:$0x3f] %v12104_v5 }
 0x128   :  { %4426 = vst [vmem:[#allocation3 + $0x78] sm:$0x3f] %v12104_v5  ;;  %4427 = vst [vmem:[#allocation3 + $0x80] sm:$0x3f] %v12104_v5 }
 0x129   :  { %4428 = vst [vmem:[#allocation3 + $0x88] sm:$0x3f] %v12104_v5  ;;  %4430 = vst [vmem:[#allocation3 + $0x98] sm:$0x3f] %v12104_v5 }
 0x12a   :  { %4431 = vst [vmem:[#allocation3 + $0xa0] sm:$0x3f] %v12104_v5  ;;  %4432 = vst [vmem:[#allocation3 + $0xa8] sm:$0x3f] %v12104_v5 }
 0x12b   :  { %4433 = vst [vmem:[#allocation3 + $0xb0] sm:$0x3f] %v12104_v5  ;;  %4434 = vst [vmem:[#allocation3 + $0xb8] sm:$0x3f] %v12104_v5 }
 0x12c   :  { %4435 = vst [vmem:[#allocation3 + $0xc0] sm:$0x3f] %v12104_v5  ;;  %4436 = vst [vmem:[#allocation3 + $0xc8] sm:$0x3f] %v12104_v5 }
 0x12d   :  { %4437 = vst [vmem:[#allocation3 + $0xd0] sm:$0x3f] %v12104_v5  ;;  %4438 = vst [vmem:[#allocation3 + $0xd8] sm:$0x3f] %v12104_v5  ;;  %11596 = vmatmul.mubr.msk.bf16.gmra.mrb[40].mxu1 %vm4691_vm0, %v11699_v24 }
 0x12e   :  { %4439 = vst [vmem:[#allocation3 + $0xe0] sm:$0x3f] %v12104_v5  ;;  %4441 = vst [vmem:[#allocation3 + $0xf0] sm:$0x3f] %v12104_v5  ;;  %11599 = vmatprep.mubr.msk.bf16.mxu1 %vm4691_vm0, %v11700_v25 }
 0x12f   :  { %4442 = vst [vmem:[#allocation3 + $0xf8] sm:$0x3f] %v12104_v5  ;;  %4443 = vst [vmem:[#allocation3 + $0x100] sm:$0x3f] %v12104_v5 }
 0x130   :  { %4444 = vst [vmem:[#allocation3 + $0x108] sm:$0x3f] %v12104_v5  ;;  %4445 = vst [vmem:[#allocation3 + $0x110] sm:$0x3f] %v12104_v5 }
 0x131   :  { %4447 = vst [vmem:[#allocation3 + $0x120] sm:$0x3f] %v12104_v5  ;;  %4448 = vst [vmem:[#allocation3 + $0x128] sm:$0x3f] %v12104_v5 }
 0x132   :  { %4449 = vst [vmem:[#allocation3 + $0x130] sm:$0x3f] %v12104_v5  ;;  %4450 = vst [vmem:[#allocation3 + $0x138] sm:$0x3f] %v12104_v5 }
 0x133   :  { %4451 = vst [vmem:[#allocation3 + $0x140] sm:$0x3f] %v12104_v5  ;;  %4453 = vst [vmem:[#allocation3 + $0x150] sm:$0x3f] %v12104_v5 }
 0x134   :  { %4454 = vst [vmem:[#allocation3 + $0x158] sm:$0x3f] %v12104_v5  ;;  %4455 = vst [vmem:[#allocation3 + $0x160] sm:$0x3f] %v12104_v5 }
 0x135   :  { %4456 = vst [vmem:[#allocation3 + $0x168] sm:$0x3f] %v12104_v5  ;;  %4457 = vst [vmem:[#allocation3 + $0x170] sm:$0x3f] %v12104_v5  ;;  %11600 = vmatmul.mubr.msk.bf16.gmra.mrb[44].mxu1 %vm4691_vm0, %v11701_v26 }
 0x136   :  { %11603 = vmatprep.mubr.msk.bf16.mxu1 %vm4691_vm0, %v11702_v27 }
 0x13d   :  { %11604 = vmatmul.mubr.msk.bf16.gmra.mrb[48].mxu1 %vm4691_vm0, %v11703_v28 }
 0x13e   :  { %11607 = vmatprep.mubr.msk.bf16.mxu1 %vm4691_vm0, %v11704_v29 }
 0x145   :  { %11608 = vmatmul.mubr.msk.bf16.gmra.mrb[52].mxu1 %vm4691_vm0, %v11705_v30 }
 0x146   :  { %11611 = vmatprep.mubr.msk.bf16.mxu1 %vm4691_vm0, %v11706_v31 }
 0x14d   :  { %11612 = vmatmul.mubr.msk.bf16.gmra.mrb[56].mxu1 %vm4691_vm0, %v11707_v32 }
 0x14e   :  { %11615 = vmatprep.mubr.msk.bf16.mxu1 %vm4691_vm0, %v11708_v33 }
 0x155   :  { %11616 = vmatmul.mubr.msk.bf16.gmra.mrb[60].mxu1 %vm4691_vm0, %v11709_v34 }
 0x1b0   :  { %v13791_v35 = vpop.f32.mrb[0].mxu1 }
 0x1b1   :  { %v13793_v36 = vpop.f32.mrb[1].mxu1  ;;  %v5083_v42 = vsel %vm16899_vm2, %v13791_v35, 0.0 }
 0x1b2   :  { %v13795_v37 = vpop.f32.mrb[2].mxu1  ;;  %v5080_v39 = vsel %vm16899_vm2, %v13793_v36, 0.0 }
 0x1b3   :  { %v13797_v38 = vpop.f32.mrb[3].mxu1  ;;  %v5085_v44 = vsel %vm16899_vm2, %v13795_v37, 0.0 }
 0x1b4   :  { %v5081_v40 = vsel %vm16899_vm2, %v13797_v38, 0.0 }
 0x1b5   :  { %v5082_v41 = vadd.f32 %v5081_v40, %v5080_v39 }
 0x1b7   :  { %v5084_v43 = vadd.f32 %v5083_v42, %v5082_v41 }
 0x1b8   :  { %v13807_v45 = vpop.f32.mrb[4].mxu1 }
 0x1b9   :  { %v13809_v46 = vpop.f32.mrb[5].mxu1  ;;  %v5086_v47 = vadd.f32 %v5085_v44, %v5084_v43  ;;  %v5091_v54 = vsel %vm16899_vm2, %v13807_v45, 0.0 }
 0x1ba   :  { %v5087_v48 = vsel %vm16899_vm2, %v13809_v46, 0.0  ;;  %v13813_v49 = vpop.f32.mrb[6].mxu1 }
 0x1bb   :  { %v5088_v50 = vadd.f32 %v5087_v48, %v5086_v47  ;;  %v13815_v51 = vpop.f32.mrb[7].mxu1  ;;  %v5093_v56 = vsel %vm16899_vm2, %v13813_v49, 0.0 }
 0x1bc   :  { %v5089_v52 = vsel %vm16899_vm2, %v13815_v51, 0.0 }
 0x1bd   :  { %v5090_v53 = vadd.f32 %v5089_v52, %v5088_v50 }
 0x1bf   :  { %v5092_v55 = vadd.f32 %v5091_v54, %v5090_v53 }
 0x1c0   :  { %v13823_v57 = vpop.f32.mrb[8].mxu1 }
 0x1c1   :  { %v13825_v58 = vpop.f32.mrb[9].mxu1  ;;  %v5094_v59 = vadd.f32 %v5093_v56, %v5092_v55  ;;  %v5099_v2 = vsel %vm16899_vm2, %v13823_v57, 0.0 }
 0x1c2   :  { %v5095_v60 = vsel %vm16899_vm2, %v13825_v58, 0.0  ;;  %v13829_v61 = vpop.f32.mrb[10].mxu1 }
 0x1c3   :  { %v5096_v62 = vadd.f32 %v5095_v60, %v5094_v59  ;;  %v13831_v63 = vpop.f32.mrb[11].mxu1  ;;  %v5101_v4 = vsel %vm16899_vm2, %v13829_v61, 0.0 }
 0x1c4   :  { %v5097_v0 = vsel %vm16899_vm2, %v13831_v63, 0.0 }
 0x1c5   :  { %v5098_v1 = vadd.f32 %v5097_v0, %v5096_v62 }
 0x1c7   :  { %v5100_v3 = vadd.f32 %v5099_v2, %v5098_v1 }
 0x1c8   :  { %v13839_v5 = vpop.f32.mrb[12].mxu1 }
 0x1c9   :  { %v13841_v6 = vpop.f32.mrb[13].mxu1  ;;  %v5102_v7 = vadd.f32 %v5101_v4, %v5100_v3  ;;  %v5107_v14 = vsel %vm16899_vm2, %v13839_v5, 0.0 }
 0x1ca   :  { %v5103_v8 = vsel %vm16899_vm2, %v13841_v6, 0.0  ;;  %v13845_v9 = vpop.f32.mrb[14].mxu1 }
 0x1cb   :  { %v5104_v10 = vadd.f32 %v5103_v8, %v5102_v7  ;;  %v13847_v11 = vpop.f32.mrb[15].mxu1  ;;  %v5109_v16 = vsel %vm16899_vm2, %v13845_v9, 0.0 }
 0x1cc   :  { %v5105_v12 = vsel %vm16899_vm2, %v13847_v11, 0.0 }
 0x1cd   :  { %v5106_v13 = vadd.f32 %v5105_v12, %v5104_v10 }
 0x1cf   :  { %v5108_v15 = vadd.f32 %v5107_v14, %v5106_v13 }
 0x1d0   :  { %v13855_v17 = vpop.f32.mrb[16].mxu1 }
 0x1d1   :  { %v13857_v18 = vpop.f32.mrb[17].mxu1  ;;  %v5110_v19 = vadd.f32 %v5109_v16, %v5108_v15  ;;  %v5115_v26 = vsel %vm16899_vm2, %v13855_v17, 0.0 }
 0x1d2   :  { %v5111_v20 = vsel %vm16899_vm2, %v13857_v18, 0.0  ;;  %v13861_v21 = vpop.f32.mrb[18].mxu1 }
 0x1d3   :  { %v5112_v22 = vadd.f32 %v5111_v20, %v5110_v19  ;;  %v13863_v23 = vpop.f32.mrb[19].mxu1  ;;  %v5117_v28 = vsel %vm16899_vm2, %v13861_v21, 0.0 }
 0x1d4   :  { %v5113_v24 = vsel %vm16899_vm2, %v13863_v23, 0.0 }
 0x1d5   :  { %v5114_v25 = vadd.f32 %v5113_v24, %v5112_v22 }
 0x1d7   :  { %v5116_v27 = vadd.f32 %v5115_v26, %v5114_v25 }
 0x1d8   :  { %v13871_v29 = vpop.f32.mrb[20].mxu1 }
 0x1d9   :  { %v13873_v30 = vpop.f32.mrb[21].mxu1  ;;  %v5118_v31 = vadd.f32 %v5117_v28, %v5116_v27  ;;  %v5123_v42 = vsel %vm16899_vm2, %v13871_v29, 0.0 }
 0x1da   :  { %v5119_v32 = vsel %vm16899_vm2, %v13873_v30, 0.0  ;;  %v13877_v33 = vpop.f32.mrb[22].mxu1 }
 0x1db   :  { %v5120_v34 = vadd.f32 %v5119_v32, %v5118_v31  ;;  %v13879_v39 = vpop.f32.mrb[23].mxu1  ;;  %v5125_v44 = vsel %vm16899_vm2, %v13877_v33, 0.0 }
 0x1dc   :  { %v5121_v40 = vsel %vm16899_vm2, %v13879_v39, 0.0 }
 0x1dd   :  { %v5122_v41 = vadd.f32 %v5121_v40, %v5120_v34 }
 0x1df   :  { %v5124_v43 = vadd.f32 %v5123_v42, %v5122_v41 }
 0x1e0   :  { %v13887_v47 = vpop.f32.mrb[24].mxu1 }
 0x1e1   :  { %v13889_v48 = vpop.f32.mrb[25].mxu1  ;;  %v5126_v50 = vadd.f32 %v5125_v44, %v5124_v43  ;;  %v5131_v60 = vsel %vm16899_vm2, %v13887_v47, 0.0 }
 0x1e2   :  { %v5127_v52 = vsel %vm16899_vm2, %v13889_v48, 0.0  ;;  %v13893_v53 = vpop.f32.mrb[26].mxu1 }
 0x1e3   :  { %v5128_v54 = vadd.f32 %v5127_v52, %v5126_v50  ;;  %v13895_v55 = vpop.f32.mrb[27].mxu1  ;;  %v5133_v0 = vsel %vm16899_vm2, %v13893_v53, 0.0 }
 0x1e4   :  { %v5129_v56 = vsel %vm16899_vm2, %v13895_v55, 0.0 }
 0x1e5   :  { %v5130_v59 = vadd.f32 %v5129_v56, %v5128_v54 }
 0x1e7   :  { %v5132_v62 = vadd.f32 %v5131_v60, %v5130_v59 }
 0x1e8   :  { %v13903_v1 = vpop.f32.mrb[28].mxu1 }
 0x1e9   :  { %v13905_v2 = vpop.f32.mrb[29].mxu1  ;;  %v5134_v3 = vadd.f32 %v5133_v0, %v5132_v62  ;;  %v5139_v14 = vsel %vm16899_vm2, %v13903_v1, 0.0 }
 0x1ea   :  { %v5135_v4 = vsel %vm16899_vm2, %v13905_v2, 0.0  ;;  %v13909_v7 = vpop.f32.mrb[30].mxu1 }
 0x1eb   :  { %v5136_v8 = vadd.f32 %v5135_v4, %v5134_v3  ;;  %v13911_v10 = vpop.f32.mrb[31].mxu1  ;;  %v5141_v16 = vsel %vm16899_vm2, %v13909_v7, 0.0 }
 0x1ec   :  { %v5137_v12 = vsel %vm16899_vm2, %v13911_v10, 0.0 }
 0x1ed   :  { %v5138_v13 = vadd.f32 %v5137_v12, %v5136_v8 }
 0x1ef   :  { %v5140_v15 = vadd.f32 %v5139_v14, %v5138_v13 }
 0x1f0   :  { %v13919_v19 = vpop.f32.mrb[32].mxu1 }
 0x1f1   :  { %v13921_v20 = vpop.f32.mrb[33].mxu1  ;;  %v5142_v22 = vadd.f32 %v5141_v16, %v5140_v15  ;;  %v5147_v32 = vsel %vm16899_vm2, %v13919_v19, 0.0 }
 0x1f2   :  { %v5143_v24 = vsel %vm16899_vm2, %v13921_v20, 0.0  ;;  %v13925_v25 = vpop.f32.mrb[34].mxu1 }
 0x1f3   :  { %v5144_v26 = vadd.f32 %v5143_v24, %v5142_v22  ;;  %v13927_v27 = vpop.f32.mrb[35].mxu1  ;;  %v5149_v40 = vsel %vm16899_vm2, %v13925_v25, 0.0 }
 0x1f4   :  { %v5145_v28 = vsel %vm16899_vm2, %v13927_v27, 0.0 }
 0x1f5   :  { %v5146_v31 = vadd.f32 %v5145_v28, %v5144_v26 }
 0x1f7   :  { %v5148_v34 = vadd.f32 %v5147_v32, %v5146_v31 }
 0x1f8   :  { %v13935_v41 = vpop.f32.mrb[36].mxu1 }
 0x1f9   :  { %v13937_v42 = vpop.f32.mrb[37].mxu1  ;;  %v5150_v43 = vadd.f32 %v5149_v40, %v5148_v34  ;;  %v5155_v60 = vsel %vm16899_vm2, %v13935_v41, 0.0 }
 0x1fa   :  { %v5151_v44 = vsel %vm16899_vm2, %v13937_v42, 0.0  ;;  %v13941_v50 = vpop.f32.mrb[38].mxu1 }
 0x1fb   :  { %v5152_v52 = vadd.f32 %v5151_v44, %v5150_v43  ;;  %v13943_v54 = vpop.f32.mrb[39].mxu1  ;;  %v5157_v0 = vsel %vm16899_vm2, %v13941_v50, 0.0 }
 0x1fc   :  { %v5153_v56 = vsel %vm16899_vm2, %v13943_v54, 0.0 }
 0x1fd   :  { %v5154_v59 = vadd.f32 %v5153_v56, %v5152_v52 }
 0x1ff   :  { %v5156_v62 = vadd.f32 %v5155_v60, %v5154_v59 }
 0x200   :  { %v13951_v3 = vpop.f32.mrb[40].mxu1 }
 0x201   :  { %v13953_v4 = vpop.f32.mrb[41].mxu1  ;;  %v5158_v8 = vadd.f32 %v5157_v0, %v5156_v62  ;;  %v5163_v24 = vsel %vm16899_vm2, %v13951_v3, 0.0 }
 0x202   :  { %v5159_v12 = vsel %vm16899_vm2, %v13953_v4, 0.0  ;;  %v13957_v13 = vpop.f32.mrb[42].mxu1 }
 0x203   :  { %v5160_v14 = vadd.f32 %v5159_v12, %v5158_v8  ;;  %v13959_v15 = vpop.f32.mrb[43].mxu1  ;;  %v5165_v28 = vsel %vm16899_vm2, %v13957_v13, 0.0 }
 0x204   :  { %v5161_v16 = vsel %vm16899_vm2, %v13959_v15, 0.0 }
 0x205   :  { %v5162_v22 = vadd.f32 %v5161_v16, %v5160_v14 }
 0x207   :  { %v5164_v26 = vadd.f32 %v5163_v24, %v5162_v22 }
 0x208   :  { %v13967_v31 = vpop.f32.mrb[44].mxu1 }
 0x209   :  { %v13969_v32 = vpop.f32.mrb[45].mxu1  ;;  %v5166_v34 = vadd.f32 %v5165_v28, %v5164_v26  ;;  %v5171_v60 = vsel %vm16899_vm2, %v13967_v31, 0.0 }
 0x20a   :  { %v5167_v40 = vsel %vm16899_vm2, %v13969_v32, 0.0  ;;  %v13973_v43 = vpop.f32.mrb[46].mxu1 }
 0x20b   :  { %16926 = vst [vmem:[#allocation11_spill] sm:$0xff] %v13973_v43  ;;  %v5168_v44 = vadd.f32 %v5167_v40, %v5166_v34  ;;  %v13975_v52 = vpop.f32.mrb[47].mxu1  ;;  %v5173_v0 = vsel %vm16899_vm2, %v13973_v43, 0.0 }
 0x20c   :  { %v5169_v56 = vsel %vm16899_vm2, %v13975_v52, 0.0 }
 0x20d   :  { %v5170_v59 = vadd.f32 %v5169_v56, %v5168_v44 }
 0x20f   :  { %v5172_v62 = vadd.f32 %v5171_v60, %v5170_v59 }
 0x210   :  { %v13983_v8 = vpop.f32.mrb[48].mxu1 }
 0x211   :  { %16927 = vst [vmem:[#allocation12_spill] sm:$0xff] %v13983_v8  ;;  %v13985_v12 = vpop.f32.mrb[49].mxu1  ;;  %v5174_v14 = vadd.f32 %v5173_v0, %v5172_v62  ;;  %v5179_v40 = vsel %vm16899_vm2, %v13983_v8, 0.0 }
 0x212   :  { %16928 = vst [vmem:[#allocation13_spill] sm:$0xff] %v13985_v12  ;;  %v5175_v16 = vsel %vm16899_vm2, %v13985_v12, 0.0  ;;  %v13989_v22 = vpop.f32.mrb[50].mxu1 }
 0x213   :  { %16929 = vst [vmem:[#allocation14_spill] sm:$0xff] %v13989_v22  ;;  %v5176_v24 = vadd.f32 %v5175_v16, %v5174_v14  ;;  %v13991_v26 = vpop.f32.mrb[51].mxu1  ;;  %v5181_v56 = vsel %vm16899_vm2, %v13989_v22, 0.0 }
 0x214   :  { %16930 = vst [vmem:[#allocation15_spill] sm:$0xff] %v13991_v26  ;;  %v5177_v28 = vsel %vm16899_vm2, %v13991_v26, 0.0 }
 0x215   :  { %v5178_v34 = vadd.f32 %v5177_v28, %v5176_v24 }
 0x217   :  { %v5180_v44 = vadd.f32 %v5179_v40, %v5178_v34 }
 0x218   :  { %v13999_v59 = vpop.f32.mrb[52].mxu1 }
 0x219   :  { %16931 = vst [vmem:[#allocation16_spill] sm:$0xff] %v13999_v59  ;;  %v14001_v60 = vpop.f32.mrb[53].mxu1  ;;  %v5182_v62 = vadd.f32 %v5181_v56, %v5180_v44  ;;  %v5187_v34 = vsel %vm16899_vm2, %v13999_v59, 0.0 }
 0x21a   :  { %16932 = vst [vmem:[#allocation17_spill] sm:$0xff] %v14001_v60  ;;  %v5183_v0 = vsel %vm16899_vm2, %v14001_v60, 0.0  ;;  %v14005_v14 = vpop.f32.mrb[54].mxu1 }
 0x21b   :  { %16933 = vst [vmem:[#allocation18_spill] sm:$0xff] %v14005_v14  ;;  %v5184_v16 = vadd.f32 %v5183_v0, %v5182_v62  ;;  %v14007_v26 = vpop.f32.mrb[55].mxu1  ;;  %v5189_v22 = vsel %vm16899_vm2, %v14005_v14, 0.0 }
 0x21c   :  { %16934 = vst [vmem:[#allocation19_spill] sm:$0xff] %v14007_v26  ;;  %v5185_v24 = vsel %vm16899_vm2, %v14007_v26, 0.0 }
 0x21d   :  { %v5186_v28 = vadd.f32 %v5185_v24, %v5184_v16 }
 0x21f   :  { %v5188_v40 = vadd.f32 %v5187_v34, %v5186_v28 }
 0x220   :  { %v14015_v44 = vpop.f32.mrb[56].mxu1 }
 0x221   :  { %16935 = vst [vmem:[#allocation20_spill] sm:$0xff] %v14015_v44  ;;  %v14017_v56 = vpop.f32.mrb[57].mxu1  ;;  %v5190_v60 = vadd.f32 %v5189_v22, %v5188_v40  ;;  %v5195_v28 = vsel %vm16899_vm2, %v14015_v44, 0.0 }
 0x222   :  { %16936 = vst [vmem:[#allocation21_spill] sm:$0xff] %v14017_v56  ;;  %v5191_v62 = vsel %vm16899_vm2, %v14017_v56, 0.0  ;;  %v14021_v0 = vpop.f32.mrb[58].mxu1 }
 0x223   :  { %16937 = vst [vmem:[#allocation22_spill] sm:$0xff] %v14021_v0  ;;  %v5192_v8 = vadd.f32 %v5191_v62, %v5190_v60  ;;  %v14023_v26 = vpop.f32.mrb[59].mxu1  ;;  %v5197_v14 = vsel %vm16899_vm2, %v14021_v0, 0.0 }
 0x224   :  { %16938 = vst [vmem:[#allocation23_spill] sm:$0xff] %v14023_v26  ;;  %v5193_v16 = vsel %vm16899_vm2, %v14023_v26, 0.0 }
 0x225   :  { %v5194_v24 = vadd.f32 %v5193_v16, %v5192_v8 }
 0x227   :  { %v5196_v34 = vadd.f32 %v5195_v28, %v5194_v24 }
 0x228   :  { %v14031_v22 = vpop.f32.mrb[60].mxu1 }
 0x229   :  { %v14033_v40 = vpop.f32.mrb[61].mxu1  ;;  %v5198_v56 = vadd.f32 %v5197_v14, %v5196_v34  ;;  %v5203_v24 = vsel %vm16899_vm2, %v14031_v22, 0.0 }
 0x22a   :  { %16939 = vst [vmem:[#allocation24_spill] sm:$0xff] %v14033_v40  ;;  %v5199_v60 = vsel %vm16899_vm2, %v14033_v40, 0.0  ;;  %v14037_v62 = vpop.f32.mrb[62].mxu1 }
 0x22b   :  { %v5200_v59 = vadd.f32 %v5199_v60, %v5198_v56  ;;  %v14039_v26 = vpop.f32.mrb[63].mxu1  ;;  %v5205_v0 = vsel %vm16899_vm2, %v14037_v62, 0.0 }
 0x22c   :  { %16940 = vst [vmem:[#allocation25_spill] sm:$0xff] %v14039_v26  ;;  %v5201_v8 = vsel %vm16899_vm2, %v14039_v26, 0.0 }
 0x22d   :  { %v5202_v16 = vadd.f32 %v5201_v8, %v5200_v59 }
 0x22f   :  { %v5204_v28 = vadd.f32 %v5203_v24, %v5202_v16  ;;  %v16955_v16 = vld [vmem:[#allocation12_spill] sm:$0xff]  ;;  %v16956_v24 = vld [vmem:[#allocation14_spill] sm:$0xff] }
 0x231   :  { %v5206_v14 = vadd.f32 %v5205_v0, %v5204_v28  ;;  %v16957_v28 = vld [vmem:[#allocation17_spill] sm:$0xff] }
 0x233   :  { %v5207_v34 = vrot.slane %v5206_v14, 4 }
 0x235   :  { %v5208_v44 = vadd.f32 %v5207_v34, %v5206_v14  ;;  %v16959_v34 = vld [vmem:[#allocation19_spill] sm:$0xff] }
 0x237   :  { %v5209_v40 = vrot.slane %v5208_v44, 2 }
 0x239   :  { %v5210_v12 = vadd.f32 %v5209_v40, %v5208_v44  ;;  %v16951_v44 = vld [vmem:[#allocation13_spill] sm:$0xff]  ;;  %v16953_v40 = vld [vmem:[#allocation15_spill] sm:$0xff] }
 0x23b   :  { %v5211_v43 = vrot.slane %v5210_v12, 1 }
 0x23d   :  { %v5212_v56 = vadd.f32 %v5211_v43, %v5210_v12  ;;  %v16950_v12 = vld [vmem:[#allocation11_spill] sm:$0xff] }
 0x23f   :  { %v14047_v60 = vmul.f32 0.001953125, %v5212_v56 }
 0x241   :  { %v14051_v26 = vsub.f32 %v13793_v36, %v14047_v60  ;;  %v14055_v59 = vsub.f32 %v13797_v38, %v14047_v60  ;;  %v14059_v8 = vsub.f32 %v13791_v35, %v14047_v60  ;;  %v14063_v0 = vsub.f32 %v13795_v37, %v14047_v60 }
 0x242   :  { %v14067_v43 = vsub.f32 %v13809_v46, %v14047_v60  ;;  %v14071_v36 = vsub.f32 %v13815_v51, %v14047_v60  ;;  %v14075_v38 = vsub.f32 %v13807_v45, %v14047_v60  ;;  %v14079_v35 = vsub.f32 %v13813_v49, %v14047_v60 }
 0x243   :  { %16941 = vst [vmem:[#allocation26_spill] sm:$0xff] %v14051_v26  ;;  %16942 = vst [vmem:[#allocation27_spill] sm:$0xff] %v14055_v59  ;;  %v14083_v37 = vsub.f32 %v13825_v58, %v14047_v60  ;;  %v14087_v46 = vsub.f32 %v13831_v63, %v14047_v60  ;;  %v14091_v51 = vsub.f32 %v13823_v57, %v14047_v60 }
 0x244   :  { %16943 = vst [vmem:[#allocation28_spill] sm:$0xff] %v14059_v8  ;;  %16944 = vst [vmem:[#allocation29_spill] sm:$0xff] %v14063_v0  ;;  %v14095_v45 = vsub.f32 %v13829_v61, %v14047_v60  ;;  %v14099_v49 = vsub.f32 %v13841_v6, %v14047_v60  ;;  %v14103_v58 = vsub.f32 %v13847_v11, %v14047_v60 }
 0x245   :  { %v14107_v63 = vsub.f32 %v13839_v5, %v14047_v60  ;;  %v14111_v57 = vsub.f32 %v13845_v9, %v14047_v60  ;;  %v14115_v61 = vsub.f32 %v13857_v18, %v14047_v60  ;;  %v14119_v6 = vsub.f32 %v13863_v23, %v14047_v60 }
 0x246   :  { %16945 = vst [vmem:[#allocation30_spill] sm:$0xff] %v14095_v45  ;;  %16946 = vst [vmem:[#allocation31_spill] sm:$0xff] %v14099_v49  ;;  %v14123_v11 = vsub.f32 %v13855_v17, %v14047_v60  ;;  %v14127_v5 = vsub.f32 %v13861_v21, %v14047_v60  ;;  %v14131_v9 = vsub.f32 %v13873_v30, %v14047_v60 }
 0x247   :  { %16947 = vst [vmem:[#allocation32_spill] sm:$0xff] %v14103_v58  ;;  %16948 = vst [vmem:[#allocation33_spill] sm:$0xff] %v14107_v63  ;;  %v14135_v18 = vsub.f32 %v13879_v39, %v14047_v60  ;;  %v14139_v23 = vsub.f32 %v13871_v29, %v14047_v60  ;;  %v14143_v17 = vsub.f32 %v13877_v33, %v14047_v60 }
 0x248   :  { %16949 = vst [vmem:[#allocation34_spill] sm:$0xff] %v14111_v57  ;;  %v14147_v21 = vsub.f32 %v13889_v48, %v14047_v60  ;;  %v14151_v30 = vsub.f32 %v13895_v55, %v14047_v60  ;;  %v14155_v39 = vsub.f32 %v13887_v47, %v14047_v60  ;;  %v14159_v29 = vsub.f32 %v13893_v53, %v14047_v60 }
 0x249   :  { %v14163_v33 = vsub.f32 %v13905_v2, %v14047_v60  ;;  %v14167_v48 = vsub.f32 %v13911_v10, %v14047_v60  ;;  %v14171_v55 = vsub.f32 %v13903_v1, %v14047_v60  ;;  %v14175_v47 = vsub.f32 %v13909_v7, %v14047_v60 }
 0x24a   :  { %v14179_v53 = vsub.f32 %v13921_v20, %v14047_v60  ;;  %v14183_v2 = vsub.f32 %v13927_v27, %v14047_v60  ;;  %v14187_v10 = vsub.f32 %v13919_v19, %v14047_v60  ;;  %v14191_v1 = vsub.f32 %v13925_v25, %v14047_v60 }
 0x24b   :  { %v14195_v7 = vsub.f32 %v13937_v42, %v14047_v60  ;;  %v14199_v20 = vsub.f32 %v13943_v54, %v14047_v60  ;;  %v14203_v27 = vsub.f32 %v13935_v41, %v14047_v60  ;;  %v14207_v19 = vsub.f32 %v13941_v50, %v14047_v60 }
 0x24c   :  { %v14211_v25 = vsub.f32 %v13953_v4, %v14047_v60  ;;  %v14215_v42 = vsub.f32 %v13959_v15, %v14047_v60  ;;  %v14219_v54 = vsub.f32 %v13951_v3, %v14047_v60  ;;  %v14223_v41 = vsub.f32 %v13957_v13, %v14047_v60 }
 0x24d   :  { %v14227_v50 = vsub.f32 %v13969_v32, %v14047_v60  ;;  %v14231_v4 = vsub.f32 %v13975_v52, %v14047_v60  ;;  %v14235_v15 = vsub.f32 %v13967_v31, %v14047_v60  ;;  %v14239_v3 = vsub.f32 %v16950_v12, %v14047_v60  ;;  %v16961_v12 = vld [vmem:[#allocation16_spill] sm:$0xff] }
 0x24e   :  { %v14243_v13 = vsub.f32 %v16951_v44, %v14047_v60  ;;  %v14247_v32 = vsub.f32 %v16953_v40, %v14047_v60  ;;  %v14251_v52 = vsub.f32 %v16955_v16, %v14047_v60  ;;  %v14255_v31 = vsub.f32 %v16956_v24, %v14047_v60  ;;  %v16963_v40 = vld [vmem:[#allocation18_spill] sm:$0xff] }
 0x24f   :  { %v14259_v14 = vsub.f32 %v16957_v28, %v14047_v60  ;;  %v14263_v56 = vsub.f32 %v16959_v34, %v14047_v60  ;;  %v14267_v44 = vsub.f32 %v16961_v12, %v14047_v60  ;;  %v14271_v16 = vsub.f32 %v16963_v40, %v14047_v60 }
 0x250   :  { %16952 = vst [vmem:[#allocation11_spill] sm:$0xff] %v14243_v13  ;;  %16954 = vst [vmem:[#allocation13_spill] sm:$0xff] %v14247_v32  ;;  %v16965_v32 = vld [vmem:[#allocation21_spill] sm:$0xff]  ;;  %v16967_v13 = vld [vmem:[#allocation23_spill] sm:$0xff] }
 0x251   :  { %16958 = vst [vmem:[#allocation15_spill] sm:$0xff] %v14259_v14  ;;  %16960 = vst [vmem:[#allocation12_spill] sm:$0xff] %v14263_v56  ;;  %v14275_v24 = vsub.f32 %v16965_v32, %v14047_v60  ;;  %v14279_v28 = vsub.f32 %v16967_v13, %v14047_v60  ;;  %v16968_v14 = vld [vmem:[#allocation20_spill] sm:$0xff]  ;;  %v16970_v56 = vld [vmem:[#allocation22_spill] sm:$0xff]  ;;  %v14299_v13 = vsub.f32 %v14031_v22, %v14047_v60 }
 0x252   :  { %16962 = vst [vmem:[#allocation14_spill] sm:$0xff] %v14267_v44  ;;  %16964 = vst [vmem:[#allocation17_spill] sm:$0xff] %v14271_v16  ;;  %v14283_v34 = vsub.f32 %v16968_v14, %v14047_v60  ;;  %v14287_v12 = vsub.f32 %v16970_v56, %v14047_v60  ;;  %v16971_v44 = vld [vmem:[#allocation24_spill] sm:$0xff]  ;;  %v16972_v16 = vld [vmem:[#allocation25_spill] sm:$0xff]  ;;  %v14303_v14 = vsub.f32 %v14037_v62, %v14047_v60 }
 0x253   :  { %16966 = vst [vmem:[#allocation19_spill] sm:$0xff] %v14275_v24  ;;  %v14291_v40 = vsub.f32 %v16971_v44, %v14047_v60  ;;  %v14295_v32 = vsub.f32 %v16972_v16, %v14047_v60  ;;  %16974 = vst [vmem:[#allocation21_spill] sm:$0xff] %v14299_v13  ;;  %v5279_v56 = vmul.f32 %v14051_v26, %v14051_v26 }
 0x254   :  { %16969 = vst [vmem:[#allocation16_spill] sm:$0xff] %v14283_v34  ;;  %16975 = vst [vmem:[#allocation23_spill] sm:$0xff] %v14303_v14  ;;  %v5280_v34 = vmul.f32 %v14055_v59, %v14055_v59  ;;  %v5281_v44 = vmul.f32 %v14059_v8, %v14059_v8  ;;  %v5282_v16 = vmul.f32 %v14063_v0, %v14063_v0 }
 0x255   :  { %16973 = vst [vmem:[#allocation18_spill] sm:$0xff] %v14295_v32  ;;  %v5343_v32 = vsel %vm16899_vm2, %v5279_v56, 0.0  ;;  %v5283_v62 = vmul.f32 %v14067_v43, %v14067_v43  ;;  %v5284_v59 = vmul.f32 %v14071_v36, %v14071_v36  ;;  %v5285_v0 = vmul.f32 %v14075_v38, %v14075_v38 }
 0x256   :  { %v5344_v22 = vsel %vm16899_vm2, %v5280_v34, 0.0  ;;  %v5346_v60 = vsel %vm16899_vm2, %v5281_v44, 0.0  ;;  %v5348_v14 = vsel %vm16899_vm2, %v5282_v16, 0.0  ;;  %v5286_v34 = vmul.f32 %v14079_v35, %v14079_v35 }
 0x257   :  { %v5345_v24 = vadd.f32 %v5344_v22, %v5343_v32  ;;  %v5350_v56 = vsel %vm16899_vm2, %v5283_v62, 0.0  ;;  %v5352_v32 = vsel %vm16899_vm2, %v5284_v59, 0.0  ;;  %v5354_v44 = vsel %vm16899_vm2, %v5285_v0, 0.0 }
 0x258   :  { %v5290_v59 = vmul.f32 %v14095_v45, %v14095_v45  ;;  %v5291_v0 = vmul.f32 %v14099_v49, %v14099_v49 }
 0x259   :  { %v5347_v26 = vadd.f32 %v5346_v60, %v5345_v24  ;;  %v5287_v24 = vmul.f32 %v14083_v37, %v14083_v37 }
 0x25b   :  { %v5349_v8 = vadd.f32 %v5348_v14, %v5347_v26  ;;  %v5288_v26 = vmul.f32 %v14087_v46, %v14087_v46  ;;  %v5356_v14 = vsel %vm16899_vm2, %v5286_v34, 0.0  ;;  %v5358_v62 = vsel %vm16899_vm2, %v5287_v24, 0.0 }
 0x25c   :  { %v5293_v34 = vmul.f32 %v14107_v63, %v14107_v63  ;;  %v5295_v24 = vmul.f32 %v14115_v61, %v14115_v61 }
 0x25d   :  { %v5351_v13 = vadd.f32 %v5350_v56, %v5349_v8  ;;  %v5289_v8 = vmul.f32 %v14091_v51, %v14091_v51 }
 0x25f   :  { %v5353_v22 = vadd.f32 %v5352_v32, %v5351_v13  ;;  %v5360_v13 = vsel %vm16899_vm2, %v5288_v26, 0.0  ;;  %v5292_v32 = vmul.f32 %v14103_v58, %v14103_v58  ;;  %v14353_v26 = vld [vmem:[%s16837_s2] ss:$0 sm:$0xff]  ;;  %v5374_v58 = vsel %vm16899_vm2, %v5295_v24, 0.0 }
 0x260   :  { %v14373_v45 = vmul.f32 %v14353_v26, %v14119_v6  ;;  %v14409_v24 = vmul.f32 %v14353_v26, %v14155_v39 }
 0x261   :  { %v5355_v60 = vadd.f32 %v5354_v44, %v5353_v22  ;;  %v5294_v44 = vmul.f32 %v14111_v57, %v14111_v57 }
 0x262   :  { %16982 = vst [vmem:[#allocation37_spill] sm:$0xff] %v14409_v24  ;;  %v14429_v24 = vmul.f32 %v14353_v26, %v14175_v47 }
 0x263   :  { %v5357_v16 = vadd.f32 %v5356_v14, %v5355_v60  ;;  %v5362_v60 = vsel %vm16899_vm2, %v5289_v8, 0.0  ;;  %v5366_v8 = vsel %vm16899_vm2, %v5291_v0, 0.0  ;;  %v5372_v63 = vsel %vm16899_vm2, %v5294_v44, 0.0 }
 0x264   :  { %v14377_v0 = vmul.f32 %v14353_v26, %v14123_v11  ;;  %v14405_v44 = vmul.f32 %v14353_v26, %v14151_v30  ;;  %16987 = vst [vmem:[#allocation42_spill] sm:$0xff] %v14429_v24 }
 0x265   :  { %v5359_v56 = vadd.f32 %v5358_v62, %v5357_v16  ;;  %v5296_v16 = vmul.f32 %v14119_v6, %v14119_v6  ;;  %v5364_v62 = vsel %vm16899_vm2, %v5290_v59, 0.0  ;;  %v14369_v59 = vmul.f32 %v14353_v26, %v14115_v61 }
 0x266   :  { %v14393_v61 = vmul.f32 %v14353_v26, %v14139_v23  ;;  %16981 = vst [vmem:[#allocation36_spill] sm:$0xff] %v14405_v44 }
 0x267   :  { %v5361_v22 = vadd.f32 %v5360_v13, %v5359_v56  ;;  %v5297_v56 = vmul.f32 %v14123_v11, %v14123_v11  ;;  %v5298_v13 = vmul.f32 %v14127_v5, %v14127_v5  ;;  %v14397_v11 = vmul.f32 %v14353_v26, %v14143_v17 }
 0x268   :  { %16978 = vst [vmem:[#allocation24_spill] sm:$0xff] %v14393_v61 }
 0x269   :  { %v5363_v14 = vadd.f32 %v5362_v60, %v5361_v22  ;;  %v5368_v22 = vsel %vm16899_vm2, %v5292_v32, 0.0  ;;  %v5370_v60 = vsel %vm16899_vm2, %v5293_v34, 0.0  ;;  %v14381_v32 = vmul.f32 %v14353_v26, %v14127_v5  ;;  %16979 = vst [vmem:[#allocation25_spill] sm:$0xff] %v14397_v11  ;;  %v17019_v11 = vld [vmem:[#allocation23_spill] sm:$0xff] }
 0x26a   :  { %v14385_v34 = vmul.f32 %v14353_v26, %v14131_v9  ;;  %v14401_v5 = vmul.f32 %v14353_v26, %v14147_v21 }
 0x26b   :  { %v5365_v57 = vadd.f32 %v5364_v62, %v5363_v14  ;;  %v14413_v14 = vmul.f32 %v14353_v26, %v14159_v29  ;;  %v14421_v62 = vmul.f32 %v14353_v26, %v14167_v48 }
 0x26c   :  { %16976 = vst [vmem:[#allocation20_spill] sm:$0xff] %v14385_v34  ;;  %16980 = vst [vmem:[#allocation35_spill] sm:$0xff] %v14401_v5  ;;  %v17017_v5 = vld [vmem:[#allocation21_spill] sm:$0xff] }
 0x26d   :  { %v5367_v49 = vadd.f32 %v5366_v8, %v5365_v57  ;;  %v14389_v57 = vmul.f32 %v14353_v26, %v14135_v18  ;;  %16983 = vst [vmem:[#allocation38_spill] sm:$0xff] %v14413_v14  ;;  %16985 = vst [vmem:[#allocation40_spill] sm:$0xff] %v14421_v62  ;;  %v14433_v14 = vmul.f32 %v14353_v26, %v14179_v53 }
 0x26e   :  { %v14441_v62 = vmul.f32 %v14353_v26, %v14187_v10 }
 0x26f   :  { %16977 = vst [vmem:[#allocation22_spill] sm:$0xff] %v14389_v57  ;;  %v5369_v6 = vadd.f32 %v5368_v22, %v5367_v49  ;;  %v14417_v49 = vmul.f32 %v14353_v26, %v14163_v33  ;;  %v14425_v22 = vmul.f32 %v14353_v26, %v14171_v55  ;;  %16988 = vst [vmem:[#allocation43_spill] sm:$0xff] %v14433_v14 }
 0x270   :  { %16990 = vst [vmem:[#allocation45_spill] sm:$0xff] %v14441_v62  ;;  %v14453_v14 = vmul.f32 %v14353_v26, %v14199_v20  ;;  %v14461_v62 = vmul.f32 %v14353_v26, %v14207_v19 }
 0x271   :  { %16984 = vst [vmem:[#allocation39_spill] sm:$0xff] %v14417_v49  ;;  %v5371_v8 = vadd.f32 %v5370_v60, %v5369_v6  ;;  %16986 = vst [vmem:[#allocation41_spill] sm:$0xff] %v14425_v22  ;;  %v14437_v49 = vmul.f32 %v14353_v26, %v14183_v2  ;;  %v14445_v60 = vmul.f32 %v14353_v26, %v14191_v1  ;;  %v5378_v22 = vsel %vm16899_vm2, %v5297_v56, 0.0 }
 0x272   :  { %v14449_v6 = vmul.f32 %v14353_v26, %v14195_v7  ;;  %16993 = vst [vmem:[#allocation48_spill] sm:$0xff] %v14453_v14  ;;  %16995 = vst [vmem:[#allocation50_spill] sm:$0xff] %v14461_v62  ;;  %v14481_v62 = vmul.f32 %v14353_v26, %v14227_v50  ;;  %v5376_v14 = vsel %vm16899_vm2, %v5296_v16, 0.0  ;;  %v14533_v56 = vmul.f32 %v14353_v26, %v14291_v40 }
 0x273   :  { %16989 = vst [vmem:[#allocation44_spill] sm:$0xff] %v14437_v49  ;;  %16991 = vst [vmem:[#allocation46_spill] sm:$0xff] %v14445_v60  ;;  %v5373_v24 = vadd.f32 %v5372_v63, %v5371_v8  ;;  %v14457_v49 = vmul.f32 %v14353_v26, %v14203_v27  ;;  %v14465_v60 = vmul.f32 %v14353_v26, %v14211_v25 }
 0x274   :  { %16992 = vst [vmem:[#allocation47_spill] sm:$0xff] %v14449_v6  ;;  %v14469_v6 = vmul.f32 %v14353_v26, %v14215_v42  ;;  %v14473_v63 = vmul.f32 %v14353_v26, %v14219_v54  ;;  %v14477_v8 = vmul.f32 %v14353_v26, %v14223_v41  ;;  %17000 = vst [vmem:[#allocation55_spill] sm:$0xff] %v14481_v62 }
 0x275   :  { %16994 = vst [vmem:[#allocation49_spill] sm:$0xff] %v14457_v49  ;;  %16996 = vst [vmem:[#allocation51_spill] sm:$0xff] %v14465_v60  ;;  %v5375_v49 = vadd.f32 %v5374_v58, %v5373_v24  ;;  %v14485_v60 = vmul.f32 %v14353_v26, %v14231_v4  ;;  %v14496_v58 = vmul.f32 %v14353_v26, %v14239_v3 }
 0x276   :  { %16997 = vst [vmem:[#allocation52_spill] sm:$0xff] %v14469_v6  ;;  %16998 = vst [vmem:[#allocation53_spill] sm:$0xff] %v14473_v63  ;;  %v14489_v6 = vmul.f32 %v14353_v26, %v14235_v15  ;;  %v5299_v63 = vmul.f32 %v14131_v9, %v14131_v9  ;;  %v14500_v24 = vmul.f32 %v14353_v26, %v14251_v52  ;;  %v17008_v9 = vld [vmem:[#allocation12_spill] sm:$0xff] }
 0x277   :  { %16999 = vst [vmem:[#allocation54_spill] sm:$0xff] %v14477_v8  ;;  %17001 = vst [vmem:[#allocation56_spill] sm:$0xff] %v14485_v60  ;;  %v5377_v62 = vadd.f32 %v5376_v14, %v5375_v49  ;;  %v14504_v60 = vmul.f32 %v14353_v26, %v14255_v31  ;;  %v17006_v8 = vld [vmem:[#allocation15_spill] sm:$0xff]  ;;  %v14512_v16 = vmul.f32 %v14353_v26, %v17008_v9 }
 0x278   :  { %17002 = vst [vmem:[#allocation57_spill] sm:$0xff] %v14489_v6  ;;  %17003 = vst [vmem:[#allocation58_spill] sm:$0xff] %v14496_v58  ;;  %v14508_v6 = vmul.f32 %v14353_v26, %v17006_v8  ;;  %v17010_v58 = vld [vmem:[#allocation14_spill] sm:$0xff]  ;;  %v14525_v49 = vmul.f32 %v14353_v26, %v14279_v28 }
 0x279   :  { %17004 = vst [vmem:[#allocation59_spill] sm:$0xff] %v14500_v24  ;;  %17005 = vst [vmem:[#allocation60_spill] sm:$0xff] %v14504_v60  ;;  %v14517_v44 = vmul.f32 %v14353_v26, %v17010_v58  ;;  %v17012_v24 = vld [vmem:[#allocation17_spill] sm:$0xff]  ;;  %v5379_v60 = vadd.f32 %v5378_v22, %v5377_v62  ;;  %v14544_v62 = vmul.f32 %v14353_v26, %v17019_v11 }
 0x27a   :  { %17007 = vst [vmem:[#allocation15_spill] sm:$0xff] %v14508_v6  ;;  %17009 = vst [vmem:[#allocation12_spill] sm:$0xff] %v14512_v16  ;;  %v14521_v14 = vmul.f32 %v14353_v26, %v17012_v24  ;;  %v14529_v6 = vmul.f32 %v14353_v26, %v14287_v12  ;;  %v5380_v16 = vsel %vm16899_vm2, %v5298_v13, 0.0 }
 0x27b   :  { %17011 = vst [vmem:[#allocation14_spill] sm:$0xff] %v14517_v44  ;;  %17014 = vst [vmem:[#allocation61_spill] sm:$0xff] %v14525_v49  ;;  %v5300_v44 = vmul.f32 %v14135_v18, %v14135_v18  ;;  %v5381_v22 = vadd.f32 %v5380_v16, %v5379_v60  ;;  %v5382_v49 = vsel %vm16899_vm2, %v5299_v63, 0.0  ;;  %v5302_v18 = vmul.f32 %v14143_v17, %v14143_v17 }
 0x27c   :  { %17013 = vst [vmem:[#allocation17_spill] sm:$0xff] %v14521_v14  ;;  %17015 = vst [vmem:[#allocation62_spill] sm:$0xff] %v14529_v6  ;;  %v14540_v14 = vmul.f32 %v14353_v26, %v17017_v5  ;;  %v5301_v6 = vmul.f32 %v14139_v23, %v14139_v23  ;;  %v5304_v60 = vmul.f32 %v14151_v30, %v14151_v30 }
 0x27d   :  { %17016 = vst [vmem:[#allocation63_spill] sm:$0xff] %v14533_v56  ;;  %v5383_v56 = vadd.f32 %v5382_v49, %v5381_v22  ;;  %v5384_v13 = vsel %vm16899_vm2, %v5300_v44, 0.0  ;;  %v5388_v23 = vsel %vm16899_vm2, %v5302_v18, 0.0  ;;  %v5305_v63 = vmul.f32 %v14155_v39, %v14155_v39 }
 0x27e   :  { %17018 = vst [vmem:[#allocation21_spill] sm:$0xff] %v14540_v14  ;;  %v5303_v14 = vmul.f32 %v14147_v21, %v14147_v21  ;;  %v5386_v57 = vsel %vm16899_vm2, %v5301_v6, 0.0  ;;  %v5306_v44 = vmul.f32 %v14159_v29, %v14159_v29  ;;  %v5392_v21 = vsel %vm16899_vm2, %v5304_v60, 0.0 }
 0x27f   :  { %v5385_v61 = vadd.f32 %v5384_v13, %v5383_v56  ;;  %v5394_v30 = vsel %vm16899_vm2, %v5305_v63, 0.0  ;;  %v5310_v18 = vmul.f32 %v14175_v47, %v14175_v47  ;;  %v5311_v60 = vmul.f32 %v14179_v53, %v14179_v53 }
 0x280   :  { %v5390_v17 = vsel %vm16899_vm2, %v5303_v14, 0.0  ;;  %v5396_v39 = vsel %vm16899_vm2, %v5306_v44, 0.0  ;;  %v5309_v14 = vmul.f32 %v14171_v55, %v14171_v55  ;;  %v5314_v44 = vmul.f32 %v14191_v1, %v14191_v1 }
 0x281   :  { %v5387_v34 = vadd.f32 %v5386_v57, %v5385_v61  ;;  %v5307_v57 = vmul.f32 %v14163_v33, %v14163_v33  ;;  %v5404_v55 = vsel %vm16899_vm2, %v5310_v18, 0.0  ;;  %v5406_v47 = vsel %vm16899_vm2, %v5311_v60, 0.0 }
 0x282   :  { %v5320_v18 = vmul.f32 %v14215_v42, %v14215_v42 }
 0x283   :  { %v5389_v16 = vadd.f32 %v5388_v23, %v5387_v34  ;;  %v5308_v34 = vmul.f32 %v14167_v48, %v14167_v48  ;;  %v5398_v29 = vsel %vm16899_vm2, %v5307_v57, 0.0  ;;  %v5402_v48 = vsel %vm16899_vm2, %v5309_v14, 0.0 }
 0x285   :  { %v5391_v49 = vadd.f32 %v5390_v17, %v5389_v16  ;;  %v5400_v33 = vsel %vm16899_vm2, %v5308_v34, 0.0  ;;  %v5312_v16 = vmul.f32 %v14183_v2, %v14183_v2  ;;  %v5313_v17 = vmul.f32 %v14187_v10, %v14187_v10 }
 0x286   :  { %v5412_v10 = vsel %vm16899_vm2, %v5314_v44, 0.0  ;;  %v5317_v34 = vmul.f32 %v14203_v27, %v14203_v27  ;;  %v5326_v44 = vmul.f32 %v14239_v3, %v14239_v3 }
 0x287   :  { %v5393_v56 = vadd.f32 %v5392_v21, %v5391_v49  ;;  %v5408_v53 = vsel %vm16899_vm2, %v5312_v16, 0.0  ;;  %v5410_v2 = vsel %vm16899_vm2, %v5313_v17, 0.0  ;;  %v5323_v16 = vmul.f32 %v14227_v50, %v14227_v50 }
 0x289   :  { %v5395_v61 = vadd.f32 %v5394_v30, %v5393_v56  ;;  %v5315_v56 = vmul.f32 %v14195_v7, %v14195_v7  ;;  %v5316_v30 = vmul.f32 %v14199_v20, %v14199_v20  ;;  %v5418_v20 = vsel %vm16899_vm2, %v5317_v34, 0.0 }
 0x28b   :  { %v5397_v6 = vadd.f32 %v5396_v39, %v5395_v61  ;;  %v5414_v1 = vsel %vm16899_vm2, %v5315_v56, 0.0  ;;  %v5416_v7 = vsel %vm16899_vm2, %v5316_v30, 0.0 }
 0x28d   :  { %v5399_v22 = vadd.f32 %v5398_v29, %v5397_v6  ;;  %v5318_v6 = vmul.f32 %v14207_v19, %v14207_v19  ;;  %v5319_v29 = vmul.f32 %v14211_v25, %v14211_v25  ;;  %v5424_v25 = vsel %vm16899_vm2, %v5320_v18, 0.0 }
 0x28e   :  { %v5333_v18 = vmul.f32 %v17010_v58, %v17010_v58 }
 0x28f   :  { %v5401_v13 = vadd.f32 %v5400_v33, %v5399_v22  ;;  %v5420_v27 = vsel %vm16899_vm2, %v5318_v6, 0.0  ;;  %v5422_v19 = vsel %vm16899_vm2, %v5319_v29, 0.0 }
 0x291   :  { %v5403_v23 = vadd.f32 %v5402_v48, %v5401_v13  ;;  %v5321_v13 = vmul.f32 %v14219_v54, %v14219_v54  ;;  %v5322_v48 = vmul.f32 %v14223_v41, %v14223_v41  ;;  %v5430_v41 = vsel %vm16899_vm2, %v5323_v16, 0.0  ;;  %v17023_v16 = vld [vmem:[#allocation16_spill] sm:$0xff] }
 0x293   :  { %v5405_v63 = vadd.f32 %v5404_v55, %v5403_v23  ;;  %v5426_v42 = vsel %vm16899_vm2, %v5321_v13, 0.0  ;;  %v5428_v54 = vsel %vm16899_vm2, %v5322_v48, 0.0 }
 0x295   :  { %v5407_v49 = vadd.f32 %v5406_v47, %v5405_v63  ;;  %v5324_v63 = vmul.f32 %v14231_v4, %v14231_v4  ;;  %v5325_v47 = vmul.f32 %v14235_v15, %v14235_v15  ;;  %v5436_v15 = vsel %vm16899_vm2, %v5326_v44, 0.0 }
 0x297   :  { %v5409_v21 = vadd.f32 %v5408_v53, %v5407_v49  ;;  %v5432_v50 = vsel %vm16899_vm2, %v5324_v63, 0.0  ;;  %v5434_v4 = vsel %vm16899_vm2, %v5325_v47, 0.0  ;;  %v5338_v63 = vmul.f32 %v14287_v12, %v14287_v12 }
 0x298   :  { %v5339_v47 = vmul.f32 %v14291_v40, %v14291_v40 }
 0x299   :  { %v5411_v57 = vadd.f32 %v5410_v2, %v5409_v21  ;;  %v17020_v21 = vld [vmem:[#allocation11_spill] sm:$0xff] }
 0x29a   :  { %v5327_v56 = vmul.f32 %v17020_v21, %v17020_v21  ;;  %v5462_v12 = vsel %vm16899_vm2, %v5339_v47, 0.0  ;;  %v14719_v47 = vmul.f32 %v14353_v26, %v17020_v21 }
 0x29b   :  { %v5413_v61 = vadd.f32 %v5412_v10, %v5411_v57  ;;  %v17021_v57 = vld [vmem:[#allocation13_spill] sm:$0xff] }
 0x29c   :  { %v5328_v30 = vmul.f32 %v17021_v57, %v17021_v57  ;;  %v5438_v3 = vsel %vm16899_vm2, %v5327_v56, 0.0  ;;  %v5341_v56 = vmul.f32 %v17017_v5, %v17017_v5 }
 0x29d   :  { %v5415_v39 = vadd.f32 %v5414_v1, %v5413_v61  ;;  %v5329_v61 = vmul.f32 %v14251_v52, %v14251_v52  ;;  %v5330_v1 = vmul.f32 %v14255_v31, %v14255_v31 }
 0x29f   :  { %v5417_v14 = vadd.f32 %v5416_v7, %v5415_v39  ;;  %v5440_v39 = vsel %vm16899_vm2, %v5328_v30, 0.0  ;;  %v5331_v7 = vmul.f32 %v17006_v8, %v17006_v8  ;;  %v5444_v52 = vsel %vm16899_vm2, %v5330_v1, 0.0 }
 0x2a1   :  { %v5419_v22 = vadd.f32 %v5418_v20, %v5417_v14  ;;  %v5442_v14 = vsel %vm16899_vm2, %v5329_v61, 0.0  ;;  %v5332_v20 = vmul.f32 %v17008_v9, %v17008_v9  ;;  %v5446_v31 = vsel %vm16899_vm2, %v5331_v7, 0.0 }
 0x2a2   :  { %v5450_v9 = vsel %vm16899_vm2, %v5333_v18, 0.0 }
 0x2a3   :  { %v5421_v33 = vadd.f32 %v5420_v27, %v5419_v22  ;;  %v5448_v8 = vsel %vm16899_vm2, %v5332_v20, 0.0  ;;  %v17025_v20 = vld [vmem:[#allocation26_spill] sm:$0xff] }
 0x2a5   :  { %v5423_v60 = vadd.f32 %v5422_v19, %v5421_v33  ;;  %v5334_v33 = vmul.f32 %v17012_v24, %v17012_v24  ;;  %v17022_v19 = vld [vmem:[#allocation19_spill] sm:$0xff] }
 0x2a7   :  { %v5425_v23 = vadd.f32 %v5424_v25, %v5423_v60  ;;  %v5335_v60 = vmul.f32 %v17022_v19, %v17022_v19  ;;  %v5336_v25 = vmul.f32 %v14279_v28, %v14279_v28  ;;  %v5452_v58 = vsel %vm16899_vm2, %v5334_v33, 0.0  ;;  %v17028_v33 = vld [vmem:[#allocation29_spill] sm:$0xff] }
 0x2a9   :  { %v5427_v55 = vadd.f32 %v5426_v42, %v5425_v23  ;;  %v5337_v42 = vmul.f32 %v17023_v16, %v17023_v16  ;;  %v5454_v24 = vsel %vm16899_vm2, %v5335_v60, 0.0  ;;  %v5488_v60 = vmul.f32 %v14353_v26, %v14071_v36 }
 0x2ab   :  { %v5429_v17 = vadd.f32 %v5428_v54, %v5427_v55  ;;  %v5456_v54 = vsel %vm16899_vm2, %v5336_v25, 0.0  ;;  %v5458_v28 = vsel %vm16899_vm2, %v5337_v42, 0.0  ;;  %v5491_v25 = vmul.f32 %v14353_v26, %v14083_v37  ;;  %v17029_v42 = vld [vmem:[#allocation30_spill] sm:$0xff] }
 0x2ac   :  { %v5539_v37 = vmul.f32 %v14353_v26, %v17022_v19  ;;  %v14727_v19 = vmul.f32 %v14353_v26, %v17023_v16 }
 0x2ad   :  { %v5431_v49 = vadd.f32 %v5430_v41, %v5429_v17 }
 0x2af   :  { %v5433_v53 = vadd.f32 %v5432_v50, %v5431_v49  ;;  %v17024_v49 = vld [vmem:[#allocation18_spill] sm:$0xff]  ;;  %v5460_v50 = vsel %vm16899_vm2, %v5338_v63, 0.0  ;;  %v17032_v63 = vld [vmem:[#allocation33_spill] sm:$0xff] }
 0x2b0   :  { %v5340_v44 = vmul.f32 %v17024_v49, %v17024_v49 }
 0x2b1   :  { %v5435_v2 = vadd.f32 %v5434_v4, %v5433_v53 }
 0x2b2   :  { %v5464_v40 = vsel %vm16899_vm2, %v5340_v44, 0.0 }
 0x2b3   :  { %v5437_v10 = vadd.f32 %v5436_v15, %v5435_v2  ;;  %v5342_v2 = vmul.f32 %v17019_v11, %v17019_v11  ;;  %v5466_v15 = vsel %vm16899_vm2, %v5341_v56, 0.0  ;;  %v5544_v11 = vmul.f32 %v14353_v26, %v17024_v49 }
 0x2b5   :  { %v5439_v34 = vadd.f32 %v5438_v3, %v5437_v10  ;;  %v5468_v61 = vsel %vm16899_vm2, %v5342_v2, 0.0 }
 0x2b7   :  { %v5441_v6 = vadd.f32 %v5440_v39, %v5439_v34 }
 0x2b9   :  { %v5443_v29 = vadd.f32 %v5442_v14, %v5441_v6 }
 0x2bb   :  { %v5445_v22 = vadd.f32 %v5444_v52, %v5443_v29  ;;  %v5483_v52 = vmul.f32 %v14353_v26, %v17025_v20 }
 0x2bd   :  { %v5447_v27 = vadd.f32 %v5446_v31, %v5445_v22  ;;  %v17026_v22 = vld [vmem:[#allocation27_spill] sm:$0xff]  ;;  %v17027_v31 = vld [vmem:[#allocation28_spill] sm:$0xff] }
 0x2be   :  { %v5484_v18 = vmul.f32 %v14353_v26, %v17026_v22 }
 0x2bf   :  { %v5449_v13 = vadd.f32 %v5448_v8, %v5447_v27  ;;  %v5485_v27 = vmul.f32 %v14353_v26, %v17027_v31  ;;  %v5486_v8 = vmul.f32 %v14353_v26, %v17028_v33  ;;  %v17044_v31 = vld [vmem:[#allocation24_spill] sm:$0xff] }
 0x2c1   :  { %v5451_v48 = vadd.f32 %v5450_v9, %v5449_v13  ;;  %v5487_v13 = vmul.f32 %v14353_v26, %v14067_v43  ;;  %v5489_v9 = vmul.f32 %v14353_v26, %v14075_v38  ;;  %v5494_v43 = vmul.f32 %v14353_v26, %v17029_v42  ;;  %v17051_v42 = vld [vmem:[#allocation40_spill] sm:$0xff] }
 0x2c3   :  { %v5453_v23 = vadd.f32 %v5452_v58, %v5451_v48  ;;  %v5490_v48 = vmul.f32 %v14353_v26, %v14079_v35  ;;  %v5492_v58 = vmul.f32 %v14353_v26, %v14087_v46  ;;  %v5497_v35 = vmul.f32 %v14353_v26, %v17032_v63  ;;  %v14713_v46 = vld [vmem:[%s16838_s3] ss:$0 sm:$0xff]  ;;  %s12105_s3 = smov 64  }
 0x2c4   :  { %v17054_v63 = vld [vmem:[#allocation43_spill] sm:$0xff] }
 0x2c5   :  { %v5455_v55 = vadd.f32 %v5454_v24, %v5453_v23  ;;  %v5493_v23 = vmul.f32 %v14353_v26, %v14091_v51  ;;  %v17030_v24 = vld [vmem:[#allocation31_spill] sm:$0xff]  ;;  %v17033_v51 = vld [vmem:[#allocation34_spill] sm:$0xff] }
 0x2c6   :  { %v5495_v36 = vmul.f32 %v14353_v26, %v17030_v24  ;;  %v17052_v24 = vld [vmem:[#allocation41_spill] sm:$0xff] }
 0x2c7   :  { %v5457_v17 = vadd.f32 %v5456_v54, %v5455_v55  ;;  %v17031_v55 = vld [vmem:[#allocation32_spill] sm:$0xff] }
 0x2c8   :  { %v5496_v38 = vmul.f32 %v14353_v26, %v17031_v55  ;;  %v17053_v55 = vld [vmem:[#allocation42_spill] sm:$0xff] }
 0x2c9   :  { %v5459_v41 = vadd.f32 %v5458_v28, %v5457_v17  ;;  %v5498_v17 = vmul.f32 %v14353_v26, %v17033_v51  ;;  %v14723_v28 = vmul.f32 %v14353_v26, %v17021_v57 }
 0x2cb   :  { %v5461_v53 = vadd.f32 %v5460_v50, %v5459_v41 }
 0x2cd   :  { %v5463_v4 = vadd.f32 %v5462_v12, %v5461_v53 }
 0x2cf   :  { %v5465_v30 = vadd.f32 %v5464_v40, %v5463_v4 }
 0x2d1   :  { %v5467_v10 = vadd.f32 %v5466_v15, %v5465_v30 }
 0x2d3   :  { %v5469_v3 = vadd.f32 %v5468_v61, %v5467_v10 }
 0x2d5   :  { %v5470_v34 = vrot.slane %v5469_v3, 4 }
 0x2d7   :  { %v5471_v1 = vadd.f32 %v5470_v34, %v5469_v3 }
 0x2d9   :  { %v5472_v39 = vrot.slane %v5471_v1, 2 }
 0x2db   :  { %v5473_v6 = vadd.f32 %v5472_v39, %v5471_v1 }
 0x2dd   :  { %v5474_v5 = vrot.slane %v5473_v6, 1 }
 0x2df   :  { %v5475_v7 = vadd.f32 %v5474_v5, %v5473_v6 }
 0x2e1   :  { %v5476_v14 = vmul.f32 0.001953125, %v5475_v7 }
 0x2e3   :  { %v5547_v29 = vadd.f32 1e-05, %v5476_v14 }
 0x2e5   :  { %12094 = vrsqrt.f32 %v5547_v29 }
 0x2ef   :  { %v14708_v54 = vpop.eup %12094 }
 0x2f0   :  { %v5610_v41 = vmul.f32 %v14708_v54, %v5544_v11  ;;  %v5605_v49 = vmul.f32 %v14708_v54, %v5539_v37  ;;  %v14732_v44 = vmul.f32 %v14708_v54, %v5483_v52  ;;  %v14735_v50 = vmul.f32 %v14708_v54, %v5484_v18  ;;  %v17042_v52 = vld [vmem:[#allocation20_spill] sm:$0xff]  ;;  %v17043_v18 = vld [vmem:[#allocation22_spill] sm:$0xff] }
 0x2f1   :  { %v14738_v21 = vmul.f32 %v14708_v54, %v5485_v27  ;;  %v14741_v57 = vmul.f32 %v14708_v54, %v5486_v8  ;;  %v14744_v53 = vmul.f32 %v14708_v54, %v5487_v13  ;;  %v14747_v26 = vmul.f32 %v14708_v54, %v5488_v60  ;;  %v17045_v27 = vld [vmem:[#allocation25_spill] sm:$0xff]  ;;  %v17046_v8 = vld [vmem:[#allocation35_spill] sm:$0xff]  ;;  %v17055_v37 = vld [vmem:[#allocation44_spill] sm:$0xff] }
 0x2f2   :  { %v5680_v16 = vadd.f32 %v14713_v46, %v5610_v41  ;;  %v5675_v56 = vadd.f32 %v14713_v46, %v5605_v49  ;;  %v14752_v12 = vmul.f32 %v14708_v54, %v5489_v9  ;;  %v14755_v4 = vmul.f32 %v14708_v54, %v5490_v48  ;;  %v17048_v60 = vld [vmem:[#allocation37_spill] sm:$0xff]  ;;  %v17049_v48 = vld [vmem:[#allocation38_spill] sm:$0xff] }
 0x2f3   :  { %v14758_v2 = vmul.f32 %v14708_v54, %v5491_v25  ;;  %v14761_v40 = vmul.f32 %v14708_v54, %v5492_v58  ;;  %v14764_v30 = vmul.f32 %v14708_v54, %v5493_v23  ;;  %v14767_v15 = vmul.f32 %v14708_v54, %v5494_v43  ;;  %v17050_v58 = vld [vmem:[#allocation39_spill] sm:$0xff]  ;;  %v17057_v49 = vld [vmem:[#allocation46_spill] sm:$0xff] }
 0x2f4   :  { %vm5744_vm4 = vcmp.ge.f32.partialorder %v5680_v16, 0.0  ;;  %v5808_v10 = vmul.f32 0.2, %v5680_v16  ;;  %vm5739_vm5 = vcmp.ge.f32.partialorder %v5675_v56, 0.0  ;;  %v5803_v61 = vmul.f32 0.2, %v5675_v56 }
 0x2f5   :  { %17034 = vst [vmem:[#allocation23_spill] sm:$0xff] %v14758_v2  ;;  %17035 = vst [vmem:[#allocation11_spill] sm:$0xff] %v14761_v40  ;;  %v14770_v3 = vmul.f32 %v14708_v54, %v5495_v36  ;;  %v14773_v34 = vmul.f32 %v14708_v54, %v5496_v38  ;;  %v14776_v1 = vmul.f32 %v14708_v54, %v5497_v35  ;;  %v17080_v40 = vld [vmem:[#allocation21_spill] sm:$0xff] }
 0x2f6   :  { %17036 = vst [vmem:[#allocation13_spill] sm:$0xff] %v14764_v30  ;;  %17037 = vst [vmem:[#allocation19_spill] sm:$0xff] %v14767_v15  ;;  %v14779_v39 = vmul.f32 %v14708_v54, %v5498_v17  ;;  %v5872_v6 = vsel %vm5744_vm4, %v5680_v16, %v5808_v10  ;;  %v5867_v5 = vsel %vm5739_vm5, %v5675_v56, %v5803_v61  ;;  %v17056_v17 = vld [vmem:[#allocation45_spill] sm:$0xff]  ;;  %v17058_v56 = vld [vmem:[#allocation47_spill] sm:$0xff] }
 0x2f7   :  { %17038 = vst [vmem:[#allocation16_spill] sm:$0xff] %v14770_v3  ;;  %17039 = vst [vmem:[#allocation18_spill] sm:$0xff] %v14773_v34  ;;  %v5565_v7 = vmul.f32 %v14708_v54, %v14369_v59  ;;  %v5566_v14 = vmul.f32 %v14708_v54, %v14373_v45  ;;  %v6196_v29 = vcombine.high %v5872_v6, %v5872_v6  ;;  %v17059_v61 = vld [vmem:[#allocation48_spill] sm:$0xff]  ;;  %v17077_v3 = vld [vmem:[#allocation61_spill] sm:$0xff] }
 0x2f8   :  { %17040 = vst [vmem:[#allocation26_spill] sm:$0xff] %v14776_v1  ;;  %17041 = vst [vmem:[#allocation27_spill] sm:$0xff] %v14779_v39  ;;  %v5567_v11 = vmul.f32 %v14708_v54, %v14377_v0  ;;  %v5568_v20 = vmul.f32 %v14708_v54, %v14381_v32  ;;  %v5569_v22 = vmul.f32 %v14708_v54, %v17042_v52  ;;  %v17047_v0 = vld [vmem:[#allocation36_spill] sm:$0xff]  ;;  %v17078_v15 = vld [vmem:[#allocation62_spill] sm:$0xff] }
 0x2f9   :  { %6206 = vst.msk [vmem:[#allocation2 + $0x5b9] sm:$0xf] %vm5888_vm3, %v5872_v6  ;;  %6183 = vst.msk [vmem:[#allocation2 + $0x549] sm:$0xf] %vm5888_vm3, %v5867_v5  ;;  %v5570_v59 = vmul.f32 %v14708_v54, %v17043_v18  ;;  %v5571_v45 = vmul.f32 %v14708_v54, %v17044_v31  ;;  %v5572_v33 = vmul.f32 %v14708_v54, %v17045_v27  ;;  %v17061_v18 = vld [vmem:[#allocation50_spill] sm:$0xff]  ;;  %v17062_v27 = vld [vmem:[#allocation51_spill] sm:$0xff] }
 0x2fa   :  { %v5573_v13 = vmul.f32 %v14708_v54, %v17046_v8  ;;  %6207 = vst.msk [vmem:[#allocation2 + $0x5c1] sm:$0xf] %vm5888_vm3, %v6196_v29  ;;  %v5574_v32 = vmul.f32 %v14708_v54, %v17047_v0  ;;  %v5575_v9 = vmul.f32 %v14708_v54, %v17048_v60  ;;  %v5576_v25 = vmul.f32 %v14708_v54, %v17049_v48  ;;  %v17060_v29 = vld [vmem:[#allocation49_spill] sm:$0xff]  ;;  %v17063_v0 = vld [vmem:[#allocation52_spill] sm:$0xff]  ;;  %v17079_v30 = vld [vmem:[#allocation63_spill] sm:$0xff] }
 0x2fb   :  { %v5577_v23 = vmul.f32 %v14708_v54, %v17050_v58  ;;  %v5578_v43 = vmul.f32 %v14708_v54, %v17051_v42  ;;  %v5579_v36 = vmul.f32 %v14708_v54, %v17052_v24  ;;  %v5580_v38 = vmul.f32 %v14708_v54, %v17053_v55  ;;  %v17064_v48 = vld [vmem:[#allocation53_spill] sm:$0xff]  ;;  %v17065_v42 = vld [vmem:[#allocation54_spill] sm:$0xff]  ;;  %v17066_v55 = vld [vmem:[#allocation55_spill] sm:$0xff] }
 0x2fc   :  { %v5581_v35 = vmul.f32 %v14708_v54, %v17054_v63  ;;  %v5582_v51 = vmul.f32 %v14708_v54, %v17055_v37  ;;  %v5583_v41 = vmul.f32 %v14708_v54, %v17056_v17  ;;  %v5584_v16 = vmul.f32 %v14708_v54, %v17057_v49  ;;  %v17067_v17 = vld [vmem:[#allocation56_spill] sm:$0xff] }
 0x2fd   :  { %v5585_v10 = vmul.f32 %v14708_v54, %v17058_v56  ;;  %v5586_v6 = vmul.f32 %v14708_v54, %v17059_v61  ;;  %v5587_v52 = vmul.f32 %v14708_v54, %v17060_v29  ;;  %v5588_v31 = vmul.f32 %v14708_v54, %v17061_v18  ;;  %v17068_v56 = vld [vmem:[#allocation57_spill] sm:$0xff]  ;;  %v17069_v29 = vld [vmem:[#allocation58_spill] sm:$0xff] }
 0x2fe   :  { %v5589_v8 = vmul.f32 %v14708_v54, %v17062_v27  ;;  %v5590_v60 = vmul.f32 %v14708_v54, %v17063_v0  ;;  %v5591_v58 = vmul.f32 %v14708_v54, %v17064_v48  ;;  %v5592_v24 = vmul.f32 %v14708_v54, %v17065_v42  ;;  %v17071_v48 = vld [vmem:[#allocation59_spill] sm:$0xff] }
 0x2ff   :  { %v5593_v63 = vmul.f32 %v14708_v54, %v17066_v55  ;;  %v5594_v49 = vmul.f32 %v14708_v54, %v17067_v17  ;;  %v5595_v61 = vmul.f32 %v14708_v54, %v17068_v56  ;;  %v5596_v18 = vmul.f32 %v14708_v54, %v17069_v29  ;;  %v17072_v55 = vld [vmem:[#allocation60_spill] sm:$0xff]  ;;  %v17073_v17 = vld [vmem:[#allocation15_spill] sm:$0xff] }
 0x300   :  { %v11710_v37 = vld [vmem:[#allocation2 + $0x541] ss:$8 sps:$4 sm:$0xff]   ;;  %v5597_v27 = vmul.f32 %v14708_v54, %v14719_v47  ;;  %v14852_v0 = vmul.f32 %v14708_v54, %v14723_v28  ;;  %v5599_v42 = vmul.f32 %v14708_v54, %v17071_v48  ;;  %v5600_v39 = vmul.f32 %v14708_v54, %v17072_v55  ;;  %v17075_v47 = vld [vmem:[#allocation14_spill] sm:$0xff]  ;;  %v17076_v28 = vld [vmem:[#allocation17_spill] sm:$0xff] }
 0x301   :  { %v5601_v1 = vmul.f32 %v14708_v54, %v17073_v17  ;;  %6329 = vrot.lane.b32.xlu0 %v11710_v37, %s12105_s3  ;;  %v17074_v56 = vld [vmem:[#allocation12_spill] sm:$0xff]  ;;  %v5603_v34 = vmul.f32 %v14708_v54, %v17075_v47  ;;  %v5606_v48 = vmul.f32 %v14708_v54, %v17077_v3  ;;  %v5607_v55 = vmul.f32 %v14708_v54, %v14727_v19 }
 0x302   :  { %17070 = vst [vmem:[#allocation28_spill] sm:$0xff] %v14852_v0  ;;  %v5602_v29 = vmul.f32 %v14708_v54, %v17074_v56  ;;  %v5604_v0 = vmul.f32 %v14708_v54, %v17076_v28  ;;  %v5608_v17 = vmul.f32 %v14708_v54, %v17078_v15  ;;  %v5609_v37 = vmul.f32 %v14708_v54, %v17079_v30 }
 0x303   :  { %v5611_v56 = vmul.f32 %v14708_v54, %v17080_v40  ;;  %v5612_v47 = vmul.f32 %v14708_v54, %v14544_v62  ;;  %v6174_v2 = vcombine.high %v5867_v5, %v5867_v5  ;;  %v5667_v28 = vadd.f32 %v14713_v46, %v5597_v27 }
 0x304   :  { %v14883_v15 = vadd.f32 %v14713_v46, %v5565_v7  ;;  %v14886_v30 = vadd.f32 %v14713_v46, %v5566_v14  ;;  %v14889_v40 = vadd.f32 %v14713_v46, %v5567_v11  ;;  %v14892_v62 = vadd.f32 %v14713_v46, %v5568_v20  ;;  %v11742_v20 = vld [vmem:[%s16839_s4 + $0x40] sm:$0xff]  }
 0x305   :  { %vm5731_vm6 = vcmp.ge.f32.partialorder %v5667_v28, 0.0  ;;  %v5795_v3 = vmul.f32 0.2, %v5667_v28  ;;  %6184 = vst.msk [vmem:[#allocation2 + $0x551] sm:$0xf] %vm5888_vm3, %v6174_v2  ;;  %v14895_v54 = vadd.f32 %v14713_v46, %v5569_v22  ;;  %v14898_v2 = vadd.f32 %v14713_v46, %v5570_v59  ;;  %11297 = vmatprep.subr.bf16.mxu1 %v11742_v20 }
 0x306   :  { %v14901_v5 = vadd.f32 %v14713_v46, %v5571_v45  ;;  %v14904_v7 = vadd.f32 %v14713_v46, %v5572_v33  ;;  %v14907_v14 = vadd.f32 %v14713_v46, %v5573_v13  ;;  %v14910_v11 = vadd.f32 %v14713_v46, %v5574_v32 }
 0x307   :  { %v5859_v19 = vsel %vm5731_vm6, %v5667_v28, %v5795_v3  ;;  %v14916_v22 = vadd.f32 %v14713_v46, %v5575_v9  ;;  %v14919_v59 = vadd.f32 %v14713_v46, %v5576_v25  ;;  %v14922_v45 = vadd.f32 %v14713_v46, %v5577_v23 }
 0x308   :  { %6141 = vst.msk [vmem:[#allocation2 + $0x489] sm:$0xf] %vm5888_vm3, %v5859_v19  ;;  %v14925_v33 = vadd.f32 %v14713_v46, %v5578_v43  ;;  %v14928_v13 = vadd.f32 %v14713_v46, %v5579_v36  ;;  %v14931_v32 = vadd.f32 %v14713_v46, %v5580_v38  ;;  %v14934_v27 = vadd.f32 %v14713_v46, %v5581_v35 }
 0x309   :  { %v14937_v9 = vadd.f32 %v14713_v46, %v5582_v51  ;;  %v14940_v25 = vadd.f32 %v14713_v46, %v5583_v41  ;;  %v14943_v23 = vadd.f32 %v14713_v46, %v5584_v16  ;;  %v14946_v43 = vadd.f32 %v14713_v46, %v5585_v10  ;;  %v11745_v16 = vld [vmem:[%s16839_s4] sm:$0xff]  }
 0x30a   :  { %v14949_v36 = vadd.f32 %v14713_v46, %v5586_v6  ;;  %v14952_v38 = vadd.f32 %v14713_v46, %v5587_v52  ;;  %v14955_v35 = vadd.f32 %v14713_v46, %v5588_v31  ;;  %v14958_v51 = vadd.f32 %v14713_v46, %v5589_v8  ;;  %11298 = vmatpush3.bf16.msra.mxu1 %v11745_v16 }
 0x30b   :  { %v14961_v41 = vadd.f32 %v14713_v46, %v5590_v60  ;;  %v14967_v6 = vadd.f32 %v14713_v46, %v5591_v58  ;;  %v14970_v52 = vadd.f32 %v14713_v46, %v5592_v24  ;;  %v14973_v31 = vadd.f32 %v14713_v46, %v5593_v63 }
 0x30c   :  { %v14976_v8 = vadd.f32 %v14713_v46, %v5594_v49  ;;  %v14979_v60 = vadd.f32 %v14713_v46, %v5595_v61  ;;  %v14982_v28 = vadd.f32 %v14713_v46, %v5596_v18  ;;  %v14985_v3 = vadd.f32 %v14713_v46, %v5599_v42 }
 0x30d   :  { %17081 = vst [vmem:[#allocation29_spill] sm:$0xff] %v14970_v52  ;;  %v14989_v58 = vadd.f32 %v14713_v46, %v5600_v39  ;;  %v14992_v24 = vadd.f32 %v14713_v46, %v5601_v1  ;;  %v14995_v63 = vadd.f32 %v14713_v46, %v5602_v29  ;;  %v14998_v49 = vadd.f32 %v14713_v46, %v5603_v34 }
 0x30e   :  { %17082 = vst [vmem:[#allocation30_spill] sm:$0xff] %v14979_v60  ;;  %17083 = vst [vmem:[#allocation31_spill] sm:$0xff] %v14982_v28  ;;  %v15001_v61 = vadd.f32 %v14713_v46, %v5604_v0  ;;  %v15004_v18 = vadd.f32 %v14713_v46, %v5606_v48  ;;  %v5677_v42 = vadd.f32 %v14713_v46, %v5607_v55  ;;  %v11752_v55 = vld [vmem:[%s16839_s4 + $0x48] sm:$0xff]  }
 0x30f   :  { %v11711_v10 = vld [vmem:[#allocation2 + $0x481] ss:$8 sps:$4 sm:$0xff]   ;;  %17084 = vst [vmem:[#allocation32_spill] sm:$0xff] %v14985_v3  ;;  %17085 = vst [vmem:[#allocation33_spill] sm:$0xff] %v14989_v58  ;;  %v15008_v39 = vadd.f32 %v14713_v46, %v5608_v17  ;;  %v15011_v1 = vadd.f32 %v14713_v46, %v5609_v37  ;;  %v15014_v29 = vadd.f32 %v14713_v46, %v5611_v56  ;;  %11299 = vmatprep.subr.bf16.mxu1 %v11752_v55 }
 0x310   :  { %6262 = vrot.lane.b32.xlu1 %v11711_v10, %s12105_s3  ;;  %17086 = vst [vmem:[#allocation34_spill] sm:$0xff] %v14992_v24  ;;  %17087 = vst [vmem:[#allocation20_spill] sm:$0xff] %v14995_v63  ;;  %v15017_v34 = vadd.f32 %v14713_v46, %v5612_v47  ;;  %v6132_v20 = vcombine.high %v5859_v19, %v5859_v19  ;;  %vm5741_vm7 = vcmp.ge.f32.partialorder %v5677_v42, 0.0  ;;  %v5805_v0 = vmul.f32 0.2, %v5677_v42 }
 0x311   :  { %17088 = vst [vmem:[#allocation22_spill] sm:$0xff] %v14998_v49  ;;  %17089 = vst [vmem:[#allocation24_spill] sm:$0xff] %v15001_v61  ;;  %v5619_v17 = vadd.f32 %v14713_v46, %v14732_v44  ;;  %v5620_v37 = vadd.f32 %v14713_v46, %v14735_v50  ;;  %v5621_v56 = vadd.f32 %v14713_v46, %v14738_v21  ;;  %v17095_v21 = vld [vmem:[#allocation23_spill] sm:$0xff] }
 0x312   :  { %17090 = vst [vmem:[#allocation25_spill] sm:$0xff] %v15004_v18  ;;  %17091 = vst [vmem:[#allocation35_spill] sm:$0xff] %v15008_v39  ;;  %v5869_v48 = vsel %vm5741_vm7, %v5677_v42, %v5805_v0  ;;  %v5622_v47 = vadd.f32 %v14713_v46, %v14741_v57  ;;  %v5623_v10 = vadd.f32 %v14713_v46, %v14744_v53  ;;  %v17097_v53 = vld [vmem:[#allocation13_spill] sm:$0xff] }
 0x313   :  { %17092 = vst [vmem:[#allocation36_spill] sm:$0xff] %v15011_v1  ;;  %17093 = vst [vmem:[#allocation37_spill] sm:$0xff] %v15014_v29  ;;  %v6176_v16 = vcombine.high %v5869_v48, %v5869_v48  ;;  %v15036_v42 = vadd.f32 %v14713_v46, %v14747_v26  ;;  %v15040_v44 = vadd.f32 %v14713_v46, %v14752_v12  ;;  %v17102_v29 = vld [vmem:[#allocation27_spill] sm:$0xff]  ;;  %vm5683_vm8 = vcmp.ge.f32.partialorder %v5619_v17, 0.0 }
 0x314   :  { %17094 = vst [vmem:[#allocation38_spill] sm:$0xff] %v15017_v34  ;;  %6142 = vst.msk [vmem:[#allocation2 + $0x491] sm:$0xf] %vm5888_vm3, %v6132_v20  ;;  %v15044_v50 = vadd.f32 %v14713_v46, %v14755_v4  ;;  %v15048_v57 = vadd.f32 %v14713_v46, %v17095_v21  ;;  %v17096_v20 = vld [vmem:[#allocation11_spill] sm:$0xff]  ;;  %v15056_v26 = vadd.f32 %v14713_v46, %v17097_v53  ;;  %v17099_v4 = vld [vmem:[#allocation16_spill] sm:$0xff]  ;;  %vm5684_vm9 = vcmp.ge.f32.partialorder %v5620_v37, 0.0 }
 0x315   :  { %6187 = vst.msk [vmem:[#allocation2 + $0x579] sm:$0xf] %vm5888_vm3, %v5869_v48  ;;  %v15052_v0 = vadd.f32 %v14713_v46, %v17096_v20  ;;  %v17098_v48 = vld [vmem:[#allocation19_spill] sm:$0xff]  ;;  %6188 = vst.msk [vmem:[#allocation2 + $0x581] sm:$0xf] %vm5888_vm3, %v6176_v16  ;;  %v15066_v55 = vadd.f32 %v14713_v46, %v17099_v4  ;;  %v17100_v21 = vld [vmem:[#allocation18_spill] sm:$0xff] }
 0x316   :  { %v15060_v12 = vadd.f32 %v14713_v46, %v17098_v48  ;;  %v15070_v20 = vadd.f32 %v14713_v46, %v17100_v21  ;;  %v17101_v34 = vld [vmem:[#allocation26_spill] sm:$0xff]  ;;  %v15078_v48 = vadd.f32 %v14713_v46, %v17102_v29  ;;  %vm5685_vm10 = vcmp.ge.f32.partialorder %v5621_v56, 0.0  ;;  %v17103_v16 = vld [vmem:[#allocation28_spill] sm:$0xff] }
 0x317   :  { %v15074_v53 = vadd.f32 %v14713_v46, %v17101_v34  ;;  %vm5686_vm11 = vcmp.ge.f32.partialorder %v5622_v47, 0.0  ;;  %vm5687_vm12 = vcmp.ge.f32.partialorder %v5623_v10, 0.0  ;;  %vm5688_vm13 = vcmp.ge.f32.partialorder %v15036_v42, 0.0 }
 0x318   :  { %vm5689_vm14 = vcmp.ge.f32.partialorder %v15040_v44, 0.0  ;;  %vm5690_vm15 = vcmp.ge.f32.partialorder %v15044_v50, 0.0  ;;  %vm5691_vm0 = vcmp.ge.f32.partialorder %v15048_v57, 0.0  ;;  %vm5692_vm1 = vcmp.ge.f32.partialorder %v15052_v0, 0.0 }
 0x319   :  { %v5747_v29 = vmul.f32 0.2, %v5619_v17  ;;  %v5748_v34 = vmul.f32 0.2, %v5620_v37  ;;  %v15090_v4 = vadd.f32 %v14713_v46, %v17103_v16  ;;  %vm5693_vm4 = vcmp.ge.f32.partialorder %v15056_v26, 0.0 }
 0x31a   :  { %v5749_v21 = vmul.f32 0.2, %v5621_v56  ;;  %v5750_v1 = vmul.f32 0.2, %v5622_v47  ;;  %v5751_v39 = vmul.f32 0.2, %v5623_v10 }
 0x31b   :  { %vm5694_vm5 = vcmp.ge.f32.partialorder %v15060_v12, 0.0  ;;  %v5752_v18 = vmul.f32 0.2, %v15036_v42  ;;  %v5754_v61 = vmul.f32 0.2, %v15044_v50  ;;  %v15098_v49 = vsel %vm5683_vm8, %v5619_v17, %v5747_v29 }
 0x31c   :  { %v11712_v19 = vld [vmem:[#allocation2 + $0x571] ss:$8 sps:$4 sm:$0xff]   ;;  %17104 = vst [vmem:[#allocation39_spill] sm:$0xff] %v15098_v49  ;;  %vm5695_vm6 = vcmp.ge.f32.partialorder %v15066_v55, 0.0  ;;  %v5755_v46 = vmul.f32 0.2, %v15048_v57  ;;  %v15107_v24 = vsel %vm5684_vm9, %v5620_v37, %v5748_v34  ;;  %v15122_v3 = vsel %vm5685_vm10, %v5621_v56, %v5749_v21 }
 0x31d   :  { %6333 = vrot.lane.b32.xlu0 %v11712_v19, %s12105_s3  ;;  %v11755_v19 = vld [vmem:[%s16839_s4 + $0x8] sm:$0xff]   ;;  %v5756_v16 = vmul.f32 0.2, %v15052_v0  ;;  %v15104_v63 = vmul.f32 0.2, %v15056_v26  ;;  %17105 = vst [vmem:[#allocation40_spill] sm:$0xff] %v15107_v24  ;;  %v15137_v28 = vsel %vm5686_vm11, %v5622_v47, %v5750_v1 }
 0x31e   :  { %11300 = vmatpush3.bf16.msra.mxu1 %v11755_v19  ;;  %v5753_v19 = vmul.f32 0.2, %v15040_v44  ;;  %5889 = vst.msk [vmem:[#allocation2 + $0x9] sm:$0xf] %vm5888_vm3, %v15098_v49  ;;  %vm5696_vm7 = vcmp.ge.f32.partialorder %v15070_v20, 0.0  ;;  %17106 = vst [vmem:[#allocation41_spill] sm:$0xff] %v15122_v3 }
 0x31f   :  { %v15113_v17 = vmul.f32 0.2, %v15060_v12  ;;  %v15116_v29 = vmul.f32 0.2, %v15066_v55  ;;  %v15119_v58 = vmul.f32 0.2, %v15070_v20 }
 0x320   :  { %5891 = vst.msk [vmem:[#allocation2 + $0x19] sm:$0xf] %vm5888_vm3, %v15107_v24  ;;  %vm5697_vm8 = vcmp.ge.f32.partialorder %v15074_v53, 0.0  ;;  %v15128_v37 = vmul.f32 0.2, %v15074_v53  ;;  %17108 = vst [vmem:[#allocation43_spill] sm:$0xff] %v15137_v28 }
 0x321   :  { %v15131_v34 = vmul.f32 0.2, %v15078_v48  ;;  %v15134_v49 = vmul.f32 0.2, %v14883_v15  ;;  %5893 = vst.msk [vmem:[#allocation2 + $0x39] sm:$0xf] %vm5888_vm3, %v15122_v3 }
 0x322   :  { %vm5698_vm9 = vcmp.ge.f32.partialorder %v15078_v48, 0.0  ;;  %v15143_v56 = vmul.f32 0.2, %v14886_v30  ;;  %v15146_v21 = vmul.f32 0.2, %v14889_v40  ;;  %vm5732_vm10 = vcmp.ge.f32.partialorder %v15090_v4, 0.0 }
 0x323   :  { %17107 = vst [vmem:[#allocation42_spill] sm:$0xff] %v15131_v34  ;;  %v15149_v24 = vmul.f32 0.2, %v14892_v62  ;;  %v15152_v34 = vsel %vm5687_vm12, %v5623_v10, %v5751_v39  ;;  %5895 = vst.msk [vmem:[#allocation2 + $0x49] sm:$0xf] %vm5888_vm3, %v15137_v28  ;;  %vm5699_vm11 = vcmp.ge.f32.partialorder %v14883_v15, 0.0 }
 0x324   :  { %17110 = vst [vmem:[#allocation45_spill] sm:$0xff] %v15152_v34  ;;  %v15158_v1 = vmul.f32 0.2, %v14895_v54  ;;  %v15161_v47 = vmul.f32 0.2, %v14898_v2 }
 0x325   :  { %17109 = vst [vmem:[#allocation44_spill] sm:$0xff] %v15149_v24  ;;  %v15164_v3 = vmul.f32 0.2, %v14901_v5  ;;  %v15169_v24 = vsel %vm5688_vm13, %v15036_v42, %v5752_v18  ;;  %5910 = vst.msk [vmem:[#allocation2 + $0x69] sm:$0xf] %vm5888_vm3, %v15152_v34  ;;  %vm17151_vm13 = vcmp.ge.f32.partialorder %v14889_v40, 0.0 }
 0x326   :  { %17112 = vst [vmem:[#allocation47_spill] sm:$0xff] %v15169_v24  ;;  %v15175_v39 = vmul.f32 0.2, %v14904_v7  ;;  %v15178_v10 = vmul.f32 0.2, %v14907_v14 }
 0x327   :  { %17111 = vst [vmem:[#allocation46_spill] sm:$0xff] %v15164_v3  ;;  %v15181_v28 = vmul.f32 0.2, %v14910_v11  ;;  %v15186_v3 = vsel %vm5689_vm14, %v15040_v44, %v5753_v19  ;;  %5912 = vst.msk [vmem:[#allocation2 + $0x79] sm:$0xf] %vm5888_vm3, %v15169_v24  ;;  %v15205_v44 = vsel %vm5690_vm15, %v15044_v50, %v5754_v61  ;;  %vm5703_vm14 = vcmp.ge.f32.partialorder %v14895_v54, 0.0 }
 0x328   :  { %17113 = vst [vmem:[#allocation48_spill] sm:$0xff] %v15186_v3  ;;  %v15194_v18 = vmul.f32 0.2, %v14916_v22  ;;  %v15197_v42 = vmul.f32 0.2, %v14919_v59  ;;  %17114 = vst [vmem:[#allocation49_spill] sm:$0xff] %v15205_v44  ;;  %v15225_v50 = vsel %vm5691_vm0, %v15048_v57, %v5755_v46  ;;  %v15245_v46 = vsel %vm5692_vm1, %v15052_v0, %v5756_v16 }
 0x329   :  { %v15200_v34 = vmul.f32 0.2, %v14922_v45  ;;  %5914 = vst.msk [vmem:[#allocation2 + $0x99] sm:$0xf] %vm5888_vm3, %v15186_v3  ;;  %v15214_v19 = vmul.f32 0.2, %v14925_v33  ;;  %v15266_v16 = vsel %vm5693_vm4, %v15056_v26, %v15104_v63  ;;  %v15287_v26 = vsel %vm5694_vm5, %v15060_v12, %v15113_v17 }
 0x32a   :  { %v15217_v24 = vmul.f32 0.2, %v14928_v13  ;;  %v15220_v61 = vmul.f32 0.2, %v14931_v32  ;;  %17116 = vst [vmem:[#allocation51_spill] sm:$0xff] %v15225_v50  ;;  %vm5707_vm15 = vcmp.ge.f32.partialorder %v14907_v14, 0.0  ;;  %v15308_v17 = vsel %vm5695_vm6, %v15066_v55, %v15116_v29 }
 0x32b   :  { %5916 = vst.msk [vmem:[#allocation2 + $0xa9] sm:$0xf] %vm5888_vm3, %v15205_v44  ;;  %v15234_v3 = vmul.f32 0.2, %v14934_v27  ;;  %v15240_v57 = vmul.f32 0.2, %v14940_v25  ;;  %v15329_v29 = vsel %vm5696_vm7, %v15070_v20, %v15119_v58  ;;  %v15348_v58 = vsel %vm5697_vm8, %v15074_v53, %v15128_v37 }
 0x32c   :  { %17115 = vst [vmem:[#allocation50_spill] sm:$0xff] %v15220_v61  ;;  %v15237_v61 = vmul.f32 0.2, %v14937_v9  ;;  %17118 = vst [vmem:[#allocation53_spill] sm:$0xff] %v15245_v46  ;;  %vm5711_vm0 = vcmp.ge.f32.partialorder %v14922_v45, 0.0  ;;  %vm5715_vm1 = vcmp.ge.f32.partialorder %v14934_v27, 0.0 }
 0x32d   :  { %17117 = vst [vmem:[#allocation52_spill] sm:$0xff] %v15240_v57  ;;  %5931 = vst.msk [vmem:[#allocation2 + $0xc9] sm:$0xf] %vm5888_vm3, %v15225_v50  ;;  %v15254_v44 = vmul.f32 0.2, %v14943_v23  ;;  %vm5719_vm4 = vcmp.ge.f32.partialorder %v14946_v43, 0.0 }
 0x32e   :  { %v15257_v57 = vmul.f32 0.2, %v14946_v43  ;;  %v15260_v0 = vmul.f32 0.2, %v14949_v36  ;;  %17120 = vst [vmem:[#allocation55_spill] sm:$0xff] %v15266_v16  ;;  %17122 = vst [vmem:[#allocation57_spill] sm:$0xff] %v15287_v26 }
 0x32f   :  { %5933 = vst.msk [vmem:[#allocation2 + $0xd9] sm:$0xf] %vm5888_vm3, %v15245_v46  ;;  %v15275_v50 = vmul.f32 0.2, %v14952_v38  ;;  %v15281_v63 = vmul.f32 0.2, %v14958_v51 }
 0x330   :  { %17119 = vst [vmem:[#allocation54_spill] sm:$0xff] %v15260_v0  ;;  %v15278_v0 = vmul.f32 0.2, %v14955_v35  ;;  %5935 = vst.msk [vmem:[#allocation2 + $0xf9] sm:$0xf] %vm5888_vm3, %v15266_v16  ;;  %vm5723_vm5 = vcmp.ge.f32.partialorder %v14958_v51, 0.0 }
 0x331   :  { %17121 = vst [vmem:[#allocation56_spill] sm:$0xff] %v15281_v63  ;;  %v15296_v46 = vmul.f32 0.2, %v14961_v41  ;;  %v15299_v63 = vmul.f32 0.2, %v14967_v6  ;;  %17124 = vst [vmem:[#allocation59_spill] sm:$0xff] %v15308_v17 }
 0x332   :  { %v15302_v12 = vmul.f32 0.2, %v14970_v52  ;;  %5937 = vst.msk [vmem:[#allocation2 + $0x109] sm:$0xf] %vm5888_vm3, %v15287_v26  ;;  %v15317_v16 = vmul.f32 0.2, %v14973_v31 }
 0x333   :  { %v15323_v55 = vmul.f32 0.2, %v14979_v60  ;;  %17128 = vst [vmem:[#allocation14_spill] sm:$0xff] %v15329_v29  ;;  %5952 = vst.msk [vmem:[#allocation2 + $0x129] sm:$0xf] %vm5888_vm3, %v15308_v17  ;;  %vm5727_vm6 = vcmp.ge.f32.partialorder %v14973_v31, 0.0 }
 0x334   :  { %17123 = vst [vmem:[#allocation58_spill] sm:$0xff] %v15302_v12  ;;  %17125 = vst [vmem:[#allocation60_spill] sm:$0xff] %v15317_v16  ;;  %v15320_v12 = vmul.f32 0.2, %v14976_v8  ;;  %v17129_v26 = vld [vmem:[#allocation31_spill] sm:$0xff]  ;;  %v17131_v16 = vld [vmem:[#allocation32_spill] sm:$0xff] }
 0x335   :  { %17127 = vst [vmem:[#allocation12_spill] sm:$0xff] %v15323_v55  ;;  %v5796_v55 = vmul.f32 0.2, %v15090_v4  ;;  %v15342_v52 = vmul.f32 0.2, %v17131_v16  ;;  %17133 = vst [vmem:[#allocation62_spill] sm:$0xff] %v15348_v58 }
 0x336   :  { %17126 = vst [vmem:[#allocation15_spill] sm:$0xff] %v15320_v12  ;;  %v15338_v12 = vmul.f32 0.2, %v17129_v26  ;;  %5954 = vst.msk [vmem:[#allocation2 + $0x139] sm:$0xf] %vm5888_vm3, %v15329_v29  ;;  %vm5733_vm7 = vcmp.ge.f32.partialorder %v17131_v16, 0.0 }
 0x337   :  { %17132 = vst [vmem:[#allocation61_spill] sm:$0xff] %v15342_v52  ;;  %v17134_v20 = vld [vmem:[#allocation33_spill] sm:$0xff]  ;;  %v17135_v17 = vld [vmem:[#allocation34_spill] sm:$0xff]  ;;  %v17136_v26 = vld [vmem:[#allocation20_spill] sm:$0xff] }
 0x338   :  { %17130 = vst [vmem:[#allocation17_spill] sm:$0xff] %v15338_v12  ;;  %v15357_v12 = vmul.f32 0.2, %v17134_v20  ;;  %v15360_v52 = vmul.f32 0.2, %v17135_v17  ;;  %v17139_v37 = vld [vmem:[#allocation42_spill] sm:$0xff] }
 0x339   :  { %v15363_v53 = vmul.f32 0.2, %v17136_v26  ;;  %v15369_v29 = vsel %vm5698_vm9, %v15078_v48, %v17139_v37  ;;  %5956 = vst.msk [vmem:[#allocation2 + $0x159] sm:$0xf] %vm5888_vm3, %v15348_v58  ;;  %v17141_v16 = vld [vmem:[#allocation22_spill] sm:$0xff]  ;;  %v17142_v60 = vld [vmem:[#allocation24_spill] sm:$0xff]  ;;  %v15389_v37 = vsel %vm5732_vm10, %v15090_v4, %v5796_v55  ;;  %v15411_v4 = vsel %vm5699_vm11, %v14883_v15, %v15134_v49 }
 0x33a   :  { %17137 = vst [vmem:[#allocation63_spill] sm:$0xff] %v15360_v52  ;;  %17140 = vst [vmem:[#allocation23_spill] sm:$0xff] %v15369_v29  ;;  %vm5737_vm8 = vcmp.ge.f32.partialorder %v17141_v16, 0.0  ;;  %vm5738_vm2 = vcmp.ge.f32.partialorder %v17142_v60, 0.0  ;;  %v17143_v20 = vld [vmem:[#allocation25_spill] sm:$0xff]  ;;  %v17144_v17 = vld [vmem:[#allocation35_spill] sm:$0xff] }
 0x33b   :  { %17138 = vst [vmem:[#allocation21_spill] sm:$0xff] %v15363_v53  ;;  %v15378_v26 = vmul.f32 0.2, %v17141_v16  ;;  %v15381_v53 = vmul.f32 0.2, %v17142_v60  ;;  %17146 = vst [vmem:[#allocation13_spill] sm:$0xff] %v15389_v37 }
 0x33c   :  { %v15384_v48 = vmul.f32 0.2, %v17143_v20  ;;  %5958 = vst.msk [vmem:[#allocation2 + $0x169] sm:$0xf] %vm5888_vm3, %v15369_v29  ;;  %v17147_v58 = vld [vmem:[#allocation36_spill] sm:$0xff]  ;;  %v17148_v52 = vld [vmem:[#allocation37_spill] sm:$0xff] }
 0x33d   :  { %vm5743_vm9 = vcmp.ge.f32.partialorder %v17147_v58, 0.0  ;;  %vm5745_vm12 = vcmp.ge.f32.partialorder %v17148_v52, 0.0  ;;  %v17149_v16 = vld [vmem:[#allocation38_spill] sm:$0xff]  ;;  %v15397_v60 = vmul.f32 0.2, %v17144_v17  ;;  %vm17150_vm10 = vcmp.ge.f32.partialorder %v14886_v30, 0.0 }
 0x33e   :  { %17145 = vst [vmem:[#allocation11_spill] sm:$0xff] %v15384_v48  ;;  %v15400_v20 = vmul.f32 0.2, %v17147_v58  ;;  %v15403_v48 = vmul.f32 0.2, %v17148_v52  ;;  %v15420_v29 = vsel %vm17150_vm10, %v14886_v30, %v15143_v56  ;;  %v17152_v52 = vld [vmem:[#allocation44_spill] sm:$0xff]  ;;  %v15440_v30 = vsel %vm5703_vm14, %v14895_v54, %v15158_v1 }
 0x33f   :  { %6143 = vst.msk [vmem:[#allocation2 + $0x499] sm:$0xf] %vm5888_vm3, %v15389_v37  ;;  %v15414_v55 = vmul.f32 0.2, %v17149_v16  ;;  %v15426_v37 = vsel %vm17151_vm13, %v14889_v40, %v15146_v21  ;;  %vm17153_vm11 = vcmp.ge.f32.partialorder %v14892_v62, 0.0  ;;  %vm17154_vm13 = vcmp.ge.f32.partialorder %v14898_v2, 0.0 }
 0x340   :  { %v15432_v15 = vsel %vm17153_vm11, %v14892_v62, %v17152_v52  ;;  %5973 = vst.msk [vmem:[#allocation2 + $0x189] sm:$0xf] %vm5888_vm3, %v15411_v4  ;;  %v15446_v40 = vsel %vm17154_vm13, %v14898_v2, %v15161_v47  ;;  %v17155_v49 = vld [vmem:[#allocation46_spill] sm:$0xff]  ;;  %vm17156_vm10 = vcmp.ge.f32.partialorder %v14901_v5, 0.0  ;;  %vm17157_vm11 = vcmp.ge.f32.partialorder %v14904_v7, 0.0  ;;  %v17177_v21 = vld [vmem:[#allocation29_spill] sm:$0xff] }
 0x341   :  { %v15452_v62 = vsel %vm17156_vm10, %v14901_v5, %v17155_v49  ;;  %v15458_v52 = vsel %vm17157_vm11, %v14904_v7, %v15175_v39  ;;  %5975 = vst.msk [vmem:[#allocation2 + $0x199] sm:$0xf] %vm5888_vm3, %v15420_v29  ;;  %5977 = vst.msk [vmem:[#allocation2 + $0x1b9] sm:$0xf] %vm5888_vm3, %v15426_v37  ;;  %v15470_v54 = vsel %vm5707_vm15, %v14907_v14, %v15178_v10  ;;  %vm17158_vm14 = vcmp.ge.f32.partialorder %v14910_v11, 0.0  ;;  %v17176_v56 = vld [vmem:[#allocation58_spill] sm:$0xff] }
 0x342   :  { %5979 = vst.msk [vmem:[#allocation2 + $0x1c9] sm:$0xf] %vm5888_vm3, %v15432_v15  ;;  %v15476_v2 = vsel %vm17158_vm14, %v14910_v11, %v15181_v28  ;;  %vm17159_vm13 = vcmp.ge.f32.partialorder %v14916_v22, 0.0  ;;  %vm17160_vm10 = vcmp.ge.f32.partialorder %v14919_v59, 0.0  ;;  %5994 = vst.msk [vmem:[#allocation2 + $0x1e9] sm:$0xf] %vm5888_vm3, %v15440_v30  ;;  %v15502_v14 = vsel %vm5711_vm0, %v14922_v45, %v15200_v34 }
 0x343   :  { %v15482_v5 = vsel %vm17159_vm13, %v14916_v22, %v15194_v18  ;;  %v15488_v7 = vsel %vm17160_vm10, %v14919_v59, %v15197_v42  ;;  %5996 = vst.msk [vmem:[#allocation2 + $0x1f9] sm:$0xf] %vm5888_vm3, %v15446_v40  ;;  %5998 = vst.msk [vmem:[#allocation2 + $0x219] sm:$0xf] %vm5888_vm3, %v15452_v62  ;;  %vm17161_vm15 = vcmp.ge.f32.partialorder %v14925_v33, 0.0  ;;  %vm17162_vm11 = vcmp.ge.f32.partialorder %v14928_v13, 0.0 }
 0x344   :  { %6000 = vst.msk [vmem:[#allocation2 + $0x229] sm:$0xf] %vm5888_vm3, %v15458_v52  ;;  %v15508_v11 = vsel %vm17161_vm15, %v14925_v33, %v15214_v19  ;;  %v15514_v22 = vsel %vm17162_vm11, %v14928_v13, %v15217_v24  ;;  %v17163_v59 = vld [vmem:[#allocation50_spill] sm:$0xff]  ;;  %vm17164_vm14 = vcmp.ge.f32.partialorder %v14931_v32, 0.0  ;;  %6015 = vst.msk [vmem:[#allocation2 + $0x249] sm:$0xf] %vm5888_vm3, %v15470_v54  ;;  %v15534_v45 = vsel %vm5715_vm1, %v14934_v27, %v15234_v3 }
 0x345   :  { %v15520_v28 = vsel %vm17164_vm14, %v14931_v32, %v17163_v59  ;;  %6017 = vst.msk [vmem:[#allocation2 + $0x259] sm:$0xf] %vm5888_vm3, %v15476_v2  ;;  %6019 = vst.msk [vmem:[#allocation2 + $0x279] sm:$0xf] %vm5888_vm3, %v15482_v5  ;;  %vm17165_vm0 = vcmp.ge.f32.partialorder %v14937_v9, 0.0  ;;  %v17166_v13 = vld [vmem:[#allocation52_spill] sm:$0xff]  ;;  %v15566_v27 = vsel %vm5719_vm4, %v14946_v43, %v15257_v57 }
 0x346   :  { %6021 = vst.msk [vmem:[#allocation2 + $0x289] sm:$0xf] %vm5888_vm3, %v15488_v7  ;;  %v15540_v33 = vsel %vm17165_vm0, %v14937_v9, %v15237_v61  ;;  %vm17167_vm13 = vcmp.ge.f32.partialorder %v14940_v25, 0.0  ;;  %vm17168_vm10 = vcmp.ge.f32.partialorder %v14943_v23, 0.0  ;;  %6036 = vst.msk [vmem:[#allocation2 + $0x2a9] sm:$0xf] %vm5888_vm3, %v15502_v14 }
 0x347   :  { %v15546_v32 = vsel %vm17167_vm13, %v14940_v25, %v17166_v13  ;;  %v15552_v24 = vsel %vm17168_vm10, %v14943_v23, %v15254_v44  ;;  %6038 = vst.msk [vmem:[#allocation2 + $0x2b9] sm:$0xf] %vm5888_vm3, %v15508_v11  ;;  %6040 = vst.msk [vmem:[#allocation2 + $0x2d9] sm:$0xf] %vm5888_vm3, %v15514_v22  ;;  %v17169_v9 = vld [vmem:[#allocation54_spill] sm:$0xff]  ;;  %vm17170_vm1 = vcmp.ge.f32.partialorder %v14949_v36, 0.0 }
 0x348   :  { %6042 = vst.msk [vmem:[#allocation2 + $0x2e9] sm:$0xf] %vm5888_vm3, %v15520_v28  ;;  %v15572_v25 = vsel %vm17170_vm1, %v14949_v36, %v17169_v9  ;;  %vm17171_vm15 = vcmp.ge.f32.partialorder %v14952_v38, 0.0  ;;  %vm17172_vm11 = vcmp.ge.f32.partialorder %v14955_v35, 0.0  ;;  %6057 = vst.msk [vmem:[#allocation2 + $0x309] sm:$0xf] %vm5888_vm3, %v15534_v45 }
 0x349   :  { %v15578_v23 = vsel %vm17171_vm15, %v14952_v38, %v15275_v50  ;;  %v15584_v3 = vsel %vm17172_vm11, %v14955_v35, %v15278_v0  ;;  %6059 = vst.msk [vmem:[#allocation2 + $0x319] sm:$0xf] %vm5888_vm3, %v15540_v33  ;;  %6061 = vst.msk [vmem:[#allocation2 + $0x339] sm:$0xf] %vm5888_vm3, %v15546_v32  ;;  %v11713_v43 = vld [vmem:[#allocation2 + $0x491] ss:$8 sps:$4 sm:$0xff]  }
 0x34a   :  { %6063 = vst.msk [vmem:[#allocation2 + $0x349] sm:$0xf] %vm5888_vm3, %v15552_v24  ;;  %v17173_v36 = vld [vmem:[#allocation56_spill] sm:$0xff]  ;;  %vm17174_vm4 = vcmp.ge.f32.partialorder %v14961_v41, 0.0  ;;  %vm17175_vm14 = vcmp.ge.f32.partialorder %v14967_v6, 0.0  ;;  %vm17178_vm0 = vcmp.ge.f32.partialorder %v17177_v21, 0.0  ;;  %6264 = vrot.lane.b32.xlu1 %v11713_v43, %s12105_s3 }
 0x34b   :  { %v15598_v38 = vsel %vm5723_vm5, %v14958_v51, %v17173_v36  ;;  %v15604_v35 = vsel %vm17174_vm4, %v14961_v41, %v15296_v46  ;;  %v15610_v34 = vsel %vm17175_vm14, %v14967_v6, %v15299_v63  ;;  %v15616_v1 = vsel %vm17178_vm0, %v17177_v21, %v17176_v56  ;;  %6078 = vst.msk [vmem:[#allocation2 + $0x369] sm:$0xf] %vm5888_vm3, %v15566_v27  ;;  %v17179_v51 = vld [vmem:[#allocation60_spill] sm:$0xff]  ;;  %v17180_v6 = vld [vmem:[#allocation15_spill] sm:$0xff]  ;;  %v17183_v10 = vld [vmem:[#allocation30_spill] sm:$0xff] }
 0x34c   :  { %6080 = vst.msk [vmem:[#allocation2 + $0x379] sm:$0xf] %vm5888_vm3, %v15572_v25  ;;  %6082 = vst.msk [vmem:[#allocation2 + $0x399] sm:$0xf] %vm5888_vm3, %v15578_v23  ;;  %v15630_v41 = vsel %vm5727_vm6, %v14973_v31, %v17179_v51  ;;  %vm17181_vm5 = vcmp.ge.f32.partialorder %v14976_v8, 0.0  ;;  %v17182_v39 = vld [vmem:[#allocation12_spill] sm:$0xff] }
 0x34d   :  { %6084 = vst.msk [vmem:[#allocation2 + $0x3a9] sm:$0xf] %vm5888_vm3, %v15584_v3  ;;  %v15636_v47 = vsel %vm17181_vm5, %v14976_v8, %v17180_v6  ;;  %vm17184_vm13 = vcmp.ge.f32.partialorder %v17183_v10, 0.0  ;;  %v17185_v42 = vld [vmem:[#allocation17_spill] sm:$0xff]  ;;  %v17186_v44 = vld [vmem:[#allocation31_spill] sm:$0xff]  ;;  %v17189_v8 = vld [vmem:[#allocation32_spill] sm:$0xff] }
 0x34e   :  { %v15642_v18 = vsel %vm17184_vm13, %v17183_v10, %v17182_v39  ;;  %vm17187_vm10 = vcmp.ge.f32.partialorder %v17186_v44, 0.0  ;;  %6099 = vst.msk [vmem:[#allocation2 + $0x3c9] sm:$0xf] %vm5888_vm3, %v15598_v38  ;;  %6101 = vst.msk [vmem:[#allocation2 + $0x3d9] sm:$0xf] %vm5888_vm3, %v15604_v35  ;;  %v17188_v31 = vld [vmem:[#allocation61_spill] sm:$0xff] }
 0x34f   :  { %v15648_v19 = vsel %vm17187_vm10, %v17186_v44, %v17185_v42  ;;  %6103 = vst.msk [vmem:[#allocation2 + $0x3f9] sm:$0xf] %vm5888_vm3, %v15610_v34  ;;  %6105 = vst.msk [vmem:[#allocation2 + $0x409] sm:$0xf] %vm5888_vm3, %v15616_v1  ;;  %v15663_v61 = vsel %vm5733_vm7, %v17189_v8, %v17188_v31  ;;  %v17190_v50 = vld [vmem:[#allocation33_spill] sm:$0xff]  ;;  %v17192_v46 = vld [vmem:[#allocation63_spill] sm:$0xff] }
 0x350   :  { %vm17191_vm6 = vcmp.ge.f32.partialorder %v17190_v50, 0.0  ;;  %v17193_v0 = vld [vmem:[#allocation34_spill] sm:$0xff]  ;;  %v17195_v49 = vld [vmem:[#allocation21_spill] sm:$0xff]  ;;  %v17196_v59 = vld [vmem:[#allocation20_spill] sm:$0xff]  ;;  %6120 = vst.msk [vmem:[#allocation2 + $0x429] sm:$0xf] %vm5888_vm3, %v15630_v41 }
 0x351   :  { %v15669_v57 = vsel %vm17191_vm6, %v17190_v50, %v15357_v12  ;;  %vm17194_vm1 = vcmp.ge.f32.partialorder %v17193_v0, 0.0  ;;  %vm17197_vm15 = vcmp.ge.f32.partialorder %v17196_v59, 0.0  ;;  %6122 = vst.msk [vmem:[#allocation2 + $0x439] sm:$0xf] %vm5888_vm3, %v15636_v47  ;;  %6124 = vst.msk [vmem:[#allocation2 + $0x459] sm:$0xf] %vm5888_vm3, %v15642_v18 }
 0x352   :  { %v15675_v63 = vsel %vm17194_vm1, %v17193_v0, %v17192_v46  ;;  %v15681_v13 = vsel %vm17197_vm15, %v17196_v59, %v17195_v49  ;;  %6126 = vst.msk [vmem:[#allocation2 + $0x469] sm:$0xf] %vm5888_vm3, %v15648_v19  ;;  %v17198_v12 = vld [vmem:[#allocation22_spill] sm:$0xff]  ;;  %v17199_v43 = vld [vmem:[#allocation24_spill] sm:$0xff]  ;;  %v17200_v56 = vld [vmem:[#allocation11_spill] sm:$0xff]  ;;  %vm17203_vm11 = vcmp.ge.f32.partialorder %v17144_v17, 0.0 }
 0x353   :  { %v15695_v9 = vsel %vm5737_vm8, %v17198_v12, %v15378_v26  ;;  %v15701_v36 = vsel %vm5738_vm2, %v17199_v43, %v15381_v53  ;;  %v17201_v21 = vld [vmem:[#allocation25_spill] sm:$0xff]  ;;  %v15713_v6 = vsel %vm17203_vm11, %v17144_v17, %v15397_v60  ;;  %6145 = vst.msk [vmem:[#allocation2 + $0x4b9] sm:$0xf] %vm5888_vm3, %v15663_v61  ;;  %6147 = vst.msk [vmem:[#allocation2 + $0x4c9] sm:$0xf] %vm5888_vm3, %v15669_v57  ;;  %vm17205_vm2 = vcmp.ge.f32.partialorder %v17149_v16, 0.0 }
 0x354   :  { %vm17202_vm7 = vcmp.ge.f32.partialorder %v17201_v21, 0.0  ;;  %6162 = vst.msk [vmem:[#allocation2 + $0x4e9] sm:$0xf] %vm5888_vm3, %v15675_v63  ;;  %6164 = vst.msk [vmem:[#allocation2 + $0x4f9] sm:$0xf] %vm5888_vm3, %v15681_v13  ;;  %v15727_v26 = vsel %vm5743_vm9, %v17147_v58, %v15400_v20  ;;  %v17204_v60 = vld [vmem:[#allocation37_spill] sm:$0xff]  ;;  %v15739_v53 = vsel %vm17205_vm2, %v17149_v16, %v15414_v55 }
 0x355   :  { %v15707_v51 = vsel %vm17202_vm7, %v17201_v21, %v17200_v56  ;;  %v15733_v17 = vsel %vm5745_vm12, %v17204_v60, %v15403_v48  ;;  %v17206_v39 = vld [vmem:[#allocation13_spill] sm:$0xff]  ;;  %6166 = vst.msk [vmem:[#allocation2 + $0x519] sm:$0xf] %vm5888_vm3, %v15695_v9  ;;  %6168 = vst.msk [vmem:[#allocation2 + $0x529] sm:$0xf] %vm5888_vm3, %v15701_v36  ;;  %v17207_v58 = vld [vmem:[#allocation39_spill] sm:$0xff] }
 0x356   :  { %v6133_v10 = vcombine.high %v17206_v39, %v17206_v39  ;;  %6185 = vst.msk [vmem:[#allocation2 + $0x559] sm:$0xf] %vm5888_vm3, %v15707_v51  ;;  %6189 = vst.msk [vmem:[#allocation2 + $0x589] sm:$0xf] %vm5888_vm3, %v15713_v6  ;;  %v5879_v20 = vcombine.high %v17207_v58, %v17207_v58  ;;  %v17208_v16 = vld [vmem:[#allocation40_spill] sm:$0xff]  ;;  %v17209_v55 = vld [vmem:[#allocation41_spill] sm:$0xff] }
 0x357   :  { %v5880_v48 = vcombine.high %v17208_v16, %v17208_v16  ;;  %v5881_v42 = vcombine.high %v17209_v55, %v17209_v55  ;;  %v17210_v44 = vld [vmem:[#allocation43_spill] sm:$0xff]  ;;  %6204 = vst.msk [vmem:[#allocation2 + $0x5a9] sm:$0xf] %vm5888_vm3, %v15727_v26  ;;  %6208 = vst.msk [vmem:[#allocation2 + $0x5d9] sm:$0xf] %vm5888_vm3, %v15733_v17  ;;  %v17211_v8 = vld [vmem:[#allocation45_spill] sm:$0xff] }
 0x358   :  { %v5882_v31 = vcombine.high %v17210_v44, %v17210_v44  ;;  %6210 = vst.msk [vmem:[#allocation2 + $0x5e9] sm:$0xf] %vm5888_vm3, %v15739_v53  ;;  %v5901_v50 = vcombine.high %v17211_v8, %v17211_v8  ;;  %v17212_v46 = vld [vmem:[#allocation47_spill] sm:$0xff]  ;;  %v17213_v49 = vld [vmem:[#allocation48_spill] sm:$0xff]  ;;  %v17214_v12 = vld [vmem:[#allocation49_spill] sm:$0xff]  ;;  %vm6274_vm8 = vcmask 1048064  }
 0x359   :  { %v5902_v0 = vcombine.high %v17212_v46, %v17212_v46  ;;  %v5903_v59 = vcombine.high %v17213_v49, %v17213_v49  ;;  %v5904_v43 = vcombine.high %v17214_v12, %v17214_v12  ;;  %6144 = vst.msk [vmem:[#allocation2 + $0x4a1] sm:$0xf] %vm5888_vm3, %v6133_v10  ;;  %v17215_v56 = vld [vmem:[#allocation51_spill] sm:$0xff]  ;;  %v17216_v60 = vld [vmem:[#allocation53_spill] sm:$0xff]  ;;  %5890 = vst.msk [vmem:[#allocation2 + $0x11] sm:$0xf] %vm5888_vm3, %v5879_v20 }
 0x35a   :  { %v5922_v21 = vcombine.high %v17215_v56, %v17215_v56  ;;  %v5923_v39 = vcombine.high %v17216_v60, %v17216_v60  ;;  %v17217_v58 = vld [vmem:[#allocation55_spill] sm:$0xff]  ;;  %v17218_v55 = vld [vmem:[#allocation57_spill] sm:$0xff]  ;;  %5892 = vst.msk [vmem:[#allocation2 + $0x21] sm:$0xf] %vm5888_vm3, %v5880_v48  ;;  %5894 = vst.msk [vmem:[#allocation2 + $0x41] sm:$0xf] %vm5888_vm3, %v5881_v42  ;;  %v5964_v60 = vcombine.high %v15411_v4, %v15411_v4 }
 0x35b   :  { %v5924_v16 = vcombine.high %v17217_v58, %v17217_v58  ;;  %v5925_v44 = vcombine.high %v17218_v55, %v17218_v55  ;;  %5896 = vst.msk [vmem:[#allocation2 + $0x51] sm:$0xf] %vm5888_vm3, %v5882_v31  ;;  %v11762_v10 = vld [vmem:[%s16839_s4 + $0x50] sm:$0xff]   ;;  %v17219_v46 = vld [vmem:[#allocation59_spill] sm:$0xff]  ;;  %v17220_v12 = vld [vmem:[#allocation14_spill] sm:$0xff]  ;;  %v5965_v58 = vcombine.high %v15420_v29, %v15420_v29  ;;  %v5966_v55 = vcombine.high %v15426_v37, %v15426_v37 }
 0x35c   :  { %v11765_v8 = vld [vmem:[%s16839_s4 + $0x10] sm:$0xff]   ;;  %v5943_v49 = vcombine.high %v17219_v46, %v17219_v46  ;;  %v5944_v20 = vcombine.high %v17220_v12, %v17220_v12  ;;  %v17221_v56 = vld [vmem:[#allocation62_spill] sm:$0xff]  ;;  %v17222_v42 = vld [vmem:[#allocation23_spill] sm:$0xff]  ;;  %5911 = vst.msk [vmem:[#allocation2 + $0x71] sm:$0xf] %vm5888_vm3, %v5901_v50  ;;  %v5967_v46 = vcombine.high %v15432_v15, %v15432_v15  ;;  %11301 = vmatprep.subr.bf16.mxu1 %v11762_v10 }
 0x35d   :  { %v5945_v48 = vcombine.high %v17221_v56, %v17221_v56  ;;  %v5946_v31 = vcombine.high %v17222_v42, %v17222_v42  ;;  %5913 = vst.msk [vmem:[#allocation2 + $0x81] sm:$0xf] %vm5888_vm3, %v5902_v0  ;;  %5915 = vst.msk [vmem:[#allocation2 + $0xa1] sm:$0xf] %vm5888_vm3, %v5903_v59  ;;  %v11714_v50 = vld [vmem:[#allocation2 + $0x4b1] ss:$8 sps:$4 sm:$0xff]   ;;  %v5985_v4 = vcombine.high %v15440_v30, %v15440_v30  ;;  %11302 = vmatpush3.bf16.msra.mxu1 %v11765_v8 }
 0x35e   :  { %5917 = vst.msk [vmem:[#allocation2 + $0xb1] sm:$0xf] %vm5888_vm3, %v5904_v43  ;;  %5932 = vst.msk [vmem:[#allocation2 + $0xd1] sm:$0xf] %vm5888_vm3, %v5922_v21  ;;  %v5986_v29 = vcombine.high %v15446_v40, %v15446_v40  ;;  %v5987_v37 = vcombine.high %v15452_v62, %v15452_v62  ;;  %v5988_v15 = vcombine.high %v15458_v52, %v15458_v52  ;;  %v11715_v0 = vld [vmem:[#allocation2 + $0x581] ss:$8 sps:$4 sm:$0xff]   ;;  %6266 = vrot.lane.b32.xlu0 %v11714_v50, %s12105_s3 }
 0x35f   :  { %5934 = vst.msk [vmem:[#allocation2 + $0xe1] sm:$0xf] %vm5888_vm3, %v5923_v39  ;;  %5936 = vst.msk [vmem:[#allocation2 + $0x101] sm:$0xf] %vm5888_vm3, %v5924_v16  ;;  %v6006_v30 = vcombine.high %v15470_v54, %v15470_v54  ;;  %v6007_v40 = vcombine.high %v15476_v2, %v15476_v2  ;;  %v6008_v62 = vcombine.high %v15482_v5, %v15482_v5  ;;  %6335 = vrot.lane.b32.xlu1 %v11715_v0, %s12105_s3  ;;  %v11716_v59 = vld [vmem:[#allocation2 + $0x482] ss:$8 sps:$4 sm:$0xff]  }
 0x360   :  { %5938 = vst.msk [vmem:[#allocation2 + $0x111] sm:$0xf] %vm5888_vm3, %v5925_v44  ;;  %5953 = vst.msk [vmem:[#allocation2 + $0x131] sm:$0xf] %vm5888_vm3, %v5943_v49  ;;  %v6009_v52 = vcombine.high %v15488_v7, %v15488_v7  ;;  %v6027_v54 = vcombine.high %v15502_v14, %v15502_v14  ;;  %v6028_v2 = vcombine.high %v15508_v11, %v15508_v11  ;;  %v11718_v43 = vld [vmem:[#allocation2 + $0x541] ss:$8 sps:$4 sm:$0xff]  }
 0x361   :  { %5955 = vst.msk [vmem:[#allocation2 + $0x141] sm:$0xf] %vm5888_vm3, %v5944_v20  ;;  %5957 = vst.msk [vmem:[#allocation2 + $0x161] sm:$0xf] %vm5888_vm3, %v5945_v48  ;;  %v6029_v5 = vcombine.high %v15514_v22, %v15514_v22  ;;  %v6030_v7 = vcombine.high %v15520_v28, %v15520_v28  ;;  %v6048_v14 = vcombine.high %v15534_v45, %v15534_v45  ;;  %v11724_v21 = vld [vmem:[#allocation2 + $0x551] ss:$8 sps:$4 sm:$0xff]  }
 0x362   :  { %5959 = vst.msk [vmem:[#allocation2 + $0x171] sm:$0xf] %vm5888_vm3, %v5946_v31  ;;  %5974 = vst.msk [vmem:[#allocation2 + $0x191] sm:$0xf] %vm5888_vm3, %v5964_v60  ;;  %v6049_v11 = vcombine.high %v15540_v33, %v15540_v33  ;;  %v6050_v22 = vcombine.high %v15546_v32, %v15546_v32  ;;  %v6051_v28 = vcombine.high %v15552_v24, %v15552_v24  ;;  %6841 = vrot.lane.b32.xlu0 %v11716_v59, %s12105_s3  ;;  %v11721_v39 = vld [vmem:[#allocation2 + $0x551] ss:$8 sps:$4 sm:$0xff]  }
 0x363   :  { %5976 = vst.msk [vmem:[#allocation2 + $0x1a1] sm:$0xf] %vm5888_vm3, %v5965_v58  ;;  %5978 = vst.msk [vmem:[#allocation2 + $0x1c1] sm:$0xf] %vm5888_vm3, %v5966_v55  ;;  %v6069_v45 = vcombine.high %v15566_v27, %v15566_v27  ;;  %v6070_v33 = vcombine.high %v15572_v25, %v15572_v25  ;;  %v6071_v32 = vcombine.high %v15578_v23, %v15578_v23  ;;  %v11725_v8 = vld [vmem:[#allocation2 + $0x581] ss:$8 sps:$4 sm:$0xff]  }
 0x364   :  { %5980 = vst.msk [vmem:[#allocation2 + $0x1d1] sm:$0xf] %vm5888_vm3, %v5967_v46  ;;  %5995 = vst.msk [vmem:[#allocation2 + $0x1f1] sm:$0xf] %vm5888_vm3, %v5985_v4  ;;  %v6072_v24 = vcombine.high %v15584_v3, %v15584_v3  ;;  %v6090_v27 = vcombine.high %v15598_v38, %v15598_v38  ;;  %v6091_v25 = vcombine.high %v15604_v35, %v15604_v35  ;;  %v11772_v12 = vld [vmem:[%s16839_s4 + $0x58] sm:$0xff]  }
 0x365   :  { %5997 = vst.msk [vmem:[#allocation2 + $0x201] sm:$0xf] %vm5888_vm3, %v5986_v29  ;;  %5999 = vst.msk [vmem:[#allocation2 + $0x221] sm:$0xf] %vm5888_vm3, %v5987_v37  ;;  %v6092_v23 = vcombine.high %v15610_v34, %v15610_v34  ;;  %v6093_v3 = vcombine.high %v15616_v1, %v15616_v1  ;;  %v6111_v38 = vcombine.high %v15630_v41, %v15630_v41  ;;  %11303 = vmatprep.subr.bf16.mxu1 %v11772_v12  ;;  %v11775_v48 = vld [vmem:[%s16839_s4 + $0x18] sm:$0xff]  }
 0x366   :  { %6001 = vst.msk [vmem:[#allocation2 + $0x231] sm:$0xf] %vm5888_vm3, %v5988_v15  ;;  %6016 = vst.msk [vmem:[#allocation2 + $0x251] sm:$0xf] %vm5888_vm3, %v6006_v30  ;;  %v6112_v35 = vcombine.high %v15636_v47, %v15636_v47  ;;  %v6113_v34 = vcombine.high %v15642_v18, %v15642_v18  ;;  %v6114_v1 = vcombine.high %v15648_v19, %v15648_v19  ;;  %6777 = vrot.lane.b32.xlu0 %v11718_v43, %s12105_s3  ;;  %v11776_v42 = vld [vmem:[#allocation2 + $0x4e1] ss:$8 sps:$4 sm:$0xff]  }
 0x367   :  { %6018 = vst.msk [vmem:[#allocation2 + $0x261] sm:$0xf] %vm5888_vm3, %v6007_v40  ;;  %6020 = vst.msk [vmem:[#allocation2 + $0x281] sm:$0xf] %vm5888_vm3, %v6008_v62  ;;  %v6134_v41 = vcombine.high %v15663_v61, %v15663_v61  ;;  %v6135_v47 = vcombine.high %v15669_v57, %v15669_v57  ;;  %v6153_v18 = vcombine.high %v15675_v63, %v15675_v63  ;;  %v11777_v31 = vld [vmem:[#allocation2 + $0x5a0] ss:$8 sps:$4 sm:$0xff]   ;;  %11304 = vmatpush3.bf16.msra.mxu1 %v11775_v48 }
 0x368   :  { %6022 = vst.msk [vmem:[#allocation2 + $0x291] sm:$0xf] %vm5888_vm3, %v6009_v52  ;;  %6037 = vst.msk [vmem:[#allocation2 + $0x2b1] sm:$0xf] %vm5888_vm3, %v6027_v54  ;;  %v6154_v19 = vcombine.high %v15681_v13, %v15681_v13  ;;  %v6155_v61 = vcombine.high %v15695_v9, %v15695_v9  ;;  %v6156_v57 = vcombine.high %v15701_v36, %v15701_v36  ;;  %v11780_v55 = vld [vmem:[#allocation2 + $0x511] ss:$8 sps:$4 sm:$0xff]  }
 0x369   :  { %6039 = vst.msk [vmem:[#allocation2 + $0x2c1] sm:$0xf] %vm5888_vm3, %v6028_v2  ;;  %6041 = vst.msk [vmem:[#allocation2 + $0x2e1] sm:$0xf] %vm5888_vm3, %v6029_v5  ;;  %v6175_v63 = vcombine.high %v15707_v51, %v15707_v51  ;;  %v6177_v13 = vcombine.high %v15713_v6, %v15713_v6  ;;  %v6195_v9 = vcombine.high %v15727_v26, %v15727_v26  ;;  %v11720_v6 = vld [vmem:[#allocation2 + $0x4b2] ss:$8 sps:$4 sm:$0xff]  }
 0x36a   :  { %6043 = vst.msk [vmem:[#allocation2 + $0x2f1] sm:$0xf] %vm5888_vm3, %v6030_v7  ;;  %6058 = vst.msk [vmem:[#allocation2 + $0x311] sm:$0xf] %vm5888_vm3, %v6048_v14  ;;  %v6197_v36 = vcombine.high %v15733_v17, %v15733_v17  ;;  %v6198_v51 = vcombine.high %v15739_v53, %v15739_v53  ;;  %6845 = vrot.lane.b32.xlu0 %v11720_v6, %s12105_s3  ;;  %v11722_v26 = vld [vmem:[#allocation2 + $0x571] ss:$8 sps:$4 sm:$0xff]  }
 0x36b   :  { %6060 = vst.msk [vmem:[#allocation2 + $0x321] sm:$0xf] %vm5888_vm3, %v6049_v11  ;;  %6062 = vst.msk [vmem:[#allocation2 + $0x341] sm:$0xf] %vm5888_vm3, %v6050_v22  ;;  %v11719_v53 = vld [vmem:[#allocation2 + $0x492] ss:$8 sps:$4 sm:$0xff]  }
 0x36c   :  { %6064 = vst.msk [vmem:[#allocation2 + $0x351] sm:$0xf] %vm5888_vm3, %v6051_v28  ;;  %6079 = vst.msk [vmem:[#allocation2 + $0x371] sm:$0xf] %vm5888_vm3, %v6069_v45  ;;  %v11729_v44 = vld [vmem:[#allocation2 + $0x189] ss:$8 sps:$4 sm:$0xff]  }
 0x36d   :  { %6081 = vst.msk [vmem:[#allocation2 + $0x381] sm:$0xf] %vm5888_vm3, %v6070_v33  ;;  %6083 = vst.msk [vmem:[#allocation2 + $0x3a1] sm:$0xf] %vm5888_vm3, %v6071_v32  ;;  %v11727_v16 = vld [vmem:[#allocation2 + $0x249] ss:$8 sps:$4 sm:$0xff]  }
 0x36e   :  { %6085 = vst.msk [vmem:[#allocation2 + $0x3b1] sm:$0xf] %vm5888_vm3, %v6072_v24  ;;  %6100 = vst.msk [vmem:[#allocation2 + $0x3d1] sm:$0xf] %vm5888_vm3, %v6090_v27  ;;  %6781 = vrot.lane.b32.xlu0 %v11722_v26, %s12105_s3  ;;  %v11731_v49 = vld [vmem:[#allocation2 + $0x279] ss:$8 sps:$4 sm:$0xff]  }
 0x36f   :  { %6102 = vst.msk [vmem:[#allocation2 + $0x3e1] sm:$0xf] %vm5888_vm3, %v6091_v25  ;;  %6104 = vst.msk [vmem:[#allocation2 + $0x401] sm:$0xf] %vm5888_vm3, %v6092_v23  ;;  %v11726_v20 = vld [vmem:[#allocation2 + $0x259] ss:$8 sps:$4 sm:$0xff]  }
 0x370   :  { %6106 = vst.msk [vmem:[#allocation2 + $0x411] sm:$0xf] %vm5888_vm3, %v6093_v3  ;;  %6121 = vst.msk [vmem:[#allocation2 + $0x431] sm:$0xf] %vm5888_vm3, %v6111_v38  ;;  %v11733_v56 = vld [vmem:[#allocation2 + $0x1b9] ss:$8 sps:$4 sm:$0xff]  }
 0x371   :  { %6123 = vst.msk [vmem:[#allocation2 + $0x441] sm:$0xf] %vm5888_vm3, %v6112_v35  ;;  %6125 = vst.msk [vmem:[#allocation2 + $0x461] sm:$0xf] %vm5888_vm3, %v6113_v34  ;;  %v11728_v60 = vld [vmem:[#allocation2 + $0x199] ss:$8 sps:$4 sm:$0xff]  }
 0x372   :  { %6127 = vst.msk [vmem:[#allocation2 + $0x471] sm:$0xf] %vm5888_vm3, %v6114_v1  ;;  %6146 = vst.msk [vmem:[#allocation2 + $0x4c1] sm:$0xf] %vm5888_vm3, %v6134_v41  ;;  %6331 = vrot.lane.b32.xlu0 %v11724_v21, %s12105_s3  ;;  %v11735_v58 = vld [vmem:[#allocation2 + $0x18a] ss:$8 sps:$4 sm:$0xff]  }
 0x373   :  { %6148 = vst.msk [vmem:[#allocation2 + $0x4d1] sm:$0xf] %vm5888_vm3, %v6135_v47  ;;  %6163 = vst.msk [vmem:[#allocation2 + $0x4f1] sm:$0xf] %vm5888_vm3, %v6153_v18  ;;  %v11730_v50 = vld [vmem:[#allocation2 + $0x289] ss:$8 sps:$4 sm:$0xff]   ;;  %v6330_v29 = vpop.permute.xlu0 %6329 }
 0x374   :  { %6165 = vst.msk [vmem:[#allocation2 + $0x501] sm:$0xf] %vm5888_vm3, %v6154_v19  ;;  %6167 = vst.msk [vmem:[#allocation2 + $0x521] sm:$0xf] %vm5888_vm3, %v6155_v61  ;;  %v11784_v4 = vld [vmem:[#allocation2 + $0x5d0] ss:$8 sps:$4 sm:$0xff]  }
 0x375   :  { %6169 = vst.msk [vmem:[#allocation2 + $0x531] sm:$0xf] %vm5888_vm3, %v6156_v57  ;;  %6186 = vst.msk [vmem:[#allocation2 + $0x561] sm:$0xf] %vm5888_vm3, %v6175_v63  ;;  %v11737_v15 = vld [vmem:[#allocation2 + $0x249] ss:$8 sps:$4 sm:$0xff]  }
 0x376   :  { %6190 = vst.msk [vmem:[#allocation2 + $0x591] sm:$0xf] %vm5888_vm3, %v6177_v13  ;;  %6205 = vst.msk [vmem:[#allocation2 + $0x5b1] sm:$0xf] %vm5888_vm3, %v6195_v9  ;;  %7353 = vrot.lane.b32.xlu0 %v11727_v16, %s12105_s3  ;;  %v11732_v30 = vld [vmem:[#allocation2 + $0x1c9] ss:$8 sps:$4 sm:$0xff]  }
 0x377   :  { %6209 = vst.msk [vmem:[#allocation2 + $0x5e1] sm:$0xf] %vm5888_vm3, %v6197_v36  ;;  %6211 = vst.msk [vmem:[#allocation2 + $0x5f1] sm:$0xf] %vm5888_vm3, %v6198_v51  ;;  %vm17223_vm3 = vcmask 523264   ;;  %v11790_v52 = vld [vmem:[%s16839_s4 + $0x60] sm:$0xff]  }
 0x378   :  { %6304 = vst.msk [vmem:[#allocation4 + $0x8] sm:$0xff] %vm17223_vm3, %v11776_v42  ;;  %vm17224_vm12 = vmmov %vm17223_vm3  ;;  %v11788_v40 = vld [vmem:[#allocation2 + $0x5a1] ss:$8 sps:$4 sm:$0xff]   ;;  %11305 = vmatprep.subr.bf16.mxu1 %v11790_v52  ;;  %v11798_v22 = vld [vmem:[#allocation2 + $0x5d1] ss:$8 sps:$4 sm:$0xff]  }
 0x379   :  { %v11717_v17 = vld [vmem:[#allocation2 + $0x4c1] ss:$8 sps:$4 sm:$0xff]   ;;  %6237 = vst.msk [vmem:[#allocation4] sm:$0xff] %vm17224_vm12, %v11777_v31  ;;  %vm17225_vm9 = vmmov %vm17223_vm3  ;;  %v11802_v33 = vld [vmem:[#allocation2 + $0x511] ss:$8 sps:$4 sm:$0xff]  }
 0x37a   :  { %6268 = vrot.lane.b32.xlu1 %v11717_v17, %s12105_s3  ;;  %v11723_v10 = vld [vmem:[#allocation2 + $0x4c2] ss:$8 sps:$4 sm:$0xff]   ;;  %7289 = vrot.lane.b32.xlu0 %v11729_v44, %s12105_s3  ;;  %6306 = vst.msk [vmem:[#allocation4 + $0x88] sm:$0xff] %vm17225_vm9, %v11780_v55  ;;  %vm17226_vm4 = vmmov %vm17223_vm3  ;;  %v11799_v28 = vld [vmem:[#allocation2 + $0x4f1] ss:$8 sps:$4 sm:$0xff]  }
 0x37b   :  { %v11785_v37 = vld [vmem:[#allocation2 + $0x521] ss:$8 sps:$4 sm:$0xff]   ;;  %6341 = vst.msk [vmem:[#allocation4 + $0x8] sm:$0xff] %vm6274_vm8, %v6330_v29  ;;  %vm17227_vm14 = vmmov %vm17223_vm3  ;;  %v11807_v3 = vld [vmem:[#allocation2 + $0x4f1] ss:$8 sps:$4 sm:$0xff]  }
 0x37c   :  { %6239 = vst.msk [vmem:[#allocation4 + $0x80] sm:$0xff] %vm17227_vm14, %v11784_v4  ;;  %vm17228_vm0 = vmmov %vm17223_vm3  ;;  %v11739_v0 = vld [vmem:[#allocation2 + $0x1ba] ss:$8 sps:$4 sm:$0xff]   ;;  %v11744_v11 = vld [vmem:[#allocation2 + $0xc9] ss:$8 sps:$4 sm:$0xff]  }
 0x37d   :  { %v11781_v46 = vld [vmem:[#allocation2 + $0x5b0] ss:$8 sps:$4 sm:$0xff]   ;;  %6307 = vst.msk [vmem:[#allocation4 + $0xc8] sm:$0xff] %vm17228_vm0, %v11785_v37  ;;  %vm17229_vm5 = vmmov %vm17228_vm0  ;;  %v11793_v2 = vld [vmem:[%s16839_s4 + $0x20] sm:$0xff]  }
 0x37e   :  { %6843 = vrot.lane.b32.xlu1 %v11719_v53, %s12105_s3  ;;  %7357 = vrot.lane.b32.xlu0 %v11731_v49, %s12105_s3  ;;  %6238 = vst.msk [vmem:[#allocation4 + $0x40] sm:$0xff] %vm17226_vm4, %v11781_v46  ;;  %v11789_v62 = vld [vmem:[#allocation2 + $0x5e0] ss:$8 sps:$4 sm:$0xff]   ;;  %vm17230_vm13 = vmmov %vm17228_vm0  ;;  %v11795_v7 = vld [vmem:[#allocation2 + $0x5b1] ss:$8 sps:$4 sm:$0xff]  }
 0x37f   :  { %6817 = vst.msk [vmem:[#allocation4 + $0x108] sm:$0xff] %vm17229_vm5, %v11788_v40  ;;  %v11734_v54 = vld [vmem:[#allocation2 + $0x19a] ss:$8 sps:$4 sm:$0xff]   ;;  %11306 = vmatpush3.bf16.msra.mxu1 %v11793_v2  ;;  %vm17231_vm10 = vmmov %vm17228_vm0  ;;  %v11747_v24 = vld [vmem:[#allocation2 + $0x9] ss:$8 sps:$4 sm:$0xff]  }
 0x380   :  { %6240 = vst.msk [vmem:[#allocation4 + $0xc0] sm:$0xff] %vm17230_vm13, %v11789_v62  ;;  %v11794_v5 = vld [vmem:[#allocation2 + $0x4e1] ss:$8 sps:$4 sm:$0xff]   ;;  %vm17232_vm6 = vmmov %vm17228_vm0  ;;  %v11812_v1 = vld [vmem:[%s16839_s4 + $0x70] sm:$0xff]  }
 0x381   :  { %v11741_v14 = vld [vmem:[#allocation2 + $0x279] ss:$8 sps:$4 sm:$0xff]   ;;  %6753 = vst.msk [vmem:[#allocation4 + $0x100] sm:$0xff] %vm17231_vm10, %v11794_v5  ;;  %vm17233_vm1 = vmmov %vm17228_vm0  ;;  %v11738_v27 = vld [vmem:[#allocation2 + $0x1ca] ss:$8 sps:$4 sm:$0xff]  }
 0x382   :  { %6779 = vrot.lane.b32.xlu1 %v11721_v39, %s12105_s3  ;;  %7293 = vrot.lane.b32.xlu0 %v11733_v56, %s12105_s3  ;;  %6818 = vst.msk [vmem:[#allocation4 + $0x148] sm:$0xff] %vm17232_vm6, %v11795_v7  ;;  %v11736_v45 = vld [vmem:[#allocation2 + $0x259] ss:$8 sps:$4 sm:$0xff]   ;;  %vm17234_vm15 = vmmov %vm17228_vm0  ;;  %v6263_v59 = vpop.permute.xlu1 %6262  ;;  %v11806_v25 = vld [vmem:[%s16839_s4 + $0x68] sm:$0xff]  }
 0x383   :  { %6819 = vst.msk [vmem:[#allocation4 + $0x188] sm:$0xff] %vm17233_vm1, %v11798_v22  ;;  %v11803_v32 = vld [vmem:[#allocation2 + $0x5e1] ss:$8 sps:$4 sm:$0xff]   ;;  %vm17235_vm7 = vmmov %vm17228_vm0  ;;  %11307 = vmatprep.subr.bf16.mxu1 %v11806_v25  ;;  %v11815_v61 = vld [vmem:[%s16839_s4 + $0x30] sm:$0xff]  }
 0x384   :  { %6754 = vst.msk [vmem:[#allocation4 + $0x140] sm:$0xff] %vm17234_vm15, %v11799_v28  ;;  %vm17236_vm11 = vmmov %vm17228_vm0  ;;  %v11740_v23 = vld [vmem:[#allocation2 + $0x289] ss:$8 sps:$4 sm:$0xff]   ;;  %v11749_v34 = vld [vmem:[#allocation2 + $0xf9] ss:$8 sps:$4 sm:$0xff]  }
 0x385   :  { %6755 = vst.msk [vmem:[#allocation4 + $0x180] sm:$0xff] %vm17235_vm7, %v11802_v33  ;;  %v11808_v38 = vld [vmem:[#allocation2 + $0x521] ss:$8 sps:$4 sm:$0xff]   ;;  %vm17237_vm2 = vmmov %vm17228_vm0  ;;  %v11818_v13 = vld [vmem:[%s16839_s4 + $0x78] sm:$0xff]  }
 0x386   :  { %6847 = vrot.lane.b32.xlu1 %v11723_v10, %s12105_s3  ;;  %7869 = vrot.lane.b32.xlu0 %v11735_v58, %s12105_s3  ;;  %6275 = vst.msk [vmem:[#allocation4] sm:$0xff] %vm6274_vm8, %v6263_v59  ;;  %v11809_v35 = vld [vmem:[%s16839_s4 + $0x28] sm:$0xff]   ;;  %vm17238_vm3 = vmmov %vm17228_vm0  ;;  %v11743_v41 = vld [vmem:[#allocation2 + $0xd9] ss:$8 sps:$4 sm:$0xff]  }
 0x387   :  { %6820 = vst.msk [vmem:[#allocation4 + $0x1c8] sm:$0xff] %vm17236_vm11, %v11803_v32  ;;  %11308 = vmatpush3.bf16.msra.mxu1 %v11809_v35  ;;  %v11751_v47 = vld [vmem:[#allocation2 + $0x39] ss:$8 sps:$4 sm:$0xff]   ;;  %v11814_v19 = vld [vmem:[#allocation2 + $0x1e9] ss:$8 sps:$4 sm:$0xff]   ;;  %vm17239_vm12 = vmmov %vm17228_vm0 }
 0x388   :  { %6305 = vst.msk [vmem:[#allocation4 + $0x48] sm:$0xff] %vm17237_vm2, %v11807_v3  ;;  %v11813_v18 = vld [vmem:[#allocation2 + $0x1f9] ss:$8 sps:$4 sm:$0xff]   ;;  %11309 = vmatprep.subr.bf16.mxu1 %v11812_v1  ;;  %vm17240_vm9 = vmmov %vm17228_vm0  ;;  %v11754_v63 = vld [vmem:[#allocation2 + $0xa] ss:$8 sps:$4 sm:$0xff]  }
 0x389   :  { %6756 = vst.msk [vmem:[#allocation4 + $0x1c0] sm:$0xff] %vm17238_vm3, %v11808_v38  ;;  %v11746_v57 = vld [vmem:[#allocation2 + $0x19] ss:$8 sps:$4 sm:$0xff]   ;;  %v11820_v9 = vld [vmem:[#allocation2 + $0x2a8] ss:$8 sps:$4 sm:$0xff]   ;;  %vm17241_vm4 = vmmov %vm17228_vm0 }
 0x38a   :  { %6783 = vrot.lane.b32.xlu1 %v11725_v8, %s12105_s3  ;;  %7805 = vrot.lane.b32.xlu0 %v11737_v15, %s12105_s3  ;;  %7330 = vst.msk [vmem:[#allocation4 + $0x248] sm:$0xff] %vm17239_vm12, %v11813_v18  ;;  %v11819_v43 = vld [vmem:[#allocation2 + $0x2b8] ss:$8 sps:$4 sm:$0xff]   ;;  %vm17242_vm14 = vmmov %vm17228_vm0  ;;  %v11748_v6 = vld [vmem:[#allocation2 + $0x109] ss:$8 sps:$4 sm:$0xff]  }
 0x38b   :  { %7329 = vst.msk [vmem:[#allocation4 + $0x208] sm:$0xff] %vm17240_vm9, %v11814_v19  ;;  %11310 = vmatpush3.bf16.msra.mxu1 %v11815_v61  ;;  %v11821_v36 = vld [vmem:[%s16839_s4 + $0x38] sm:$0xff]   ;;  %v11757_v26 = vld [vmem:[#allocation2 + $0xc9] ss:$8 sps:$4 sm:$0xff]   ;;  %vm17243_vm5 = vmmov %vm17228_vm0 }
 0x38c   :  { %11311 = vmatprep.subr.bf16.mxu1 %v11818_v13  ;;  %7266 = vst.msk [vmem:[#allocation4 + $0x240] sm:$0xff] %vm17241_vm4, %v11819_v43  ;;  %v11824_v17 = vld [vmem:[#allocation2 + $0x229] ss:$8 sps:$4 sm:$0xff]   ;;  %v11825_v53 = vld [vmem:[#allocation2 + $0x219] ss:$8 sps:$4 sm:$0xff]   ;;  %vm17244_vm13 = vmmov %vm17228_vm0 }
 0x38d   :  { %7265 = vst.msk [vmem:[#allocation4 + $0x200] sm:$0xff] %vm17242_vm14, %v11820_v9  ;;  %v11750_v21 = vld [vmem:[#allocation2 + $0x49] ss:$8 sps:$4 sm:$0xff]   ;;  %v11759_v39 = vld [vmem:[#allocation2 + $0x3a] ss:$8 sps:$4 sm:$0xff]   ;;  %vm17245_vm10 = vmmov %vm17228_vm0 }
 0x38e   :  { %7355 = vrot.lane.b32.xlu1 %v11726_v20, %s12105_s3  ;;  %7873 = vrot.lane.b32.xlu0 %v11739_v0, %s12105_s3  ;;  %7332 = vst.msk [vmem:[#allocation4 + $0x2c8] sm:$0xff] %vm17228_vm0, %v11824_v17  ;;  %v11828_v16 = vld [vmem:[#allocation2 + $0x2e8] ss:$8 sps:$4 sm:$0xff]   ;;  %v11829_v44 = vld [vmem:[#allocation2 + $0x2d8] ss:$8 sps:$4 sm:$0xff]   ;;  %vm17246_vm6 = vmmov %vm17228_vm0 }
 0x38f   :  { %v6334_v51 = vpop.permute.xlu0 %6333  ;;  %11312 = vmatpush3.bf16.msra.mxu1 %v11821_v36  ;;  %7331 = vst.msk [vmem:[#allocation4 + $0x288] sm:$0xff] %vm17243_vm5, %v11825_v53  ;;  %v11753_v10 = vld [vmem:[#allocation2 + $0x1a] ss:$8 sps:$4 sm:$0xff]   ;;  %v11833_v12 = vld [vmem:[#allocation2 + $0x2a9] ss:$8 sps:$4 sm:$0xff]   ;;  %vm17247_vm1 = vmmov %vm17228_vm0 }
 0x390   :  { %6343 = vst.msk [vmem:[#allocation4 + $0x88] sm:$0xff] %vm6274_vm8, %v6334_v51  ;;  %v11761_v8 = vld [vmem:[#allocation2 + $0xf9] ss:$8 sps:$4 sm:$0xff]   ;;  %v11764_v56 = vld [vmem:[#allocation2 + $0x3c9] ss:$8 sps:$4 sm:$0xff]   ;;  %vm17248_vm15 = vmmov %vm17228_vm0 }
 0x391   :  { %7268 = vst.msk [vmem:[#allocation4 + $0x2c0] sm:$0xff] %vm17244_vm13, %v11828_v16  ;;  %v11832_v49 = vld [vmem:[#allocation2 + $0x2b9] ss:$8 sps:$4 sm:$0xff]   ;;  %v11837_v42 = vld [vmem:[#allocation2 + $0x1e9] ss:$8 sps:$4 sm:$0xff]   ;;  %vm17249_vm7 = vmmov %vm17228_vm0 }
 0x392   :  { %7291 = vrot.lane.b32.xlu1 %v11728_v60, %s12105_s3  ;;  %7809 = vrot.lane.b32.xlu0 %v11741_v14, %s12105_s3  ;;  %7267 = vst.msk [vmem:[#allocation4 + $0x280] sm:$0xff] %vm17245_vm10, %v11829_v44  ;;  %v11756_v20 = vld [vmem:[#allocation2 + $0xd9] ss:$8 sps:$4 sm:$0xff]   ;;  %v11758_v31 = vld [vmem:[#allocation2 + $0x4a] ss:$8 sps:$4 sm:$0xff]   ;;  %vm17250_vm11 = vmmov %vm17228_vm0 }
 0x393   :  { %7846 = vst.msk [vmem:[#allocation4 + $0x348] sm:$0xff] %vm17246_vm6, %v11832_v49  ;;  %v11836_v48 = vld [vmem:[#allocation2 + $0x1f9] ss:$8 sps:$4 sm:$0xff]   ;;  %v11767_v60 = vld [vmem:[#allocation2 + $0x309] ss:$8 sps:$4 sm:$0xff]   ;;  %vm17251_vm2 = vmmov %vm17228_vm0 }
 0x394   :  { %7845 = vst.msk [vmem:[#allocation4 + $0x308] sm:$0xff] %vm17247_vm1, %v11833_v12  ;;  %v11840_v58 = vld [vmem:[#allocation2 + $0x2e9] ss:$8 sps:$4 sm:$0xff]   ;;  %v11841_v55 = vld [vmem:[#allocation2 + $0x2d9] ss:$8 sps:$4 sm:$0xff]   ;;  %vm17252_vm3 = vmmov %vm17228_vm0 }
 0x395   :  { %7782 = vst.msk [vmem:[#allocation4 + $0x340] sm:$0xff] %vm17248_vm15, %v11836_v48  ;;  %v11760_v46 = vld [vmem:[#allocation2 + $0x109] ss:$8 sps:$4 sm:$0xff]   ;;  %v11845_v29 = vld [vmem:[#allocation2 + $0x219] ss:$8 sps:$4 sm:$0xff]   ;;  %vm17253_vm12 = vmmov %vm17228_vm0 }
 0x396   :  { %7359 = vrot.lane.b32.xlu1 %v11730_v50, %s12105_s3  ;;  %6457 = vrot.lane.b32.xlu0 %v11744_v11, %s12105_s3  ;;  %7781 = vst.msk [vmem:[#allocation4 + $0x300] sm:$0xff] %vm17249_vm7, %v11837_v42  ;;  %v11769_v50 = vld [vmem:[#allocation2 + $0x3f9] ss:$8 sps:$4 sm:$0xff]   ;;  %v11844_v4 = vld [vmem:[#allocation2 + $0x229] ss:$8 sps:$4 sm:$0xff]   ;;  %vm17254_vm9 = vmmov %vm17228_vm0 }
 0x397   :  { %7848 = vst.msk [vmem:[#allocation4 + $0x3c8] sm:$0xff] %vm17250_vm11, %v11840_v58  ;;  %v11763_v37 = vld [vmem:[#allocation2 + $0x3d9] ss:$8 sps:$4 sm:$0xff]   ;;  %v11849_v40 = vld [vmem:[#allocation2 + $0x69] ss:$8 sps:$4 sm:$0xff]   ;;  %vm17255_vm4 = vmmov %vm17228_vm0 }
 0x398   :  { %7847 = vst.msk [vmem:[#allocation4 + $0x388] sm:$0xff] %vm17251_vm2, %v11841_v55  ;;  %v11771_v15 = vld [vmem:[#allocation2 + $0x339] ss:$8 sps:$4 sm:$0xff]   ;;  %v11774_v52 = vld [vmem:[#allocation2 + $0x30a] ss:$8 sps:$4 sm:$0xff]   ;;  %vm17256_vm14 = vmmov %vm17228_vm0 }
 0x399   :  { %7784 = vst.msk [vmem:[#allocation4 + $0x3c0] sm:$0xff] %vm17252_vm3, %v11844_v4  ;;  %v11766_v62 = vld [vmem:[#allocation2 + $0x319] ss:$8 sps:$4 sm:$0xff]   ;;  %v11768_v2 = vld [vmem:[#allocation2 + $0x409] ss:$8 sps:$4 sm:$0xff]   ;;  %vm17257_vm5 = vmmov %vm17228_vm0 }
 0x39a   :  { %7295 = vrot.lane.b32.xlu1 %v11732_v30, %s12105_s3  ;;  %6393 = vrot.lane.b32.xlu0 %v11747_v24, %s12105_s3  ;;  %7783 = vst.msk [vmem:[#allocation4 + $0x380] sm:$0xff] %vm17253_vm12, %v11845_v29  ;;  %v11848_v30 = vld [vmem:[#allocation2 + $0x79] ss:$8 sps:$4 sm:$0xff]   ;;  %v11779_v7 = vld [vmem:[#allocation2 + $0x3c9] ss:$8 sps:$4 sm:$0xff]   ;;  %vm17258_vm13 = vmmov %vm17228_vm0 }
 0x39b   :  { %6434 = vst.msk [vmem:[#allocation4 + $0x58] sm:$0xff] %vm17254_vm9, %v11848_v30  ;;  %v11852_v0 = vld [vmem:[#allocation2 + $0x138] ss:$8 sps:$4 sm:$0xff]   ;;  %v11857_v11 = vld [vmem:[#allocation2 + $0xa9] ss:$8 sps:$4 sm:$0xff]   ;;  %vm17259_vm10 = vmmov %vm17228_vm0 }
 0x39c   :  { %6433 = vst.msk [vmem:[#allocation4 + $0x18] sm:$0xff] %vm17255_vm4, %v11849_v40  ;;  %v11856_v14 = vld [vmem:[%s16839_s4 + $0xc0] sm:$0xff]   ;;  %v11770_v28 = vld [vmem:[#allocation2 + $0x349] ss:$8 sps:$4 sm:$0xff]   ;;  %vm17260_vm6 = vmmov %vm17228_vm0 }
 0x39d   :  { %6370 = vst.msk [vmem:[#allocation4 + $0x50] sm:$0xff] %vm17256_vm14, %v11852_v0  ;;  %v11858_v22 = vld [vmem:[#allocation2 + $0x99] ss:$8 sps:$4 sm:$0xff]   ;;  %11361 = vmatprep.subr.bf16.mxu1 %v11856_v14  ;;  %v11863_v33 = vld [vmem:[#allocation2 + $0x168] ss:$8 sps:$4 sm:$0xff]   ;;  %vm17261_vm1 = vmmov %vm17228_vm0 }
 0x39e   :  { %7871 = vrot.lane.b32.xlu1 %v11734_v54, %s12105_s3  ;;  %6461 = vrot.lane.b32.xlu0 %v11749_v34, %s12105_s3  ;;  %v11853_v54 = vld [vmem:[#allocation2 + $0x128] ss:$8 sps:$4 sm:$0xff]   ;;  %6436 = vst.msk [vmem:[#allocation4 + $0xd8] sm:$0xff] %vm17257_vm5, %v11857_v11  ;;  %v11864_v32 = vld [vmem:[#allocation2 + $0x158] ss:$8 sps:$4 sm:$0xff]   ;;  %vm17262_vm15 = vmmov %vm17228_vm0 }
 0x39f   :  { %6369 = vst.msk [vmem:[#allocation4 + $0x10] sm:$0xff] %vm17228_vm0, %v11853_v54  ;;  %v11773_v24 = vld [vmem:[#allocation2 + $0x31a] ss:$8 sps:$4 sm:$0xff]   ;;  %v11870_v3 = vld [vmem:[#allocation2 + $0x129] ss:$8 sps:$4 sm:$0xff]   ;;  %vm17263_vm7 = vmmov %vm17228_vm0 }
 0x3a0   :  { %6435 = vst.msk [vmem:[#allocation4 + $0x98] sm:$0xff] %vm17258_vm13, %v11858_v22  ;;  %v11778_v38 = vld [vmem:[#allocation2 + $0x3d9] ss:$8 sps:$4 sm:$0xff]   ;;  %v11792_v34 = vld [vmem:[#allocation2 + $0x249] ss:$8 sps:$4 sm:$0xff]   ;;  %vm17264_vm11 = vmmov %vm17228_vm0 }
 0x3a1   :  { %6372 = vst.msk [vmem:[#allocation4 + $0xd0] sm:$0xff] %vm17259_vm10, %v11863_v33  ;;  %v11875_v1 = vld [vmem:[#allocation2 + $0x79] ss:$8 sps:$4 sm:$0xff]   ;;  %v11797_v19 = vld [vmem:[#allocation2 + $0x189] ss:$8 sps:$4 sm:$0xff]   ;;  %vm17265_vm2 = vmmov %vm17228_vm0 }
 0x3a2   :  { %7807 = vrot.lane.b32.xlu1 %v11736_v45, %s12105_s3  ;;  %6397 = vrot.lane.b32.xlu0 %v11751_v47, %s12105_s3  ;;  %v11783_v45 = vld [vmem:[#allocation2 + $0x33a] ss:$8 sps:$4 sm:$0xff]   ;;  %6371 = vst.msk [vmem:[#allocation4 + $0x90] sm:$0xff] %vm17260_vm6, %v11864_v32  ;;  %v11782_v47 = vld [vmem:[#allocation2 + $0x34a] ss:$8 sps:$4 sm:$0xff]   ;;  %vm17266_vm3 = vmmov %vm17228_vm0 }
 0x3a3   :  { %6945 = vst.msk [vmem:[#allocation4 + $0x118] sm:$0xff] %vm17262_vm15, %v11870_v3  ;;  %v11881_v61 = vld [vmem:[#allocation2 + $0x169] ss:$8 sps:$4 sm:$0xff]   ;;  %v11882_v43 = vld [vmem:[#allocation2 + $0x159] ss:$8 sps:$4 sm:$0xff]   ;;  %vm17267_vm12 = vmmov %vm17228_vm0 }
 0x3a4   :  { %6882 = vst.msk [vmem:[#allocation4 + $0x150] sm:$0xff] %vm17263_vm7, %v11875_v1  ;;  %v11801_v13 = vld [vmem:[#allocation2 + $0x3c9] ss:$8 sps:$4 sm:$0xff]   ;;  %v11791_v9 = vld [vmem:[#allocation2 + $0x259] ss:$8 sps:$4 sm:$0xff]   ;;  %vm17268_vm9 = vmmov %vm17228_vm0 }
 0x3a5   :  { %6948 = vst.msk [vmem:[#allocation4 + $0x1d8] sm:$0xff] %vm17265_vm2, %v11881_v61  ;;  %v11887_v36 = vld [vmem:[#allocation2 + $0xa9] ss:$8 sps:$4 sm:$0xff]   ;;  %v11888_v17 = vld [vmem:[#allocation2 + $0x99] ss:$8 sps:$4 sm:$0xff]   ;;  %vm17269_vm4 = vmmov %vm17228_vm0 }
 0x3a6   :  { %7875 = vrot.lane.b32.xlu1 %v11738_v27, %s12105_s3  ;;  %6969 = vrot.lane.b32.xlu0 %v11754_v63, %s12105_s3  ;;  %v11787_v27 = vld [vmem:[#allocation2 + $0x3f9] ss:$8 sps:$4 sm:$0xff]   ;;  %6947 = vst.msk [vmem:[#allocation4 + $0x198] sm:$0xff] %vm17266_vm3, %v11882_v43  ;;  %vm17270_vm14 = vmmov %vm17228_vm0  ;;  %v8270_v42 = vld [vmem:[#allocation4 + $0x8] sm:$0xff] }
 0x3a7   :  { %6884 = vst.msk [vmem:[#allocation4 + $0x1d0] sm:$0xff] %vm17267_vm12, %v11887_v36  ;;  %v11796_v53 = vld [vmem:[#allocation2 + $0x199] ss:$8 sps:$4 sm:$0xff]   ;;  %v11900_v55 = vld [vmem:[#allocation2 + $0x428] ss:$8 sps:$4 sm:$0xff]   ;;  %vm17271_vm5 = vmmov %vm17228_vm0 }
 0x3a8   :  { %6883 = vst.msk [vmem:[#allocation4 + $0x190] sm:$0xff] %vm17268_vm9, %v11888_v17  ;;  %v11811_v16 = vld [vmem:[#allocation2 + $0x279] ss:$8 sps:$4 sm:$0xff]   ;;  %v8286_v29 = vld [vmem:[#allocation4 + $0x88] sm:$0xff]  ;;  %vm17272_vm13 = vmmov %vm17228_vm0 }
 0x3a9   :  { %v11893_v44 = vld [vmem:[#allocation2 + $0x379] ss:$8 sps:$4 sm:$0xff]   ;;  %v11862_v40 = vld [vmem:[%s16839_s4 + $0xc8] sm:$0xff]   ;;  %7393 = vst.msk [vmem:[#allocation4 + $0x210] sm:$0xff] %vm17271_vm5, %v11900_v55  ;;  %v11868_v22 = vld [vmem:[%s16839_s4 + $0xd0] sm:$0xff]  }
 0x3aa   :  { %7811 = vrot.lane.b32.xlu1 %v11740_v23, %s12105_s3  ;;  %6905 = vrot.lane.b32.xlu0 %v11757_v26, %s12105_s3  ;;  %v11869_v23 = vld [vmem:[#allocation2 + $0x139] ss:$8 sps:$4 sm:$0xff]   ;;  %v11805_v26 = vld [vmem:[#allocation2 + $0x309] ss:$8 sps:$4 sm:$0xff]   ;;  %7458 = vst.msk [vmem:[#allocation4 + $0x258] sm:$0xff] %vm17269_vm4, %v11893_v44  ;;  %vm17273_vm10 = vmmov %vm17228_vm0 }
 0x3ab   :  { %6946 = vst.msk [vmem:[#allocation4 + $0x158] sm:$0xff] %vm17261_vm1, %v11869_v23  ;;  %v11800_v49 = vld [vmem:[#allocation2 + $0x3d9] ss:$8 sps:$4 sm:$0xff]   ;;  %v11904_v0 = vld [vmem:[#allocation2 + $0x3a9] ss:$8 sps:$4 sm:$0xff]   ;;  %vm17274_vm6 = vmmov %vm17228_vm0 }
 0x3ac   :  { %v11823_v48 = vld [vmem:[#allocation2 + $0x3f9] ss:$8 sps:$4 sm:$0xff]   ;;  %v11865_v11 = vld [vmem:[%s16839_s4 + $0x88] sm:$0xff]   ;;  %7460 = vst.msk [vmem:[#allocation4 + $0x2d8] sm:$0xff] %vm17272_vm13, %v11904_v0  ;;  %vm17275_vm1 = vmmov %vm17228_vm0 }
 0x3ad   :  { %v11827_v14 = vld [vmem:[#allocation2 + $0x339] ss:$8 sps:$4 sm:$0xff]   ;;  %v11908_v32 = vld [vmem:[#allocation2 + $0x468] ss:$8 sps:$4 sm:$0xff]   ;;  %vm17276_vm15 = vmmov %vm17228_vm0 }
 0x3ae   :  { %6459 = vrot.lane.b32.xlu1 %v11743_v41, %s12105_s3  ;;  %6973 = vrot.lane.b32.xlu0 %v11759_v39, %s12105_s3  ;;  %v11876_v41 = vld [vmem:[#allocation2 + $0x69] ss:$8 sps:$4 sm:$0xff]   ;;  %v11909_v23 = vld [vmem:[#allocation2 + $0x458] ss:$8 sps:$4 sm:$0xff]   ;;  %7396 = vst.msk [vmem:[#allocation4 + $0x2d0] sm:$0xff] %vm17274_vm6, %v11908_v32  ;;  %vm17277_vm7 = vmmov %vm17228_vm0 }
 0x3af   :  { %6881 = vst.msk [vmem:[#allocation4 + $0x110] sm:$0xff] %vm17264_vm11, %v11876_v41  ;;  %v11912_v41 = vld [vmem:[%s16839_s4 + $0x140] sm:$0xff]   ;;  %v11915_v43 = vld [vmem:[#allocation2 + $0x429] ss:$8 sps:$4 sm:$0xff]   ;;  %vm17278_vm11 = vmmov %vm17228_vm0 }
 0x3b0   :  { %7395 = vst.msk [vmem:[#allocation4 + $0x290] sm:$0xff] %vm17275_vm1, %v11909_v23  ;;  %11425 = vmatprep.subr.bf16.mxu0 %v11912_v41  ;;  %v11839_v36 = vld [vmem:[#allocation2 + $0x30a] ss:$8 sps:$4 sm:$0xff]   ;;  %v11883_v17 = vld [vmem:[%s16839_s4 + $0xa0] sm:$0xff]   ;;  %vm17279_vm2 = vmmov %vm17228_vm0 }
 0x3b1   :  { %7973 = vst.msk [vmem:[#allocation4 + $0x318] sm:$0xff] %vm17277_vm7, %v11915_v43  ;;  %vm17280_vm3 = vmmov %vm17228_vm0  ;;  %v11855_v23 = vld [vmem:[#allocation2 + $0x33a] ss:$8 sps:$4 sm:$0xff]   ;;  %v11846_v43 = vld [vmem:[#allocation2 + $0x1ca] ss:$8 sps:$4 sm:$0xff]  }
 0x3b2   :  { %6395 = vrot.lane.b32.xlu1 %v11746_v57, %s12105_s3  ;;  %6909 = vrot.lane.b32.xlu0 %v11761_v8, %s12105_s3  ;;  %v11786_v57 = vld [vmem:[#allocation2 + $0x409] ss:$8 sps:$4 sm:$0xff]   ;;  %vm17281_vm12 = vmmov %vm17228_vm0 }
 0x3b3   :  { %vm17282_vm9 = vmmov %vm17228_vm0 }
 0x3b4   :  { %vm17283_vm4 = vmmov %vm17228_vm0 }
 0x3b5   :  { %vm17285_vm5 = vmmov %vm17228_vm0 }
 0x3b6   :  { %6463 = vrot.lane.b32.xlu1 %v11748_v6, %s12105_s3  ;;  %7481 = vrot.lane.b32.xlu0 %v11764_v56, %s12105_s3  ;;  %v11804_v56 = vld [vmem:[#allocation2 + $0x319] ss:$8 sps:$4 sm:$0xff]   ;;  %vm17286_vm13 = vmmov %vm17228_vm0 }
 0x3b7   :  { %vm17288_vm6 = vmmov %vm17228_vm0 }
 0x3b8   :  { %vm17289_vm1 = vmmov %vm17228_vm0 }
 0x3b9   :  { %vm17291_vm7 = vmmov %vm17228_vm0 }
 0x3ba   :  { %6399 = vrot.lane.b32.xlu1 %v11750_v21, %s12105_s3  ;;  %7417 = vrot.lane.b32.xlu0 %v11767_v60, %s12105_s3  ;;  %v8269_v60 = vld [vmem:[#allocation4] sm:$0xff] }
 0x3bc   :  { %v6265_v5 = vpop.permute.xlu1 %6264 }
 0x3bd   :  { %6276 = vst.msk [vmem:[#allocation4 + $0x40] sm:$0xff] %vm6274_vm8, %v6265_v5 }
 0x3be   :  { %6971 = vrot.lane.b32.xlu1 %v11753_v10, %s12105_s3  ;;  %7485 = vrot.lane.b32.xlu0 %v11769_v50, %s12105_s3  ;;  %v11894_v10 = vld [vmem:[#allocation2 + $0x369] ss:$8 sps:$4 sm:$0xff]  }
 0x3bf   :  { %7457 = vst.msk [vmem:[#allocation4 + $0x218] sm:$0xff] %vm17270_vm14, %v11894_v10  ;;  %vm17284_vm14 = vmmov %vm17228_vm0 }
 0x3c2   :  { %6907 = vrot.lane.b32.xlu1 %v11756_v20, %s12105_s3  ;;  %7421 = vrot.lane.b32.xlu0 %v11771_v15, %s12105_s3  ;;  %v11817_v20 = vld [vmem:[#allocation2 + $0x1b9] ss:$8 sps:$4 sm:$0xff]  }
 0x3c3   :  { %v11859_v15 = vld [vmem:[%s16839_s4 + $0x80] sm:$0xff]  }
 0x3c4   :  { %v8277_v58 = vld [vmem:[#allocation4 + $0x40] sm:$0xff] }
 0x3c6   :  { %6975 = vrot.lane.b32.xlu1 %v11758_v31, %s12105_s3  ;;  %7997 = vrot.lane.b32.xlu0 %v11774_v52, %s12105_s3  ;;  %v11899_v31 = vld [vmem:[#allocation2 + $0x438] ss:$8 sps:$4 sm:$0xff]   ;;  %v8397_v52 = vpack.c.bf16 %v8277_v58, %v8269_v60  ;;  %v11843_v60 = vld [vmem:[#allocation2 + $0x3c9] ss:$8 sps:$4 sm:$0xff]  }
 0x3c7   :  { %7394 = vst.msk [vmem:[#allocation4 + $0x250] sm:$0xff] %vm17228_vm0, %v11899_v31  ;;  %v11889_v58 = vld [vmem:[%s16839_s4 + $0xa8] sm:$0xff]  }
 0x3ca   :  { %6911 = vrot.lane.b32.xlu1 %v11760_v46, %s12105_s3  ;;  %7933 = vrot.lane.b32.xlu0 %v11779_v7, %s12105_s3 }
 0x3ce   :  { %7483 = vrot.lane.b32.xlu1 %v11763_v37, %s12105_s3  ;;  %8001 = vrot.lane.b32.xlu0 %v11783_v45, %s12105_s3  ;;  %v11831_v45 = vld [vmem:[#allocation2 + $0x18a] ss:$8 sps:$4 sm:$0xff]  }
 0x3d0   :  { %v6267_v59 = vpop.permute.xlu0 %6266 }
 0x3d1   :  { %6277 = vst.msk [vmem:[#allocation4 + $0x80] sm:$0xff] %vm6274_vm8, %v6267_v59  ;;  %v6336_v25 = vpop.permute.xlu1 %6335 }
 0x3d2   :  { %7419 = vrot.lane.b32.xlu1 %v11766_v62, %s12105_s3  ;;  %6344 = vst.msk [vmem:[#allocation4 + $0xc8] sm:$0xff] %vm6274_vm8, %v6336_v25  ;;  %7937 = vrot.lane.b32.xlu0 %v11787_v27, %s12105_s3  ;;  %v11810_v62 = vld [vmem:[#allocation2 + $0x289] ss:$8 sps:$4 sm:$0xff]  }
 0x3d3   :  { %v11871_v25 = vld [vmem:[%s16839_s4 + $0x90] sm:$0xff]  }
 0x3d4   :  { %v6842_v35 = vpop.permute.xlu0 %6841 }
 0x3d5   :  { %6853 = vst.msk [vmem:[#allocation4 + $0x108] sm:$0xff] %vm6274_vm8, %v6842_v35  ;;  %v11822_v35 = vld [vmem:[#allocation2 + $0x409] ss:$8 sps:$4 sm:$0xff]  }
 0x3d6   :  { %7487 = vrot.lane.b32.xlu1 %v11768_v2, %s12105_s3  ;;  %6585 = vrot.lane.b32.xlu0 %v11792_v34, %s12105_s3  ;;  %v11905_v2 = vld [vmem:[#allocation2 + $0x399] ss:$8 sps:$4 sm:$0xff]  }
 0x3d7   :  { %7459 = vst.msk [vmem:[#allocation4 + $0x298] sm:$0xff] %vm17273_vm10, %v11905_v2  ;;  %vm17287_vm10 = vmmov %vm17228_vm0 }
 0x3d8   :  { %v6778_v18 = vpop.permute.xlu0 %6777  ;;  %v8285_v3 = vld [vmem:[#allocation4 + $0x80] sm:$0xff] }
 0x3d9   :  { %6789 = vst.msk [vmem:[#allocation4 + $0x100] sm:$0xff] %vm6274_vm8, %v6778_v18  ;;  %v8294_v37 = vld [vmem:[#allocation4 + $0xc8] sm:$0xff]  ;;  %v11913_v18 = vld [vmem:[%s16839_s4 + $0x100] sm:$0xff]  }
 0x3da   :  { %7423 = vrot.lane.b32.xlu1 %v11770_v28, %s12105_s3  ;;  %6521 = vrot.lane.b32.xlu0 %v11797_v19, %s12105_s3  ;;  %v8406_v54 = vpack.c.bf16 %v8294_v37, %v8286_v29  ;;  %v11816_v28 = vld [vmem:[#allocation2 + $0x1c9] ss:$8 sps:$4 sm:$0xff]   ;;  %v11834_v29 = vld [vmem:[#allocation2 + $0x259] ss:$8 sps:$4 sm:$0xff]  }
 0x3db   :  { %11426 = vmatpush3.bf16.msra.mxu0 %v11913_v18  ;;  %v11847_v37 = vld [vmem:[#allocation2 + $0x1ba] ss:$8 sps:$4 sm:$0xff]  }
 0x3dc   :  { %v6846_v63 = vpop.permute.xlu0 %6845  ;;  %v8302_v1 = vld [vmem:[#allocation4 + $0x108] sm:$0xff] }
 0x3dd   :  { %6855 = vst.msk [vmem:[#allocation4 + $0x188] sm:$0xff] %vm6274_vm8, %v6846_v63  ;;  %v11877_v63 = vld [vmem:[%s16839_s4 + $0x98] sm:$0xff]  }
 0x3de   :  { %7999 = vrot.lane.b32.xlu1 %v11773_v24, %s12105_s3  ;;  %6713 = vrot.lane.b32.xlu0 %v11801_v13, %s12105_s3  ;;  %v11914_v13 = vld [vmem:[#allocation2 + $0x439] ss:$8 sps:$4 sm:$0xff]  }
 0x3df   :  { %7974 = vst.msk [vmem:[#allocation4 + $0x358] sm:$0xff] %vm17276_vm15, %v11914_v13  ;;  %vm17290_vm15 = vmmov %vm17228_vm0 }
 0x3e0   :  { %v6782_v6 = vpop.permute.xlu0 %6781 }
 0x3e1   :  { %6791 = vst.msk [vmem:[#allocation4 + $0x180] sm:$0xff] %vm6274_vm8, %v6782_v6  ;;  %v8301_v6 = vld [vmem:[#allocation4 + $0x100] sm:$0xff] }
 0x3e2   :  { %7935 = vrot.lane.b32.xlu1 %v11778_v38, %s12105_s3  ;;  %6649 = vrot.lane.b32.xlu0 %v11805_v26, %s12105_s3  ;;  %v11874_v38 = vld [vmem:[%s16839_s4 + $0xd8] sm:$0xff]  }
 0x3e4   :  { %v6332_v39 = vpop.permute.xlu0 %6331  ;;  %v8318_v44 = vld [vmem:[#allocation4 + $0x188] sm:$0xff] }
 0x3e5   :  { %6342 = vst.msk [vmem:[#allocation4 + $0x48] sm:$0xff] %vm6274_vm8, %v6332_v39 }
 0x3e6   :  { %8003 = vrot.lane.b32.xlu1 %v11782_v47, %s12105_s3  ;;  %6589 = vrot.lane.b32.xlu0 %v11811_v16, %s12105_s3 }
 0x3e8   :  { %v7354_v12 = vpop.permute.xlu0 %7353  ;;  %v8317_v0 = vld [vmem:[#allocation4 + $0x180] sm:$0xff] }
 0x3e9   :  { %7365 = vst.msk [vmem:[#allocation4 + $0x208] sm:$0xff] %vm6274_vm8, %v7354_v12  ;;  %v11921_v12 = vld [vmem:[#allocation2 + $0x369] ss:$8 sps:$4 sm:$0xff]  }
 0x3ea   :  { %7939 = vrot.lane.b32.xlu1 %v11786_v57, %s12105_s3  ;;  %6525 = vrot.lane.b32.xlu0 %v11817_v20, %s12105_s3  ;;  %v11835_v57 = vld [vmem:[#allocation2 + $0x249] ss:$8 sps:$4 sm:$0xff]   ;;  %7909 = vst.msk [vmem:[#allocation4 + $0x310] sm:$0xff] %vm17279_vm2, %v11921_v12  ;;  %vm17293_vm2 = vmmov %vm17228_vm0 }
 0x3ec   :  { %v6269_v51 = vpop.permute.xlu1 %6268  ;;  %v7290_v50 = vpop.permute.xlu0 %7289  ;;  %v8278_v4 = vld [vmem:[#allocation4 + $0x48] sm:$0xff] }
 0x3ed   :  { %6278 = vst.msk [vmem:[#allocation4 + $0xc0] sm:$0xff] %vm6274_vm8, %v6269_v51  ;;  %7301 = vst.msk [vmem:[#allocation4 + $0x200] sm:$0xff] %vm6274_vm8, %v7290_v50  ;;  %v8398_v30 = vpack.c.bf16 %v8278_v4, %v8270_v42  ;;  %v11880_v51 = vld [vmem:[%s16839_s4 + $0xe0] sm:$0xff]   ;;  %v11924_v50 = vld [vmem:[%s16839_s4 + $0x150] sm:$0xff]  }
 0x3ee   :  { %6587 = vrot.lane.b32.xlu1 %v11791_v9, %s12105_s3  ;;  %6717 = vrot.lane.b32.xlu0 %v11823_v48, %s12105_s3  ;;  %v11826_v9 = vld [vmem:[#allocation2 + $0x349] ss:$8 sps:$4 sm:$0xff]   ;;  %v11830_v42 = vld [vmem:[#allocation2 + $0x19a] ss:$8 sps:$4 sm:$0xff]  }
 0x3ef   :  { %9005 = vmatprep.mubr.bf16.mxu1 %v8398_v30  ;;  %v11925_v4 = vld [vmem:[%s16839_s4 + $0x110] sm:$0xff]  }
 0x3f0   :  { %v6844_v21 = vpop.permute.xlu1 %6843  ;;  %9006 = vmatmul.mubr.bf16.vlgmr.msra.gmra.mrb[64].mxu1 %v8397_v52  ;;  %v7358_v7 = vpop.permute.xlu0 %7357  ;;  %v11895_v30 = vld [vmem:[%s16839_s4 + $0xb0] sm:$0xff]  }
 0x3f1   :  { %6854 = vst.msk [vmem:[#allocation4 + $0x148] sm:$0xff] %vm6274_vm8, %v6844_v21  ;;  %7367 = vst.msk [vmem:[#allocation4 + $0x288] sm:$0xff] %vm6274_vm8, %v7358_v7  ;;  %9013 = vmatprep.mubr.bf16.mxu1 %v8406_v54  ;;  %11362 = vmatpush3.bf16.msra.mxu1 %v11859_v15  ;;  %v11919_v21 = vld [vmem:[%s16839_s4 + $0x108] sm:$0xff]   ;;  %v11838_v7 = vld [vmem:[#allocation2 + $0x31a] ss:$8 sps:$4 sm:$0xff]  }
 0x3f2   :  { %6523 = vrot.lane.b32.xlu1 %v11796_v53, %s12105_s3  ;;  %6653 = vrot.lane.b32.xlu0 %v11827_v14, %s12105_s3  ;;  %v11918_v53 = vld [vmem:[%s16839_s4 + $0x148] sm:$0xff]  }
 0x3f3   :  { %11363 = vmatprep.subr.bf16.mxu1 %v11862_v40  ;;  %11427 = vmatprep.subr.bf16.mxu0 %v11918_v53  ;;  %v11926_v15 = vld [vmem:[#allocation2 + $0x469] ss:$8 sps:$4 sm:$0xff]   ;;  %v11927_v40 = vld [vmem:[#allocation2 + $0x459] ss:$8 sps:$4 sm:$0xff]  }
 0x3f4   :  { %v6780_v8 = vpop.permute.xlu1 %6779  ;;  %v8293_v33 = vld [vmem:[#allocation4 + $0xc0] sm:$0xff]  ;;  %v7294_v59 = vpop.permute.xlu0 %7293  ;;  %11428 = vmatpush3.bf16.msra.mxu0 %v11919_v21  ;;  %v8334_v54 = vld [vmem:[#allocation4 + $0x208] sm:$0xff]  ;;  %7976 = vst.msk [vmem:[#allocation4 + $0x3d8] sm:$0xff] %vm17280_vm3, %v11926_v15  ;;  %vm17294_vm3 = vmmov %vm17228_vm0 }
 0x3f5   :  { %6790 = vst.msk [vmem:[#allocation4 + $0x140] sm:$0xff] %vm6274_vm8, %v6780_v8  ;;  %7303 = vst.msk [vmem:[#allocation4 + $0x280] sm:$0xff] %vm6274_vm8, %v7294_v59  ;;  %11364 = vmatpush3.bf16.msra.mxu1 %v11865_v11  ;;  %v8405_v34 = vpack.c.bf16 %v8293_v33, %v8285_v3  ;;  %v11920_v8 = vld [vmem:[#allocation2 + $0x379] ss:$8 sps:$4 sm:$0xff]   ;;  %11429 = vmatprep.subr.bf16.mxu0 %v11924_v50  ;;  %v11850_v53 = vld [vmem:[#allocation2 + $0x289] ss:$8 sps:$4 sm:$0xff]  }
 0x3f6   :  { %6715 = vrot.lane.b32.xlu1 %v11800_v49, %s12105_s3  ;;  %7097 = vrot.lane.b32.xlu0 %v11831_v45, %s12105_s3  ;;  %7910 = vst.msk [vmem:[#allocation4 + $0x350] sm:$0xff] %vm17278_vm11, %v11920_v8  ;;  %v11930_v11 = vld [vmem:[%s16839_s4 + $0x158] sm:$0xff]   ;;  %v11932_v45 = vld [vmem:[#allocation2 + $0x3a9] ss:$8 sps:$4 sm:$0xff]   ;;  %v8333_v3 = vld [vmem:[#allocation4 + $0x200] sm:$0xff] }
 0x3f7   :  { %11365 = vmatprep.subr.bf16.mxu1 %v11868_v22  ;;  %7975 = vst.msk [vmem:[#allocation4 + $0x398] sm:$0xff] %vm17281_vm12, %v11927_v40  ;;  %v11931_v22 = vld [vmem:[%s16839_s4 + $0x118] sm:$0xff]   ;;  %v11867_v21 = vld [vmem:[#allocation2 + $0x549] ss:$8 sps:$4 sm:$0xff]   ;;  %vm17292_vm11 = vmmov %vm17228_vm0 }
 0x3f8   :  { %v6848_v46 = vpop.permute.xlu1 %6847  ;;  %v8310_v27 = vld [vmem:[#allocation4 + $0x148] sm:$0xff]  ;;  %9014 = vmatmul.mubr.bf16.gmra.mrb[68].mxu1 %v8405_v34  ;;  %v7870_v61 = vpop.permute.xlu0 %7869  ;;  %11430 = vmatpush3.bf16.msra.mxu0 %v11925_v4  ;;  %v11901_v59 = vld [vmem:[%s16839_s4 + $0xb8] sm:$0xff]   ;;  %7912 = vst.msk [vmem:[#allocation4 + $0x3d0] sm:$0xff] %vm17282_vm9, %v11932_v45  ;;  %v11937_v34 = vld [vmem:[%s16839_s4 + $0x120] sm:$0xff]  }
 0x3f9   :  { %6856 = vst.msk [vmem:[#allocation4 + $0x1c8] sm:$0xff] %vm6274_vm8, %v6848_v46  ;;  %v8414_v47 = vpack.c.bf16 %v8310_v27, %v8302_v1  ;;  %7881 = vst.msk [vmem:[#allocation4 + $0x308] sm:$0xff] %vm6274_vm8, %v7870_v61  ;;  %11366 = vmatpush3.bf16.msra.mxu1 %v11871_v25  ;;  %v11892_v46 = vld [vmem:[%s16839_s4 + $0xf0] sm:$0xff]   ;;  %11431 = vmatprep.subr.bf16.mxu0 %v11930_v11  ;;  %v11933_v27 = vld [vmem:[#allocation2 + $0x399] ss:$8 sps:$4 sm:$0xff]  }
 0x3fa   :  { %6651 = vrot.lane.b32.xlu1 %v11804_v56, %s12105_s3  ;;  %7033 = vrot.lane.b32.xlu0 %v11835_v57, %s12105_s3  ;;  %v11886_v56 = vld [vmem:[%s16839_s4 + $0xe8] sm:$0xff]   ;;  %v11842_v25 = vld [vmem:[#allocation2 + $0x3d9] ss:$8 sps:$4 sm:$0xff]   ;;  %7911 = vst.msk [vmem:[#allocation4 + $0x390] sm:$0xff] %vm17283_vm4, %v11933_v27  ;;  %vm17295_vm12 = vmmov %vm17228_vm0 }
 0x3fb   :  { %9021 = vmatprep.mubr.bf16.mxu1 %v8414_v47  ;;  %11367 = vmatprep.subr.bf16.mxu1 %v11874_v38  ;;  %v8350_v47 = vld [vmem:[#allocation4 + $0x288] sm:$0xff]  ;;  %v11885_v45 = vld [vmem:[#allocation2 + $0x11] ss:$8 sps:$4 sm:$0xff]   ;;  %vm17296_vm9 = vmmov %vm17228_vm0 }
 0x3fc   :  { %v6784_v5 = vpop.permute.xlu1 %6783  ;;  %v8309_v26 = vld [vmem:[#allocation4 + $0x140] sm:$0xff]  ;;  %v7806_v16 = vpop.permute.xlu0 %7805  ;;  %11432 = vmatpush3.bf16.msra.mxu0 %v11931_v22  ;;  %v11939_v57 = vld [vmem:[#allocation2 + $0x1e9] ss:$8 sps:$4 sm:$0xff]   ;;  %vm17297_vm4 = vmmov %vm17228_vm0 }
 0x3fd   :  { %6792 = vst.msk [vmem:[#allocation4 + $0x1c0] sm:$0xff] %vm6274_vm8, %v6784_v5  ;;  %7817 = vst.msk [vmem:[#allocation4 + $0x300] sm:$0xff] %vm6274_vm8, %v7806_v16  ;;  %11368 = vmatpush3.bf16.msra.mxu1 %v11877_v63  ;;  %v8413_v49 = vpack.c.bf16 %v8309_v26, %v8301_v6  ;;  %v11898_v5 = vld [vmem:[%s16839_s4 + $0xf8] sm:$0xff]   ;;  %v11942_v26 = vld [vmem:[%s16839_s4 + $0x168] sm:$0xff]  }
 0x3fe   :  { %6591 = vrot.lane.b32.xlu1 %v11810_v62, %s12105_s3  ;;  %7225 = vrot.lane.b32.xlu0 %v11839_v36, %s12105_s3  ;;  %v11861_v36 = vld [vmem:[#allocation2 + $0x3f9] ss:$8 sps:$4 sm:$0xff]   ;;  %6561 = vst.msk [vmem:[#allocation4 + $0x28] sm:$0xff] %vm17228_vm0, %v11939_v57  ;;  %v11945_v16 = vld [vmem:[#allocation2 + $0x2a8] ss:$8 sps:$4 sm:$0xff]  }
 0x3ff   :  { %11369 = vmatprep.subr.bf16.mxu1 %v11880_v51  ;;  %v8349_v51 = vld [vmem:[#allocation4 + $0x280] sm:$0xff]  ;;  %6497 = vst.msk [vmem:[#allocation4 + $0x20] sm:$0xff] %vm17286_vm13, %v11945_v16  ;;  %v11952_v50 = vld [vmem:[#allocation2 + $0x369] ss:$8 sps:$4 sm:$0xff]   ;;  %vm17300_vm13 = vmmov %vm17228_vm0 }
 0x400   :  { %v7356_v24 = vpop.permute.xlu1 %7355  ;;  %v8326_v10 = vld [vmem:[#allocation4 + $0x1c8] sm:$0xff]  ;;  %9022 = vmatmul.mubr.bf16.gmra.mrb[72].mxu1 %v8413_v49  ;;  %v7874_v31 = vpop.permute.xlu0 %7873  ;;  %6689 = vst.msk [vmem:[#allocation4 + $0x38] sm:$0xff] %vm17288_vm6, %v11952_v50  ;;  %v11866_v22 = vld [vmem:[#allocation2 + $0x559] ss:$8 sps:$4 sm:$0xff]   ;;  %vm17302_vm6 = vmmov %vm17228_vm0 }
 0x401   :  { %7366 = vst.msk [vmem:[#allocation4 + $0x248] sm:$0xff] %vm6274_vm8, %v7356_v24  ;;  %v8422_v20 = vpack.c.bf16 %v8326_v10, %v8318_v44  ;;  %7883 = vst.msk [vmem:[#allocation4 + $0x388] sm:$0xff] %vm6274_vm8, %v7874_v31  ;;  %11370 = vmatpush3.bf16.msra.mxu1 %v11883_v17  ;;  %v11851_v24 = vld [vmem:[#allocation2 + $0x279] ss:$8 sps:$4 sm:$0xff]   ;;  %v11943_v17 = vld [vmem:[%s16839_s4 + $0x128] sm:$0xff]  }
 0x402   :  { %6527 = vrot.lane.b32.xlu1 %v11816_v28, %s12105_s3  ;;  %7161 = vrot.lane.b32.xlu0 %v11843_v60, %s12105_s3  ;;  %v8366_v8 = vld [vmem:[#allocation4 + $0x308] sm:$0xff]  ;;  %v11964_v27 = vld [vmem:[#allocation2 + $0x219] ss:$8 sps:$4 sm:$0xff]  }
 0x403   :  { %9029 = vmatprep.mubr.bf16.mxu1 %v8422_v20  ;;  %11371 = vmatprep.subr.bf16.mxu1 %v11886_v56  ;;  %v11948_v20 = vld [vmem:[%s16839_s4 + $0x170] sm:$0xff]   ;;  %6563 = vst.msk [vmem:[#allocation4 + $0xa8] sm:$0xff] %vm17292_vm11, %v11964_v27  ;;  %v11953_v16 = vld [vmem:[%s16839_s4 + $0x180] sm:$0xff]   ;;  %vm17306_vm11 = vmmov %vm17228_vm0 }
 0x404   :  { %v7292_v19 = vpop.permute.xlu1 %7291  ;;  %v8325_v55 = vld [vmem:[#allocation4 + $0x1c0] sm:$0xff]  ;;  %v7810_v52 = vpop.permute.xlu0 %7809  ;;  %v11949_v56 = vld [vmem:[%s16839_s4 + $0x130] sm:$0xff]  }
 0x405   :  { %7302 = vst.msk [vmem:[#allocation4 + $0x240] sm:$0xff] %vm6274_vm8, %v7292_v19  ;;  %7819 = vst.msk [vmem:[#allocation4 + $0x380] sm:$0xff] %vm6274_vm8, %v7810_v52  ;;  %11372 = vmatpush3.bf16.msra.mxu1 %v11889_v58  ;;  %v8421_v14 = vpack.c.bf16 %v8325_v55, %v8317_v0  ;;  %v11938_v19 = vld [vmem:[#allocation2 + $0x1f9] ss:$8 sps:$4 sm:$0xff]   ;;  %v11854_v60 = vld [vmem:[#allocation2 + $0x34a] ss:$8 sps:$4 sm:$0xff]  }
 0x406   :  { %6719 = vrot.lane.b32.xlu1 %v11822_v35, %s12105_s3  ;;  %7101 = vrot.lane.b32.xlu0 %v11847_v37, %s12105_s3  ;;  %v11936_v35 = vld [vmem:[%s16839_s4 + $0x160] sm:$0xff]   ;;  %6562 = vst.msk [vmem:[#allocation4 + $0x68] sm:$0xff] %vm17284_vm14, %v11938_v19  ;;  %v11873_v55 = vld [vmem:[#allocation2 + $0x489] ss:$8 sps:$4 sm:$0xff]   ;;  %v11956_v0 = vld [vmem:[%s16839_s4 + $0x178] sm:$0xff]  }
 0x407   :  { %11373 = vmatprep.subr.bf16.mxu1 %v11892_v46  ;;  %11433 = vmatprep.subr.bf16.mxu0 %v11936_v35  ;;  %v11951_v46 = vld [vmem:[#allocation2 + $0x379] ss:$8 sps:$4 sm:$0xff]   ;;  %v11860_v4 = vld [vmem:[#allocation2 + $0x409] ss:$8 sps:$4 sm:$0xff]   ;;  %vm17298_vm14 = vmmov %vm17228_vm0 }
 0x408   :  { %v7360_v39 = vpop.permute.xlu1 %7359  ;;  %v8342_v2 = vld [vmem:[#allocation4 + $0x248] sm:$0xff]  ;;  %9030 = vmatmul.mubr.bf16.gmra.mrb[76].mxu1 %v8421_v14  ;;  %v6458_v32 = vpop.permute.xlu0 %6457  ;;  %11434 = vmatpush3.bf16.msra.mxu0 %v11937_v34  ;;  %v8365_v37 = vld [vmem:[#allocation4 + $0x300] sm:$0xff]  ;;  %6690 = vst.msk [vmem:[#allocation4 + $0x78] sm:$0xff] %vm17287_vm10, %v11951_v46  ;;  %vm17301_vm10 = vmmov %vm17228_vm0 }
 0x409   :  { %7368 = vst.msk [vmem:[#allocation4 + $0x2c8] sm:$0xff] %vm6274_vm8, %v7360_v39  ;;  %v8430_v28 = vpack.c.bf16 %v8342_v2, %v8334_v54  ;;  %6469 = vst.msk [vmem:[#allocation4 + $0x18] sm:$0xff] %vm6274_vm8, %v6458_v32  ;;  %11374 = vmatpush3.bf16.msra.mxu1 %v11895_v30  ;;  %v11944_v39 = vld [vmem:[#allocation2 + $0x2b8] ss:$8 sps:$4 sm:$0xff]   ;;  %11435 = vmatprep.subr.bf16.mxu0 %v11942_v26  ;;  %v11960_v14 = vld [vmem:[#allocation2 + $0x428] ss:$8 sps:$4 sm:$0xff]  }
 0x40a   :  { %6655 = vrot.lane.b32.xlu1 %v11826_v9, %s12105_s3  ;;  %7037 = vrot.lane.b32.xlu0 %v11851_v24, %s12105_s3  ;;  %6498 = vst.msk [vmem:[#allocation4 + $0x60] sm:$0xff] %vm17285_vm5, %v11944_v39  ;;  %v11957_v54 = vld [vmem:[%s16839_s4 + $0x138] sm:$0xff]   ;;  %v11962_v32 = vld [vmem:[#allocation2 + $0x229] ss:$8 sps:$4 sm:$0xff]   ;;  %vm17299_vm5 = vmmov %vm17228_vm0 }
 0x40b   :  { %9037 = vmatprep.mubr.bf16.mxu1 %v8430_v28  ;;  %11375 = vmatprep.subr.bf16.mxu1 %v11898_v5  ;;  %v11958_v5 = vld [vmem:[#allocation2 + $0x438] ss:$8 sps:$4 sm:$0xff]   ;;  %6625 = vst.msk [vmem:[#allocation4 + $0x30] sm:$0xff] %vm17290_vm15, %v11960_v14  ;;  %v11966_v34 = vld [vmem:[#allocation2 + $0x2e8] ss:$8 sps:$4 sm:$0xff]   ;;  %vm17304_vm15 = vmmov %vm17228_vm0 }
 0x40c   :  { %v7296_v48 = vpop.permute.xlu1 %7295  ;;  %v8341_v38 = vld [vmem:[#allocation4 + $0x240] sm:$0xff]  ;;  %v6394_v41 = vpop.permute.xlu0 %6393  ;;  %11436 = vmatpush3.bf16.msra.mxu0 %v11943_v17  ;;  %6626 = vst.msk [vmem:[#allocation4 + $0x70] sm:$0xff] %vm17289_vm1, %v11958_v5  ;;  %v11896_v46 = vld [vmem:[#allocation2 + $0x4c9] ss:$8 sps:$4 sm:$0xff]   ;;  %vm17303_vm1 = vmmov %vm17228_vm0 }
 0x40d   :  { %7304 = vst.msk [vmem:[#allocation4 + $0x2c0] sm:$0xff] %vm6274_vm8, %v7296_v48  ;;  %6405 = vst.msk [vmem:[#allocation4 + $0x10] sm:$0xff] %vm6274_vm8, %v6394_v41  ;;  %11376 = vmatpush3.bf16.msra.mxu1 %v11901_v59  ;;  %v8429_v61 = vpack.c.bf16 %v8341_v38, %v8333_v3  ;;  %11437 = vmatprep.subr.bf16.mxu0 %v11948_v20  ;;  %v11872_v24 = vld [vmem:[#allocation2 + $0x499] ss:$8 sps:$4 sm:$0xff]   ;;  %v11980_v20 = vld [vmem:[#allocation2 + $0x2a9] ss:$8 sps:$4 sm:$0xff]  }
 0x40e   :  { %7099 = vrot.lane.b32.xlu1 %v11830_v42, %s12105_s3  ;;  %7229 = vrot.lane.b32.xlu0 %v11855_v23, %s12105_s3  ;;  %v11950_v42 = vld [vmem:[%s16839_s4 + $0x1c0] sm:$0xff]   ;;  %6564 = vst.msk [vmem:[#allocation4 + $0xe8] sm:$0xff] %vm17291_vm7, %v11962_v32  ;;  %v11911_v50 = vld [vmem:[#allocation2 + $0x48a] ss:$8 sps:$4 sm:$0xff]   ;;  %vm17305_vm7 = vmmov %vm17228_vm0 }
 0x40f   :  { %11489 = vmatprep.subr.bf16.mxu1 %v11950_v42  ;;  %v11891_v59 = vld [vmem:[#allocation2 + $0x579] ss:$8 sps:$4 sm:$0xff]   ;;  %6500 = vst.msk [vmem:[#allocation4 + $0xe0] sm:$0xff] %vm17293_vm2, %v11966_v34  ;;  %v11990_v27 = vld [vmem:[#allocation2 + $0x2e9] ss:$8 sps:$4 sm:$0xff]   ;;  %vm17307_vm2 = vmmov %vm17228_vm0 }
 0x410   :  { %v7872_v62 = vpop.permute.xlu1 %7871  ;;  %v8358_v18 = vld [vmem:[#allocation4 + $0x2c8] sm:$0xff]  ;;  %9038 = vmatmul.mubr.bf16.gmra.mrb[80].mxu1 %v8429_v61  ;;  %v6462_v9 = vpop.permute.xlu0 %6461  ;;  %11438 = vmatpush3.bf16.msra.mxu0 %v11949_v56  ;;  %v8272_v38 = vld [vmem:[#allocation4 + $0x18] sm:$0xff]  ;;  %7073 = vst.msk [vmem:[#allocation4 + $0x128] sm:$0xff] %vm17299_vm5, %v11980_v20  ;;  %vm17313_vm5 = vmmov %vm17228_vm0 }
 0x411   :  { %7882 = vst.msk [vmem:[#allocation4 + $0x348] sm:$0xff] %vm6274_vm8, %v7872_v62  ;;  %v8438_v63 = vpack.c.bf16 %v8358_v18, %v8350_v47  ;;  %6471 = vst.msk [vmem:[#allocation4 + $0x98] sm:$0xff] %vm6274_vm8, %v6462_v9  ;;  %v8382_v62 = vld [vmem:[#allocation4 + $0x388] sm:$0xff]  ;;  %11439 = vmatprep.subr.bf16.mxu0 %v11956_v0  ;;  %v11968_v41 = vld [vmem:[#allocation2 + $0x2d8] ss:$8 sps:$4 sm:$0xff]  }
 0x412   :  { %7035 = vrot.lane.b32.xlu1 %v11834_v29, %s12105_s3  ;;  %7165 = vrot.lane.b32.xlu0 %v11861_v36, %s12105_s3  ;;  %v11879_v29 = vld [vmem:[#allocation2 + $0xd1] ss:$8 sps:$4 sm:$0xff]   ;;  %v11878_v61 = vld [vmem:[#allocation2 + $0xe1] ss:$8 sps:$4 sm:$0xff]   ;;  %6499 = vst.msk [vmem:[#allocation4 + $0xa0] sm:$0xff] %vm17294_vm3, %v11968_v41  ;;  %vm17308_vm3 = vmmov %vm17228_vm0 }
 0x413   :  { %9045 = vmatprep.mubr.bf16.mxu1 %v8438_v63  ;;  %v11970_v18 = vld [vmem:[#allocation2 + $0x3a9] ss:$8 sps:$4 sm:$0xff]   ;;  %v11897_v63 = vld [vmem:[#allocation2 + $0x4b9] ss:$8 sps:$4 sm:$0xff]   ;;  %7076 = vst.msk [vmem:[#allocation4 + $0x1e8] sm:$0xff] %vm17306_vm11, %v11990_v27  ;;  %vm17320_vm11 = vmmov %vm17228_vm0 }
 0x414   :  { %v7808_v33 = vpop.permute.xlu1 %7807  ;;  %v8357_v6 = vld [vmem:[#allocation4 + $0x2c0] sm:$0xff]  ;;  %v6398_v10 = vpop.permute.xlu0 %6397  ;;  %11440 = vmatpush3.bf16.msra.mxu0 %v11957_v54  ;;  %6692 = vst.msk [vmem:[#allocation4 + $0xf8] sm:$0xff] %vm17295_vm12, %v11970_v18  ;;  %v11967_v0 = vld [vmem:[%s16839_s4 + $0x1d8] sm:$0xff]   ;;  %v11987_v54 = vld [vmem:[#allocation2 + $0x429] ss:$8 sps:$4 sm:$0xff]  }
 0x415   :  { %7818 = vst.msk [vmem:[#allocation4 + $0x340] sm:$0xff] %vm6274_vm8, %v7808_v33  ;;  %6407 = vst.msk [vmem:[#allocation4 + $0x90] sm:$0xff] %vm6274_vm8, %v6398_v10  ;;  %v8437_v12 = vpack.c.bf16 %v8357_v6, %v8349_v51  ;;  %v8381_v33 = vld [vmem:[#allocation4 + $0x380] sm:$0xff]  ;;  %v11974_v51 = vld [vmem:[#allocation2 + $0x468] ss:$8 sps:$4 sm:$0xff]  }
 0x416   :  { %7227 = vrot.lane.b32.xlu1 %v11838_v7, %s12105_s3  ;;  %7609 = vrot.lane.b32.xlu0 %v11867_v21, %s12105_s3  ;;  %v11884_v9 = vld [vmem:[#allocation2 + $0x21] ss:$8 sps:$4 sm:$0xff]   ;;  %6628 = vst.msk [vmem:[#allocation4 + $0xf0] sm:$0xff] %vm17297_vm4, %v11974_v51  ;;  %vm17309_vm12 = vmmov %vm17228_vm0  ;;  %v11929_v51 = vld [vmem:[#allocation2 + $0xd1] ss:$8 sps:$4 sm:$0xff]  }
 0x417   :  { %v11903_v36 = vld [vmem:[#allocation2 + $0x101] ss:$8 sps:$4 sm:$0xff]   ;;  %7201 = vst.msk [vmem:[#allocation4 + $0x138] sm:$0xff] %vm17303_vm1, %v11987_v54  ;;  %vm17311_vm4 = vmmov %vm17228_vm0 }
 0x418   :  { %v7876_v1 = vpop.permute.xlu1 %7875  ;;  %v8374_v49 = vld [vmem:[#allocation4 + $0x348] sm:$0xff]  ;;  %9046 = vmatmul.mubr.bf16.gmra.mrb[84].mxu1 %v8437_v12  ;;  %v6970_v58 = vpop.permute.xlu0 %6969  ;;  %v11976_v39 = vld [vmem:[#allocation2 + $0x458] ss:$8 sps:$4 sm:$0xff]   ;;  %vm17317_vm1 = vmmov %vm17228_vm0 }
 0x419   :  { %7884 = vst.msk [vmem:[#allocation4 + $0x3c8] sm:$0xff] %vm6274_vm8, %v7876_v1  ;;  %v8446_v48 = vpack.c.bf16 %v8374_v49, %v8366_v8  ;;  %6981 = vst.msk [vmem:[#allocation4 + $0x118] sm:$0xff] %vm6274_vm8, %v6970_v58  ;;  %v11978_v8 = vld [vmem:[#allocation2 + $0x2b9] ss:$8 sps:$4 sm:$0xff]   ;;  %v11959_v12 = vld [vmem:[%s16839_s4 + $0x1c8] sm:$0xff]  }
 0x41a   :  { %7163 = vrot.lane.b32.xlu1 %v11842_v25, %s12105_s3  ;;  %7545 = vrot.lane.b32.xlu0 %v11873_v55, %s12105_s3  ;;  %6627 = vst.msk [vmem:[#allocation4 + $0xb0] sm:$0xff] %vm17298_vm14, %v11976_v39  ;;  %v11907_v42 = vld [vmem:[#allocation2 + $0x41] ss:$8 sps:$4 sm:$0xff]   ;;  %v11963_v58 = vld [vmem:[%s16839_s4 + $0x1d0] sm:$0xff]   ;;  %vm17312_vm14 = vmmov %vm17228_vm0 }
 0x41b   :  { %9053 = vmatprep.mubr.bf16.mxu1 %v8446_v48  ;;  %7074 = vst.msk [vmem:[#allocation4 + $0x168] sm:$0xff] %vm17228_vm0, %v11978_v8  ;;  %v11982_v55 = vld [vmem:[#allocation2 + $0x1f9] ss:$8 sps:$4 sm:$0xff]   ;;  %v11975_v18 = vld [vmem:[%s16839_s4 + $0x1e8] sm:$0xff]   ;;  %v11981_v8 = vld [vmem:[%s16839_s4 + $0x1b0] sm:$0xff]  }
 0x41c   :  { %v7812_v13 = vpop.permute.xlu1 %7811  ;;  %v8373_v15 = vld [vmem:[#allocation4 + $0x340] sm:$0xff]  ;;  %v6906_v40 = vpop.permute.xlu0 %6905  ;;  %7010 = vst.msk [vmem:[#allocation4 + $0x160] sm:$0xff] %vm17300_vm13, %v11982_v55  ;;  %vm17314_vm13 = vmmov %vm17228_vm0 }
 0x41d   :  { %7820 = vst.msk [vmem:[#allocation4 + $0x3c0] sm:$0xff] %vm6274_vm8, %v7812_v13  ;;  %6917 = vst.msk [vmem:[#allocation4 + $0x110] sm:$0xff] %vm6274_vm8, %v6906_v40  ;;  %v8445_v2 = vpack.c.bf16 %v8373_v15, %v8365_v37  ;;  %v8271_v13 = vld [vmem:[#allocation4 + $0x10] sm:$0xff]  ;;  %v11997_v39 = vld [vmem:[#allocation2 + $0x399] ss:$8 sps:$4 sm:$0xff]  }
 0x41e   :  { %7103 = vrot.lane.b32.xlu1 %v11846_v43, %s12105_s3  ;;  %7741 = vrot.lane.b32.xlu0 %v11879_v29, %s12105_s3  ;;  %v11972_v43 = vld [vmem:[#allocation2 + $0x399] ss:$8 sps:$4 sm:$0xff]   ;;  %v11984_v29 = vld [vmem:[#allocation2 + $0x1e9] ss:$8 sps:$4 sm:$0xff]   ;;  %7139 = vst.msk [vmem:[#allocation4 + $0x1b0] sm:$0xff] %vm17228_vm0, %v11997_v39 }
 0x41f   :  { %6691 = vst.msk [vmem:[#allocation4 + $0xb8] sm:$0xff] %vm17296_vm9, %v11972_v43  ;;  %v11995_v43 = vld [vmem:[#allocation2 + $0x459] ss:$8 sps:$4 sm:$0xff]   ;;  %vm17310_vm9 = vmmov %vm17228_vm0 }
 0x420   :  { %v6460_v44 = vpop.permute.xlu1 %6459  ;;  %v8390_v52 = vld [vmem:[#allocation4 + $0x3c8] sm:$0xff]  ;;  %9054 = vmatmul.mubr.bf16.gmra.mrb[88].mxu1 %v8445_v2  ;;  %v6974_v28 = vpop.permute.xlu0 %6973  ;;  %7009 = vst.msk [vmem:[#allocation4 + $0x120] sm:$0xff] %vm17301_vm10, %v11984_v29  ;;  %v11902_v2 = vld [vmem:[#allocation2 + $0x111] ss:$8 sps:$4 sm:$0xff]   ;;  %vm17315_vm10 = vmmov %vm17228_vm0 }
 0x421   :  { %6470 = vst.msk [vmem:[#allocation4 + $0x58] sm:$0xff] %vm6274_vm8, %v6460_v44  ;;  %v8454_v7 = vpack.c.bf16 %v8390_v52, %v8382_v62  ;;  %6983 = vst.msk [vmem:[#allocation4 + $0x198] sm:$0xff] %vm6274_vm8, %v6974_v28  ;;  %v11890_v44 = vld [vmem:[#allocation2 + $0x589] ss:$8 sps:$4 sm:$0xff]   ;;  %v11986_v52 = vld [vmem:[#allocation2 + $0x439] ss:$8 sps:$4 sm:$0xff]  }
 0x422   :  { %7039 = vrot.lane.b32.xlu1 %v11850_v53, %s12105_s3  ;;  %7675 = vrot.lane.b32.xlu0 %v11885_v45, %s12105_s3  ;;  %v8288_v53 = vld [vmem:[#allocation4 + $0x98] sm:$0xff]  ;;  %v11965_v62 = vld [vmem:[%s16839_s4 + $0x190] sm:$0xff]   ;;  %7202 = vst.msk [vmem:[#allocation4 + $0x178] sm:$0xff] %vm17302_vm6, %v11986_v52  ;;  %vm17316_vm6 = vmmov %vm17228_vm0 }
 0x423   :  { %9061 = vmatprep.mubr.bf16.mxu1 %v8454_v7  ;;  %v11988_v7 = vld [vmem:[#allocation2 + $0x379] ss:$8 sps:$4 sm:$0xff]   ;;  %v11917_v45 = vld [vmem:[#allocation2 + $0x549] ss:$8 sps:$4 sm:$0xff]   ;;  %7203 = vst.msk [vmem:[#allocation4 + $0x1b8] sm:$0xff] %vm17311_vm4, %v11995_v43  ;;  %vm17325_vm4 = vmmov %vm17228_vm0 }
 0x424   :  { %v6396_v31 = vpop.permute.xlu1 %6395  ;;  %v8389_v25 = vld [vmem:[#allocation4 + $0x3c0] sm:$0xff]  ;;  %v6910_v3 = vpop.permute.xlu0 %6909  ;;  %7138 = vst.msk [vmem:[#allocation4 + $0x170] sm:$0xff] %vm17304_vm15, %v11988_v7  ;;  %v8303_v32 = vld [vmem:[#allocation4 + $0x110] sm:$0xff]  ;;  %vm17318_vm15 = vmmov %vm17228_vm0 }
 0x425   :  { %6406 = vst.msk [vmem:[#allocation4 + $0x50] sm:$0xff] %vm6274_vm8, %v6396_v31  ;;  %6919 = vst.msk [vmem:[#allocation4 + $0x190] sm:$0xff] %vm6274_vm8, %v6910_v3  ;;  %v8453_v1 = vpack.c.bf16 %v8389_v25, %v8381_v33  ;;  %v11961_v31 = vld [vmem:[%s16839_s4 + $0x188] sm:$0xff]   ;;  %v11969_v33 = vld [vmem:[%s16839_s4 + $0x198] sm:$0xff]  }
 0x426   :  { %7231 = vrot.lane.b32.xlu1 %v11854_v60, %s12105_s3  ;;  %7613 = vrot.lane.b32.xlu0 %v11891_v59, %s12105_s3  ;;  %v8287_v60 = vld [vmem:[#allocation4 + $0x90] sm:$0xff]  ;;  %v11971_v59 = vld [vmem:[%s16839_s4 + $0x1e0] sm:$0xff]  }
 0x427   :  { %v11906_v25 = vld [vmem:[#allocation2 + $0x51] ss:$8 sps:$4 sm:$0xff]   ;;  %v11928_v54 = vld [vmem:[#allocation2 + $0xe1] ss:$8 sps:$4 sm:$0xff]  }
 0x428   :  { %v6464_v30 = vpop.permute.xlu1 %6463  ;;  %v8280_v35 = vld [vmem:[#allocation4 + $0x58] sm:$0xff]  ;;  %9062 = vmatmul.mubr.bf16.gmra.mrb[92].mxu1 %v8453_v1  ;;  %v7482_v57 = vpop.permute.xlu0 %7481 }
 0x429   :  { %6472 = vst.msk [vmem:[#allocation4 + $0xd8] sm:$0xff] %vm6274_vm8, %v6464_v30  ;;  %v8400_v47 = vpack.c.bf16 %v8280_v35, %v8272_v38  ;;  %7493 = vst.msk [vmem:[#allocation4 + $0x218] sm:$0xff] %vm6274_vm8, %v7482_v57  ;;  %v8320_v3 = vld [vmem:[#allocation4 + $0x198] sm:$0xff]  ;;  %v11992_v35 = vld [vmem:[#allocation2 + $0x229] ss:$8 sps:$4 sm:$0xff]  }
 0x42a   :  { %7167 = vrot.lane.b32.xlu1 %v11860_v4, %s12105_s3  ;;  %7549 = vrot.lane.b32.xlu0 %v11897_v63, %s12105_s3  ;;  %v8304_v4 = vld [vmem:[#allocation4 + $0x118] sm:$0xff]  ;;  %7012 = vst.msk [vmem:[#allocation4 + $0x1e0] sm:$0xff] %vm17308_vm3, %v11992_v35  ;;  %v11994_v63 = vld [vmem:[#allocation2 + $0x469] ss:$8 sps:$4 sm:$0xff]   ;;  %vm17322_vm3 = vmmov %vm17228_vm0 }
 0x42b   :  { %9102 = vmatprep.mubr.bf16.mxu1 %v8400_v47  ;;  %v11991_v38 = vld [vmem:[#allocation2 + $0x2d9] ss:$8 sps:$4 sm:$0xff]   ;;  %7204 = vst.msk [vmem:[#allocation4 + $0x1f8] sm:$0xff] %vm17310_vm9, %v11994_v63  ;;  %vm17324_vm9 = vmmov %vm17228_vm0 }
 0x42c   :  { %v6400_v11 = vpop.permute.xlu1 %6399  ;;  %v8279_v6 = vld [vmem:[#allocation4 + $0x50] sm:$0xff]  ;;  %v7418_v17 = vpop.permute.xlu0 %7417  ;;  %v11973_v47 = vld [vmem:[%s16839_s4 + $0x1a0] sm:$0xff]   ;;  %7075 = vst.msk [vmem:[#allocation4 + $0x1a8] sm:$0xff] %vm17307_vm2, %v11991_v38  ;;  %vm17321_vm2 = vmmov %vm17228_vm0 }
 0x42d   :  { %6408 = vst.msk [vmem:[#allocation4 + $0xd0] sm:$0xff] %vm6274_vm8, %v6400_v11  ;;  %7429 = vst.msk [vmem:[#allocation4 + $0x210] sm:$0xff] %vm6274_vm8, %v7418_v17  ;;  %v8399_v10 = vpack.c.bf16 %v8279_v6, %v8271_v13  ;;  %v11989_v11 = vld [vmem:[#allocation2 + $0x369] ss:$8 sps:$4 sm:$0xff]   ;;  %v12007_v7 = vld [vmem:[#allocation2 + $0x519] ss:$8 sps:$4 sm:$0xff]  }
 0x42e   :  { %7611 = vrot.lane.b32.xlu1 %v11866_v22, %s12105_s3  ;;  %7745 = vrot.lane.b32.xlu0 %v11903_v36, %s12105_s3  ;;  %7137 = vst.msk [vmem:[#allocation4 + $0x130] sm:$0xff] %vm17305_vm7, %v11989_v11  ;;  %v11977_v6 = vld [vmem:[%s16839_s4 + $0x1a8] sm:$0xff]   ;;  %v8319_v17 = vld [vmem:[#allocation4 + $0x190] sm:$0xff]  ;;  %vm17319_vm7 = vmmov %vm17228_vm0 }
 0x42f   :  { %7587 = vst.msk [vmem:[#allocation4 + $0x2a8] sm:$0xff] %vm17322_vm3, %v12007_v7  ;;  %v12011_v38 = vld [vmem:[#allocation2 + $0xa1] ss:$8 sps:$4 sm:$0xff]   ;;  %v12019_v39 = vld [vmem:[#allocation2 + $0x131] ss:$8 sps:$4 sm:$0xff]   ;;  %vm17336_vm3 = vmmov %vm17228_vm0 }
 0x430   :  { %v6972_v23 = vpop.permute.xlu1 %6971  ;;  %v8296_v21 = vld [vmem:[#allocation4 + $0xd8] sm:$0xff]  ;;  %9103 = vmatmul.mubr.bf16.vlgmr.msra.gmra.mrb[96].mxu1 %v8399_v10  ;;  %v7486_v48 = vpop.permute.xlu0 %7485 }
 0x431   :  { %6982 = vst.msk [vmem:[#allocation4 + $0x158] sm:$0xff] %vm6274_vm8, %v6972_v23  ;;  %v8408_v49 = vpack.c.bf16 %v8296_v21, %v8288_v53  ;;  %7495 = vst.msk [vmem:[#allocation4 + $0x298] sm:$0xff] %vm6274_vm8, %v7486_v48  ;;  %11490 = vmatpush3.bf16.msra.mxu1 %v11953_v16  ;;  %v11923_v23 = vld [vmem:[#allocation2 + $0x12] ss:$8 sps:$4 sm:$0xff]  }
 0x432   :  { %7547 = vrot.lane.b32.xlu1 %v11872_v24, %s12105_s3  ;;  %7679 = vrot.lane.b32.xlu0 %v11907_v42, %s12105_s3  ;;  %v11979_v21 = vld [vmem:[%s16839_s4 + $0x1f0] sm:$0xff]   ;;  %v11916_v16 = vld [vmem:[#allocation2 + $0x559] ss:$8 sps:$4 sm:$0xff]  }
 0x433   :  { %9110 = vmatprep.mubr.bf16.mxu1 %v8408_v49  ;;  %11491 = vmatprep.subr.bf16.mxu1 %v11959_v12  ;;  %v11998_v10 = vld [vmem:[#allocation2 + $0x4f9] ss:$8 sps:$4 sm:$0xff]   ;;  %v11999_v49 = vld [vmem:[#allocation2 + $0x4e9] ss:$8 sps:$4 sm:$0xff]  }
 0x434   :  { %v6908_v19 = vpop.permute.xlu1 %6907  ;;  %v8295_v37 = vld [vmem:[#allocation4 + $0xd0] sm:$0xff]  ;;  %v7422_v30 = vpop.permute.xlu0 %7421  ;;  %7586 = vst.msk [vmem:[#allocation4 + $0x268] sm:$0xff] %vm17313_vm5, %v11998_v10  ;;  %v12000_v42 = vld [vmem:[#allocation2 + $0x5b8] ss:$8 sps:$4 sm:$0xff]   ;;  %vm17327_vm5 = vmmov %vm17228_vm0 }
 0x435   :  { %6918 = vst.msk [vmem:[#allocation4 + $0x150] sm:$0xff] %vm6274_vm8, %v6908_v19  ;;  %7431 = vst.msk [vmem:[#allocation4 + $0x290] sm:$0xff] %vm6274_vm8, %v7422_v30  ;;  %11492 = vmatpush3.bf16.msra.mxu1 %v11961_v31  ;;  %v8407_v5 = vpack.c.bf16 %v8295_v37, %v8287_v60  ;;  %v11993_v19 = vld [vmem:[#allocation2 + $0x219] ss:$8 sps:$4 sm:$0xff]   ;;  %v12001_v60 = vld [vmem:[#allocation2 + $0x5a8] ss:$8 sps:$4 sm:$0xff]  }
 0x436   :  { %7743 = vrot.lane.b32.xlu1 %v11878_v61, %s12105_s3  ;;  %8125 = vrot.lane.b32.xlu0 %v11911_v50, %s12105_s3  ;;  %v11910_v61 = vld [vmem:[#allocation2 + $0x49a] ss:$8 sps:$4 sm:$0xff]   ;;  %7011 = vst.msk [vmem:[#allocation4 + $0x1a0] sm:$0xff] %vm17309_vm12, %v11993_v19  ;;  %vm17323_vm12 = vmmov %vm17228_vm0  ;;  %v12015_v19 = vld [vmem:[#allocation2 + $0x5a9] ss:$8 sps:$4 sm:$0xff]  }
 0x437   :  { %11493 = vmatprep.subr.bf16.mxu1 %v11963_v58  ;;  %v11983_v31 = vld [vmem:[%s16839_s4 + $0x1f8] sm:$0xff]   ;;  %7585 = vst.msk [vmem:[#allocation4 + $0x228] sm:$0xff] %vm17314_vm13, %v11999_v49  ;;  %v11922_v58 = vld [vmem:[#allocation2 + $0x22] ss:$8 sps:$4 sm:$0xff]   ;;  %vm17328_vm13 = vmmov %vm17228_vm0 }
 0x438   :  { %v6976_v26 = vpop.permute.xlu1 %6975  ;;  %v8312_v40 = vld [vmem:[#allocation4 + $0x158] sm:$0xff]  ;;  %9111 = vmatmul.mubr.bf16.gmra.mrb[100].mxu1 %v8407_v5  ;;  %v7998_v28 = vpop.permute.xlu0 %7997  ;;  %7522 = vst.msk [vmem:[#allocation4 + $0x260] sm:$0xff] %vm17315_vm10, %v12000_v42  ;;  %v12006_v5 = vld [vmem:[#allocation2 + $0x529] ss:$8 sps:$4 sm:$0xff]   ;;  %vm17329_vm10 = vmmov %vm17228_vm0 }
 0x439   :  { %6984 = vst.msk [vmem:[#allocation4 + $0x1d8] sm:$0xff] %vm6274_vm8, %v6976_v26  ;;  %v8416_v14 = vpack.c.bf16 %v8312_v40, %v8304_v4  ;;  %8009 = vst.msk [vmem:[#allocation4 + $0x318] sm:$0xff] %vm6274_vm8, %v7998_v28  ;;  %11494 = vmatpush3.bf16.msra.mxu1 %v11965_v62  ;;  %v11996_v26 = vld [vmem:[#allocation2 + $0x3a9] ss:$8 sps:$4 sm:$0xff]   ;;  %v11985_v30 = vld [vmem:[%s16839_s4 + $0x1b8] sm:$0xff]  }
 0x43a   :  { %7677 = vrot.lane.b32.xlu1 %v11884_v9, %s12105_s3  ;;  %8061 = vrot.lane.b32.xlu0 %v11917_v45, %s12105_s3  ;;  %7140 = vst.msk [vmem:[#allocation4 + $0x1f0] sm:$0xff] %vm17312_vm14, %v11996_v26  ;;  %v12003_v4 = vld [vmem:[#allocation2 + $0x71] ss:$8 sps:$4 sm:$0xff]   ;;  %v12004_v40 = vld [vmem:[#allocation2 + $0x140] ss:$8 sps:$4 sm:$0xff]   ;;  %vm17326_vm14 = vmmov %vm17228_vm0 }
 0x43b   :  { %9118 = vmatprep.mubr.bf16.mxu1 %v8416_v14  ;;  %11495 = vmatprep.subr.bf16.mxu1 %v11967_v0  ;;  %7521 = vst.msk [vmem:[#allocation4 + $0x220] sm:$0xff] %vm17316_vm6, %v12001_v60  ;;  %v8335_v62 = vld [vmem:[#allocation4 + $0x210] sm:$0xff]  ;;  %v12016_v43 = vld [vmem:[#allocation2 + $0x4f9] ss:$8 sps:$4 sm:$0xff]   ;;  %vm17330_vm6 = vmmov %vm17228_vm0 }
 0x43c   :  { %v6912_v56 = vpop.permute.xlu1 %6911  ;;  %v8311_v24 = vld [vmem:[#allocation4 + $0x150] sm:$0xff]  ;;  %v7934_v1 = vpop.permute.xlu0 %7933  ;;  %7716 = vst.msk [vmem:[#allocation4 + $0x238] sm:$0xff] %vm17318_vm15, %v12003_v4  ;;  %vm17332_vm15 = vmmov %vm17228_vm0  ;;  %v12020_v10 = vld [vmem:[#allocation2 + $0x81] ss:$8 sps:$4 sm:$0xff]  }
 0x43d   :  { %6920 = vst.msk [vmem:[#allocation4 + $0x1d0] sm:$0xff] %vm6274_vm8, %v6912_v56  ;;  %7945 = vst.msk [vmem:[#allocation4 + $0x310] sm:$0xff] %vm6274_vm8, %v7934_v1  ;;  %11496 = vmatpush3.bf16.msra.mxu1 %v11969_v33  ;;  %v8415_v57 = vpack.c.bf16 %v8311_v24, %v8303_v32  ;;  %v8336_v56 = vld [vmem:[#allocation4 + $0x218] sm:$0xff]  ;;  %v12008_v45 = vld [vmem:[#allocation2 + $0x5e8] ss:$8 sps:$4 sm:$0xff]  }
 0x43e   :  { %7615 = vrot.lane.b32.xlu1 %v11890_v44, %s12105_s3  ;;  %8253 = vrot.lane.b32.xlu0 %v11923_v23, %s12105_s3  ;;  %v11935_v44 = vld [vmem:[#allocation2 + $0x4ba] ss:$8 sps:$4 sm:$0xff]   ;;  %7651 = vst.msk [vmem:[#allocation4 + $0x270] sm:$0xff] %vm17319_vm7, %v12004_v40  ;;  %v8351_v35 = vld [vmem:[#allocation4 + $0x290] sm:$0xff]  ;;  %vm17333_vm7 = vmmov %vm17228_vm0 }
 0x43f   :  { %11497 = vmatprep.subr.bf16.mxu1 %v11971_v59  ;;  %v12005_v0 = vld [vmem:[#allocation2 + $0x130] ss:$8 sps:$4 sm:$0xff]   ;;  %7588 = vst.msk [vmem:[#allocation4 + $0x2e8] sm:$0xff] %vm17321_vm2, %v12006_v5  ;;  %vm17335_vm2 = vmmov %vm17228_vm0  ;;  %v12029_v5 = vld [vmem:[#allocation2 + $0xa1] ss:$8 sps:$4 sm:$0xff]  }
 0x440   :  { %v7484_v15 = vpop.permute.xlu1 %7483  ;;  %v8328_v41 = vld [vmem:[#allocation4 + $0x1d8] sm:$0xff]  ;;  %9119 = vmatmul.mubr.bf16.gmra.mrb[104].mxu1 %v8415_v57  ;;  %v8002_v36 = vpop.permute.xlu0 %8001  ;;  %7650 = vst.msk [vmem:[#allocation4 + $0x230] sm:$0xff] %vm17320_vm11, %v12005_v0  ;;  %vm17334_vm11 = vmmov %vm17228_vm0 }
 0x441   :  { %7494 = vst.msk [vmem:[#allocation4 + $0x258] sm:$0xff] %vm6274_vm8, %v7484_v15  ;;  %v8424_v13 = vpack.c.bf16 %v8328_v41, %v8320_v3  ;;  %8011 = vst.msk [vmem:[#allocation4 + $0x398] sm:$0xff] %vm6274_vm8, %v8002_v36  ;;  %11498 = vmatpush3.bf16.msra.mxu1 %v11973_v47  ;;  %v11941_v15 = vld [vmem:[#allocation2 + $0x579] ss:$8 sps:$4 sm:$0xff]   ;;  %v11940_v41 = vld [vmem:[#allocation2 + $0x589] ss:$8 sps:$4 sm:$0xff]  }
 0x442   :  { %7551 = vrot.lane.b32.xlu1 %v11896_v46, %s12105_s3  ;;  %8189 = vrot.lane.b32.xlu0 %v11929_v51, %s12105_s3  ;;  %v12002_v46 = vld [vmem:[#allocation2 + $0x81] ss:$8 sps:$4 sm:$0xff]   ;;  %7524 = vst.msk [vmem:[#allocation4 + $0x2e0] sm:$0xff] %vm17323_vm12, %v12008_v45  ;;  %v12010_v59 = vld [vmem:[#allocation2 + $0xb1] ss:$8 sps:$4 sm:$0xff]   ;;  %vm17337_vm12 = vmmov %vm17228_vm0 }
 0x443   :  { %9126 = vmatprep.mubr.bf16.mxu1 %v8424_v13  ;;  %11499 = vmatprep.subr.bf16.mxu1 %v11975_v18  ;;  %7717 = vst.msk [vmem:[#allocation4 + $0x278] sm:$0xff] %vm17317_vm1, %v12002_v46  ;;  %v12009_v32 = vld [vmem:[#allocation2 + $0x5d8] ss:$8 sps:$4 sm:$0xff]   ;;  %v12017_v36 = vld [vmem:[#allocation2 + $0x4e9] ss:$8 sps:$4 sm:$0xff]   ;;  %vm17331_vm1 = vmmov %vm17228_vm0 }
 0x444   :  { %v7420_v22 = vpop.permute.xlu1 %7419  ;;  %v8327_v53 = vld [vmem:[#allocation4 + $0x1d0] sm:$0xff]  ;;  %v7938_v20 = vpop.permute.xlu0 %7937  ;;  %v11955_v3 = vld [vmem:[#allocation2 + $0x101] ss:$8 sps:$4 sm:$0xff]   ;;  %7523 = vst.msk [vmem:[#allocation4 + $0x2a0] sm:$0xff] %vm17324_vm9, %v12009_v32  ;;  %v8368_v63 = vld [vmem:[#allocation4 + $0x318] sm:$0xff] }
 0x445   :  { %7430 = vst.msk [vmem:[#allocation4 + $0x250] sm:$0xff] %vm6274_vm8, %v7420_v22  ;;  %7947 = vst.msk [vmem:[#allocation4 + $0x390] sm:$0xff] %vm6274_vm8, %v7938_v20  ;;  %11500 = vmatpush3.bf16.msra.mxu1 %v11977_v6  ;;  %v8423_v55 = vpack.c.bf16 %v8327_v53, %v8319_v17  ;;  %v8352_v22 = vld [vmem:[#allocation4 + $0x298] sm:$0xff]  ;;  %v12013_v47 = vld [vmem:[#allocation2 + $0x160] ss:$8 sps:$4 sm:$0xff]  }
 0x446   :  { %7747 = vrot.lane.b32.xlu1 %v11902_v2, %s12105_s3  ;;  %8129 = vrot.lane.b32.xlu0 %v11935_v44, %s12105_s3  ;;  %v11947_v2 = vld [vmem:[#allocation2 + $0x42] ss:$8 sps:$4 sm:$0xff]   ;;  %7719 = vst.msk [vmem:[#allocation4 + $0x2f8] sm:$0xff] %vm17325_vm4, %v12010_v59  ;;  %v12012_v1 = vld [vmem:[#allocation2 + $0x170] ss:$8 sps:$4 sm:$0xff]   ;;  %vm17338_vm9 = vmmov %vm17228_vm0 }
 0x447   :  { %11501 = vmatprep.subr.bf16.mxu1 %v11979_v21  ;;  %7718 = vst.msk [vmem:[#allocation4 + $0x2b8] sm:$0xff] %vm17326_vm14, %v12011_v38  ;;  %v12014_v18 = vld [vmem:[#allocation2 + $0x5b9] ss:$8 sps:$4 sm:$0xff]   ;;  %v12022_v20 = vld [vmem:[#allocation2 + $0x5e9] ss:$8 sps:$4 sm:$0xff]   ;;  %vm17339_vm4 = vmmov %vm17228_vm0 }
 0x448   :  { %v7488_v34 = vpop.permute.xlu1 %7487  ;;  %v8344_v48 = vld [vmem:[#allocation4 + $0x258] sm:$0xff]  ;;  %9127 = vmatmul.mubr.bf16.gmra.mrb[108].mxu1 %v8423_v55  ;;  %v6586_v37 = vpop.permute.xlu0 %6585  ;;  %7653 = vst.msk [vmem:[#allocation4 + $0x2f0] sm:$0xff] %vm17228_vm0, %v12012_v1  ;;  %v12018_v6 = vld [vmem:[#allocation2 + $0x141] ss:$8 sps:$4 sm:$0xff]   ;;  %vm17340_vm14 = vmmov %vm17228_vm0 }
 0x449   :  { %7496 = vst.msk [vmem:[#allocation4 + $0x2d8] sm:$0xff] %vm6274_vm8, %v7488_v34  ;;  %v8432_v50 = vpack.c.bf16 %v8344_v48, %v8336_v56  ;;  %6597 = vst.msk [vmem:[#allocation4 + $0x28] sm:$0xff] %vm6274_vm8, %v6586_v37  ;;  %11502 = vmatpush3.bf16.msra.mxu1 %v11981_v8  ;;  %v11946_v17 = vld [vmem:[#allocation2 + $0x52] ss:$8 sps:$4 sm:$0xff]  }
 0x44a   :  { %7681 = vrot.lane.b32.xlu1 %v11906_v25, %s12105_s3  ;;  %8065 = vrot.lane.b32.xlu0 %v11941_v15, %s12105_s3  ;;  %v11934_v25 = vld [vmem:[#allocation2 + $0x4ca] ss:$8 sps:$4 sm:$0xff]   ;;  %7652 = vst.msk [vmem:[#allocation4 + $0x2b0] sm:$0xff] %vm17327_vm5, %v12013_v47  ;;  %v8384_v49 = vld [vmem:[#allocation4 + $0x398] sm:$0xff]  ;;  %vm17341_vm5 = vmmov %vm17228_vm0 }
 0x44b   :  { %9134 = vmatprep.mubr.bf16.mxu1 %v8432_v50  ;;  %11503 = vmatprep.subr.bf16.mxu1 %v11983_v31  ;;  %8102 = vst.msk [vmem:[#allocation4 + $0x368] sm:$0xff] %vm17328_vm13, %v12014_v18  ;;  %v11954_v8 = vld [vmem:[#allocation2 + $0x111] ss:$8 sps:$4 sm:$0xff]   ;;  %vm17342_vm13 = vmmov %vm17228_vm0 }
 0x44c   :  { %v7424_v9 = vpop.permute.xlu1 %7423  ;;  %v8343_v52 = vld [vmem:[#allocation4 + $0x250] sm:$0xff]  ;;  %v6522_v11 = vpop.permute.xlu0 %6521  ;;  %8101 = vst.msk [vmem:[#allocation4 + $0x328] sm:$0xff] %vm17329_vm10, %v12015_v19  ;;  %v12023_v55 = vld [vmem:[#allocation2 + $0x5d9] ss:$8 sps:$4 sm:$0xff]  }
 0x44d   :  { %7432 = vst.msk [vmem:[#allocation4 + $0x2d0] sm:$0xff] %vm6274_vm8, %v7424_v9  ;;  %6533 = vst.msk [vmem:[#allocation4 + $0x20] sm:$0xff] %vm6274_vm8, %v6522_v11  ;;  %11504 = vmatpush3.bf16.msra.mxu1 %v11985_v30  ;;  %v8431_v33 = vpack.c.bf16 %v8343_v52, %v8335_v62  ;;  %v12024_v50 = vld [vmem:[#allocation2 + $0x529] ss:$8 sps:$4 sm:$0xff]  }
 0x44e   :  { %8127 = vrot.lane.b32.xlu1 %v11910_v61, %s12105_s3  ;;  %8257 = vrot.lane.b32.xlu0 %v11947_v2, %s12105_s3  ;;  %8038 = vst.msk [vmem:[#allocation4 + $0x360] sm:$0xff] %vm17330_vm6, %v12016_v43  ;;  %v12026_v37 = vld [vmem:[#allocation2 + $0x171] ss:$8 sps:$4 sm:$0xff]   ;;  %v12027_v52 = vld [vmem:[#allocation2 + $0x161] ss:$8 sps:$4 sm:$0xff]  }
 0x44f   :  { %8037 = vst.msk [vmem:[#allocation4 + $0x320] sm:$0xff] %vm17331_vm1, %v12017_v36  ;;  %v12028_v0 = vld [vmem:[#allocation2 + $0xb1] ss:$8 sps:$4 sm:$0xff]  }
 0x450   :  { %v8000_v12 = vpop.permute.xlu1 %7999  ;;  %v8360_v28 = vld [vmem:[#allocation4 + $0x2d8] sm:$0xff]  ;;  %9135 = vmatmul.mubr.bf16.gmra.mrb[112].mxu1 %v8431_v33  ;;  %v6714_v23 = vpop.permute.xlu0 %6713  ;;  %v8274_v53 = vld [vmem:[#allocation4 + $0x28] sm:$0xff]  ;;  %8230 = vst.msk [vmem:[#allocation4 + $0x378] sm:$0xff] %vm17332_vm15, %v12018_v6 }
 0x451   :  { %8010 = vst.msk [vmem:[#allocation4 + $0x358] sm:$0xff] %vm6274_vm8, %v8000_v12  ;;  %v8440_v24 = vpack.c.bf16 %v8360_v28, %v8352_v22  ;;  %6725 = vst.msk [vmem:[#allocation4 + $0x38] sm:$0xff] %vm6274_vm8, %v6714_v23  ;;  %v12021_v12 = vld [vmem:[#allocation2 + $0x71] ss:$8 sps:$4 sm:$0xff]  }
 0x452   :  { %8063 = vrot.lane.b32.xlu1 %v11916_v16, %s12105_s3  ;;  %8193 = vrot.lane.b32.xlu0 %v11955_v3, %s12105_s3  ;;  %v8367_v16 = vld [vmem:[#allocation4 + $0x310] sm:$0xff]  ;;  %8229 = vst.msk [vmem:[#allocation4 + $0x338] sm:$0xff] %vm17333_vm7, %v12019_v39 }
 0x453   :  { %9142 = vmatprep.mubr.bf16.mxu1 %v8440_v24  ;;  %8166 = vst.msk [vmem:[#allocation4 + $0x370] sm:$0xff] %vm17334_vm11, %v12020_v10 }
 0x454   :  { %v7936_v29 = vpop.permute.xlu1 %7935  ;;  %v8359_v34 = vld [vmem:[#allocation4 + $0x2d0] sm:$0xff]  ;;  %v6650_v57 = vpop.permute.xlu0 %6649  ;;  %v8273_v42 = vld [vmem:[#allocation4 + $0x20] sm:$0xff]  ;;  %8165 = vst.msk [vmem:[#allocation4 + $0x330] sm:$0xff] %vm17335_vm2, %v12021_v12 }
 0x455   :  { %7946 = vst.msk [vmem:[#allocation4 + $0x350] sm:$0xff] %vm6274_vm8, %v7936_v29  ;;  %6661 = vst.msk [vmem:[#allocation4 + $0x30] sm:$0xff] %vm6274_vm8, %v6650_v57  ;;  %v8439_v9 = vpack.c.bf16 %v8359_v34, %v8351_v35  ;;  %v12025_v29 = vld [vmem:[#allocation2 + $0x519] ss:$8 sps:$4 sm:$0xff]  }
 0x456   :  { %8255 = vrot.lane.b32.xlu1 %v11922_v58, %s12105_s3  ;;  %8104 = vst.msk [vmem:[#allocation4 + $0x3e8] sm:$0xff] %vm17336_vm3, %v12022_v20 }
 0x457   :  { %8103 = vst.msk [vmem:[#allocation4 + $0x3a8] sm:$0xff] %vm17337_vm12, %v12023_v55 }
 0x458   :  { %v8004_v14 = vpop.permute.xlu1 %8003  ;;  %v8376_v13 = vld [vmem:[#allocation4 + $0x358] sm:$0xff]  ;;  %9143 = vmatmul.mubr.bf16.gmra.mrb[116].mxu1 %v8439_v9  ;;  %v6590_v21 = vpop.permute.xlu0 %6589  ;;  %8040 = vst.msk [vmem:[#allocation4 + $0x3e0] sm:$0xff] %vm17338_vm9, %v12024_v50 }
 0x459   :  { %8012 = vst.msk [vmem:[#allocation4 + $0x3d8] sm:$0xff] %vm6274_vm8, %v8004_v14  ;;  %v8448_v51 = vpack.c.bf16 %v8376_v13, %v8368_v63  ;;  %6599 = vst.msk [vmem:[#allocation4 + $0xa8] sm:$0xff] %vm6274_vm8, %v6590_v21  ;;  %v8276_v11 = vld [vmem:[#allocation4 + $0x38] sm:$0xff] }
 0x45a   :  { %8191 = vrot.lane.b32.xlu1 %v11928_v54, %s12105_s3  ;;  %8039 = vst.msk [vmem:[#allocation4 + $0x3a0] sm:$0xff] %vm17339_vm4, %v12025_v29  ;;  %v8383_v54 = vld [vmem:[#allocation4 + $0x390] sm:$0xff] }
 0x45b   :  { %9150 = vmatprep.mubr.bf16.mxu1 %v8448_v51  ;;  %8232 = vst.msk [vmem:[#allocation4 + $0x3f8] sm:$0xff] %vm17340_vm14, %v12026_v37 }
 0x45c   :  { %v7940_v27 = vpop.permute.xlu1 %7939  ;;  %v8375_v44 = vld [vmem:[#allocation4 + $0x350] sm:$0xff]  ;;  %v6526_v31 = vpop.permute.xlu0 %6525  ;;  %8231 = vst.msk [vmem:[#allocation4 + $0x3b8] sm:$0xff] %vm17228_vm0, %v12027_v52 }
 0x45d   :  { %7948 = vst.msk [vmem:[#allocation4 + $0x3d0] sm:$0xff] %vm6274_vm8, %v7940_v27  ;;  %6535 = vst.msk [vmem:[#allocation4 + $0xa0] sm:$0xff] %vm6274_vm8, %v6526_v31  ;;  %v8447_v46 = vpack.c.bf16 %v8375_v44, %v8367_v16  ;;  %v8275_v59 = vld [vmem:[#allocation4 + $0x30] sm:$0xff] }
 0x45e   :  { %8131 = vrot.lane.b32.xlu1 %v11934_v25, %s12105_s3  ;;  %8168 = vst.msk [vmem:[#allocation4 + $0x3f0] sm:$0xff] %vm17341_vm5, %v12028_v0 }
 0x45f   :  { %8167 = vst.msk [vmem:[#allocation4 + $0x3b0] sm:$0xff] %vm17342_vm13, %v12029_v5 }
 0x460   :  { %v6588_v61 = vpop.permute.xlu1 %6587  ;;  %v8392_v60 = vld [vmem:[#allocation4 + $0x3d8] sm:$0xff]  ;;  %9151 = vmatmul.mubr.bf16.gmra.mrb[120].mxu1 %v8447_v46  ;;  %v6718_v40 = vpop.permute.xlu0 %6717  ;;  %v8290_v24 = vld [vmem:[#allocation4 + $0xa8] sm:$0xff] }
 0x461   :  { %6598 = vst.msk [vmem:[#allocation4 + $0x68] sm:$0xff] %vm6274_vm8, %v6588_v61  ;;  %v8456_v4 = vpack.c.bf16 %v8392_v60, %v8384_v49  ;;  %6727 = vst.msk [vmem:[#allocation4 + $0xb8] sm:$0xff] %vm6274_vm8, %v6718_v40 }
 0x462   :  { %8067 = vrot.lane.b32.xlu1 %v11940_v41, %s12105_s3 }
 0x463   :  { %9158 = vmatprep.mubr.bf16.mxu1 %v8456_v4 }
 0x464   :  { %v6524_v26 = vpop.permute.xlu1 %6523  ;;  %v8391_v2 = vld [vmem:[#allocation4 + $0x3d0] sm:$0xff]  ;;  %v6654_v14 = vpop.permute.xlu0 %6653  ;;  %v8289_v35 = vld [vmem:[#allocation4 + $0xa0] sm:$0xff] }
 0x465   :  { %6534 = vst.msk [vmem:[#allocation4 + $0x60] sm:$0xff] %vm6274_vm8, %v6524_v26  ;;  %6663 = vst.msk [vmem:[#allocation4 + $0xb0] sm:$0xff] %vm6274_vm8, %v6654_v14  ;;  %v8455_v28 = vpack.c.bf16 %v8391_v2, %v8383_v54 }
 0x466   :  { %8259 = vrot.lane.b32.xlu1 %v11946_v17, %s12105_s3 }
 0x468   :  { %v6716_v56 = vpop.permute.xlu1 %6715  ;;  %v8282_v48 = vld [vmem:[#allocation4 + $0x68] sm:$0xff]  ;;  %9159 = vmatmul.mubr.bf16.gmra.mrb[124].mxu1 %v8455_v28  ;;  %v7098_v32 = vpop.permute.xlu0 %7097  ;;  %v8292_v19 = vld [vmem:[#allocation4 + $0xb8] sm:$0xff] }
 0x469   :  { %6726 = vst.msk [vmem:[#allocation4 + $0x78] sm:$0xff] %vm6274_vm8, %v6716_v56  ;;  %v8402_v58 = vpack.c.bf16 %v8282_v48, %v8274_v53  ;;  %7109 = vst.msk [vmem:[#allocation4 + $0x128] sm:$0xff] %vm6274_vm8, %v7098_v32 }
 0x46a   :  { %8195 = vrot.lane.b32.xlu1 %v11954_v8, %s12105_s3 }
 0x46b   :  { %9199 = vmatprep.mubr.bf16.mxu0 %v8402_v58 }
 0x46c   :  { %v6652_v15 = vpop.permute.xlu1 %6651  ;;  %v8281_v30 = vld [vmem:[#allocation4 + $0x60] sm:$0xff]  ;;  %v7034_v3 = vpop.permute.xlu0 %7033  ;;  %v8291_v43 = vld [vmem:[#allocation4 + $0xb0] sm:$0xff] }
 0x46d   :  { %6662 = vst.msk [vmem:[#allocation4 + $0x70] sm:$0xff] %vm6274_vm8, %v6652_v15  ;;  %v8401_v62 = vpack.c.bf16 %v8281_v30, %v8273_v42  ;;  %7045 = vst.msk [vmem:[#allocation4 + $0x120] sm:$0xff] %vm6274_vm8, %v7034_v3 }
 0x46f   :  { %9200 = vmatmul.mubr.bf16.vlgmr.msra.gmra.mrb[0].mxu0 %v8401_v62 }
 0x470   :  { %v6592_v7 = vpop.permute.xlu1 %6591  ;;  %v8284_v22 = vld [vmem:[#allocation4 + $0x78] sm:$0xff]  ;;  %v7226_v47 = vpop.permute.xlu0 %7225  ;;  %v8306_v26 = vld [vmem:[#allocation4 + $0x128] sm:$0xff] }
 0x471   :  { %6600 = vst.msk [vmem:[#allocation4 + $0xe8] sm:$0xff] %vm6274_vm8, %v6592_v7  ;;  %v8404_v45 = vpack.c.bf16 %v8284_v22, %v8276_v11  ;;  %7237 = vst.msk [vmem:[#allocation4 + $0x138] sm:$0xff] %vm6274_vm8, %v7226_v47 }
 0x473   :  { %9296 = vmatprep.mubr.bf16.mxu1 %v8404_v45 }
 0x474   :  { %v6528_v33 = vpop.permute.xlu1 %6527  ;;  %v8283_v27 = vld [vmem:[#allocation4 + $0x70] sm:$0xff]  ;;  %v7162_v63 = vpop.permute.xlu0 %7161  ;;  %v8305_v16 = vld [vmem:[#allocation4 + $0x120] sm:$0xff] }
 0x475   :  { %6536 = vst.msk [vmem:[#allocation4 + $0xe0] sm:$0xff] %vm6274_vm8, %v6528_v33  ;;  %v8403_v34 = vpack.c.bf16 %v8283_v27, %v8275_v59  ;;  %7173 = vst.msk [vmem:[#allocation4 + $0x130] sm:$0xff] %vm6274_vm8, %v7162_v63 }
 0x477   :  { %9297 = vmatmul.mubr.bf16.vlgmr.msra.gmra.mrb[128].mxu1 %v8403_v34 }
 0x478   :  { %v6720_v25 = vpop.permute.xlu1 %6719  ;;  %v8298_v23 = vld [vmem:[#allocation4 + $0xe8] sm:$0xff]  ;;  %v7102_v51 = vpop.permute.xlu0 %7101  ;;  %v8308_v12 = vld [vmem:[#allocation4 + $0x138] sm:$0xff] }
 0x479   :  { %6728 = vst.msk [vmem:[#allocation4 + $0xf8] sm:$0xff] %vm6274_vm8, %v6720_v25  ;;  %v8410_v38 = vpack.c.bf16 %v8298_v23, %v8290_v24  ;;  %7111 = vst.msk [vmem:[#allocation4 + $0x1a8] sm:$0xff] %vm6274_vm8, %v7102_v51 }
 0x47b   :  { %9207 = vmatprep.mubr.bf16.mxu0 %v8410_v38 }
 0x47c   :  { %v6656_v1 = vpop.permute.xlu1 %6655  ;;  %v8297_v41 = vld [vmem:[#allocation4 + $0xe0] sm:$0xff]  ;;  %v7038_v21 = vpop.permute.xlu0 %7037  ;;  %v8307_v31 = vld [vmem:[#allocation4 + $0x130] sm:$0xff] }
 0x47d   :  { %6664 = vst.msk [vmem:[#allocation4 + $0xf0] sm:$0xff] %vm6274_vm8, %v6656_v1  ;;  %v8409_v18 = vpack.c.bf16 %v8297_v41, %v8289_v35  ;;  %7047 = vst.msk [vmem:[#allocation4 + $0x1a0] sm:$0xff] %vm6274_vm8, %v7038_v21 }
 0x47f   :  { %9208 = vmatmul.mubr.bf16.gmra.mrb[4].mxu0 %v8409_v18 }
 0x480   :  { %v7100_v61 = vpop.permute.xlu1 %7099  ;;  %v8300_v57 = vld [vmem:[#allocation4 + $0xf8] sm:$0xff]  ;;  %v7230_v8 = vpop.permute.xlu0 %7229  ;;  %v8322_v50 = vld [vmem:[#allocation4 + $0x1a8] sm:$0xff] }
 0x481   :  { %7110 = vst.msk [vmem:[#allocation4 + $0x168] sm:$0xff] %vm6274_vm8, %v7100_v61  ;;  %v8412_v13 = vpack.c.bf16 %v8300_v57, %v8292_v19  ;;  %7239 = vst.msk [vmem:[#allocation4 + $0x1b8] sm:$0xff] %vm6274_vm8, %v7230_v8 }
 0x483   :  { %9304 = vmatprep.mubr.bf16.mxu1 %v8412_v13 }
 0x484   :  { %v7036_v9 = vpop.permute.xlu1 %7035  ;;  %v8299_v36 = vld [vmem:[#allocation4 + $0xf0] sm:$0xff]  ;;  %v7166_v48 = vpop.permute.xlu0 %7165  ;;  %v8321_v30 = vld [vmem:[#allocation4 + $0x1a0] sm:$0xff] }
 0x485   :  { %7046 = vst.msk [vmem:[#allocation4 + $0x160] sm:$0xff] %vm6274_vm8, %v7036_v9  ;;  %v8411_v6 = vpack.c.bf16 %v8299_v36, %v8291_v43  ;;  %7175 = vst.msk [vmem:[#allocation4 + $0x1b0] sm:$0xff] %vm6274_vm8, %v7166_v48 }
 0x487   :  { %9305 = vmatmul.mubr.bf16.gmra.mrb[132].mxu1 %v8411_v6 }
 0x488   :  { %v7228_v17 = vpop.permute.xlu1 %7227  ;;  %v8314_v53 = vld [vmem:[#allocation4 + $0x168] sm:$0xff]  ;;  %v7610_v55 = vpop.permute.xlu0 %7609  ;;  %v8324_v54 = vld [vmem:[#allocation4 + $0x1b8] sm:$0xff] }
 0x489   :  { %7238 = vst.msk [vmem:[#allocation4 + $0x178] sm:$0xff] %vm6274_vm8, %v7228_v17  ;;  %v8418_v39 = vpack.c.bf16 %v8314_v53, %v8306_v26  ;;  %7621 = vst.msk [vmem:[#allocation4 + $0x228] sm:$0xff] %vm6274_vm8, %v7610_v55 }
 0x48b   :  { %9215 = vmatprep.mubr.bf16.mxu0 %v8418_v39 }
 0x48c   :  { %v7164_v44 = vpop.permute.xlu1 %7163  ;;  %v8313_v10 = vld [vmem:[#allocation4 + $0x160] sm:$0xff]  ;;  %v7546_v37 = vpop.permute.xlu0 %7545  ;;  %v8323_v11 = vld [vmem:[#allocation4 + $0x1b0] sm:$0xff] }
 0x48d   :  { %7174 = vst.msk [vmem:[#allocation4 + $0x170] sm:$0xff] %vm6274_vm8, %v7164_v44  ;;  %v8417_v49 = vpack.c.bf16 %v8313_v10, %v8305_v16  ;;  %7557 = vst.msk [vmem:[#allocation4 + $0x220] sm:$0xff] %vm6274_vm8, %v7546_v37 }
 0x48f   :  { %9216 = vmatmul.mubr.bf16.gmra.mrb[8].mxu0 %v8417_v49 }
 0x490   :  { %v7104_v20 = vpop.permute.xlu1 %7103  ;;  %v8316_v56 = vld [vmem:[#allocation4 + $0x178] sm:$0xff]  ;;  %v7742_v52 = vpop.permute.xlu0 %7741  ;;  %v8338_v32 = vld [vmem:[#allocation4 + $0x228] sm:$0xff] }
 0x491   :  { %7112 = vst.msk [vmem:[#allocation4 + $0x1e8] sm:$0xff] %vm6274_vm8, %v7104_v20  ;;  %v8420_v42 = vpack.c.bf16 %v8316_v56, %v8308_v12  ;;  %7753 = vst.msk [vmem:[#allocation4 + $0x238] sm:$0xff] %vm6274_vm8, %v7742_v52 }
 0x493   :  { %9312 = vmatprep.mubr.bf16.mxu1 %v8420_v42 }
 0x494   :  { %v7040_v60 = vpop.permute.xlu1 %7039  ;;  %v8315_v58 = vld [vmem:[#allocation4 + $0x170] sm:$0xff]  ;;  %v7676_v7 = vpop.permute.xlu0 %7675  ;;  %v8337_v23 = vld [vmem:[#allocation4 + $0x220] sm:$0xff] }
 0x495   :  { %7048 = vst.msk [vmem:[#allocation4 + $0x1e0] sm:$0xff] %vm6274_vm8, %v7040_v60  ;;  %v8419_v46 = vpack.c.bf16 %v8315_v58, %v8307_v31  ;;  %7687 = vst.msk [vmem:[#allocation4 + $0x230] sm:$0xff] %vm6274_vm8, %v7676_v7 }
 0x497   :  { %9313 = vmatmul.mubr.bf16.gmra.mrb[136].mxu1 %v8419_v46 }
 0x498   :  { %v7232_v4 = vpop.permute.xlu1 %7231  ;;  %v8330_v29 = vld [vmem:[#allocation4 + $0x1e8] sm:$0xff]  ;;  %v7614_v45 = vpop.permute.xlu0 %7613  ;;  %v8340_v1 = vld [vmem:[#allocation4 + $0x238] sm:$0xff] }
 0x499   :  { %7240 = vst.msk [vmem:[#allocation4 + $0x1f8] sm:$0xff] %vm6274_vm8, %v7232_v4  ;;  %v8426_v15 = vpack.c.bf16 %v8330_v29, %v8322_v50  ;;  %7623 = vst.msk [vmem:[#allocation4 + $0x2a8] sm:$0xff] %vm6274_vm8, %v7614_v45 }
 0x49b   :  { %9223 = vmatprep.mubr.bf16.mxu0 %v8426_v15 }
 0x49c   :  { %v7168_v40 = vpop.permute.xlu1 %7167  ;;  %v8329_v62 = vld [vmem:[#allocation4 + $0x1e0] sm:$0xff]  ;;  %v7550_v27 = vpop.permute.xlu0 %7549  ;;  %v8339_v61 = vld [vmem:[#allocation4 + $0x230] sm:$0xff] }
 0x49d   :  { %7176 = vst.msk [vmem:[#allocation4 + $0x1f0] sm:$0xff] %vm6274_vm8, %v7168_v40  ;;  %v8425_v0 = vpack.c.bf16 %v8329_v62, %v8321_v30  ;;  %7559 = vst.msk [vmem:[#allocation4 + $0x2a0] sm:$0xff] %vm6274_vm8, %v7550_v27 }
 0x49f   :  { %9224 = vmatmul.mubr.bf16.gmra.mrb[12].mxu0 %v8425_v0 }
 0x4a0   :  { %v7612_v2 = vpop.permute.xlu1 %7611  ;;  %v8332_v5 = vld [vmem:[#allocation4 + $0x1f8] sm:$0xff]  ;;  %v7746_v35 = vpop.permute.xlu0 %7745  ;;  %v8354_v9 = vld [vmem:[#allocation4 + $0x2a8] sm:$0xff] }
 0x4a1   :  { %7622 = vst.msk [vmem:[#allocation4 + $0x268] sm:$0xff] %vm6274_vm8, %v7612_v2  ;;  %v8428_v14 = vpack.c.bf16 %v8332_v5, %v8324_v54  ;;  %7755 = vst.msk [vmem:[#allocation4 + $0x2b8] sm:$0xff] %vm6274_vm8, %v7746_v35 }
 0x4a3   :  { %9320 = vmatprep.mubr.bf16.mxu1 %v8428_v14 }
 0x4a4   :  { %v7548_v22 = vpop.permute.xlu1 %7547  ;;  %v8331_v28 = vld [vmem:[#allocation4 + $0x1f0] sm:$0xff]  ;;  %v7680_v18 = vpop.permute.xlu0 %7679  ;;  %v8353_v17 = vld [vmem:[#allocation4 + $0x2a0] sm:$0xff] }
 0x4a5   :  { %7558 = vst.msk [vmem:[#allocation4 + $0x260] sm:$0xff] %vm6274_vm8, %v7548_v22  ;;  %v8427_v33 = vpack.c.bf16 %v8331_v28, %v8323_v11  ;;  %7689 = vst.msk [vmem:[#allocation4 + $0x2b0] sm:$0xff] %vm6274_vm8, %v7680_v18 }
 0x4a7   :  { %9321 = vmatmul.mubr.bf16.gmra.mrb[140].mxu1 %v8427_v33 }
 0x4a8   :  { %v7744_v24 = vpop.permute.xlu1 %7743  ;;  %v8346_v59 = vld [vmem:[#allocation4 + $0x268] sm:$0xff]  ;;  %v8126_v13 = vpop.permute.xlu0 %8125  ;;  %v8356_v44 = vld [vmem:[#allocation4 + $0x2b8] sm:$0xff] }
 0x4a9   :  { %7754 = vst.msk [vmem:[#allocation4 + $0x278] sm:$0xff] %vm6274_vm8, %v7744_v24  ;;  %v8434_v25 = vpack.c.bf16 %v8346_v59, %v8338_v32  ;;  %8137 = vst.msk [vmem:[#allocation4 + $0x328] sm:$0xff] %vm6274_vm8, %v8126_v13 }
 0x4ab   :  { %9231 = vmatprep.mubr.bf16.mxu0 %v8434_v25 }
 0x4ac   :  { %v7678_v3 = vpop.permute.xlu1 %7677  ;;  %v8345_v38 = vld [vmem:[#allocation4 + $0x260] sm:$0xff]  ;;  %v8062_v6 = vpop.permute.xlu0 %8061  ;;  %v8355_v20 = vld [vmem:[#allocation4 + $0x2b0] sm:$0xff] }
 0x4ad   :  { %7688 = vst.msk [vmem:[#allocation4 + $0x270] sm:$0xff] %vm6274_vm8, %v7678_v3  ;;  %v8433_v34 = vpack.c.bf16 %v8345_v38, %v8337_v23  ;;  %8073 = vst.msk [vmem:[#allocation4 + $0x320] sm:$0xff] %vm6274_vm8, %v8062_v6 }
 0x4af   :  { %9232 = vmatmul.mubr.bf16.gmra.mrb[16].mxu0 %v8433_v34 }
 0x4b0   :  { %v7616_v41 = vpop.permute.xlu1 %7615  ;;  %v8348_v47 = vld [vmem:[#allocation4 + $0x278] sm:$0xff]  ;;  %v8254_v39 = vpop.permute.xlu0 %8253  ;;  %v8370_v60 = vld [vmem:[#allocation4 + $0x328] sm:$0xff] }
 0x4b1   :  { %7624 = vst.msk [vmem:[#allocation4 + $0x2e8] sm:$0xff] %vm6274_vm8, %v7616_v41  ;;  %v8436_v19 = vpack.c.bf16 %v8348_v47, %v8340_v1  ;;  %8265 = vst.msk [vmem:[#allocation4 + $0x338] sm:$0xff] %vm6274_vm8, %v8254_v39 }
 0x4b3   :  { %9328 = vmatprep.mubr.bf16.mxu1 %v8436_v19 }
 0x4b4   :  { %v7552_v57 = vpop.permute.xlu1 %7551  ;;  %v8347_v63 = vld [vmem:[#allocation4 + $0x270] sm:$0xff]  ;;  %v8190_v49 = vpop.permute.xlu0 %8189  ;;  %v8369_v4 = vld [vmem:[#allocation4 + $0x320] sm:$0xff] }
 0x4b5   :  { %7560 = vst.msk [vmem:[#allocation4 + $0x2e0] sm:$0xff] %vm6274_vm8, %v7552_v57  ;;  %v8435_v43 = vpack.c.bf16 %v8347_v63, %v8339_v61  ;;  %8201 = vst.msk [vmem:[#allocation4 + $0x330] sm:$0xff] %vm6274_vm8, %v8190_v49 }
 0x4b7   :  { %9329 = vmatmul.mubr.bf16.gmra.mrb[144].mxu1 %v8435_v43 }
 0x4b8   :  { %v7748_v36 = vpop.permute.xlu1 %7747  ;;  %v8362_v51 = vld [vmem:[#allocation4 + $0x2e8] sm:$0xff]  ;;  %v8130_v42 = vpop.permute.xlu0 %8129  ;;  %v8372_v40 = vld [vmem:[#allocation4 + $0x338] sm:$0xff] }
 0x4b9   :  { %7756 = vst.msk [vmem:[#allocation4 + $0x2f8] sm:$0xff] %vm6274_vm8, %v7748_v36  ;;  %v8442_v26 = vpack.c.bf16 %v8362_v51, %v8354_v9  ;;  %8139 = vst.msk [vmem:[#allocation4 + $0x3a8] sm:$0xff] %vm6274_vm8, %v8130_v42 }
 0x4bb   :  { %9239 = vmatprep.mubr.bf16.mxu0 %v8442_v26 }
 0x4bc   :  { %v7682_v53 = vpop.permute.xlu1 %7681  ;;  %v8361_v21 = vld [vmem:[#allocation4 + $0x2e0] sm:$0xff]  ;;  %v8066_v46 = vpop.permute.xlu0 %8065  ;;  %v8371_v11 = vld [vmem:[#allocation4 + $0x330] sm:$0xff] }
 0x4bd   :  { %7690 = vst.msk [vmem:[#allocation4 + $0x2f0] sm:$0xff] %vm6274_vm8, %v7682_v53  ;;  %v8441_v16 = vpack.c.bf16 %v8361_v21, %v8353_v17  ;;  %8075 = vst.msk [vmem:[#allocation4 + $0x3a0] sm:$0xff] %vm6274_vm8, %v8066_v46 }
 0x4bf   :  { %9240 = vmatmul.mubr.bf16.gmra.mrb[20].mxu0 %v8441_v16 }
 0x4c0   :  { %v8128_v10 = vpop.permute.xlu1 %8127  ;;  %v8364_v8 = vld [vmem:[#allocation4 + $0x2f8] sm:$0xff]  ;;  %v8258_v15 = vpop.permute.xlu0 %8257  ;;  %v8386_v24 = vld [vmem:[#allocation4 + $0x3a8] sm:$0xff] }
 0x4c1   :  { %8138 = vst.msk [vmem:[#allocation4 + $0x368] sm:$0xff] %vm6274_vm8, %v8128_v10  ;;  %v8444_v12 = vpack.c.bf16 %v8364_v8, %v8356_v44  ;;  %8267 = vst.msk [vmem:[#allocation4 + $0x3b8] sm:$0xff] %vm6274_vm8, %v8258_v15 }
 0x4c3   :  { %9336 = vmatprep.mubr.bf16.mxu1 %v8444_v12  ;;  %v11313_v62 = vpop.f32.mrb[64].mxu1 }
 0x4c4   :  { %v8064_v56 = vpop.permute.xlu1 %8063  ;;  %v8363_v48 = vld [vmem:[#allocation4 + $0x2f0] sm:$0xff]  ;;  %v11314_v54 = vpop.f32.mrb[65].mxu1  ;;  %v8385_v34 = vld [vmem:[#allocation4 + $0x3a0] sm:$0xff] }
 0x4c5   :  { %8074 = vst.msk [vmem:[#allocation4 + $0x360] sm:$0xff] %vm6274_vm8, %v8064_v56  ;;  %v8443_v31 = vpack.c.bf16 %v8363_v48, %v8355_v20  ;;  %v16491_v5 = vadd.f32 %v11314_v54, %v11313_v62  ;;  %v8194_v7 = vpop.permute.xlu0 %8193  ;;  %v11316_v14 = vpop.f32.mrb[66].mxu1 }
 0x4c6   :  { %8203 = vst.msk [vmem:[#allocation4 + $0x3b0] sm:$0xff] %vm6274_vm8, %v8194_v7  ;;  %v11317_v22 = vpop.f32.mrb[67].mxu1 }
 0x4c7   :  { %9337 = vmatmul.mubr.bf16.gmra.mrb[148].mxu1 %v8443_v31  ;;  %v16494_v28 = vadd.f32 %v11317_v22, %v11316_v14 }
 0x4c8   :  { %v8256_v58 = vpop.permute.xlu1 %8255  ;;  %v8378_v55 = vld [vmem:[#allocation4 + $0x368] sm:$0xff]  ;;  %v8388_v61 = vld [vmem:[#allocation4 + $0x3b8] sm:$0xff] }
 0x4c9   :  { %8266 = vst.msk [vmem:[#allocation4 + $0x378] sm:$0xff] %vm6274_vm8, %v8256_v58  ;;  %v8450_v50 = vpack.c.bf16 %v8378_v55, %v8370_v60 }
 0x4cb   :  { %9247 = vmatprep.mubr.bf16.mxu0 %v8450_v50  ;;  %v11319_v59 = vpop.f32.mrb[68].mxu1 }
 0x4cc   :  { %v8192_v29 = vpop.permute.xlu1 %8191  ;;  %v8377_v37 = vld [vmem:[#allocation4 + $0x360] sm:$0xff]  ;;  %v11320_v23 = vpop.f32.mrb[69].mxu1 }
 0x4cd   :  { %8202 = vst.msk [vmem:[#allocation4 + $0x370] sm:$0xff] %vm6274_vm8, %v8192_v29  ;;  %v8449_v30 = vpack.c.bf16 %v8377_v37, %v8369_v4  ;;  %v16498_v38 = vadd.f32 %v11320_v23, %v11319_v59  ;;  %v11322_v35 = vpop.f32.mrb[70].mxu1  ;;  %v8387_v51 = vld [vmem:[#allocation4 + $0x3b0] sm:$0xff] }
 0x4ce   :  { %v11323_v1 = vpop.f32.mrb[71].mxu1 }
 0x4cf   :  { %9248 = vmatmul.mubr.bf16.gmra.mrb[24].mxu0 %v8449_v30  ;;  %v16500_v41 = vadd.f32 %v11323_v1, %v11322_v35 }
 0x4d0   :  { %v8132_v52 = vpop.permute.xlu1 %8131  ;;  %v8380_v0 = vld [vmem:[#allocation4 + $0x378] sm:$0xff] }
 0x4d1   :  { %8140 = vst.msk [vmem:[#allocation4 + $0x3e8] sm:$0xff] %vm6274_vm8, %v8132_v52  ;;  %v8452_v2 = vpack.c.bf16 %v8380_v0, %v8372_v40 }
 0x4d3   :  { %9344 = vmatprep.mubr.bf16.mxu1 %v8452_v2  ;;  %v11325_v57 = vpop.f32.mrb[72].mxu1 }
 0x4d4   :  { %v8068_v45 = vpop.permute.xlu1 %8067  ;;  %v8379_v33 = vld [vmem:[#allocation4 + $0x370] sm:$0xff]  ;;  %v11326_v13 = vpop.f32.mrb[73].mxu1 }
 0x4d5   :  { %8076 = vst.msk [vmem:[#allocation4 + $0x3e0] sm:$0xff] %vm6274_vm8, %v8068_v45  ;;  %v8451_v32 = vpack.c.bf16 %v8379_v33, %v8371_v11  ;;  %v11327_v9 = vadd.f32 %v11326_v13, %v11325_v57  ;;  %v11328_v36 = vpop.f32.mrb[74].mxu1 }
 0x4d6   :  { %v11329_v6 = vpop.f32.mrb[75].mxu1 }
 0x4d7   :  { %9345 = vmatmul.mubr.bf16.gmra.mrb[152].mxu1 %v8451_v32  ;;  %v11330_v26 = vadd.f32 %v11329_v6, %v11328_v36 }
 0x4d8   :  { %v8260_v27 = vpop.permute.xlu1 %8259  ;;  %v8394_v25 = vld [vmem:[#allocation4 + $0x3e8] sm:$0xff] }
 0x4d9   :  { %8268 = vst.msk [vmem:[#allocation4 + $0x3f8] sm:$0xff] %vm6274_vm8, %v8260_v27  ;;  %v8458_v3 = vpack.c.bf16 %v8394_v25, %v8386_v24 }
 0x4db   :  { %9255 = vmatprep.mubr.bf16.mxu0 %v8458_v3  ;;  %v11331_v21 = vpop.f32.mrb[76].mxu1 }
 0x4dc   :  { %v8196_v47 = vpop.permute.xlu1 %8195  ;;  %v8393_v18 = vld [vmem:[#allocation4 + $0x3e0] sm:$0xff]  ;;  %v11332_v39 = vpop.f32.mrb[77].mxu1 }
 0x4dd   :  { %8204 = vst.msk [vmem:[#allocation4 + $0x3f0] sm:$0xff] %vm6274_vm8, %v8196_v47  ;;  %v8457_v19 = vpack.c.bf16 %v8393_v18, %v8385_v34  ;;  %v11333_v16 = vadd.f32 %v11332_v39, %v11331_v21  ;;  %v11334_v44 = vpop.f32.mrb[78].mxu1 }
 0x4de   :  { %v11335_v10 = vpop.f32.mrb[79].mxu1 }
 0x4df   :  { %9256 = vmatmul.mubr.bf16.gmra.mrb[28].mxu0 %v8457_v19  ;;  %v11336_v8 = vadd.f32 %v11335_v10, %v11334_v44 }
 0x4e0   :  { %v8396_v63 = vld [vmem:[#allocation4 + $0x3f8] sm:$0xff] }
 0x4e1   :  { %v8460_v43 = vpack.c.bf16 %v8396_v63, %v8388_v61 }
 0x4e3   :  { %9352 = vmatprep.mubr.bf16.mxu1 %v8460_v43  ;;  %v11337_v49 = vpop.f32.mrb[80].mxu1 }
 0x4e4   :  { %v8395_v17 = vld [vmem:[#allocation4 + $0x3f0] sm:$0xff]  ;;  %v11338_v12 = vpop.f32.mrb[81].mxu1 }
 0x4e5   :  { %v8459_v53 = vpack.c.bf16 %v8395_v17, %v8387_v51  ;;  %v11339_v20 = vadd.f32 %v11338_v12, %v11337_v49  ;;  %v11340_v56 = vpop.f32.mrb[82].mxu1 }
 0x4e6   :  { %v11341_v48 = vpop.f32.mrb[83].mxu1 }
 0x4e7   :  { %9353 = vmatmul.mubr.bf16.gmra.mrb[156].mxu1 %v8459_v53  ;;  %v11342_v42 = vadd.f32 %v11341_v48, %v11340_v56 }
 0x4eb   :  { %v11343_v31 = vpop.f32.mrb[84].mxu1 }
 0x4ec   :  { %v11344_v60 = vpop.f32.mrb[85].mxu1 }
 0x4ed   :  { %v11345_v58 = vadd.f32 %v11344_v60, %v11343_v31  ;;  %v11346_v55 = vpop.f32.mrb[86].mxu1 }
 0x4ee   :  { %v11347_v46 = vpop.f32.mrb[87].mxu1 }
 0x4ef   :  { %v11348_v50 = vadd.f32 %v11347_v46, %v11346_v55 }
 0x4f3   :  { %v11349_v4 = vpop.f32.mrb[88].mxu1 }
 0x4f4   :  { %v11350_v29 = vpop.f32.mrb[89].mxu1 }
 0x4f5   :  { %v16503_v37 = vadd.f32 %v11350_v29, %v11349_v4  ;;  %v11352_v15 = vpop.f32.mrb[90].mxu1 }
 0x4f6   :  { %v11353_v30 = vpop.f32.mrb[91].mxu1 }
 0x4f7   :  { %v16505_v40 = vadd.f32 %v11353_v30, %v11352_v15 }
 0x4fb   :  { %v11355_v62 = vpop.f32.mrb[92].mxu1 }
 0x4fc   :  { %v11356_v52 = vpop.f32.mrb[93].mxu1 }
 0x4fd   :  { %v16507_v0 = vadd.f32 %v11356_v52, %v11355_v62  ;;  %v11358_v54 = vpop.f32.mrb[94].mxu1 }
 0x4fe   :  { %v11359_v2 = vpop.f32.mrb[95].mxu1 }
 0x4ff   :  { %v16509_v7 = vadd.f32 %v11359_v2, %v11358_v54 }
 0x503   :  { %v11377_v14 = vpop.f32.mrb[96].mxu1 }
 0x504   :  { %v11378_v11 = vpop.f32.mrb[97].mxu1 }
 0x505   :  { %v11379_v22 = vadd.f32 %v11378_v11, %v11377_v14  ;;  %v11380_v45 = vpop.f32.mrb[98].mxu1 }
 0x506   :  { %v11381_v33 = vpop.f32.mrb[99].mxu1 }
 0x507   :  { %v9105_v32 = vadd.f32 %v11379_v22, %v16491_v5  ;;  %v11382_v24 = vadd.f32 %v11381_v33, %v11380_v45 }
 0x509   :  { %v9108_v59 = vadd.f32 %v11382_v24, %v16494_v28 }
 0x50b   :  { %v11383_v27 = vpop.f32.mrb[100].mxu1 }
 0x50c   :  { %v11384_v25 = vpop.f32.mrb[101].mxu1 }
 0x50d   :  { %v11385_v23 = vadd.f32 %v11384_v25, %v11383_v27  ;;  %v11386_v3 = vpop.f32.mrb[102].mxu1 }
 0x50e   :  { %v11387_v35 = vpop.f32.mrb[103].mxu1 }
 0x50f   :  { %v16514_v34 = vadd.f32 %v11385_v23, %v16498_v38  ;;  %v11388_v1 = vadd.f32 %v11387_v35, %v11386_v3 }
 0x511   :  { %v16517_v47 = vadd.f32 %v11388_v1, %v16500_v41 }
 0x513   :  { %v11389_v18 = vpop.f32.mrb[104].mxu1 }
 0x514   :  { %v11390_v19 = vpop.f32.mrb[105].mxu1 }
 0x515   :  { %v11391_v61 = vadd.f32 %v11390_v19, %v11389_v18  ;;  %v11392_v57 = vpop.f32.mrb[106].mxu1 }
 0x516   :  { %v11393_v5 = vpop.f32.mrb[107].mxu1 }
 0x517   :  { %v16519_v63 = vadd.f32 %v11391_v61, %v11327_v9  ;;  %v11394_v28 = vadd.f32 %v11393_v5, %v11392_v57 }
 0x519   :  { %v16521_v13 = vadd.f32 %v11394_v28, %v11330_v26 }
 0x51b   :  { %v11395_v43 = vpop.f32.mrb[108].mxu1 }
 0x51c   :  { %v11396_v36 = vpop.f32.mrb[109].mxu1 }
 0x51d   :  { %v11397_v51 = vadd.f32 %v11396_v36, %v11395_v43  ;;  %v11398_v6 = vpop.f32.mrb[110].mxu1 }
 0x51e   :  { %v11399_v38 = vpop.f32.mrb[111].mxu1 }
 0x51f   :  { %v16523_v17 = vadd.f32 %v11397_v51, %v11333_v16  ;;  %v11400_v53 = vadd.f32 %v11399_v38, %v11398_v6 }
 0x521   :  { %v16525_v41 = vadd.f32 %v11400_v53, %v11336_v8 }
 0x523   :  { %v11401_v21 = vpop.f32.mrb[112].mxu1 }
 0x524   :  { %v11402_v39 = vpop.f32.mrb[113].mxu1 }
 0x525   :  { %v11403_v44 = vadd.f32 %v11402_v39, %v11401_v21  ;;  %v11404_v10 = vpop.f32.mrb[114].mxu1 }
 0x526   :  { %v11405_v49 = vpop.f32.mrb[115].mxu1 }
 0x527   :  { %v16527_v9 = vadd.f32 %v11403_v44, %v11339_v20  ;;  %v11406_v12 = vadd.f32 %v11405_v49, %v11404_v10 }
 0x529   :  { %v16529_v26 = vadd.f32 %v11406_v12, %v11342_v42 }
 0x52b   :  { %v11407_v56 = vpop.f32.mrb[116].mxu1 }
 0x52c   :  { %v11408_v48 = vpop.f32.mrb[117].mxu1 }
 0x52d   :  { %v11409_v31 = vadd.f32 %v11408_v48, %v11407_v56  ;;  %v11410_v60 = vpop.f32.mrb[118].mxu1 }
 0x52e   :  { %v11411_v55 = vpop.f32.mrb[119].mxu1 }
 0x52f   :  { %v16531_v16 = vadd.f32 %v11409_v31, %v11345_v58  ;;  %v11412_v46 = vadd.f32 %v11411_v55, %v11410_v60 }
 0x531   :  { %v16533_v8 = vadd.f32 %v11412_v46, %v11348_v50 }
 0x533   :  { %v11413_v4 = vpop.f32.mrb[120].mxu1 }
 0x534   :  { %v11414_v29 = vpop.f32.mrb[121].mxu1 }
 0x535   :  { %v11415_v15 = vadd.f32 %v11414_v29, %v11413_v4  ;;  %v11416_v30 = vpop.f32.mrb[122].mxu1 }
 0x536   :  { %v11417_v20 = vpop.f32.mrb[123].mxu1 }
 0x537   :  { %v16536_v42 = vadd.f32 %v11415_v15, %v16503_v37  ;;  %v11418_v54 = vadd.f32 %v11417_v20, %v11416_v30 }
 0x539   :  { %v16539_v58 = vadd.f32 %v11418_v54, %v16505_v40 }
 0x53b   :  { %v11419_v45 = vpop.f32.mrb[124].mxu1 }
 0x53c   :  { %v11420_v24 = vpop.f32.mrb[125].mxu1 }
 0x53d   :  { %v11421_v27 = vadd.f32 %v11420_v24, %v11419_v45  ;;  %v11422_v25 = vpop.f32.mrb[126].mxu1 }
 0x53e   :  { %v11423_v23 = vpop.f32.mrb[127].mxu1 }
 0x53f   :  { %v16542_v3 = vadd.f32 %v11421_v27, %v16507_v0  ;;  %v11424_v37 = vadd.f32 %v11423_v23, %v11422_v25 }
 0x541   :  { %v16545_v35 = vadd.f32 %v11424_v37, %v16509_v7 }
 0x542   :  { %v11441_v62 = vpop.f32.mrb[0].mxu0 }
 0x543   :  { %v11442_v52 = vpop.f32.mrb[1].mxu0 }
 0x544   :  { %v11443_v2 = vadd.f32 %v11442_v52, %v11441_v62  ;;  %v11444_v14 = vpop.f32.mrb[2].mxu0 }
 0x545   :  { %v11445_v11 = vpop.f32.mrb[3].mxu0 }
 0x546   :  { %v9202_v22 = vadd.f32 %v11443_v2, %v9105_v32  ;;  %v11446_v50 = vadd.f32 %v11445_v11, %v11444_v14 }
 0x548   :  { %v9205_v33 = vadd.f32 %v11446_v50, %v9108_v59 }
 0x54a   :  { %v11505_v1 = vpop.f32.mrb[128].mxu1 }
 0x54b   :  { %v11506_v18 = vpop.f32.mrb[129].mxu1 }
 0x54c   :  { %v11507_v19 = vadd.f32 %v11506_v18, %v11505_v1  ;;  %v11508_v40 = vpop.f32.mrb[130].mxu1 }
 0x54d   :  { %v11509_v32 = vpop.f32.mrb[131].mxu1 }
 0x54e   :  { %v16547_v5 = vadd.f32 %v11507_v19, %v9202_v22  ;;  %v11510_v59 = vadd.f32 %v11509_v32, %v11508_v40 }
 0x550   :  { %v16549_v51 = vadd.f32 %v11510_v59, %v9205_v33 }
 0x552   :  { %v11447_v61 = vpop.f32.mrb[4].mxu0  ;;  %v9363_v7 = vadd.f32 %v16549_v51, %v16547_v5 }
 0x553   :  { %v11448_v57 = vpop.f32.mrb[5].mxu0 }
 0x554   :  { %v11449_v28 = vadd.f32 %v11448_v57, %v11447_v61  ;;  %v11450_v43 = vpop.f32.mrb[6].mxu0 }
 0x555   :  { %v11451_v36 = vpop.f32.mrb[7].mxu0 }
 0x556   :  { %v9210_v0 = vadd.f32 %v11449_v28, %v16514_v34  ;;  %v11452_v6 = vadd.f32 %v11451_v36, %v11450_v43 }
 0x558   :  { %v9213_v38 = vadd.f32 %v11452_v6, %v16517_v47 }
 0x55a   :  { %v11511_v53 = vpop.f32.mrb[132].mxu1 }
 0x55b   :  { %v11512_v21 = vpop.f32.mrb[133].mxu1 }
 0x55c   :  { %v11513_v39 = vadd.f32 %v11512_v21, %v11511_v53  ;;  %v11514_v44 = vpop.f32.mrb[134].mxu1 }
 0x55d   :  { %v11515_v10 = vpop.f32.mrb[135].mxu1 }
 0x55e   :  { %v16555_v49 = vadd.f32 %v11513_v39, %v9210_v0  ;;  %v11516_v12 = vadd.f32 %v11515_v10, %v11514_v44 }
 0x560   :  { %v9364_v56 = vadd.f32 %v9363_v7, %v16555_v49  ;;  %v16558_v48 = vadd.f32 %v11516_v12, %v9213_v38 }
 0x562   :  { %v11453_v31 = vpop.f32.mrb[8].mxu0  ;;  %v9365_v34 = vadd.f32 %v9364_v56, %v16558_v48 }
 0x563   :  { %v11454_v60 = vpop.f32.mrb[9].mxu0 }
 0x564   :  { %v11455_v55 = vadd.f32 %v11454_v60, %v11453_v31  ;;  %v11456_v46 = vpop.f32.mrb[10].mxu0 }
 0x565   :  { %v11457_v4 = vpop.f32.mrb[11].mxu0 }
 0x566   :  { %v9218_v47 = vadd.f32 %v11455_v55, %v16519_v63  ;;  %v11458_v29 = vadd.f32 %v11457_v4, %v11456_v46 }
 0x568   :  { %v9221_v15 = vadd.f32 %v11458_v29, %v16521_v13 }
 0x56a   :  { %v11517_v30 = vpop.f32.mrb[136].mxu1 }
 0x56b   :  { %v11518_v62 = vpop.f32.mrb[137].mxu1 }
 0x56c   :  { %v11519_v20 = vadd.f32 %v11518_v62, %v11517_v30  ;;  %v11520_v52 = vpop.f32.mrb[138].mxu1 }
 0x56d   :  { %v11521_v54 = vpop.f32.mrb[139].mxu1 }
 0x56e   :  { %v16563_v2 = vadd.f32 %v11519_v20, %v9218_v47  ;;  %v11522_v14 = vadd.f32 %v11521_v54, %v11520_v52 }
 0x570   :  { %v9366_v11 = vadd.f32 %v9365_v34, %v16563_v2  ;;  %v16566_v22 = vadd.f32 %v11522_v14, %v9221_v15 }
 0x572   :  { %v9367_v50 = vadd.f32 %v9366_v11, %v16566_v22  ;;  %v11459_v45 = vpop.f32.mrb[12].mxu0 }
 0x573   :  { %v11460_v33 = vpop.f32.mrb[13].mxu0 }
 0x574   :  { %v11461_v63 = vadd.f32 %v11460_v33, %v11459_v45  ;;  %v11462_v24 = vpop.f32.mrb[14].mxu0 }
 0x575   :  { %v11463_v27 = vpop.f32.mrb[15].mxu0 }
 0x576   :  { %v9226_v13 = vadd.f32 %v11461_v63, %v16523_v17  ;;  %v11464_v25 = vadd.f32 %v11463_v27, %v11462_v24 }
 0x578   :  { %v9229_v23 = vadd.f32 %v11464_v25, %v16525_v41 }
 0x57a   :  { %v11523_v37 = vpop.f32.mrb[140].mxu1 }
 0x57b   :  { %v11524_v1 = vpop.f32.mrb[141].mxu1 }
 0x57c   :  { %v11525_v18 = vadd.f32 %v11524_v1, %v11523_v37  ;;  %v11526_v19 = vpop.f32.mrb[142].mxu1 }
 0x57d   :  { %v11527_v40 = vpop.f32.mrb[143].mxu1 }
 0x57e   :  { %v16571_v61 = vadd.f32 %v11525_v18, %v9226_v13  ;;  %v11528_v32 = vadd.f32 %v11527_v40, %v11526_v19 }
 0x580   :  { %v9368_v57 = vadd.f32 %v9367_v50, %v16571_v61  ;;  %v16574_v59 = vadd.f32 %v11528_v32, %v9229_v23 }
 0x582   :  { %v9369_v28 = vadd.f32 %v9368_v57, %v16574_v59  ;;  %v11465_v43 = vpop.f32.mrb[16].mxu0 }
 0x583   :  { %v11466_v36 = vpop.f32.mrb[17].mxu0 }
 0x584   :  { %v11467_v17 = vadd.f32 %v11466_v36, %v11465_v43  ;;  %v11468_v0 = vpop.f32.mrb[18].mxu0 }
 0x585   :  { %v11469_v6 = vpop.f32.mrb[19].mxu0 }
 0x586   :  { %v9234_v41 = vadd.f32 %v11467_v17, %v16527_v9  ;;  %v11470_v7 = vadd.f32 %v11469_v6, %v11468_v0 }
 0x588   :  { %v9237_v38 = vadd.f32 %v11470_v7, %v16529_v26 }
 0x58a   :  { %v11529_v53 = vpop.f32.mrb[144].mxu1 }
 0x58b   :  { %v11530_v21 = vpop.f32.mrb[145].mxu1 }
 0x58c   :  { %v11531_v39 = vadd.f32 %v11530_v21, %v11529_v53  ;;  %v11532_v44 = vpop.f32.mrb[146].mxu1 }
 0x58d   :  { %v11533_v10 = vpop.f32.mrb[147].mxu1 }
 0x58e   :  { %v16579_v12 = vadd.f32 %v11531_v39, %v9234_v41  ;;  %v11534_v56 = vadd.f32 %v11533_v10, %v11532_v44 }
 0x590   :  { %v9370_v31 = vadd.f32 %v9369_v28, %v16579_v12  ;;  %v16582_v34 = vadd.f32 %v11534_v56, %v9237_v38 }
 0x592   :  { %v9371_v60 = vadd.f32 %v9370_v31, %v16582_v34  ;;  %v11471_v55 = vpop.f32.mrb[20].mxu0 }
 0x593   :  { %v11472_v46 = vpop.f32.mrb[21].mxu0 }
 0x594   :  { %v11473_v9 = vadd.f32 %v11472_v46, %v11471_v55  ;;  %v11474_v4 = vpop.f32.mrb[22].mxu0 }
 0x595   :  { %v11475_v47 = vpop.f32.mrb[23].mxu0 }
 0x596   :  { %v9242_v26 = vadd.f32 %v11473_v9, %v16531_v16  ;;  %v11476_v29 = vadd.f32 %v11475_v47, %v11474_v4 }
 0x598   :  { %v9245_v15 = vadd.f32 %v11476_v29, %v16533_v8 }
 0x59a   :  { %v11535_v30 = vpop.f32.mrb[148].mxu1 }
 0x59b   :  { %v11536_v62 = vpop.f32.mrb[149].mxu1 }
 0x59c   :  { %v11537_v20 = vadd.f32 %v11536_v62, %v11535_v30  ;;  %v11538_v52 = vpop.f32.mrb[150].mxu1 }
 0x59d   :  { %v11539_v54 = vpop.f32.mrb[151].mxu1 }
 0x59e   :  { %v9339_v14 = vadd.f32 %v11537_v20, %v9242_v26  ;;  %v11540_v11 = vadd.f32 %v11539_v54, %v11538_v52 }
 0x5a0   :  { %v9372_v50 = vadd.f32 %v9371_v60, %v9339_v14  ;;  %v9342_v45 = vadd.f32 %v11540_v11, %v9245_v15 }
 0x5a2   :  { %v9373_v33 = vadd.f32 %v9372_v50, %v9342_v45  ;;  %v11477_v63 = vpop.f32.mrb[24].mxu0 }
 0x5a3   :  { %v11478_v24 = vpop.f32.mrb[25].mxu0 }
 0x5a4   :  { %v11479_v27 = vadd.f32 %v11478_v24, %v11477_v63  ;;  %v11480_v13 = vpop.f32.mrb[26].mxu0 }
 0x5a5   :  { %v11481_v25 = vpop.f32.mrb[27].mxu0 }
 0x5a6   :  { %v9250_v16 = vadd.f32 %v11479_v27, %v16536_v42  ;;  %v11482_v23 = vadd.f32 %v11481_v25, %v11480_v13 }
 0x5a8   :  { %v9253_v8 = vadd.f32 %v11482_v23, %v16539_v58 }
 0x5aa   :  { %v11541_v37 = vpop.f32.mrb[152].mxu1 }
 0x5ab   :  { %v11542_v1 = vpop.f32.mrb[153].mxu1 }
 0x5ac   :  { %v11543_v18 = vadd.f32 %v11542_v1, %v11541_v37  ;;  %v11544_v19 = vpop.f32.mrb[154].mxu1 }
 0x5ad   :  { %v11545_v40 = vpop.f32.mrb[155].mxu1 }
 0x5ae   :  { %v9347_v32 = vadd.f32 %v11543_v18, %v9250_v16  ;;  %v11546_v57 = vadd.f32 %v11545_v40, %v11544_v19 }
 0x5b0   :  { %v9374_v28 = vadd.f32 %v9373_v33, %v9347_v32  ;;  %v9350_v43 = vadd.f32 %v11546_v57, %v9253_v8 }
 0x5b2   :  { %v9375_v36 = vadd.f32 %v9374_v28, %v9350_v43  ;;  %v11483_v17 = vpop.f32.mrb[28].mxu0 }
 0x5b3   :  { %v11484_v0 = vpop.f32.mrb[29].mxu0 }
 0x5b4   :  { %v11485_v6 = vadd.f32 %v11484_v0, %v11483_v17  ;;  %v11486_v41 = vpop.f32.mrb[30].mxu0 }
 0x5b5   :  { %v11487_v7 = vpop.f32.mrb[31].mxu0 }
 0x5b6   :  { %v9258_v42 = vadd.f32 %v11485_v6, %v16542_v3  ;;  %v11488_v38 = vadd.f32 %v11487_v7, %v11486_v41 }
 0x5b8   :  { %v9261_v58 = vadd.f32 %v11488_v38, %v16545_v35 }
 0x5ba   :  { %v11547_v53 = vpop.f32.mrb[156].mxu1 }
 0x5bb   :  { %v11548_v21 = vpop.f32.mrb[157].mxu1 }
 0x5bc   :  { %v11549_v39 = vadd.f32 %v11548_v21, %v11547_v53  ;;  %v11550_v44 = vpop.f32.mrb[158].mxu1 }
 0x5bd   :  { %v11551_v10 = vpop.f32.mrb[159].mxu1 }
 0x5be   :  { %v9355_v56 = vadd.f32 %v11549_v39, %v9258_v42  ;;  %v11552_v31 = vadd.f32 %v11551_v10, %v11550_v44 }
 0x5c0   :  { %v9376_v60 = vadd.f32 %v9375_v36, %v9355_v56  ;;  %v9358_v55 = vadd.f32 %v11552_v31, %v9261_v58 }
 0x5c2   :  { %v9377_v46 = vadd.f32 %v9376_v60, %v9358_v55 }
 0x5c4   :  { %v9378_v9 = vrot.slane %v9377_v46, 4 }
 0x5c6   :  { %v9379_v4 = vadd.f32 %v9378_v9, %v9377_v46 }
 0x5c8   :  { %v9380_v47 = vrot.slane %v9379_v4, 2 }
 0x5ca   :  { %v9381_v26 = vadd.f32 %v9380_v47, %v9379_v4 }
 0x5cc   :  { %v9382_v29 = vrot.slane %v9381_v26, 1 }
 0x5ce   :  { %v9383_v15 = vadd.f32 %v9382_v29, %v9381_v26 }
 0x5d0   :  { %v9385_v3 = vmul.f32 0.0078125, %v9383_v15 }
 0x5d2   :  { %v9386_v30 = vsub.f32 %v16547_v5, %v9385_v3  ;;  %v9387_v35 = vsub.f32 %v16549_v51, %v9385_v3  ;;  %v9388_v62 = vsub.f32 %v16555_v49, %v9385_v3  ;;  %v9389_v20 = vsub.f32 %v16558_v48, %v9385_v3 }
 0x5d3   :  { %v9390_v52 = vsub.f32 %v16563_v2, %v9385_v3  ;;  %v9391_v54 = vsub.f32 %v16566_v22, %v9385_v3  ;;  %v9392_v11 = vsub.f32 %v16571_v61, %v9385_v3  ;;  %v9393_v50 = vsub.f32 %v16574_v59, %v9385_v3 }
 0x5d4   :  { %v9394_v33 = vsub.f32 %v16579_v12, %v9385_v3  ;;  %v9395_v63 = vsub.f32 %v16582_v34, %v9385_v3  ;;  %v9396_v24 = vsub.f32 %v9339_v14, %v9385_v3  ;;  %v9397_v5 = vsub.f32 %v9342_v45, %v9385_v3 }
 0x5d5   :  { %v9398_v27 = vsub.f32 %v9347_v32, %v9385_v3  ;;  %v9399_v51 = vsub.f32 %v9350_v43, %v9385_v3  ;;  %v9400_v13 = vsub.f32 %v9355_v56, %v9385_v3  ;;  %v9401_v49 = vsub.f32 %v9358_v55, %v9385_v3  ;;  %v11261_v55 = vld [vmem:[%s16840_s5] ss:$0 sm:$0xff] }
 0x5d6   :  { %v9402_v25 = vmul.f32 %v9386_v30, %v9386_v30  ;;  %v9403_v48 = vmul.f32 %v9387_v35, %v9387_v35  ;;  %v9404_v16 = vmul.f32 %v9388_v62, %v9388_v62  ;;  %v9405_v23 = vmul.f32 %v9389_v20, %v9389_v20 }
 0x5d7   :  { %v9406_v8 = vmul.f32 %v9390_v52, %v9390_v52  ;;  %v9407_v37 = vmul.f32 %v9391_v54, %v9391_v54  ;;  %v9408_v1 = vmul.f32 %v9392_v11, %v9392_v11  ;;  %v9409_v18 = vmul.f32 %v9393_v50, %v9393_v50 }
 0x5d8   :  { %v9418_v2 = vadd.f32 %v9403_v48, %v9402_v25  ;;  %v9410_v14 = vmul.f32 %v9394_v33, %v9394_v33  ;;  %v9411_v19 = vmul.f32 %v9395_v63, %v9395_v63  ;;  %v9412_v32 = vmul.f32 %v9396_v24, %v9396_v24 }
 0x5d9   :  { %v9413_v28 = vmul.f32 %v9397_v5, %v9397_v5  ;;  %v9414_v36 = vmul.f32 %v9398_v27, %v9398_v27  ;;  %v9415_v0 = vmul.f32 %v9399_v51, %v9399_v51  ;;  %v9416_v41 = vmul.f32 %v9400_v13, %v9400_v13 }
 0x5da   :  { %v9419_v22 = vadd.f32 %v9418_v2, %v9404_v16  ;;  %v9417_v42 = vmul.f32 %v9401_v49, %v9401_v49  ;;  %v9446_v46 = vmul.f32 %v11261_v55, %v9386_v30  ;;  %v9447_v9 = vmul.f32 %v11261_v55, %v9387_v35  ;;  %v11262_v35 = vld [vmem:[%s16841_s6] ss:$0 sm:$0xff] }
 0x5db   :  { %v9448_v4 = vmul.f32 %v11261_v55, %v9388_v62  ;;  %v9449_v47 = vmul.f32 %v11261_v55, %v9389_v20  ;;  %v9450_v26 = vmul.f32 %v11261_v55, %v9390_v52  ;;  %v9451_v29 = vmul.f32 %v11261_v55, %v9391_v54 }
 0x5dc   :  { %v9420_v61 = vadd.f32 %v9419_v22, %v9405_v23  ;;  %v9452_v15 = vmul.f32 %v11261_v55, %v9392_v11  ;;  %v9453_v3 = vmul.f32 %v11261_v55, %v9393_v50  ;;  %v9454_v25 = vmul.f32 %v11261_v55, %v9394_v33 }
 0x5dd   :  { %v9455_v48 = vmul.f32 %v11261_v55, %v9395_v63  ;;  %v9456_v16 = vmul.f32 %v11261_v55, %v9396_v24  ;;  %v9457_v2 = vmul.f32 %v11261_v55, %v9397_v5  ;;  %v9458_v22 = vmul.f32 %v11261_v55, %v9398_v27 }
 0x5de   :  { %v9421_v59 = vadd.f32 %v9420_v61, %v9406_v8  ;;  %v9459_v8 = vmul.f32 %v11261_v55, %v9399_v51  ;;  %v9460_v61 = vmul.f32 %v11261_v55, %v9400_v13 }
 0x5e0   :  { %v9422_v12 = vadd.f32 %v9421_v59, %v9407_v37  ;;  %v9461_v37 = vmul.f32 %v11261_v55, %v9401_v49 }
 0x5e2   :  { %v9423_v34 = vadd.f32 %v9422_v12, %v9408_v1 }
 0x5e4   :  { %v9424_v45 = vadd.f32 %v9423_v34, %v9409_v18 }
 0x5e6   :  { %v9425_v40 = vadd.f32 %v9424_v45, %v9410_v14 }
 0x5e8   :  { %v9426_v57 = vadd.f32 %v9425_v40, %v9411_v19 }
 0x5ea   :  { %v9427_v43 = vadd.f32 %v9426_v57, %v9412_v32 }
 0x5ec   :  { %v9428_v17 = vadd.f32 %v9427_v43, %v9413_v28 }
 0x5ee   :  { %v9429_v6 = vadd.f32 %v9428_v17, %v9414_v36 }
 0x5f0   :  { %v9430_v7 = vadd.f32 %v9429_v6, %v9415_v0 }
 0x5f2   :  { %v9431_v38 = vadd.f32 %v9430_v7, %v9416_v41 }
 0x5f4   :  { %v9432_v58 = vadd.f32 %v9431_v38, %v9417_v42 }
 0x5f6   :  { %v9433_v53 = vrot.slane %v9432_v58, 4 }
 0x5f8   :  { %v9434_v21 = vadd.f32 %v9433_v53, %v9432_v58 }
 0x5fa   :  { %v9435_v39 = vrot.slane %v9434_v21, 2 }
 0x5fc   :  { %v9436_v44 = vadd.f32 %v9435_v39, %v9434_v21 }
 0x5fe   :  { %v9437_v10 = vrot.slane %v9436_v44, 1 }
 0x600   :  { %v9438_v56 = vadd.f32 %v9437_v10, %v9436_v44 }
 0x602   :  { %v9439_v31 = vmul.f32 0.0078125, %v9438_v56 }
 0x604   :  { %v9462_v60 = vadd.f32 1e-05, %v9439_v31 }
 0x606   :  { %12096 = vrsqrt.f32 %v9462_v60 }
 0x610   :  { %v12097_v23 = vpop.eup %12096 }
 0x611   :  { %v9464_v59 = vmul.f32 %v12097_v23, %v9446_v46  ;;  %v9465_v1 = vmul.f32 %v12097_v23, %v9447_v9  ;;  %v9466_v12 = vmul.f32 %v12097_v23, %v9448_v4  ;;  %v9467_v30 = vmul.f32 %v12097_v23, %v9449_v47 }
 0x612   :  { %v9468_v62 = vmul.f32 %v12097_v23, %v9450_v26  ;;  %v9469_v20 = vmul.f32 %v12097_v23, %v9451_v29  ;;  %v9470_v52 = vmul.f32 %v12097_v23, %v9452_v15  ;;  %v9471_v54 = vmul.f32 %v12097_v23, %v9453_v3 }
 0x613   :  { %v9472_v11 = vmul.f32 %v12097_v23, %v9454_v25  ;;  %v9473_v50 = vmul.f32 %v12097_v23, %v9455_v48  ;;  %v9474_v33 = vmul.f32 %v12097_v23, %v9456_v16  ;;  %v9475_v63 = vmul.f32 %v12097_v23, %v9457_v2 }
 0x614   :  { %v9476_v24 = vmul.f32 %v12097_v23, %v9458_v22  ;;  %v9477_v5 = vmul.f32 %v12097_v23, %v9459_v8  ;;  %v9478_v27 = vmul.f32 %v12097_v23, %v9460_v61  ;;  %v9479_v51 = vmul.f32 %v12097_v23, %v9461_v37 }
 0x615   :  { %v9486_v13 = vadd.f32 %v11262_v35, %v9464_v59  ;;  %v9487_v49 = vadd.f32 %v11262_v35, %v9465_v1  ;;  %v9488_v18 = vadd.f32 %v11262_v35, %v9466_v12  ;;  %v9489_v34 = vadd.f32 %v11262_v35, %v9467_v30 }
 0x616   :  { %v9490_v14 = vadd.f32 %v11262_v35, %v9468_v62  ;;  %v9491_v45 = vadd.f32 %v11262_v35, %v9469_v20  ;;  %v9492_v19 = vadd.f32 %v11262_v35, %v9470_v52  ;;  %v9493_v40 = vadd.f32 %v11262_v35, %v9471_v54 }
 0x617   :  { %v9494_v32 = vadd.f32 %v11262_v35, %v9472_v11  ;;  %v9495_v57 = vadd.f32 %v11262_v35, %v9473_v50  ;;  %v9496_v28 = vadd.f32 %v11262_v35, %v9474_v33  ;;  %v9497_v43 = vadd.f32 %v11262_v35, %v9475_v63 }
 0x618   :  { %v9498_v36 = vadd.f32 %v11262_v35, %v9476_v24  ;;  %v9499_v17 = vadd.f32 %v11262_v35, %v9477_v5  ;;  %v9500_v0 = vadd.f32 %v11262_v35, %v9478_v27  ;;  %v9501_v6 = vadd.f32 %v11262_v35, %v9479_v51 }
 0x619   :  { %vm9502_vm8 = vcmp.ge.f32.partialorder %v9486_v13, 0.0  ;;  %vm9503_vm10 = vcmp.ge.f32.partialorder %v9487_v49, 0.0  ;;  %vm9504_vm6 = vcmp.ge.f32.partialorder %v9488_v18, 0.0  ;;  %vm9505_vm1 = vcmp.ge.f32.partialorder %v9489_v34, 0.0 }
 0x61a   :  { %vm9506_vm15 = vcmp.ge.f32.partialorder %v9490_v14, 0.0  ;;  %vm9507_vm7 = vcmp.ge.f32.partialorder %v9491_v45, 0.0  ;;  %vm9508_vm11 = vcmp.ge.f32.partialorder %v9492_v19, 0.0  ;;  %vm9509_vm2 = vcmp.ge.f32.partialorder %v9493_v40, 0.0 }
 0x61b   :  { %vm9510_vm3 = vcmp.ge.f32.partialorder %v9494_v32, 0.0  ;;  %vm9511_vm12 = vcmp.ge.f32.partialorder %v9495_v57, 0.0  ;;  %vm9512_vm9 = vcmp.ge.f32.partialorder %v9496_v28, 0.0  ;;  %vm9513_vm4 = vcmp.ge.f32.partialorder %v9497_v43, 0.0 }
 0x61c   :  { %vm9514_vm14 = vcmp.ge.f32.partialorder %v9498_v36, 0.0  ;;  %vm9515_vm0 = vcmp.ge.f32.partialorder %v9499_v17, 0.0  ;;  %vm9516_vm5 = vcmp.ge.f32.partialorder %v9500_v0, 0.0  ;;  %vm9517_vm13 = vcmp.ge.f32.partialorder %v9501_v6, 0.0 }
 0x61d   :  { %v9518_v41 = vmul.f32 0.2, %v9486_v13  ;;  %v9519_v7 = vmul.f32 0.2, %v9487_v49  ;;  %v9520_v42 = vmul.f32 0.2, %v9488_v18 }
 0x61e   :  { %v9521_v38 = vmul.f32 0.2, %v9489_v34  ;;  %v9522_v58 = vmul.f32 0.2, %v9490_v14  ;;  %v9523_v53 = vmul.f32 0.2, %v9491_v45 }
 0x61f   :  { %v9524_v21 = vmul.f32 0.2, %v9492_v19  ;;  %v9525_v39 = vmul.f32 0.2, %v9493_v40  ;;  %v9526_v44 = vmul.f32 0.2, %v9494_v32  ;;  %v9534_v10 = vsel %vm9502_vm8, %v9486_v13, %v9518_v41 }
 0x620   :  { %v9527_v56 = vmul.f32 0.2, %v9495_v57  ;;  %v9528_v31 = vmul.f32 0.2, %v9496_v28  ;;  %v9529_v60 = vmul.f32 0.2, %v9497_v43  ;;  %v9535_v55 = vsel %vm9503_vm10, %v9487_v49, %v9519_v7 }
 0x621   :  { %9563 = vst [vmem:[#allocation3 + $0x9] sm:$0xf] %v9534_v10  ;;  %v9530_v46 = vmul.f32 0.2, %v9498_v36  ;;  %v9531_v9 = vmul.f32 0.2, %v9499_v17  ;;  %v9536_v47 = vsel %vm9504_vm6, %v9488_v18, %v9520_v42  ;;  %v9537_v29 = vsel %vm9505_vm1, %v9489_v34, %v9521_v38 }
 0x622   :  { %v9532_v4 = vmul.f32 0.2, %v9500_v0  ;;  %9565 = vst [vmem:[#allocation3 + $0x19] sm:$0xf] %v9535_v55  ;;  %v9533_v26 = vmul.f32 0.2, %v9501_v6  ;;  %v9538_v15 = vsel %vm9506_vm15, %v9490_v14, %v9522_v58  ;;  %v9539_v3 = vsel %vm9507_vm7, %v9491_v45, %v9523_v53 }
 0x623   :  { %9567 = vst [vmem:[#allocation3 + $0x39] sm:$0xf] %v9536_v47  ;;  %v9540_v25 = vsel %vm9508_vm11, %v9492_v19, %v9524_v21  ;;  %v9541_v48 = vsel %vm9509_vm2, %v9493_v40, %v9525_v39  ;;  %v9542_v16 = vsel %vm9510_vm3, %v9494_v32, %v9526_v44  ;;  %v9543_v2 = vsel %vm9511_vm12, %v9495_v57, %v9527_v56 }
 0x624   :  { %9569 = vst [vmem:[#allocation3 + $0x49] sm:$0xf] %v9537_v29  ;;  %9584 = vst [vmem:[#allocation3 + $0x69] sm:$0xf] %v9538_v15  ;;  %v9544_v23 = vsel %vm9512_vm9, %v9496_v28, %v9528_v31  ;;  %v9545_v22 = vsel %vm9513_vm4, %v9497_v43, %v9529_v60  ;;  %v9546_v8 = vsel %vm9514_vm14, %v9498_v36, %v9530_v46 }
 0x625   :  { %9586 = vst [vmem:[#allocation3 + $0x79] sm:$0xf] %v9539_v3  ;;  %v9547_v61 = vsel %vm9515_vm0, %v9499_v17, %v9531_v9  ;;  %9588 = vst [vmem:[#allocation3 + $0x99] sm:$0xf] %v9540_v25  ;;  %v9548_v37 = vsel %vm9516_vm5, %v9500_v0, %v9532_v4  ;;  %v9549_v59 = vsel %vm9517_vm13, %v9501_v6, %v9533_v26 }
 0x626   :  { %9590 = vst [vmem:[#allocation3 + $0xa9] sm:$0xf] %v9541_v48  ;;  %9605 = vst [vmem:[#allocation3 + $0xc9] sm:$0xf] %v9542_v16  ;;  %v9554_v1 = vcombine.high %v9534_v10, %v9534_v10  ;;  %v9555_v12 = vcombine.high %v9535_v55, %v9535_v55  ;;  %v9556_v30 = vcombine.high %v9536_v47, %v9536_v47 }
 0x627   :  { %9607 = vst [vmem:[#allocation3 + $0xd9] sm:$0xf] %v9543_v2  ;;  %9609 = vst [vmem:[#allocation3 + $0xf9] sm:$0xf] %v9544_v23  ;;  %v9557_v35 = vcombine.high %v9537_v29, %v9537_v29  ;;  %v9575_v62 = vcombine.high %v9538_v15, %v9538_v15  ;;  %v9576_v20 = vcombine.high %v9539_v3, %v9539_v3 }
 0x628   :  { %9611 = vst [vmem:[#allocation3 + $0x109] sm:$0xf] %v9545_v22  ;;  %9626 = vst [vmem:[#allocation3 + $0x129] sm:$0xf] %v9546_v8  ;;  %v9577_v52 = vcombine.high %v9540_v25, %v9540_v25  ;;  %v9578_v54 = vcombine.high %v9541_v48, %v9541_v48  ;;  %v9596_v11 = vcombine.high %v9542_v16, %v9542_v16 }
 0x629   :  { %9628 = vst [vmem:[#allocation3 + $0x139] sm:$0xf] %v9547_v61  ;;  %9630 = vst [vmem:[#allocation3 + $0x159] sm:$0xf] %v9548_v37  ;;  %v9597_v50 = vcombine.high %v9543_v2, %v9543_v2  ;;  %v9598_v33 = vcombine.high %v9544_v23, %v9544_v23  ;;  %v9599_v63 = vcombine.high %v9545_v22, %v9545_v22 }
 0x62a   :  { %9632 = vst [vmem:[#allocation3 + $0x169] sm:$0xf] %v9549_v59  ;;  %9564 = vst [vmem:[#allocation3 + $0x11] sm:$0xf] %v9554_v1  ;;  %v9617_v24 = vcombine.high %v9546_v8, %v9546_v8  ;;  %v9618_v5 = vcombine.high %v9547_v61, %v9547_v61  ;;  %v9619_v27 = vcombine.high %v9548_v37, %v9548_v37 }
 0x62b   :  { %9566 = vst [vmem:[#allocation3 + $0x21] sm:$0xf] %v9555_v12  ;;  %9568 = vst [vmem:[#allocation3 + $0x41] sm:$0xf] %v9556_v30  ;;  %v9620_v51 = vcombine.high %v9549_v59, %v9549_v59 }
 0x62c   :  { %9570 = vst [vmem:[#allocation3 + $0x51] sm:$0xf] %v9557_v35  ;;  %9585 = vst [vmem:[#allocation3 + $0x71] sm:$0xf] %v9575_v62 }
 0x62d   :  { %9587 = vst [vmem:[#allocation3 + $0x81] sm:$0xf] %v9576_v20  ;;  %9589 = vst [vmem:[#allocation3 + $0xa1] sm:$0xf] %v9577_v52  ;;  %v16623_v13 = vld [vmem:[#allocation3 + $0xc1] ss:$8 sps:$4 sm:$0xff]  }
 0x62e   :  { %9591 = vst [vmem:[#allocation3 + $0xb1] sm:$0xf] %v9578_v54  ;;  %9606 = vst [vmem:[#allocation3 + $0xd1] sm:$0xf] %v9596_v11  ;;  %v16629_v34 = vld [vmem:[#allocation3 + $0xf1] ss:$8 sps:$4 sm:$0xff]  }
 0x62f   :  { %9608 = vst [vmem:[#allocation3 + $0xe1] sm:$0xf] %v9597_v50  ;;  %9610 = vst [vmem:[#allocation3 + $0x101] sm:$0xf] %v9598_v33  ;;  %v16625_v49 = vld [vmem:[#allocation3 + $0x120] ss:$8 sps:$4 sm:$0xff]  }
 0x630   :  { %9612 = vst [vmem:[#allocation3 + $0x111] sm:$0xf] %v9599_v63  ;;  %9627 = vst [vmem:[#allocation3 + $0x131] sm:$0xf] %v9617_v24  ;;  %v16627_v18 = vld [vmem:[#allocation3 + $0x150] ss:$8 sps:$4 sm:$0xff]  }
 0x631   :  { %9629 = vst [vmem:[#allocation3 + $0x141] sm:$0xf] %v9618_v5  ;;  %9631 = vst [vmem:[#allocation3 + $0x161] sm:$0xf] %v9619_v27  ;;  %v16639_v32 = vld [vmem:[#allocation3 + $0x121] ss:$8 sps:$4 sm:$0xff]  }
 0x632   :  { %9633 = vst [vmem:[#allocation3 + $0x171] sm:$0xf] %v9620_v51  ;;  %v16643_v28 = vld [vmem:[#allocation3 + $0x151] ss:$8 sps:$4 sm:$0xff]   ;;  %v16647_v36 = vld [vmem:[#allocation3 + $0xc2] ss:$8 sps:$4 sm:$0xff]  }
 0x633   :  { %v16651_v0 = vld [vmem:[#allocation3 + $0xf2] ss:$8 sps:$4 sm:$0xff]   ;;  %v16725_v20 = vld [vmem:[#allocation3 + $0x21] ss:$8 sps:$4 sm:$0xff]  }
 0x634   :  { %v16655_v41 = vld [vmem:[#allocation3 + $0x68] ss:$8 sps:$4 sm:$0xff]   ;;  %v16657_v7 = vld [vmem:[#allocation3 + $0x78] ss:$8 sps:$4 sm:$0xff]  }
 0x635   :  { %v16631_v14 = vld [vmem:[#allocation3 + $0xd1] ss:$8 sps:$4 sm:$0xff]   ;;  %v16717_v12 = vld [vmem:[#allocation3 + $0x80] ss:$8 sps:$4 sm:$0xff]  }
 0x636   :  { %v16637_v40 = vld [vmem:[#allocation3 + $0x101] ss:$8 sps:$4 sm:$0xff]   ;;  %v16649_v17 = vld [vmem:[#allocation3 + $0xd2] ss:$8 sps:$4 sm:$0xff]  }
 0x637   :  { %v16633_v45 = vld [vmem:[#allocation3 + $0x130] ss:$8 sps:$4 sm:$0xff]   ;;  %v16653_v6 = vld [vmem:[#allocation3 + $0x102] ss:$8 sps:$4 sm:$0xff]  }
 0x638   :  { %v16635_v19 = vld [vmem:[#allocation3 + $0x160] ss:$8 sps:$4 sm:$0xff]   ;;  %v16641_v57 = vld [vmem:[#allocation3 + $0x131] ss:$8 sps:$4 sm:$0xff]  }
 0x639   :  { %v16645_v43 = vld [vmem:[#allocation3 + $0x161] ss:$8 sps:$4 sm:$0xff]   ;;  %v16715_v1 = vld [vmem:[#allocation3 + $0x70] ss:$8 sps:$4 sm:$0xff]  }
 0x63a   :  { %v16659_v42 = vld [vmem:[#allocation3 + $0x98] ss:$8 sps:$4 sm:$0xff]   ;;  %v16661_v38 = vld [vmem:[#allocation3 + $0xa8] ss:$8 sps:$4 sm:$0xff]  }
 0x63b   :  { %v12050_v58 = vld [vmem:[#allocation3 + $0x9] ss:$8 sps:$4 sm:$0xff]   ;;  %v12051_v53 = vld [vmem:[#allocation3 + $0x19] ss:$8 sps:$4 sm:$0xff]  }
 0x63c   :  { %v16663_v21 = vld [vmem:[#allocation3 + $0x39] ss:$8 sps:$4 sm:$0xff]   ;;  %v16665_v39 = vld [vmem:[#allocation3 + $0x49] ss:$8 sps:$4 sm:$0xff]  }
 0x63d   :  { %v16667_v44 = vld [vmem:[#allocation3 + $0x69] ss:$8 sps:$4 sm:$0xff]   ;;  %v16669_v10 = vld [vmem:[#allocation3 + $0x79] ss:$8 sps:$4 sm:$0xff]  }
 0x63e   :  { %v16671_v56 = vld [vmem:[#allocation3 + $0x99] ss:$8 sps:$4 sm:$0xff]   ;;  %v16673_v31 = vld [vmem:[#allocation3 + $0xa9] ss:$8 sps:$4 sm:$0xff]  }
 0x63f   :  { %v16675_v60 = vld [vmem:[#allocation3 + $0xa] ss:$8 sps:$4 sm:$0xff]   ;;  %v16677_v55 = vld [vmem:[#allocation3 + $0x1a] ss:$8 sps:$4 sm:$0xff]  }
 0x640   :  { %v16679_v46 = vld [vmem:[#allocation3 + $0x3a] ss:$8 sps:$4 sm:$0xff]   ;;  %v16681_v9 = vld [vmem:[#allocation3 + $0x4a] ss:$8 sps:$4 sm:$0xff]  }
 0x641   :  { %v16683_v4 = vld [vmem:[#allocation3 + $0x128] ss:$8 sps:$4 sm:$0xff]   ;;  %v16685_v47 = vld [vmem:[#allocation3 + $0x138] ss:$8 sps:$4 sm:$0xff]  }
 0x642   :  { %v16687_v26 = vld [vmem:[#allocation3 + $0x158] ss:$8 sps:$4 sm:$0xff]   ;;  %v16689_v29 = vld [vmem:[#allocation3 + $0x168] ss:$8 sps:$4 sm:$0xff]  }
 0x643   :  { %v16691_v15 = vld [vmem:[#allocation3 + $0xc9] ss:$8 sps:$4 sm:$0xff]   ;;  %v16693_v3 = vld [vmem:[#allocation3 + $0xd9] ss:$8 sps:$4 sm:$0xff]  }
 0x644   :  { %v16695_v25 = vld [vmem:[#allocation3 + $0xf9] ss:$8 sps:$4 sm:$0xff]   ;;  %v16697_v48 = vld [vmem:[#allocation3 + $0x109] ss:$8 sps:$4 sm:$0xff]  }
 0x645   :  { %v16699_v16 = vld [vmem:[#allocation3 + $0x129] ss:$8 sps:$4 sm:$0xff]   ;;  %v16701_v2 = vld [vmem:[#allocation3 + $0x139] ss:$8 sps:$4 sm:$0xff]  }
 0x646   :  { %v16703_v23 = vld [vmem:[#allocation3 + $0x159] ss:$8 sps:$4 sm:$0xff]   ;;  %v16705_v22 = vld [vmem:[#allocation3 + $0x169] ss:$8 sps:$4 sm:$0xff]  }
 0x647   :  { %v16707_v8 = vld [vmem:[#allocation3 + $0xca] ss:$8 sps:$4 sm:$0xff]   ;;  %v16709_v61 = vld [vmem:[#allocation3 + $0xda] ss:$8 sps:$4 sm:$0xff]  }
 0x648   :  { %v16711_v37 = vld [vmem:[#allocation3 + $0xfa] ss:$8 sps:$4 sm:$0xff]   ;;  %v16713_v59 = vld [vmem:[#allocation3 + $0x10a] ss:$8 sps:$4 sm:$0xff]  }
 0x649   :  { %v16719_v30 = vld [vmem:[#allocation3 + $0xa0] ss:$8 sps:$4 sm:$0xff]   ;;  %v16721_v35 = vld [vmem:[#allocation3 + $0xb0] ss:$8 sps:$4 sm:$0xff]  }
 0x64a   :  { %17343 = vst [vmem:[#allocation19_spill] sm:$0xff] %v16719_v30  ;;  %17344 = vst [vmem:[#allocation16_spill] sm:$0xff] %v16721_v35  ;;  %v16723_v62 = vld [vmem:[#allocation3 + $0x11] ss:$8 sps:$4 sm:$0xff]   ;;  %v16727_v52 = vld [vmem:[#allocation3 + $0x41] ss:$8 sps:$4 sm:$0xff]  }
 0x64b   :  { %v16729_v54 = vld [vmem:[#allocation3 + $0x51] ss:$8 sps:$4 sm:$0xff]   ;;  %v16733_v50 = vld [vmem:[#allocation3 + $0x81] ss:$8 sps:$4 sm:$0xff]  }
 0x64c   :  { %17345 = vst [vmem:[#allocation18_spill] sm:$0xff] %v16729_v54  ;;  %v16731_v11 = vld [vmem:[#allocation3 + $0x71] ss:$8 sps:$4 sm:$0xff]   ;;  %17347 = vst [vmem:[#allocation27_spill] sm:$0xff] %v16733_v50  ;;  %v16735_v33 = vld [vmem:[#allocation3 + $0xa1] ss:$8 sps:$4 sm:$0xff]  }
 0x64d   :  { %17346 = vst [vmem:[#allocation26_spill] sm:$0xff] %v16731_v11  ;;  %17348 = vst [vmem:[#allocation28_spill] sm:$0xff] %v16735_v33  ;;  %v16737_v63 = vld [vmem:[#allocation3 + $0xb1] ss:$8 sps:$4 sm:$0xff]   ;;  %v16741_v5 = vld [vmem:[#allocation3 + $0x22] ss:$8 sps:$4 sm:$0xff]  }
 0x64e   :  { %17349 = vst [vmem:[#allocation42_spill] sm:$0xff] %v16737_v63  ;;  %v16739_v24 = vld [vmem:[#allocation3 + $0x12] ss:$8 sps:$4 sm:$0xff]   ;;  %17350 = vst [vmem:[#allocation35_spill] sm:$0xff] %v16741_v5  ;;  %v16743_v27 = vld [vmem:[#allocation3 + $0x42] ss:$8 sps:$4 sm:$0xff]  }
 0x64f   :  { %17351 = vst [vmem:[#allocation36_spill] sm:$0xff] %v16743_v27  ;;  %v16745_v51 = vld [vmem:[#allocation3 + $0x52] ss:$8 sps:$4 sm:$0xff]  }
 0x650   :  { %17352 = vst [vmem:[#allocation38_spill] sm:$0xff] %v16745_v51 }
 0x651   :  { %12102 = dma.done.wait [#allocation7], 32768 }
 0x652   :  { %12103 = vsyncadd [#allocation7], 4294934528  ;;  %v10159_v35 = vpack.c.bf16 %v12051_v53, %v12050_v58  ;;  %v10251_v30 = vld [vmem:[#allocation6 + $0x208] sm:$0xff]  ;;  %v10250_v11 = vld [vmem:[#allocation6 + $0x200] sm:$0xff]  ;;  %vm11053_vm3 = vcmask 1041409   ;;  %vm11059_vm12 = vcmask 1041408  }
 0x653   :  { %v10253_v54 = vld [vmem:[#allocation6 + $0x218] sm:$0xff]  ;;  %10548 = vmatprep.subr.bf16.mxu0 %v10251_v30  ;;  %v10252_v33 = vld [vmem:[#allocation6 + $0x210] sm:$0xff]  ;;  %v10255_v63 = vld [vmem:[#allocation6 + $0x228] sm:$0xff]  ;;  %vm11068_vm9 = vcmask 1024  }
 0x654   :  { %10580 = vmatprep.mubr.bf16.mxu0 %v10159_v35  ;;  %10549 = vmatpush1.bf16.msra.mxu0 %v10250_v11  ;;  %v10254_v50 = vld [vmem:[#allocation6 + $0x220] sm:$0xff]  ;;  %v10257_v5 = vld [vmem:[#allocation6 + $0x238] sm:$0xff]  ;;  %v10256_v27 = vld [vmem:[#allocation6 + $0x230] sm:$0xff] }
 0x655   :  { %10550 = vmatprep.subr.bf16.mxu0 %v10253_v54  ;;  %v10259_v51 = vld [vmem:[#allocation6 + $0x248] sm:$0xff]  ;;  %v10258_v58 = vld [vmem:[#allocation6 + $0x240] sm:$0xff]  ;;  %v10261_v53 = vld [vmem:[#allocation6 + $0x258] sm:$0xff] }
 0x656   :  { %v10260_v35 = vld [vmem:[#allocation6 + $0x250] sm:$0xff]  ;;  %v10263_v30 = vld [vmem:[#allocation6 + $0x268] sm:$0xff]  ;;  %v10262_v54 = vld [vmem:[#allocation6 + $0x260] sm:$0xff] }
 0x657   :  { %v10265_v11 = vld [vmem:[#allocation6 + $0x278] sm:$0xff] }
 0x658   :  { %10551 = vmatpush1.bf16.msra.mxu0 %v10252_v33  ;;  %v10264_v33 = vld [vmem:[#allocation6 + $0x270] sm:$0xff] }
 0x659   :  { %10552 = vmatprep.subr.bf16.mxu0 %v10255_v63  ;;  %v10267_v63 = vld [vmem:[#allocation6 + $0x288] sm:$0xff] }
 0x65c   :  { %10553 = vmatpush1.bf16.msra.mxu0 %v10254_v50  ;;  %v10266_v50 = vld [vmem:[#allocation6 + $0x280] sm:$0xff] }
 0x65d   :  { %10554 = vmatprep.subr.bf16.mxu0 %v10257_v5  ;;  %v10269_v5 = vld [vmem:[#allocation6 + $0x298] sm:$0xff] }
 0x660   :  { %10555 = vmatpush1.bf16.msra.mxu0 %v10256_v27  ;;  %v10268_v27 = vld [vmem:[#allocation6 + $0x290] sm:$0xff] }
 0x661   :  { %10556 = vmatprep.subr.bf16.mxu0 %v10259_v51  ;;  %v10271_v51 = vld [vmem:[#allocation6 + $0x2a8] sm:$0xff] }
 0x664   :  { %10557 = vmatpush1.bf16.msra.mxu0 %v10258_v58  ;;  %v10270_v58 = vld [vmem:[#allocation6 + $0x2a0] sm:$0xff] }
 0x665   :  { %10558 = vmatprep.subr.bf16.mxu0 %v10261_v53  ;;  %v10273_v53 = vld [vmem:[#allocation6 + $0x2b8] sm:$0xff] }
 0x668   :  { %10559 = vmatpush1.bf16.msra.mxu0 %v10260_v35  ;;  %v10272_v35 = vld [vmem:[#allocation6 + $0x2b0] sm:$0xff] }
 0x669   :  { %10560 = vmatprep.subr.bf16.mxu0 %v10263_v30  ;;  %v10275_v30 = vld [vmem:[#allocation6 + $0x2c8] sm:$0xff] }
 0x66c   :  { %10561 = vmatpush1.bf16.msra.mxu0 %v10262_v54  ;;  %v10274_v54 = vld [vmem:[#allocation6 + $0x2c0] sm:$0xff] }
 0x66d   :  { %10562 = vmatprep.subr.bf16.mxu0 %v10265_v11  ;;  %v10277_v11 = vld [vmem:[#allocation6 + $0x2d8] sm:$0xff] }
 0x670   :  { %10563 = vmatpush1.bf16.msra.mxu0 %v10264_v33  ;;  %v10276_v33 = vld [vmem:[#allocation6 + $0x2d0] sm:$0xff] }
 0x671   :  { %10564 = vmatprep.subr.bf16.mxu0 %v10267_v63  ;;  %v10279_v63 = vld [vmem:[#allocation6 + $0x2e8] sm:$0xff] }
 0x674   :  { %10565 = vmatpush1.bf16.msra.mxu0 %v10266_v50  ;;  %v10278_v50 = vld [vmem:[#allocation6 + $0x2e0] sm:$0xff] }
 0x675   :  { %10566 = vmatprep.subr.bf16.mxu0 %v10269_v5  ;;  %v10281_v5 = vld [vmem:[#allocation6 + $0x2f8] sm:$0xff] }
 0x678   :  { %10567 = vmatpush1.bf16.msra.mxu0 %v10268_v27  ;;  %v10280_v27 = vld [vmem:[#allocation6 + $0x2f0] sm:$0xff] }
 0x679   :  { %10568 = vmatprep.subr.bf16.mxu0 %v10271_v51  ;;  %v10283_v51 = vld [vmem:[#allocation6 + $0x308] sm:$0xff] }
 0x67c   :  { %10569 = vmatpush1.bf16.msra.mxu0 %v10270_v58  ;;  %v10158_v58 = vpack.c.bf16 %v16657_v7, %v16655_v41  ;;  %v10287_v41 = vld [vmem:[#allocation6 + $0x328] sm:$0xff]  ;;  %v10174_v7 = vpack.c.bf16 %v16661_v38, %v16659_v42 }
 0x67d   :  { %10570 = vmatprep.subr.bf16.mxu0 %v10273_v53  ;;  %v10175_v53 = vpack.c.bf16 %v16665_v39, %v16663_v21  ;;  %v10161_v21 = vpack.c.bf16 %v16677_v55, %v16675_v60  ;;  %v10191_v39 = vld [vmem:[#allocation6 + $0x28] sm:$0xff]  ;;  %v10194_v60 = vld [vmem:[#allocation6 + $0x40] sm:$0xff] }
 0x67e   :  { %v10291_v42 = vld [vmem:[#allocation6 + $0x348] sm:$0xff]  ;;  %v10290_v55 = vld [vmem:[#allocation6 + $0x340] sm:$0xff] }
 0x67f   :  { %v10195_v38 = vld [vmem:[#allocation6 + $0x48] sm:$0xff] }
 0x680   :  { %10571 = vmatpush1.bf16.msra.mxu0 %v10272_v35  ;;  %v10187_v35 = vld [vmem:[#allocation6 + $0x8] sm:$0xff] }
 0x681   :  { %10572 = vmatprep.subr.bf16.mxu0 %v10275_v30  ;;  %v10186_v30 = vld [vmem:[#allocation6] sm:$0xff]  ;;  %10442 = vmatprep.subr.bf16.mxu1 %v10187_v35  ;;  %v10288_v35 = vld [vmem:[#allocation6 + $0x330] sm:$0xff] }
 0x682   :  { %10443 = vmatpush1.bf16.msra.mxu1 %v10186_v30  ;;  %v10293_v30 = vld [vmem:[#allocation6 + $0x358] sm:$0xff] }
 0x684   :  { %10573 = vmatpush1.bf16.msra.mxu0 %v10274_v54  ;;  %v10282_v54 = vld [vmem:[#allocation6 + $0x300] sm:$0xff] }
 0x685   :  { %10574 = vmatprep.subr.bf16.mxu0 %v10277_v11  ;;  %v10285_v11 = vld [vmem:[#allocation6 + $0x318] sm:$0xff] }
 0x688   :  { %10575 = vmatpush1.bf16.msra.mxu0 %v10276_v33  ;;  %v10189_v33 = vld [vmem:[#allocation6 + $0x18] sm:$0xff] }
 0x689   :  { %10576 = vmatprep.subr.bf16.mxu0 %v10279_v63  ;;  %v10188_v63 = vld [vmem:[#allocation6 + $0x10] sm:$0xff]  ;;  %10444 = vmatprep.subr.bf16.mxu1 %v10189_v33 }
 0x68a   :  { %10445 = vmatpush1.bf16.msra.mxu1 %v10188_v63  ;;  %v10292_v33 = vld [vmem:[#allocation6 + $0x350] sm:$0xff]  ;;  %v10295_v63 = vld [vmem:[#allocation6 + $0x368] sm:$0xff] }
 0x68b   :  { %10446 = vmatprep.subr.bf16.mxu1 %v10191_v39  ;;  %v10201_v39 = vld [vmem:[#allocation6 + $0x78] sm:$0xff] }
 0x68c   :  { %10577 = vmatpush1.bf16.msra.mxu0 %v10278_v50  ;;  %v10284_v50 = vld [vmem:[#allocation6 + $0x310] sm:$0xff] }
 0x68d   :  { %10578 = vmatprep.subr.bf16.mxu0 %v10281_v5  ;;  %v10190_v5 = vld [vmem:[#allocation6 + $0x20] sm:$0xff] }
 0x68e   :  { %10447 = vmatpush1.bf16.msra.mxu1 %v10190_v5  ;;  %v10200_v5 = vld [vmem:[#allocation6 + $0x70] sm:$0xff] }
 0x690   :  { %10579 = vmatpush1.bf16.msra.mxu0 %v10280_v27  ;;  %v10286_v27 = vld [vmem:[#allocation6 + $0x320] sm:$0xff] }
 0x691   :  { %10601 = vmatprep.subr.bf16.mxu0 %v10283_v51  ;;  %v10289_v51 = vld [vmem:[#allocation6 + $0x338] sm:$0xff] }
 0x693   :  { %10581 = vmatmul.mubr.bf16.vlgmr.msra.gmra.mrb[32].mxu0 %v10158_v58  ;;  %v10193_v58 = vld [vmem:[#allocation6 + $0x38] sm:$0xff] }
 0x694   :  { %10602 = vmatpush1.bf16.msra.mxu0 %v10282_v54  ;;  %10590 = vmatprep.mubr.bf16.mxu0 %v10175_v53  ;;  %v10192_v53 = vld [vmem:[#allocation6 + $0x30] sm:$0xff]  ;;  %v10197_v54 = vld [vmem:[#allocation6 + $0x58] sm:$0xff] }
 0x695   :  { %10603 = vmatprep.subr.bf16.mxu0 %v10285_v11  ;;  %10448 = vmatprep.subr.bf16.mxu1 %v10193_v58  ;;  %v10196_v11 = vld [vmem:[#allocation6 + $0x50] sm:$0xff]  ;;  %v10203_v58 = vld [vmem:[#allocation6 + $0x88] sm:$0xff] }
 0x696   :  { %10449 = vmatpush1.bf16.msra.mxu1 %v10192_v53  ;;  %v10202_v53 = vld [vmem:[#allocation6 + $0x80] sm:$0xff] }
 0x697   :  { %10450 = vmatprep.subr.bf16.mxu1 %v10195_v38  ;;  %v10205_v38 = vld [vmem:[#allocation6 + $0x98] sm:$0xff] }
 0x698   :  { %10604 = vmatpush1.bf16.msra.mxu0 %v10284_v50  ;;  %v10199_v50 = vld [vmem:[#allocation6 + $0x68] sm:$0xff] }
 0x699   :  { %10605 = vmatprep.subr.bf16.mxu0 %v10287_v41  ;;  %v10198_v41 = vld [vmem:[#allocation6 + $0x60] sm:$0xff] }
 0x69a   :  { %10451 = vmatpush1.bf16.msra.mxu1 %v10194_v60  ;;  %v10204_v60 = vld [vmem:[#allocation6 + $0x90] sm:$0xff] }
 0x69b   :  { %10591 = vmatmul.mubr.bf16.gmra.mrb[36].mxu0 %v10174_v7  ;;  %10452 = vmatprep.subr.bf16.mxu1 %v10197_v54  ;;  %v10294_v7 = vld [vmem:[#allocation6 + $0x360] sm:$0xff]  ;;  %v10207_v54 = vld [vmem:[#allocation6 + $0xa8] sm:$0xff] }
 0x69c   :  { %10606 = vmatpush1.bf16.msra.mxu0 %v10286_v27  ;;  %10633 = vmatprep.mubr.bf16.mxu0 %v10161_v21  ;;  %v10297_v21 = vld [vmem:[#allocation6 + $0x378] sm:$0xff]  ;;  %v10296_v27 = vld [vmem:[#allocation6 + $0x370] sm:$0xff] }
 0x69d   :  { %10607 = vmatprep.subr.bf16.mxu0 %v10289_v51  ;;  %v10299_v51 = vld [vmem:[#allocation6 + $0x388] sm:$0xff] }
 0x69e   :  { %10453 = vmatpush1.bf16.msra.mxu1 %v10196_v11  ;;  %v10206_v11 = vld [vmem:[#allocation6 + $0xa0] sm:$0xff] }
 0x69f   :  { %10454 = vmatprep.subr.bf16.mxu1 %v10199_v50  ;;  %v10209_v50 = vld [vmem:[#allocation6 + $0xb8] sm:$0xff] }
 0x6a0   :  { %10608 = vmatpush1.bf16.msra.mxu0 %v10288_v35  ;;  %v10298_v35 = vld [vmem:[#allocation6 + $0x380] sm:$0xff] }
 0x6a1   :  { %10609 = vmatprep.subr.bf16.mxu0 %v10291_v42  ;;  %v10301_v42 = vld [vmem:[#allocation6 + $0x398] sm:$0xff] }
 0x6a2   :  { %10455 = vmatpush1.bf16.msra.mxu1 %v10198_v41  ;;  %v10208_v41 = vld [vmem:[#allocation6 + $0xb0] sm:$0xff] }
 0x6a3   :  { %10456 = vmatprep.subr.bf16.mxu1 %v10201_v39  ;;  %v10211_v39 = vld [vmem:[#allocation6 + $0xc8] sm:$0xff] }
 0x6a4   :  { %10610 = vmatpush1.bf16.msra.mxu0 %v10290_v55  ;;  %v10300_v55 = vld [vmem:[#allocation6 + $0x390] sm:$0xff] }
 0x6a5   :  { %10611 = vmatprep.subr.bf16.mxu0 %v10293_v30  ;;  %v10303_v30 = vld [vmem:[#allocation6 + $0x3a8] sm:$0xff] }
 0x6a6   :  { %10457 = vmatpush1.bf16.msra.mxu1 %v10200_v5  ;;  %v10210_v5 = vld [vmem:[#allocation6 + $0xc0] sm:$0xff] }
 0x6a7   :  { %10458 = vmatprep.subr.bf16.mxu1 %v10203_v58  ;;  %v10213_v58 = vld [vmem:[#allocation6 + $0xd8] sm:$0xff] }
 0x6a8   :  { %10612 = vmatpush1.bf16.msra.mxu0 %v10292_v33  ;;  %v10302_v33 = vld [vmem:[#allocation6 + $0x3a0] sm:$0xff] }
 0x6a9   :  { %10613 = vmatprep.subr.bf16.mxu0 %v10295_v63  ;;  %v10305_v63 = vld [vmem:[#allocation6 + $0x3b8] sm:$0xff] }
 0x6aa   :  { %10459 = vmatpush1.bf16.msra.mxu1 %v10202_v53  ;;  %v10212_v53 = vld [vmem:[#allocation6 + $0xd0] sm:$0xff] }
 0x6ab   :  { %10460 = vmatprep.subr.bf16.mxu1 %v10205_v38  ;;  %v10215_v38 = vld [vmem:[#allocation6 + $0xe8] sm:$0xff] }
 0x6ac   :  { %10614 = vmatpush1.bf16.msra.mxu0 %v10294_v7  ;;  %v10304_v7 = vld [vmem:[#allocation6 + $0x3b0] sm:$0xff] }
 0x6ad   :  { %10615 = vmatprep.subr.bf16.mxu0 %v10297_v21  ;;  %v10307_v21 = vld [vmem:[#allocation6 + $0x3c8] sm:$0xff] }
 0x6ae   :  { %10461 = vmatpush1.bf16.msra.mxu1 %v10204_v60  ;;  %v10214_v60 = vld [vmem:[#allocation6 + $0xe0] sm:$0xff] }
 0x6af   :  { %10462 = vmatprep.subr.bf16.mxu1 %v10207_v54  ;;  %v10217_v54 = vld [vmem:[#allocation6 + $0xf8] sm:$0xff] }
 0x6b0   :  { %10616 = vmatpush1.bf16.msra.mxu0 %v10296_v27  ;;  %v10306_v27 = vld [vmem:[#allocation6 + $0x3c0] sm:$0xff] }
 0x6b1   :  { %10617 = vmatprep.subr.bf16.mxu0 %v10299_v51  ;;  %v10309_v51 = vld [vmem:[#allocation6 + $0x3d8] sm:$0xff] }
 0x6b2   :  { %10463 = vmatpush1.bf16.msra.mxu1 %v10206_v11  ;;  %v10216_v11 = vld [vmem:[#allocation6 + $0xf0] sm:$0xff] }
 0x6b3   :  { %10464 = vmatprep.subr.bf16.mxu1 %v10209_v50  ;;  %v10160_v50 = vpack.c.bf16 %v16669_v10, %v16667_v44  ;;  %v10316_v44 = vld [vmem:[#allocation6 + $0x410] sm:$0xff]  ;;  %v10319_v10 = vld [vmem:[#allocation6 + $0x428] sm:$0xff] }
 0x6b4   :  { %10618 = vmatpush1.bf16.msra.mxu0 %v10298_v35  ;;  %v10308_v35 = vld [vmem:[#allocation6 + $0x3d0] sm:$0xff] }
 0x6b5   :  { %10619 = vmatprep.subr.bf16.mxu0 %v10301_v42  ;;  %v10311_v42 = vld [vmem:[#allocation6 + $0x3e8] sm:$0xff] }
 0x6b6   :  { %10465 = vmatpush1.bf16.msra.mxu1 %v10208_v41  ;;  %v10155_v41 = vpack.c.bf16 %v16631_v14, %v16623_v13  ;;  %v10221_v13 = vld [vmem:[#allocation6 + $0x118] sm:$0xff]  ;;  %v10220_v14 = vld [vmem:[#allocation6 + $0x110] sm:$0xff] }
 0x6b7   :  { %10466 = vmatprep.subr.bf16.mxu1 %v10211_v39  ;;  %v10154_v39 = vpack.c.bf16 %v16633_v45, %v16625_v49  ;;  %v10176_v49 = vpack.c.bf16 %v16673_v31, %v16671_v56  ;;  %v10163_v45 = vpack.c.bf16 %v16693_v3, %v16691_v15  ;;  %v10323_v56 = vld [vmem:[#allocation6 + $0x448] sm:$0xff]  ;;  %v10226_v15 = vld [vmem:[#allocation6 + $0x140] sm:$0xff] }
 0x6b8   :  { %10620 = vmatpush1.bf16.msra.mxu0 %v10300_v55  ;;  %v10310_v55 = vld [vmem:[#allocation6 + $0x3e0] sm:$0xff]  ;;  %10474 = vmatprep.mubr.bf16.mxu1 %v10155_v41  ;;  %v10227_v31 = vld [vmem:[#allocation6 + $0x148] sm:$0xff]  ;;  %v10329_v41 = vld [vmem:[#allocation6 + $0x478] sm:$0xff] }
 0x6b9   :  { %10621 = vmatprep.subr.bf16.mxu0 %v10303_v30  ;;  %v10313_v30 = vld [vmem:[#allocation6 + $0x3f8] sm:$0xff]  ;;  %v10322_v3 = vld [vmem:[#allocation6 + $0x440] sm:$0xff] }
 0x6ba   :  { %10467 = vmatpush1.bf16.msra.mxu1 %v10210_v5  ;;  %v10218_v5 = vld [vmem:[#allocation6 + $0x100] sm:$0xff] }
 0x6bb   :  { %10468 = vmatprep.subr.bf16.mxu1 %v10213_v58  ;;  %v10318_v58 = vld [vmem:[#allocation6 + $0x420] sm:$0xff] }
 0x6bc   :  { %10622 = vmatpush1.bf16.msra.mxu0 %v10302_v33  ;;  %v10312_v33 = vld [vmem:[#allocation6 + $0x3f0] sm:$0xff] }
 0x6bd   :  { %10623 = vmatprep.subr.bf16.mxu0 %v10305_v63  ;;  %v10315_v63 = vld [vmem:[#allocation6 + $0x408] sm:$0xff] }
 0x6be   :  { %10469 = vmatpush1.bf16.msra.mxu1 %v10212_v53  ;;  %v10321_v53 = vld [vmem:[#allocation6 + $0x438] sm:$0xff] }
 0x6bf   :  { %10470 = vmatprep.subr.bf16.mxu1 %v10215_v38  ;;  %v10320_v38 = vld [vmem:[#allocation6 + $0x430] sm:$0xff] }
 0x6c0   :  { %10624 = vmatpush1.bf16.msra.mxu0 %v10304_v7  ;;  %v10177_v7 = vpack.c.bf16 %v16681_v9, %v16679_v46  ;;  %v10223_v46 = vld [vmem:[#allocation6 + $0x128] sm:$0xff]  ;;  %v10222_v9 = vld [vmem:[#allocation6 + $0x120] sm:$0xff] }
 0x6c1   :  { %10625 = vmatprep.subr.bf16.mxu0 %v10307_v21  ;;  %v10219_v21 = vld [vmem:[#allocation6 + $0x108] sm:$0xff] }
 0x6c2   :  { %10471 = vmatpush1.bf16.msra.mxu1 %v10214_v60  ;;  %v10325_v60 = vld [vmem:[#allocation6 + $0x458] sm:$0xff] }
 0x6c3   :  { %10472 = vmatprep.subr.bf16.mxu1 %v10217_v54  ;;  %v10324_v54 = vld [vmem:[#allocation6 + $0x450] sm:$0xff] }
 0x6c4   :  { %10626 = vmatpush1.bf16.msra.mxu0 %v10306_v27  ;;  %v10314_v27 = vld [vmem:[#allocation6 + $0x400] sm:$0xff] }
 0x6c5   :  { %10627 = vmatprep.subr.bf16.mxu0 %v10309_v51  ;;  %v10317_v51 = vld [vmem:[#allocation6 + $0x418] sm:$0xff] }
 0x6c6   :  { %10473 = vmatpush1.bf16.msra.mxu1 %v10216_v11  ;;  %v10327_v11 = vld [vmem:[#allocation6 + $0x468] sm:$0xff] }
 0x6c7   :  { %10495 = vmatprep.subr.bf16.mxu1 %v10219_v21  ;;  %v10232_v21 = vld [vmem:[#allocation6 + $0x170] sm:$0xff] }
 0x6c8   :  { %10628 = vmatpush1.bf16.msra.mxu0 %v10308_v35  ;;  %v10225_v35 = vld [vmem:[#allocation6 + $0x138] sm:$0xff] }
 0x6c9   :  { %10629 = vmatprep.subr.bf16.mxu0 %v10311_v42  ;;  %10475 = vmatmul.mubr.bf16.vlgmr.msra.gmra.mrb[160].mxu1 %v10154_v39  ;;  %v10224_v42 = vld [vmem:[#allocation6 + $0x130] sm:$0xff] }
 0x6ca   :  { %10496 = vmatpush1.bf16.msra.mxu1 %v10218_v5  ;;  %v10328_v39 = vld [vmem:[#allocation6 + $0x470] sm:$0xff]  ;;  %v10331_v5 = vld [vmem:[#allocation6 + $0x488] sm:$0xff] }
 0x6cb   :  { %10497 = vmatprep.subr.bf16.mxu1 %v10221_v13  ;;  %v10330_v13 = vld [vmem:[#allocation6 + $0x480] sm:$0xff] }
 0x6cc   :  { %10630 = vmatpush1.bf16.msra.mxu0 %v10310_v55  ;;  %v10229_v55 = vld [vmem:[#allocation6 + $0x158] sm:$0xff] }
 0x6cd   :  { %10631 = vmatprep.subr.bf16.mxu0 %v10313_v30  ;;  %v10228_v30 = vld [vmem:[#allocation6 + $0x150] sm:$0xff] }
 0x6ce   :  { %10498 = vmatpush1.bf16.msra.mxu1 %v10220_v14  ;;  %v10333_v14 = vld [vmem:[#allocation6 + $0x498] sm:$0xff] }
 0x6cf   :  { %10499 = vmatprep.subr.bf16.mxu1 %v10223_v46  ;;  %v10239_v46 = vld [vmem:[#allocation6 + $0x1a8] sm:$0xff] }
 0x6d0   :  { %10632 = vmatpush1.bf16.msra.mxu0 %v10312_v33  ;;  %v10231_v33 = vld [vmem:[#allocation6 + $0x168] sm:$0xff] }
 0x6d1   :  { %10654 = vmatprep.subr.bf16.mxu0 %v10315_v63  ;;  %v10230_v63 = vld [vmem:[#allocation6 + $0x160] sm:$0xff] }
 0x6d2   :  { %10500 = vmatpush1.bf16.msra.mxu1 %v10222_v9  ;;  %v10238_v9 = vld [vmem:[#allocation6 + $0x1a0] sm:$0xff] }
 0x6d3   :  { %10634 = vmatmul.mubr.bf16.vlgmr.msra.gmra.mrb[32].mxu0 %v10160_v50  ;;  %10501 = vmatprep.subr.bf16.mxu1 %v10225_v35  ;;  %v10326_v50 = vld [vmem:[#allocation6 + $0x460] sm:$0xff]  ;;  %v10241_v35 = vld [vmem:[#allocation6 + $0x1b8] sm:$0xff] }
 0x6d4   :  { %10655 = vmatpush1.bf16.msra.mxu0 %v10314_v27  ;;  %10643 = vmatprep.mubr.bf16.mxu0 %v10177_v7  ;;  %v10233_v7 = vld [vmem:[#allocation6 + $0x178] sm:$0xff]  ;;  %v10235_v27 = vld [vmem:[#allocation6 + $0x188] sm:$0xff] }
 0x6d5   :  { %10656 = vmatprep.subr.bf16.mxu0 %v10317_v51  ;;  %v10234_v51 = vld [vmem:[#allocation6 + $0x180] sm:$0xff] }
 0x6d6   :  { %10502 = vmatpush1.bf16.msra.mxu1 %v10224_v42  ;;  %v10240_v42 = vld [vmem:[#allocation6 + $0x1b0] sm:$0xff] }
 0x6d7   :  { %10503 = vmatprep.subr.bf16.mxu1 %v10227_v31  ;;  %v10243_v31 = vld [vmem:[#allocation6 + $0x1c8] sm:$0xff] }
 0x6d8   :  { %10657 = vmatpush1.bf16.msra.mxu0 %v10316_v44  ;;  %v10237_v44 = vld [vmem:[#allocation6 + $0x198] sm:$0xff] }
 0x6d9   :  { %10658 = vmatprep.subr.bf16.mxu0 %v10319_v10  ;;  %v10236_v10 = vld [vmem:[#allocation6 + $0x190] sm:$0xff] }
 0x6da   :  { %10504 = vmatpush1.bf16.msra.mxu1 %v10226_v15  ;;  %v10242_v15 = vld [vmem:[#allocation6 + $0x1c0] sm:$0xff] }
 0x6db   :  { %10644 = vmatmul.mubr.bf16.gmra.mrb[36].mxu0 %v10176_v49  ;;  %10505 = vmatprep.subr.bf16.mxu1 %v10229_v55  ;;  %v10332_v49 = vld [vmem:[#allocation6 + $0x490] sm:$0xff]  ;;  %v10245_v55 = vld [vmem:[#allocation6 + $0x1d8] sm:$0xff] }
 0x6dc   :  { %10659 = vmatpush1.bf16.msra.mxu0 %v10318_v58  ;;  %10686 = vmatprep.mubr.bf16.mxu0 %v10163_v45  ;;  %v10335_v45 = vld [vmem:[#allocation6 + $0x4a8] sm:$0xff]  ;;  %v10334_v58 = vld [vmem:[#allocation6 + $0x4a0] sm:$0xff] }
 0x6dd   :  { %10660 = vmatprep.subr.bf16.mxu0 %v10321_v53  ;;  %v10337_v53 = vld [vmem:[#allocation6 + $0x4b8] sm:$0xff] }
 0x6de   :  { %10506 = vmatpush1.bf16.msra.mxu1 %v10228_v30  ;;  %v10244_v30 = vld [vmem:[#allocation6 + $0x1d0] sm:$0xff] }
 0x6df   :  { %10507 = vmatprep.subr.bf16.mxu1 %v10231_v33  ;;  %v10343_v33 = vld [vmem:[#allocation6 + $0x4e8] sm:$0xff] }
 0x6e0   :  { %10661 = vmatpush1.bf16.msra.mxu0 %v10320_v38  ;;  %v10336_v38 = vld [vmem:[#allocation6 + $0x4b0] sm:$0xff] }
 0x6e1   :  { %10662 = vmatprep.subr.bf16.mxu0 %v10323_v56  ;;  %v10339_v56 = vld [vmem:[#allocation6 + $0x4c8] sm:$0xff] }
 0x6e2   :  { %10508 = vmatpush1.bf16.msra.mxu1 %v10230_v63  ;;  %v10170_v63 = vpack.c.bf16 %v16635_v19, %v16627_v18  ;;  %v10162_v18 = vpack.c.bf16 %v16685_v47, %v16683_v4  ;;  %v10156_v19 = vpack.c.bf16 %v16641_v57, %v16639_v32  ;;  %v10178_v4 = vpack.c.bf16 %v16689_v29, %v16687_v26  ;;  %v10350_v57 = vld [vmem:[#allocation6 + $0x520] sm:$0xff]  ;;  %v10353_v47 = vld [vmem:[#allocation6 + $0x538] sm:$0xff]  ;;  %v10356_v26 = vld [vmem:[#allocation6 + $0x550] sm:$0xff] }
 0x6e3   :  { %10509 = vmatprep.subr.bf16.mxu1 %v10233_v7  ;;  %v10342_v7 = vld [vmem:[#allocation6 + $0x4e0] sm:$0xff]  ;;  %v10165_v32 = vpack.c.bf16 %v16709_v61, %v16707_v8  ;;  %v10359_v29 = vld [vmem:[#allocation6 + $0x568] sm:$0xff]  ;;  %v10361_v61 = vld [vmem:[#allocation6 + $0x578] sm:$0xff] }
 0x6e4   :  { %10663 = vmatpush1.bf16.msra.mxu0 %v10322_v3  ;;  %v10338_v3 = vld [vmem:[#allocation6 + $0x4c0] sm:$0xff] }
 0x6e5   :  { %10664 = vmatprep.subr.bf16.mxu0 %v10325_v60  ;;  %v10341_v60 = vld [vmem:[#allocation6 + $0x4d8] sm:$0xff]  ;;  %v10358_v8 = vld [vmem:[#allocation6 + $0x560] sm:$0xff] }
 0x6e6   :  { %10510 = vmatpush1.bf16.msra.mxu1 %v10232_v21  ;;  %v10345_v21 = vld [vmem:[#allocation6 + $0x4f8] sm:$0xff] }
 0x6e7   :  { %10511 = vmatprep.subr.bf16.mxu1 %v10235_v27  ;;  %v10347_v27 = vld [vmem:[#allocation6 + $0x508] sm:$0xff] }
 0x6e8   :  { %10665 = vmatpush1.bf16.msra.mxu0 %v10324_v54  ;;  %v10340_v54 = vld [vmem:[#allocation6 + $0x4d0] sm:$0xff] }
 0x6e9   :  { %10666 = vmatprep.subr.bf16.mxu0 %v10327_v11  ;;  %v10171_v11 = vpack.c.bf16 %v16637_v40, %v16629_v34  ;;  %v10344_v34 = vld [vmem:[#allocation6 + $0x4f0] sm:$0xff]  ;;  %v10157_v40 = vpack.c.bf16 %v16649_v17, %v16647_v36  ;;  %v10351_v17 = vld [vmem:[#allocation6 + $0x528] sm:$0xff] }
 0x6ea   :  { %10512 = vmatpush1.bf16.msra.mxu1 %v10234_v51  ;;  %v10179_v51 = vpack.c.bf16 %v16697_v48, %v16695_v25  ;;  %v10348_v36 = vld [vmem:[#allocation6 + $0x510] sm:$0xff]  ;;  %v10355_v48 = vld [vmem:[#allocation6 + $0x548] sm:$0xff] }
 0x6eb   :  { %10513 = vmatprep.subr.bf16.mxu1 %v10237_v44  ;;  %10484 = vmatprep.mubr.bf16.mxu1 %v10171_v11  ;;  %v10352_v25 = vld [vmem:[#allocation6 + $0x530] sm:$0xff]  ;;  %v10354_v44 = vld [vmem:[#allocation6 + $0x540] sm:$0xff]  ;;  %v10377_v11 = vld [vmem:[#allocation6 + $0x5f8] sm:$0xff] }
 0x6ec   :  { %10667 = vmatpush1.bf16.msra.mxu0 %v10326_v50  ;;  %v10247_v50 = vld [vmem:[#allocation6 + $0x1e8] sm:$0xff]  ;;  %10485 = vmatmul.mubr.bf16.gmra.mrb[164].mxu1 %v10170_v63 }
 0x6ed   :  { %10668 = vmatprep.subr.bf16.mxu0 %v10329_v41  ;;  %v10246_v41 = vld [vmem:[#allocation6 + $0x1e0] sm:$0xff]  ;;  %10527 = vmatprep.mubr.bf16.mxu1 %v10157_v40  ;;  %v10379_v63 = vld [vmem:[#allocation6 + $0x608] sm:$0xff] }
 0x6ee   :  { %10514 = vmatpush1.bf16.msra.mxu1 %v10236_v10  ;;  %v10357_v10 = vld [vmem:[#allocation6 + $0x558] sm:$0xff]  ;;  %v10395_v40 = vld [vmem:[#allocation6 + $0x688] sm:$0xff] }
 0x6ef   :  { %10515 = vmatprep.subr.bf16.mxu1 %v10239_v46  ;;  %v10362_v46 = vld [vmem:[#allocation6 + $0x580] sm:$0xff] }
 0x6f0   :  { %10669 = vmatpush1.bf16.msra.mxu0 %v10328_v39  ;;  %v10249_v39 = vld [vmem:[#allocation6 + $0x1f8] sm:$0xff] }
 0x6f1   :  { %10670 = vmatprep.subr.bf16.mxu0 %v10331_v5  ;;  %v10248_v5 = vld [vmem:[#allocation6 + $0x1f0] sm:$0xff] }
 0x6f2   :  { %10516 = vmatpush1.bf16.msra.mxu1 %v10238_v9  ;;  %v10365_v9 = vld [vmem:[#allocation6 + $0x598] sm:$0xff] }
 0x6f3   :  { %10517 = vmatprep.subr.bf16.mxu1 %v10241_v35  ;;  %v10366_v35 = vld [vmem:[#allocation6 + $0x5a0] sm:$0xff] }
 0x6f4   :  { %10671 = vmatpush1.bf16.msra.mxu0 %v10330_v13  ;;  %v10346_v13 = vld [vmem:[#allocation6 + $0x500] sm:$0xff] }
 0x6f5   :  { %10672 = vmatprep.subr.bf16.mxu0 %v10333_v14  ;;  %v10349_v14 = vld [vmem:[#allocation6 + $0x518] sm:$0xff] }
 0x6f6   :  { %10518 = vmatpush1.bf16.msra.mxu1 %v10240_v42  ;;  %v10369_v42 = vld [vmem:[#allocation6 + $0x5b8] sm:$0xff] }
 0x6f7   :  { %10519 = vmatprep.subr.bf16.mxu1 %v10243_v31  ;;  %v10370_v31 = vld [vmem:[#allocation6 + $0x5c0] sm:$0xff] }
 0x6f8   :  { %10673 = vmatpush1.bf16.msra.mxu0 %v10332_v49  ;;  %v10360_v49 = vld [vmem:[#allocation6 + $0x570] sm:$0xff] }
 0x6f9   :  { %10674 = vmatprep.subr.bf16.mxu0 %v10335_v45  ;;  %v10363_v45 = vld [vmem:[#allocation6 + $0x588] sm:$0xff] }
 0x6fa   :  { %10520 = vmatpush1.bf16.msra.mxu1 %v10242_v15  ;;  %v10373_v15 = vld [vmem:[#allocation6 + $0x5d8] sm:$0xff] }
 0x6fb   :  { %10521 = vmatprep.subr.bf16.mxu1 %v10245_v55  ;;  %v10172_v55 = vpack.c.bf16 %v16645_v43, %v16643_v28  ;;  %v10378_v28 = vld [vmem:[#allocation6 + $0x600] sm:$0xff]  ;;  %v10381_v43 = vld [vmem:[#allocation6 + $0x618] sm:$0xff] }
 0x6fc   :  { %10675 = vmatpush1.bf16.msra.mxu0 %v10334_v58  ;;  %v10364_v58 = vld [vmem:[#allocation6 + $0x590] sm:$0xff] }
 0x6fd   :  { %10676 = vmatprep.subr.bf16.mxu0 %v10337_v53  ;;  %v10367_v53 = vld [vmem:[#allocation6 + $0x5a8] sm:$0xff] }
 0x6fe   :  { %10522 = vmatpush1.bf16.msra.mxu1 %v10244_v30  ;;  %v10375_v30 = vld [vmem:[#allocation6 + $0x5e8] sm:$0xff] }
 0x6ff   :  { %10523 = vmatprep.subr.bf16.mxu1 %v10247_v50  ;;  %v10164_v50 = vpack.c.bf16 %v16701_v2, %v16699_v16  ;;  %v10167_v16 = vpack.c.bf16 %v16725_v20, %v16723_v62  ;;  %v10382_v2 = vld [vmem:[#allocation6 + $0x620] sm:$0xff]  ;;  %v10393_v20 = vld [vmem:[#allocation6 + $0x678] sm:$0xff] }
 0x700   :  { %10677 = vmatpush1.bf16.msra.mxu0 %v10336_v38  ;;  %v10368_v38 = vld [vmem:[#allocation6 + $0x5b0] sm:$0xff]  ;;  %v10390_v62 = vld [vmem:[#allocation6 + $0x660] sm:$0xff] }
 0x701   :  { %10678 = vmatprep.subr.bf16.mxu0 %v10339_v56  ;;  %v10371_v56 = vld [vmem:[#allocation6 + $0x5c8] sm:$0xff] }
 0x702   :  { %10524 = vmatpush1.bf16.msra.mxu1 %v10246_v41  ;;  %v10383_v41 = vld [vmem:[#allocation6 + $0x628] sm:$0xff] }
 0x703   :  { %10525 = vmatprep.subr.bf16.mxu1 %v10249_v39  ;;  %v10386_v39 = vld [vmem:[#allocation6 + $0x640] sm:$0xff] }
 0x704   :  { %10679 = vmatpush1.bf16.msra.mxu0 %v10338_v3  ;;  %v10173_v3 = vpack.c.bf16 %v16653_v6, %v16651_v0  ;;  %v10181_v0 = vpack.c.bf16 %v16713_v59, %v16711_v37  ;;  %v10380_v6 = vld [vmem:[#allocation6 + $0x610] sm:$0xff]  ;;  %v10387_v59 = vld [vmem:[#allocation6 + $0x648] sm:$0xff] }
 0x705   :  { %10680 = vmatprep.subr.bf16.mxu0 %v10341_v60  ;;  %v10372_v60 = vld [vmem:[#allocation6 + $0x5d0] sm:$0xff] }
 0x706   :  { %10526 = vmatpush1.bf16.msra.mxu1 %v10248_v5  ;;  %v10384_v37 = vld [vmem:[#allocation6 + $0x630] sm:$0xff]  ;;  %v10389_v5 = vld [vmem:[#allocation6 + $0x658] sm:$0xff] }
 0x708   :  { %10681 = vmatpush1.bf16.msra.mxu0 %v10340_v54  ;;  %v10374_v54 = vld [vmem:[#allocation6 + $0x5e0] sm:$0xff] }
 0x709   :  { %10682 = vmatprep.subr.bf16.mxu0 %v10343_v33  ;;  %10528 = vmatmul.mubr.bf16.vlgmr.msra.gmra.mrb[160].mxu1 %v10156_v19  ;;  %v10376_v33 = vld [vmem:[#allocation6 + $0x5f0] sm:$0xff] }
 0x70a   :  { %10537 = vmatprep.mubr.bf16.mxu1 %v10173_v3  ;;  %v10396_v19 = vld [vmem:[#allocation6 + $0x690] sm:$0xff]  ;;  %v10423_v3 = vld [vmem:[#allocation6 + $0x768] sm:$0xff] }
 0x70c   :  { %10683 = vmatpush1.bf16.msra.mxu0 %v10342_v7  ;;  %v10180_v7 = vpack.c.bf16 %v16705_v22, %v16703_v23  ;;  %v10388_v23 = vld [vmem:[#allocation6 + $0x650] sm:$0xff]  ;;  %v10391_v22 = vld [vmem:[#allocation6 + $0x668] sm:$0xff] }
 0x70d   :  { %10684 = vmatprep.subr.bf16.mxu0 %v10345_v21  ;;  %v10385_v21 = vld [vmem:[#allocation6 + $0x638] sm:$0xff] }
 0x710   :  { %10685 = vmatpush1.bf16.msra.mxu0 %v10344_v34  ;;  %v10392_v34 = vld [vmem:[#allocation6 + $0x670] sm:$0xff] }
 0x711   :  { %10707 = vmatprep.subr.bf16.mxu0 %v10347_v27  ;;  %10538 = vmatmul.mubr.bf16.gmra.mrb[164].mxu1 %v10172_v55  ;;  %v10394_v27 = vld [vmem:[#allocation6 + $0x680] sm:$0xff]  ;;  %v10424_v55 = vld [vmem:[#allocation6 + $0x770] sm:$0xff] }
 0x713   :  { %10687 = vmatmul.mubr.bf16.vlgmr.msra.gmra.mrb[32].mxu0 %v10162_v18  ;;  %v10397_v18 = vld [vmem:[#allocation6 + $0x698] sm:$0xff] }
 0x714   :  { %10708 = vmatpush1.bf16.msra.mxu0 %v10346_v13  ;;  %10696 = vmatprep.mubr.bf16.mxu0 %v10179_v51  ;;  %v10399_v51 = vld [vmem:[#allocation6 + $0x6a8] sm:$0xff]  ;;  %v10398_v13 = vld [vmem:[#allocation6 + $0x6a0] sm:$0xff] }
 0x715   :  { %10709 = vmatprep.subr.bf16.mxu0 %v10349_v14  ;;  %v10401_v14 = vld [vmem:[#allocation6 + $0x6b8] sm:$0xff] }
 0x718   :  { %10710 = vmatpush1.bf16.msra.mxu0 %v10348_v36  ;;  %v10400_v36 = vld [vmem:[#allocation6 + $0x6b0] sm:$0xff] }
 0x719   :  { %10711 = vmatprep.subr.bf16.mxu0 %v10351_v17  ;;  %v10403_v17 = vld [vmem:[#allocation6 + $0x6c8] sm:$0xff] }
 0x71b   :  { %10697 = vmatmul.mubr.bf16.gmra.mrb[36].mxu0 %v10178_v4  ;;  %v10402_v4 = vld [vmem:[#allocation6 + $0x6c0] sm:$0xff] }
 0x71c   :  { %10712 = vmatpush1.bf16.msra.mxu0 %v10350_v57  ;;  %10739 = vmatprep.mubr.bf16.mxu0 %v10165_v32  ;;  %v10405_v32 = vld [vmem:[#allocation6 + $0x6d8] sm:$0xff]  ;;  %v10404_v57 = vld [vmem:[#allocation6 + $0x6d0] sm:$0xff] }
 0x71d   :  { %10713 = vmatprep.subr.bf16.mxu0 %v10353_v47  ;;  %v10407_v47 = vld [vmem:[#allocation6 + $0x6e8] sm:$0xff] }
 0x720   :  { %10714 = vmatpush1.bf16.msra.mxu0 %v10352_v25  ;;  %v10406_v25 = vld [vmem:[#allocation6 + $0x6e0] sm:$0xff] }
 0x721   :  { %10715 = vmatprep.subr.bf16.mxu0 %v10355_v48  ;;  %v10409_v48 = vld [vmem:[#allocation6 + $0x6f8] sm:$0xff] }
 0x724   :  { %10716 = vmatpush1.bf16.msra.mxu0 %v10354_v44  ;;  %v10408_v44 = vld [vmem:[#allocation6 + $0x6f0] sm:$0xff] }
 0x725   :  { %10717 = vmatprep.subr.bf16.mxu0 %v10357_v10  ;;  %v10411_v10 = vld [vmem:[#allocation6 + $0x708] sm:$0xff] }
 0x728   :  { %10718 = vmatpush1.bf16.msra.mxu0 %v10356_v26  ;;  %v10166_v26 = vpack.c.bf16 %v16717_v12, %v16715_v1  ;;  %v10414_v12 = vld [vmem:[#allocation6 + $0x720] sm:$0xff] }
 0x729   :  { %10719 = vmatprep.subr.bf16.mxu0 %v10359_v29  ;;  %v17353_v29 = vld [vmem:[#allocation18_spill] sm:$0xff] }
 0x72c   :  { %10720 = vmatpush1.bf16.msra.mxu0 %v10358_v8  ;;  %v10183_v8 = vpack.c.bf16 %v17353_v29, %v16727_v52  ;;  %v10416_v52 = vld [vmem:[#allocation6 + $0x730] sm:$0xff] }
 0x72d   :  { %10721 = vmatprep.subr.bf16.mxu0 %v10361_v61  ;;  %v10410_v61 = vld [vmem:[#allocation6 + $0x700] sm:$0xff] }
 0x730   :  { %10722 = vmatpush1.bf16.msra.mxu0 %v10360_v49  ;;  %v10413_v49 = vld [vmem:[#allocation6 + $0x718] sm:$0xff] }
 0x731   :  { %10723 = vmatprep.subr.bf16.mxu0 %v10363_v45  ;;  %v10412_v45 = vld [vmem:[#allocation6 + $0x710] sm:$0xff] }
 0x734   :  { %10724 = vmatpush1.bf16.msra.mxu0 %v10362_v46  ;;  %v10415_v46 = vld [vmem:[#allocation6 + $0x728] sm:$0xff] }
 0x735   :  { %10725 = vmatprep.subr.bf16.mxu0 %v10365_v9  ;;  %v17354_v9 = vld [vmem:[#allocation19_spill] sm:$0xff] }
 0x738   :  { %10726 = vmatpush1.bf16.msra.mxu0 %v10364_v58  ;;  %v17355_v58 = vld [vmem:[#allocation16_spill] sm:$0xff] }
 0x739   :  { %10727 = vmatprep.subr.bf16.mxu0 %v10367_v53  ;;  %v10182_v53 = vpack.c.bf16 %v17355_v58, %v17354_v9 }
 0x73c   :  { %10728 = vmatpush1.bf16.msra.mxu0 %v10366_v35  ;;  %v17356_v35 = vld [vmem:[#allocation35_spill] sm:$0xff] }
 0x73d   :  { %10729 = vmatprep.subr.bf16.mxu0 %v10369_v42  ;;  %v10169_v1 = vpack.c.bf16 %v17356_v35, %v16739_v24  ;;  %v10417_v42 = vld [vmem:[#allocation6 + $0x738] sm:$0xff]  ;;  %v10422_v24 = vld [vmem:[#allocation6 + $0x760] sm:$0xff] }
 0x740   :  { %10730 = vmatpush1.bf16.msra.mxu0 %v10368_v38  ;;  %v10419_v38 = vld [vmem:[#allocation6 + $0x748] sm:$0xff] }
 0x741   :  { %10731 = vmatprep.subr.bf16.mxu0 %v10371_v56  ;;  %v10418_v56 = vld [vmem:[#allocation6 + $0x740] sm:$0xff] }
 0x744   :  { %10732 = vmatpush1.bf16.msra.mxu0 %v10370_v31  ;;  %v10421_v31 = vld [vmem:[#allocation6 + $0x758] sm:$0xff] }
 0x745   :  { %10733 = vmatprep.subr.bf16.mxu0 %v10373_v15  ;;  %v10420_v15 = vld [vmem:[#allocation6 + $0x750] sm:$0xff] }
 0x748   :  { %10734 = vmatpush1.bf16.msra.mxu0 %v10372_v60  ;;  %v10425_v60 = vld [vmem:[#allocation6 + $0x778] sm:$0xff] }
 0x749   :  { %10735 = vmatprep.subr.bf16.mxu0 %v10375_v30  ;;  %v10427_v30 = vld [vmem:[#allocation6 + $0x788] sm:$0xff] }
 0x74c   :  { %10736 = vmatpush1.bf16.msra.mxu0 %v10374_v54  ;;  %v10426_v54 = vld [vmem:[#allocation6 + $0x780] sm:$0xff] }
 0x74d   :  { %10737 = vmatprep.subr.bf16.mxu0 %v10377_v11  ;;  %v10429_v11 = vld [vmem:[#allocation6 + $0x798] sm:$0xff] }
 0x750   :  { %10738 = vmatpush1.bf16.msra.mxu0 %v10376_v33  ;;  %v10428_v33 = vld [vmem:[#allocation6 + $0x790] sm:$0xff] }
 0x751   :  { %10760 = vmatprep.subr.bf16.mxu0 %v10379_v63  ;;  %v10431_v63 = vld [vmem:[#allocation6 + $0x7a8] sm:$0xff] }
 0x753   :  { %10740 = vmatmul.mubr.bf16.vlgmr.msra.gmra.mrb[32].mxu0 %v10164_v50  ;;  %v10430_v50 = vld [vmem:[#allocation6 + $0x7a0] sm:$0xff] }
 0x754   :  { %10761 = vmatpush1.bf16.msra.mxu0 %v10378_v28  ;;  %10749 = vmatprep.mubr.bf16.mxu0 %v10181_v0  ;;  %v10433_v0 = vld [vmem:[#allocation6 + $0x7b8] sm:$0xff]  ;;  %v10432_v28 = vld [vmem:[#allocation6 + $0x7b0] sm:$0xff] }
 0x755   :  { %10762 = vmatprep.subr.bf16.mxu0 %v10381_v43  ;;  %v10435_v43 = vld [vmem:[#allocation6 + $0x7c8] sm:$0xff] }
 0x758   :  { %10763 = vmatpush1.bf16.msra.mxu0 %v10380_v6  ;;  %v10434_v6 = vld [vmem:[#allocation6 + $0x7c0] sm:$0xff] }
 0x759   :  { %10764 = vmatprep.subr.bf16.mxu0 %v10383_v41  ;;  %v10437_v41 = vld [vmem:[#allocation6 + $0x7d8] sm:$0xff] }
 0x75b   :  { %10750 = vmatmul.mubr.bf16.gmra.mrb[36].mxu0 %v10180_v7  ;;  %v10436_v7 = vld [vmem:[#allocation6 + $0x7d0] sm:$0xff] }
 0x75c   :  { %10765 = vmatpush1.bf16.msra.mxu0 %v10382_v2  ;;  %10792 = vmatprep.mubr.bf16.mxu0 %v10167_v16  ;;  %v10439_v16 = vld [vmem:[#allocation6 + $0x7e8] sm:$0xff]  ;;  %v10438_v2 = vld [vmem:[#allocation6 + $0x7e0] sm:$0xff] }
 0x75d   :  { %10766 = vmatprep.subr.bf16.mxu0 %v10385_v21  ;;  %v10441_v21 = vld [vmem:[#allocation6 + $0x7f8] sm:$0xff] }
 0x760   :  { %10767 = vmatpush1.bf16.msra.mxu0 %v10384_v37  ;;  %v10440_v37 = vld [vmem:[#allocation6 + $0x7f0] sm:$0xff] }
 0x761   :  { %10768 = vmatprep.subr.bf16.mxu0 %v10387_v59  ;;  %v17357_v59 = vld [vmem:[#allocation26_spill] sm:$0xff] }
 0x764   :  { %10769 = vmatpush1.bf16.msra.mxu0 %v10386_v39  ;;  %v17358_v39 = vld [vmem:[#allocation27_spill] sm:$0xff] }
 0x765   :  { %10770 = vmatprep.subr.bf16.mxu0 %v10389_v5  ;;  %v10168_v5 = vpack.c.bf16 %v17358_v39, %v17357_v59 }
 0x768   :  { %10771 = vmatpush1.bf16.msra.mxu0 %v10388_v23  ;;  %v17359_v23 = vld [vmem:[#allocation36_spill] sm:$0xff] }
 0x769   :  { %10772 = vmatprep.subr.bf16.mxu0 %v10391_v22  ;;  %v17360_v22 = vld [vmem:[#allocation38_spill] sm:$0xff] }
 0x76c   :  { %10773 = vmatpush1.bf16.msra.mxu0 %v10390_v62  ;;  %v10185_v62 = vpack.c.bf16 %v17360_v22, %v17359_v23 }
 0x76d   :  { %10774 = vmatprep.subr.bf16.mxu0 %v10393_v20  ;;  %v17361_v20 = vld [vmem:[#allocation28_spill] sm:$0xff] }
 0x770   :  { %10775 = vmatpush1.bf16.msra.mxu0 %v10392_v34  ;;  %v17362_v34 = vld [vmem:[#allocation42_spill] sm:$0xff] }
 0x771   :  { %10776 = vmatprep.subr.bf16.mxu0 %v10395_v40  ;;  %v10184_v40 = vpack.c.bf16 %v17362_v34, %v17361_v20 }
 0x774   :  { %10777 = vmatpush1.bf16.msra.mxu0 %v10394_v27 }
 0x775   :  { %10778 = vmatprep.subr.bf16.mxu0 %v10397_v18 }
 0x778   :  { %10779 = vmatpush1.bf16.msra.mxu0 %v10396_v19 }
 0x779   :  { %10780 = vmatprep.subr.bf16.mxu0 %v10399_v51 }
 0x77c   :  { %10781 = vmatpush1.bf16.msra.mxu0 %v10398_v13 }
 0x77d   :  { %10782 = vmatprep.subr.bf16.mxu0 %v10401_v14 }
 0x780   :  { %10783 = vmatpush1.bf16.msra.mxu0 %v10400_v36 }
 0x781   :  { %10784 = vmatprep.subr.bf16.mxu0 %v10403_v17 }
 0x784   :  { %10785 = vmatpush1.bf16.msra.mxu0 %v10402_v4 }
 0x785   :  { %10786 = vmatprep.subr.bf16.mxu0 %v10405_v32 }
 0x788   :  { %10787 = vmatpush1.bf16.msra.mxu0 %v10404_v57 }
 0x789   :  { %10788 = vmatprep.subr.bf16.mxu0 %v10407_v47 }
 0x78c   :  { %10789 = vmatpush1.bf16.msra.mxu0 %v10406_v25 }
 0x78d   :  { %10790 = vmatprep.subr.bf16.mxu0 %v10409_v48 }
 0x790   :  { %10791 = vmatpush1.bf16.msra.mxu0 %v10408_v44 }
 0x791   :  { %10813 = vmatprep.subr.bf16.mxu0 %v10411_v10 }
 0x793   :  { %10793 = vmatmul.mubr.bf16.vlgmr.msra.gmra.mrb[32].mxu0 %v10166_v26 }
 0x794   :  { %10814 = vmatpush1.bf16.msra.mxu0 %v10410_v61  ;;  %10802 = vmatprep.mubr.bf16.mxu0 %v10183_v8 }
 0x795   :  { %10815 = vmatprep.subr.bf16.mxu0 %v10413_v49 }
 0x798   :  { %10816 = vmatpush1.bf16.msra.mxu0 %v10412_v45 }
 0x799   :  { %10817 = vmatprep.subr.bf16.mxu0 %v10415_v46 }
 0x79b   :  { %10803 = vmatmul.mubr.bf16.gmra.mrb[36].mxu0 %v10182_v53 }
 0x79c   :  { %10818 = vmatpush1.bf16.msra.mxu0 %v10414_v12  ;;  %10845 = vmatprep.mubr.bf16.mxu0 %v10169_v1 }
 0x79d   :  { %10819 = vmatprep.subr.bf16.mxu0 %v10417_v42 }
 0x7a0   :  { %10820 = vmatpush1.bf16.msra.mxu0 %v10416_v52 }
 0x7a1   :  { %10821 = vmatprep.subr.bf16.mxu0 %v10419_v38 }
 0x7a4   :  { %10822 = vmatpush1.bf16.msra.mxu0 %v10418_v56 }
 0x7a5   :  { %10823 = vmatprep.subr.bf16.mxu0 %v10421_v31 }
 0x7a8   :  { %10824 = vmatpush1.bf16.msra.mxu0 %v10420_v15 }
 0x7a9   :  { %10825 = vmatprep.subr.bf16.mxu0 %v10423_v3 }
 0x7ac   :  { %10826 = vmatpush1.bf16.msra.mxu0 %v10422_v24 }
 0x7ad   :  { %10827 = vmatprep.subr.bf16.mxu0 %v10425_v60 }
 0x7b0   :  { %10828 = vmatpush1.bf16.msra.mxu0 %v10424_v55 }
 0x7b1   :  { %10829 = vmatprep.subr.bf16.mxu0 %v10427_v30 }
 0x7b4   :  { %10830 = vmatpush1.bf16.msra.mxu0 %v10426_v54 }
 0x7b5   :  { %10831 = vmatprep.subr.bf16.mxu0 %v10429_v11 }
 0x7b8   :  { %10832 = vmatpush1.bf16.msra.mxu0 %v10428_v33 }
 0x7b9   :  { %10833 = vmatprep.subr.bf16.mxu0 %v10431_v63 }
 0x7bc   :  { %10834 = vmatpush1.bf16.msra.mxu0 %v10430_v50 }
 0x7bd   :  { %10835 = vmatprep.subr.bf16.mxu0 %v10433_v0 }
 0x7c0   :  { %10836 = vmatpush1.bf16.msra.mxu0 %v10432_v28 }
 0x7c1   :  { %10837 = vmatprep.subr.bf16.mxu0 %v10435_v43 }
 0x7c4   :  { %10838 = vmatpush1.bf16.msra.mxu0 %v10434_v6 }
 0x7c5   :  { %10839 = vmatprep.subr.bf16.mxu0 %v10437_v41 }
 0x7c8   :  { %10840 = vmatpush1.bf16.msra.mxu0 %v10436_v7 }
 0x7c9   :  { %10841 = vmatprep.subr.bf16.mxu0 %v10439_v16 }
 0x7cc   :  { %10842 = vmatpush1.bf16.msra.mxu0 %v10438_v2 }
 0x7cd   :  { %10843 = vmatprep.subr.bf16.mxu0 %v10441_v21 }
 0x7d0   :  { %10844 = vmatpush1.bf16.msra.mxu0 %v10440_v37 }
 0x7d3   :  { %10846 = vmatmul.mubr.bf16.vlgmr.msra.gmra.mrb[32].mxu0 %v10168_v5 }
 0x7d4   :  { %10855 = vmatprep.mubr.bf16.mxu0 %v10185_v62 }
 0x7db   :  { %10856 = vmatmul.mubr.bf16.gmra.mrb[36].mxu0 %v10184_v40 }
 0x7dc   :  { %v10529_v27 = vpop.f32.mrb[160].mxu1 }
 0x7dd   :  { %v10531_v18 = vpop.f32.mrb[161].mxu1 }
 0x7de   :  { %v10533_v19 = vpop.f32.mrb[162].mxu1 }
 0x7df   :  { %v10535_v51 = vpop.f32.mrb[163].mxu1 }
 0x7e4   :  { %v10539_v13 = vpop.f32.mrb[164].mxu1 }
 0x7e5   :  { %v10541_v14 = vpop.f32.mrb[165].mxu1 }
 0x7e6   :  { %v10543_v36 = vpop.f32.mrb[166].mxu1 }
 0x7e7   :  { %v10545_v17 = vpop.f32.mrb[167].mxu1 }
 0x8a6   :  { %v10847_v4 = vpop.f32.mrb[32].mxu0 }
 0x8a7   :  { %v11619_v32 = vadd.f32 %v10847_v4, %v10529_v27  ;;  %v10849_v57 = vpop.f32.mrb[33].mxu0 }
 0x8a8   :  { %v11620_v47 = vadd.f32 %v10849_v57, %v10531_v18  ;;  %v10851_v25 = vpop.f32.mrb[34].mxu0 }
 0x8a9   :  { %v11621_v48 = vadd.f32 %v10851_v25, %v10533_v19  ;;  %v10853_v44 = vpop.f32.mrb[35].mxu0 }
 0x8aa   :  { %v11622_v10 = vadd.f32 %v10853_v44, %v10535_v51 }
 0x8ab   :  { %v10868_v26 = vadd.f32 %v11621_v48, %v11619_v32 }
 0x8ac   :  { %v10877_v29 = vadd.f32 %v11622_v10, %v11620_v47 }
 0x8ae   :  { %v10857_v8 = vpop.f32.mrb[36].mxu0 }
 0x8af   :  { %v11623_v61 = vadd.f32 %v10857_v8, %v10539_v13  ;;  %v10859_v49 = vpop.f32.mrb[37].mxu0 }
 0x8b0   :  { %v11624_v45 = vadd.f32 %v10859_v49, %v10541_v14  ;;  %v10861_v46 = vpop.f32.mrb[38].mxu0 }
 0x8b1   :  { %v10869_v9 = vadd.f32 %v11623_v61, %v10868_v26  ;;  %v11625_v58 = vadd.f32 %v10861_v46, %v10543_v36  ;;  %v10863_v53 = vpop.f32.mrb[39].mxu0 }
 0x8b2   :  { %v10878_v35 = vadd.f32 %v11624_v45, %v10877_v29  ;;  %v11626_v1 = vadd.f32 %v10863_v53, %v10545_v17 }
 0x8b3   :  { %v10870_v12 = vadd.f32 %v11625_v58, %v10869_v9  ;;  %v10867_v9 = vld [vmem:[%s16844_s9] sm:$0x3] }
 0x8b4   :  { %v10879_v42 = vadd.f32 %v11626_v1, %v10878_v35 }
 0x8b5   :  { %v10871_v52 = vrot.slane %v10870_v12, 4 }
 0x8b6   :  { %v10880_v38 = vrot.slane %v10879_v42, 4 }
 0x8b7   :  { %v10872_v56 = vadd.f32 %v10871_v52, %v10870_v12 }
 0x8b8   :  { %v10881_v31 = vadd.f32 %v10880_v38, %v10879_v42 }
 0x8b9   :  { %v10873_v15 = vrot.slane %v10872_v56, 2 }
 0x8ba   :  { %v10882_v3 = vrot.slane %v10881_v31, 2 }
 0x8bb   :  { %v10874_v24 = vadd.f32 %v10873_v15, %v10872_v56 }
 0x8bc   :  { %v10883_v60 = vadd.f32 %v10882_v3, %v10881_v31 }
 0x8bd   :  { %v10875_v55 = vrot.slane %v10874_v24, 1 }
 0x8be   :  { %v10884_v30 = vrot.slane %v10883_v60, 1 }
 0x8bf   :  { %v10876_v54 = vadd.f32 %v10875_v55, %v10874_v24 }
 0x8c0   :  { %v10885_v11 = vadd.f32 %v10884_v30, %v10883_v60 }
 0x8c1   :  { %v10887_v33 = vmul.f32 0.03125, %v10876_v54 }
 0x8c2   :  { %v10888_v63 = vmul.f32 0.03125, %v10885_v11 }
 0x8c3   :  { %v10889_v50 = vsub.f32 %v11619_v32, %v10887_v33  ;;  %v10891_v0 = vsub.f32 %v11621_v48, %v10887_v33  ;;  %v10893_v28 = vsub.f32 %v11623_v61, %v10887_v33  ;;  %v10895_v43 = vsub.f32 %v11625_v58, %v10887_v33 }
 0x8c4   :  { %v10890_v6 = vsub.f32 %v11620_v47, %v10888_v63  ;;  %v10892_v41 = vsub.f32 %v11622_v10, %v10888_v63  ;;  %v10894_v7 = vsub.f32 %v11624_v45, %v10888_v63  ;;  %v10896_v16 = vsub.f32 %v11626_v1, %v10888_v63  ;;  %v10866_v45 = vld [vmem:[%s16843_s8] sm:$0x3] }
 0x8c5   :  { %v10897_v2 = vmul.f32 %v10889_v50, %v10889_v50  ;;  %v10899_v21 = vmul.f32 %v10891_v0, %v10891_v0  ;;  %v10901_v37 = vmul.f32 %v10893_v28, %v10893_v28  ;;  %v10903_v23 = vmul.f32 %v10895_v43, %v10895_v43 }
 0x8c6   :  { %v10898_v39 = vmul.f32 %v10890_v6, %v10890_v6  ;;  %v10900_v5 = vmul.f32 %v10892_v41, %v10892_v41  ;;  %v10902_v62 = vmul.f32 %v10894_v7, %v10894_v7  ;;  %v10904_v40 = vmul.f32 %v10896_v16, %v10896_v16 }
 0x8c7   :  { %v10905_v59 = vadd.f32 %v10899_v21, %v10897_v2  ;;  %v10926_v47 = vlaneseq }
 0x8c8   :  { %v10914_v20 = vadd.f32 %v10900_v5, %v10898_v39 }
 0x8c9   :  { %v10906_v22 = vadd.f32 %v10905_v59, %v10901_v37  ;;  %v10927_v26 = vshrl.u32 %v10926_v47, 7 }
 0x8ca   :  { %v10915_v27 = vadd.f32 %v10914_v20, %v10902_v62 }
 0x8cb   :  { %v10907_v34 = vadd.f32 %v10906_v22, %v10903_v23  ;;  %v16809_v49 = vsub.s32 0, %v10927_v26  ;;  %v16814_v46 = vsub.s32 1, %v10927_v26 }
 0x8cc   :  { %v10916_v19 = vadd.f32 %v10915_v27, %v10904_v40 }
 0x8cd   :  { %v10908_v18 = vrot.slane %v10907_v34, 4  ;;  %v10929_v58 = vrot.slane %v10866_v45, %v16809_v49  ;;  %v10933_v53 = vrot.slane %v10866_v45, %v16814_v46  ;;  %v10960_v35 = vrot.slane %v10867_v9, %v16809_v49 }
 0x8ce   :  { %v10917_v13 = vrot.slane %v10916_v19, 4  ;;  %v10964_v11 = vrot.slane %v10867_v9, %v16814_v46  ;;  %v11032_v9 = vld [vmem:[%s16845_s10] sm:$0x3] }
 0x8cf   :  { %v10909_v51 = vadd.f32 %v10908_v18, %v10907_v34  ;;  %v10936_v1 = vmul.f32 %v10929_v58, %v10889_v50  ;;  %v10938_v12 = vmul.f32 %v10929_v58, %v10891_v0  ;;  %v10940_v42 = vmul.f32 %v10929_v58, %v10893_v28 }
 0x8d0   :  { %v10918_v36 = vadd.f32 %v10917_v13, %v10916_v19  ;;  %v10942_v52 = vmul.f32 %v10929_v58, %v10895_v43  ;;  %v10937_v56 = vmul.f32 %v10933_v53, %v10890_v6  ;;  %v10939_v31 = vmul.f32 %v10933_v53, %v10892_v41 }
 0x8d1   :  { %v10910_v14 = vrot.slane %v10909_v51, 2  ;;  %v10941_v30 = vmul.f32 %v10933_v53, %v10894_v7  ;;  %v10943_v54 = vmul.f32 %v10933_v53, %v10896_v16 }
 0x8d2   :  { %v10919_v4 = vrot.slane %v10918_v36, 2 }
 0x8d3   :  { %v10911_v17 = vadd.f32 %v10910_v14, %v10909_v51 }
 0x8d4   :  { %v10920_v57 = vadd.f32 %v10919_v4, %v10918_v36 }
 0x8d5   :  { %v10912_v32 = vrot.slane %v10911_v17, 1 }
 0x8d6   :  { %v10921_v48 = vrot.slane %v10920_v57, 1 }
 0x8d7   :  { %v10913_v25 = vadd.f32 %v10912_v32, %v10911_v17 }
 0x8d8   :  { %v10922_v10 = vadd.f32 %v10921_v48, %v10920_v57 }
 0x8d9   :  { %v10923_v44 = vmul.f32 0.03125, %v10913_v25 }
 0x8da   :  { %v10924_v8 = vmul.f32 0.03125, %v10922_v10 }
 0x8db   :  { %v10944_v29 = vadd.f32 1e-05, %v10923_v44 }
 0x8dc   :  { %v10945_v61 = vadd.f32 1e-05, %v10924_v8 }
 0x8dd   :  { %12098 = vrsqrt.f32 %v10944_v29 }
 0x8de   :  { %12100 = vrsqrt.f32 %v10945_v61 }
 0x8e7   :  { %v12099_v38 = vpop.eup %12098 }
 0x8e8   :  { %v10948_v15 = vmul.f32 %v12099_v38, %v10936_v1  ;;  %v10950_v3 = vmul.f32 %v12099_v38, %v10938_v12  ;;  %v10952_v24 = vmul.f32 %v12099_v38, %v10940_v42  ;;  %v10954_v60 = vmul.f32 %v12099_v38, %v10942_v52  ;;  %v12101_v55 = vpop.eup %12100 }
 0x8e9   :  { %v10949_v2 = vmul.f32 %v12101_v55, %v10937_v56  ;;  %v10951_v21 = vmul.f32 %v12101_v55, %v10939_v31  ;;  %v10953_v50 = vmul.f32 %v12101_v55, %v10941_v30  ;;  %v10955_v0 = vmul.f32 %v12101_v55, %v10943_v54 }
 0x8ea   :  { %v10971_v33 = vadd.f32 %v10960_v35, %v10952_v24  ;;  %v10973_v63 = vadd.f32 %v10960_v35, %v10954_v60  ;;  %v10967_v28 = vadd.f32 %v10960_v35, %v10948_v15  ;;  %v10969_v43 = vadd.f32 %v10960_v35, %v10950_v3 }
 0x8eb   :  { %v10972_v37 = vadd.f32 %v10964_v11, %v10953_v50  ;;  %v10974_v59 = vadd.f32 %v10964_v11, %v10955_v0  ;;  %v10968_v39 = vadd.f32 %v10964_v11, %v10949_v2  ;;  %v10970_v5 = vadd.f32 %v10964_v11, %v10951_v21 }
 0x8ec   :  { %vm10979_vm8 = vcmp.ge.f32.partialorder %v10971_v33, 0.0  ;;  %vm10981_vm10 = vcmp.ge.f32.partialorder %v10973_v63, 0.0  ;;  %v10987_v6 = vmul.f32 0.2, %v10971_v33  ;;  %v10989_v41 = vmul.f32 0.2, %v10973_v63 }
 0x8ed   :  { %vm10975_vm6 = vcmp.ge.f32.partialorder %v10967_v28, 0.0  ;;  %vm10977_vm1 = vcmp.ge.f32.partialorder %v10969_v43, 0.0  ;;  %vm10980_vm15 = vcmp.ge.f32.partialorder %v10972_v37, 0.0  ;;  %vm10982_vm7 = vcmp.ge.f32.partialorder %v10974_v59, 0.0 }
 0x8ee   :  { %v10995_v7 = vsel %vm10979_vm8, %v10971_v33, %v10987_v6  ;;  %v10997_v16 = vsel %vm10981_vm10, %v10973_v63, %v10989_v41  ;;  %v10988_v22 = vmul.f32 0.2, %v10972_v37  ;;  %v10990_v62 = vmul.f32 0.2, %v10974_v59 }
 0x8ef   :  { %v11013_v23 = vadd.f32 %v10997_v16, %v10995_v7  ;;  %vm10976_vm11 = vcmp.ge.f32.partialorder %v10968_v39, 0.0  ;;  %vm10978_vm2 = vcmp.ge.f32.partialorder %v10970_v5, 0.0  ;;  %v10983_v20 = vmul.f32 0.2, %v10967_v28 }
 0x8f0   :  { %v10996_v34 = vsel %vm10980_vm15, %v10972_v37, %v10988_v22  ;;  %v10984_v40 = vmul.f32 0.2, %v10968_v39  ;;  %v10985_v27 = vmul.f32 0.2, %v10969_v43  ;;  %v10986_v18 = vmul.f32 0.2, %v10970_v5 }
 0x8f1   :  { %v10998_v19 = vsel %vm10982_vm7, %v10974_v59, %v10990_v62  ;;  %v10991_v51 = vsel %vm10975_vm6, %v10967_v28, %v10983_v20  ;;  %v11014_v13 = vrot.slane %v11013_v23, 4  ;;  %v11037_v38 = vrot.slane %v11032_v9, %v16809_v49 }
 0x8f2   :  { %v11020_v14 = vadd.f32 %v10998_v19, %v10996_v34  ;;  %v10992_v36 = vsel %vm10976_vm11, %v10968_v39, %v10984_v40  ;;  %v10993_v17 = vsel %vm10977_vm1, %v10969_v43, %v10985_v27  ;;  %v10994_v4 = vsel %vm10978_vm2, %v10970_v5, %v10986_v18 }
 0x8f3   :  { %v10999_v32 = vadd.f32 %v10993_v17, %v10991_v51  ;;  %v11006_v57 = vadd.f32 %v10994_v4, %v10992_v36  ;;  %v11015_v47 = vadd.f32 %v11014_v13, %v11013_v23  ;;  %v11041_v60 = vrot.slane %v11032_v9, %v16814_v46 }
 0x8f4   :  { %v11021_v25 = vrot.slane %v11020_v14, 4  ;;  %v11066_v46 = vstv %s16846_s11 }
 0x8f5   :  { %v11000_v48 = vrot.slane %v10999_v32, 4  ;;  %v11007_v44 = vrot.slane %v11006_v57, 4  ;;  %v11016_v10 = vrot.slane %v11015_v47, 2 }
 0x8f6   :  { %v11022_v26 = vadd.f32 %v11021_v25, %v11020_v14 }
 0x8f7   :  { %v11001_v29 = vadd.f32 %v11000_v48, %v10999_v32  ;;  %v11008_v8 = vadd.f32 %v11007_v44, %v11006_v57  ;;  %v11017_v61 = vadd.f32 %v11016_v10, %v11015_v47 }
 0x8f8   :  { %v11023_v45 = vrot.slane %v11022_v26, 2 }
 0x8f9   :  { %v11002_v58 = vrot.slane %v11001_v29, 2  ;;  %v11009_v53 = vrot.slane %v11008_v8, 2  ;;  %v11018_v35 = vrot.slane %v11017_v61, 1 }
 0x8fa   :  { %v11024_v1 = vadd.f32 %v11023_v45, %v11022_v26 }
 0x8fb   :  { %v11003_v12 = vadd.f32 %v11002_v58, %v11001_v29  ;;  %v11010_v42 = vadd.f32 %v11009_v53, %v11008_v8  ;;  %v11019_v52 = vadd.f32 %v11018_v35, %v11017_v61 }
 0x8fc   :  { %v11025_v56 = vrot.slane %v11024_v1, 1 }
 0x8fd   :  { %v11004_v31 = vrot.slane %v11003_v12, 1  ;;  %v11011_v15 = vrot.slane %v11010_v42, 1  ;;  %v11030_v3 = vmul.f32 0.0625, %v11019_v52 }
 0x8fe   :  { %v11026_v24 = vadd.f32 %v11025_v56, %v11024_v1 }
 0x8ff   :  { %v11005_v55 = vadd.f32 %v11004_v31, %v11003_v12  ;;  %v11012_v30 = vadd.f32 %v11011_v15, %v11010_v42  ;;  %v11046_v54 = vmul.f32 %v11037_v38, %v11030_v3 }
 0x900   :  { %v11031_v11 = vmul.f32 0.0625, %v11026_v24 }
 0x901   :  { %v11028_v33 = vmul.f32 0.0625, %v11005_v55  ;;  %v11029_v63 = vmul.f32 0.0625, %v11012_v30  ;;  %v11052_v2 = vrot.slane %v11046_v54, 7 }
 0x902   :  { %v11047_v21 = vmul.f32 %v11041_v60, %v11031_v11 }
 0x903   :  { %v11044_v50 = vmul.f32 %v11037_v38, %v11028_v33  ;;  %v11045_v0 = vmul.f32 %v11041_v60, %v11029_v63 }
 0x904   :  { %v11055_v49 = vrot.slane %v11047_v21, 7 }
 0x905   :  { %v11054_v28 = vsel %vm11053_vm3, %v11052_v2, %v11044_v50 }
 0x906   :  { %v11056_v43 = vsel %vm11053_vm3, %v11055_v49, %v11045_v0  ;;  %v11060_v6 = vsel %vm11059_vm12, %v11054_v28, 0.0 }
 0x907   :  { %v11061_v41 = vsel %vm11059_vm12, %v11056_v43, 0.0 }
 0x908   :  { %v11062_v37 = vadd.f32 %v11061_v41, %v11060_v6 }
 0x90a   :  { %11063 = vadd.xlane.f32.xlu0 %v11062_v37 }
 0x997   :  { %v11064_v59 = vpop.xlane.xlu0 %11063 }
 0x998   :  { %v11067_v39 = vadd.f32 %v11066_v46, %v11064_v59 }
 0x99a   :  { %11069 = vst.msk [vmem:[%s16847_s12] sm:$0x3] %vm11068_vm9, %v11067_v39 }
 0x99b   :  { %11074 = vsyncmov [#allocation7] }
 0x99e   :  { %s11075_s26 = vpop.sfrf %11074 }
 0x99f   :  { %p11263_p0 = scmp.ne.s32.totalorder %s11075_s26, 0 }
 0x9a1   :  { %11079 = shalt.err (%p11263_p0)  }

</bundles_post_ra>
